<compile_context>
chip_gen: v7x
topology: tpu7x:2x2x1
jax: 0.10.0
libtpu: 0.0.40
codegen_flags: <defaults>
</compile_context>

<pallas_src>
import functools

import jax
import jax.numpy as jnp
from jax.experimental import pallas as pl
from jax.experimental.pallas import tpu as pltpu


def _sigmoid(v):
    # exp -> EUP, approx reciprocal -> EUP; keeps the VALU slot free on the
    # GRU per-step critical path.
    return pl.reciprocal(1.0 + jnp.exp(-v), approx=True)


def _round_up(n, m):
    return ((n + m - 1) // m) * m


def _row_tile_and_pad(n, cap=512):
    """Row tile (multiple of 8) and padded row count it divides."""
    tm = cap if n >= cap else _round_up(n, 8)
    return tm, _round_up(n, tm)


def _time_tile(t, cap=32):
    """Largest time block <= cap that divides t (leading dim, no constraint)."""
    if t <= cap:
        return t
    for d in range(cap, 0, -1):
        if t % d == 0:
            return d
    return 1


# ------------------ fused input Linear+Tanh + layer-0 GRU gi -----------------
def _input_gi_kernel(x_ref, w1_ref, b1_ref, wg_ref, bg_ref, o_ref):
    h = jnp.tanh(
        jnp.dot(x_ref[...].astype(jnp.bfloat16), w1_ref[...],
                preferred_element_type=jnp.float32) + b1_ref[...])
    o_ref[...] = (
        jnp.dot(h.astype(jnp.bfloat16), wg_ref[...],
                preferred_element_type=jnp.float32) + bg_ref[...])


def input_and_gi0(x, w1_bf, b1, wih0_bf, bih0, *, tile_cap=512):
    n, din = x.shape
    h = w1_bf.shape[1]
    g = wih0_bf.shape[1]
    tm, n_pad = _row_tile_and_pad(n, tile_cap)
    if n_pad != n:
        x = jnp.pad(x, ((0, n_pad - n), (0, 0)))
    out = pl.pallas_call(
        _input_gi_kernel,
        out_shape=jax.ShapeDtypeStruct((n_pad, g), jnp.float32),
        grid=(n_pad // tm,),
        in_specs=[
            pl.BlockSpec((tm, din), lambda i: (i, 0)),
            pl.BlockSpec((din, h), lambda i: (0, 0)),
            pl.BlockSpec((1, h), lambda i: (0, 0)),
            pl.BlockSpec((h, g), lambda i: (0, 0)),
            pl.BlockSpec((1, g), lambda i: (0, 0)),
        ],
        out_specs=pl.BlockSpec((tm, g), lambda i: (i, 0)),
        compiler_params=pltpu.CompilerParams(dimension_semantics=("parallel",)),
    )(x, w1_bf, b1.reshape(1, h), wih0_bf, bih0.reshape(1, g))
    return out[:n] if n_pad != n else out


# ---------------- GRU recurrence (time-blocked, gi precomputed) --------------
# For non-last layers the next layer's input-to-hidden matmul is fused into the
# epilogue: the kernel emits gi_{l+1} = h_slab @ wih_{l+1}^T + bih_{l+1} instead
# of the raw hidden states (no (T,B,H) HBM round trip between layers).
def _gru_kernel(*refs, hsz, emit_next):
    if emit_next:
        (gi_ref, whh_ref, bhh_ref, wih_n_ref, bih_n_ref,
         o_ref, h_ref, slab_ref) = refs
    else:
        gi_ref, whh_ref, bhh_ref, o_ref, h_ref = refs
        wih_n_ref = bih_n_ref = slab_ref = None

    @pl.when(pl.program_id(0) == 0)
    def _():
        h_ref[...] = jnp.zeros_like(h_ref)

    tt = gi_ref.shape[0]
    bsz = h_ref.shape[0]
    whh = whh_ref[...]                       # (H, 3H) bf16, resident
    bhh = bhh_ref[...]                       # (1, 3H) f32

    def step(s, h):
        gh = jnp.dot(h.astype(jnp.bfloat16), whh,
                     preferred_element_type=jnp.float32) + bhh
        gi = gi_ref[s]                       # (B, 3H), leading index
        # PyTorch GRU gate order: r, z, n
        r = _sigmoid(gi[:, :hsz] + gh[:, :hsz])
        z = _sigmoid(gi[:, hsz:2 * hsz] + gh[:, hsz:2 * hsz])
        n = jnp.tanh(gi[:, 2 * hsz:] + r * gh[:, 2 * hsz:])
        h_new = (1.0 - z) * n + z * h
        if emit_next:
            slab_ref[s] = h_new
        else:
            o_ref[s] = h_new
        return h_new

    h_ref[...] = jax.lax.fori_loop(0, tt, step, h_ref[...], unroll=True)

    if emit_next:
        slab = slab_ref[...].reshape(tt * bsz, hsz).astype(jnp.bfloat16)
        gi_next = (jnp.dot(slab, wih_n_ref[...],
                           preferred_element_type=jnp.float32)
                   + bih_n_ref[...])
        o_ref[...] = gi_next.reshape(tt, bsz, 3 * hsz)


def gru_layer(gi_tbg, whh_bf, bhh, wih_next_bf=None, bih_next=None,
              *, time_cap=32):
    t, b, g = gi_tbg.shape
    h = g // 3
    tt = _time_tile(t, time_cap)
    emit_next = wih_next_bf is not None
    kernel = functools.partial(_gru_kernel, hsz=h, emit_next=emit_next)

    in_specs = [
        pl.BlockSpec((tt, b, g), lambda i: (i, 0, 0)),
        pl.BlockSpec((h, g), lambda i: (0, 0)),
        pl.BlockSpec((1, g), lambda i: (0, 0)),
    ]
    args = [gi_tbg, whh_bf, bhh.reshape(1, g)]
    scratch = [pltpu.VMEM((b, h), jnp.float32)]
    if emit_next:
        in_specs += [pl.BlockSpec((h, g), lambda i: (0, 0)),
                     pl.BlockSpec((1, g), lambda i: (0, 0))]
        args += [wih_next_bf, bih_next.reshape(1, g)]
        scratch.append(pltpu.VMEM((tt, b, h), jnp.float32))
        out_dim = g
    else:
        out_dim = h

    return pl.pallas_call(
        kernel,
        out_shape=jax.ShapeDtypeStruct((t, b, out_dim), jnp.float32),
        grid=(t // tt,),
        in_specs=in_specs,
        out_specs=pl.BlockSpec((tt, b, out_dim), lambda i: (i, 0, 0)),
        scratch_shapes=scratch,
        compiler_params=pltpu.CompilerParams(dimension_semantics=("arbitrary",)),
    )(*args)


# ------ fused Conv2d(1->C) + Tanh + MaxPool(3,1,pad=1) + Linear + Sigmoid ----
def _conv_pool_out_kernel(xp_ref, wconv_ref, bconv_ref, w2c_ref, b2_ref,
                          xin_ref, o_ref, *, t_len, h_units, k):
    c = w2c_ref.shape[0]
    dpad = w2c_ref.shape[2]
    to, ho = t_len + 2, h_units + 2           # conv output + 1-wide pool ring

    ximg = xp_ref[0]                          # (tp_pad, hp_pad), lane aligned
    # Row slabs hoisted out of the channel loop (channel independent).
    rslabs = [ximg[ki:ki + to, :] for ki in range(k)]

    rows = jax.lax.broadcasted_iota(jnp.int32, (to, ho), 0)
    cols = jax.lax.broadcasted_iota(jnp.int32, (to, ho), 1)
    interior = ((rows >= 1) & (rows <= t_len)
                & (cols >= 1) & (cols <= h_units))

    out_acc = jnp.zeros((t_len, dpad), jnp.float32)
    for ci in range(c):
        # Single live conv accumulator per channel (keeps VMEM footprint ~C x
        # smaller than materializing all channels up front).
        acc = jnp.zeros((to, ho), jnp.float32)
        for ki in range(k):
            rslab = rslabs[ki]
            for kj in range(k):
                acc = acc + wconv_ref[ci, ki * k + kj] * rslab[:, kj:kj + ho]
        # Bias + tanh.  The -1e30 ring is a stand-in for the max-pool's -inf
        # padding; it is safe only because the pooled values are post-tanh
        # (range [-1, 1]).
        a = jnp.tanh(acc + bconv_ref[ci])
        a = jnp.where(interior, a, -1e30)
        # Separable 3x3 / stride-1 / pad-1 max pool: 1x3 lane max, then 3x1
        # sublane max (4 shifted maxima instead of 8).
        lmax = jnp.maximum(jnp.maximum(a[:, 0:h_units], a[:, 1:h_units + 1]),
                           a[:, 2:h_units + 2])                 # (to, H)
        m = jnp.maximum(jnp.maximum(lmax[0:t_len, :], lmax[1:t_len + 1, :]),
                        lmax[2:t_len + 2, :])                   # (t_len, H)
        # Fold straight into the output Linear as a bf16 MXU matmul accumulated
        # over channels (torch feature order h-major/c-minor is baked into w2c).
        out_acc = out_acc + jnp.dot(m.astype(jnp.bfloat16), w2c_ref[ci],
                                    preferred_element_type=jnp.float32)

    logits = out_acc + b2_ref[...]
    o_ref[0] = _sigmoid(logits) * xin_ref[0]


def conv_pool_output(xp, wconv_flat, bconv, w2c_bf, b2_p, xin_p,
                     t_len, h_units, k):
    bsz = xin_p.shape[0]                      # real batch (xp may be padded)
    _, tp, hp = xp.shape
    c = wconv_flat.shape[0]
    dpad = w2c_bf.shape[2]
    kernel = functools.partial(_conv_pool_out_kernel,
                               t_len=t_len, h_units=h_units, k=k)
    return pl.pallas_call(
        kernel,
        out_shape=jax.ShapeDtypeStruct((bsz, t_len, dpad), jnp.float32),
        grid=(bsz,),
        in_specs=[
            pl.BlockSpec((1, tp, hp), lambda b: (b, 0, 0)),
            pl.BlockSpec(memory_space=pltpu.MemorySpace.SMEM),
            pl.BlockSpec(memory_space=pltpu.MemorySpace.SMEM),
            pl.BlockSpec((c, h_units, dpad), lambda b: (0, 0, 0)),
            pl.BlockSpec((1, dpad), lambda b: (0, 0)),
            pl.BlockSpec((1, t_len, dpad), lambda b: (b, 0, 0)),
        ],
        out_specs=pl.BlockSpec((1, t_len, dpad), lambda b: (b, 0, 0)),
        compiler_params=pltpu.CompilerParams(dimension_semantics=("parallel",)),
    )(xp, wconv_flat, bconv, w2c_bf, b2_p, xin_p)


# --------------------------------- forward ----------------------------------
def cldnn_forward(x, params, *, kernel_size):
    bsz, tlen, d = x.shape
    hunits = params["w1"].shape[0]
    c = params["wconv"].shape[0]
    dout = params["w2"].shape[0]
    # Module semantics: mask (dim dout) is multiplied elementwise by the input
    # (dim d) -> requires dout == d (true for the default CLDNN config).
    if dout != d:
        raise ValueError("CLDNN mask*input requires output_dim == input_dim")
    dpad = _round_up(max(dout, 128), 128)
    bp = _round_up(bsz, 8)                    # full-sublane GRU batch

    # One-off weight re-layouts: (K, N) orientation, bf16 MXU operands, torch
    # (B,T,H,C)->(B,T,H*C) feature order folded into per-channel output blocks.
    w1_bf = params["w1"].T.astype(jnp.bfloat16)                     # (D, H)
    wih_bf = [w.T.astype(jnp.bfloat16) for w in params["wih"]]      # (H, 3H)
    whh_bf = [w.T.astype(jnp.bfloat16) for w in params["whh"]]      # (H, 3H)
    w2c = params["w2"].reshape(dout, hunits, c).transpose(2, 1, 0)  # (C,H,dout)
    w2c_bf = jnp.pad(w2c, ((0, 0), (0, 0), (0, dpad - dout))).astype(jnp.bfloat16)
    b2_p = jnp.pad(params["b2"], (0, dpad - dout)).reshape(1, dpad)

    # Fused input Linear+Tanh + layer-0 input-to-hidden GRU matmul, hoisted out
    # of the serial recurrence (time-major rows; feature dim D is tiny).
    xt = jnp.swapaxes(x, 0, 1).reshape(tlen * bsz, d)               # (T*B, D)
    gi = input_and_gi0(xt, w1_bf, params["b1"], wih_bf[0], params["bih"][0])
    gi = gi.reshape(tlen, bsz, 3 * hunits)
    if bp != bsz:
        gi = jnp.pad(gi, ((0, 0), (0, bp - bsz), (0, 0)))           # (T, Bp, 3H)

    # GRU stack; non-last layers emit the next layer's gi directly.
    num_layers = len(whh_bf)
    out_tb = None
    for layer in range(num_layers):
        if layer == num_layers - 1:
            out_tb = gru_layer(gi, whh_bf[layer], params["bhh"][layer])
        else:
            gi = gru_layer(gi, whh_bf[layer], params["bhh"][layer],
                           wih_bf[layer + 1], params["bih"][layer + 1])

    # Single activation-sized transpose in the whole forward: time-major GRU
    # output -> batch-major conv image.
    conv_in = jnp.swapaxes(out_tb, 0, 1)                            # (Bp, T, H)

    # Asymmetric 'SAME' padding for an even kernel (module semantics), plus one
    # extra ring per side for the in-kernel 3x3 max pool, then round the image
    # up to (mult-of-8 rows, mult-of-128 lanes) for aligned blocks.
    kw = kh = kernel_size
    pads = [kw, kw, kh, kh]
    if pads[1] % 2 == 0:
        pads[1] -= 1
    if pads[3] % 2 == 0:
        pads[3] -= 1
    w_l, w_r, h_t, h_b = pads[0] // 2, pads[1] // 2, pads[2] // 2, pads[3] // 2
    tp = tlen + h_t + h_b + 2
    hp = hunits + w_l + w_r + 2
    tp_pad = _round_up(tp, 8)
    hp_pad = _round_up(hp, 128)
    xp = jnp.pad(conv_in, ((0, 0),
                           (h_t + 1, h_b + 1 + tp_pad - tp),
                           (w_l + 1, w_r + 1 + hp_pad - hp)))

    xin_p = jnp.pad(x, ((0, 0), (0, 0), (0, dpad - d)))             # mask operand

    out_p = conv_pool_output(xp, params["wconv"], params["bconv"],
                             w2c_bf, b2_p, xin_p, tlen, hunits, kernel_size)
    return out_p[:, :, :dout]


# ------------------------------ parameter init -------------------------------
def init_params(key, *, input_dim, output_dim, hidden_units, hidden_layers,
                kernel_size, kernel_num):
    std = 0.05
    ks = jax.random.split(key, 4 + 4 * hidden_layers)
    it = iter(ks)
    p = {}
    p["w1"] = std * jax.random.normal(next(it), (hidden_units, input_dim), jnp.float32)
    p["b1"] = jnp.zeros((hidden_units,), jnp.float32)
    p["wih"], p["whh"], p["bih"], p["bhh"] = [], [], [], []
    for _ in range(hidden_layers):
        p["wih"].append(std * jax.random.normal(next(it), (3 * hidden_units, hidden_units), jnp.float32))
        p["whh"].append(std * jax.random.normal(next(it), (3 * hidden_units, hidden_units), jnp.float32))
        p["bih"].append(std * jax.random.normal(next(it), (3 * hidden_units,), jnp.float32))
        p["bhh"].append(std * jax.random.normal(next(it), (3 * hidden_units,), jnp.float32))
    # Conv2d: kernel ~ N(0, 0.05), bias = 0 (matches the module's init)
    p["wconv"] = std * jax.random.normal(next(it), (kernel_num, kernel_size * kernel_size), jnp.float32)
    p["bconv"] = jnp.zeros((kernel_num,), jnp.float32)
    # Output Linear over torch-ordered (h-major, c-minor) features.
    p["w2"] = std * jax.random.normal(next(it), (output_dim, hidden_units * kernel_num), jnp.float32)
    p["b2"] = jnp.zeros((output_dim,), jnp.float32)
    return p


if __name__ == "__main__":
    B, T = 2, 8
    INPUT_DIM = 18          # module default
    HIDDEN_UNITS = 32       # scaled down from 512 for a small example
    HIDDEN_LAYERS = 2
    KERNEL_SIZE = 6
    KERNEL_NUM = 4          # scaled down from 9

    key = jax.random.PRNGKey(0)
    k_x, k_p = jax.random.split(key)
    x = jax.random.normal(k_x, (B, T, INPUT_DIM), jnp.float32)
    params = init_params(k_p, input_dim=INPUT_DIM, output_dim=INPUT_DIM,
                         hidden_units=HIDDEN_UNITS, hidden_layers=HIDDEN_LAYERS,
                         kernel_size=KERNEL_SIZE, kernel_num=KERNEL_NUM)

    fwd = jax.jit(functools.partial(cldnn_forward, kernel_size=KERNEL_SIZE))
    out = fwd(x, params)
    out = jax.block_until_ready(out)
    assert out.shape == (B, T, INPUT_DIM) and out.dtype == jnp.float32
    print("KERNEL_OK")
</pallas_src>

<mosaic_0001>
module attributes {stable_mosaic.version = 11 : i64} {
  func.func @_gru_kernel(%arg0: i32, %arg1: memref<8x8x96xf32, #tpu.memory_space<vmem>>, %arg2: memref<32x96xbf16, #tpu.memory_space<vmem>>, %arg3: memref<1x96xf32, #tpu.memory_space<vmem>>, %arg4: memref<8x8x32xf32, #tpu.memory_space<vmem>>, %arg5: memref<8x32xf32, #tpu.memory_space<vmem>>) attributes {dimension_semantics = [#tpu.dimension_semantics<arbitrary>], iteration_bounds = array<i64: 1>, scalar_prefetch = 0 : i64, scratch_operands = 1 : i64, tpu.core_type = #tpu.core_type<tc>, window_params = [{transform_indices = @transform_0, window_bounds = array<i64: 8, 8, 96>}, {pipeline_mode = #tpu.pipeline_mode<synchronous>, transform_indices = @transform_1, window_bounds = array<i64: 32, 96>}, {pipeline_mode = #tpu.pipeline_mode<synchronous>, transform_indices = @transform_2, window_bounds = array<i64: 1, 96>}, {transform_indices = @transform_3, window_bounds = array<i64: 8, 8, 32>}]} {
    %c0_i32 = arith.constant 0 : i32
    %0 = arith.cmpi eq, %arg0, %c0_i32 : i32
    %1 = arith.extui %0 : i1 to i32
    %c0_i32_0 = arith.constant 0 : i32
    %2 = arith.cmpi ne, %1, %c0_i32_0 : i32
    scf.if %2 {
      %cst_88 = arith.constant 0.000000e+00 : f32
      %319 = vector.broadcast %cst_88 : f32 to vector<8x32xf32>
      %c0_89 = arith.constant 0 : index
      %c0_90 = arith.constant 0 : index
      %320 = vector.load %arg5[%c0_89, %c0_90] : memref<8x32xf32, #tpu.memory_space<vmem>>, vector<8x32xf32>
      tpu.vector_store %arg5[%c0_89, %c0_90], %319 {strides = array<i32>} : memref<8x32xf32, #tpu.memory_space<vmem>>, vector<8x32xf32>,
    } else {
    }
    %c0 = arith.constant 0 : index
    %c0_1 = arith.constant 0 : index
    %3 = vector.load %arg2[%c0, %c0_1] : memref<32x96xbf16, #tpu.memory_space<vmem>>, vector<32x96xbf16>
    %c0_2 = arith.constant 0 : index
    %c0_3 = arith.constant 0 : index
    %4 = vector.load %arg3[%c0_2, %c0_3] : memref<1x96xf32, #tpu.memory_space<vmem>>, vector<1x96xf32>
    %c0_4 = arith.constant 0 : index
    %c0_5 = arith.constant 0 : index
    %5 = vector.load %arg5[%c0_4, %c0_5] : memref<8x32xf32, #tpu.memory_space<vmem>>, vector<8x32xf32>
    %c0_i32_6 = arith.constant 0 : i32
    %6 = arith.truncf %5 : vector<8x32xf32> to vector<8x32xbf16>
    %cst = arith.constant dense<0.000000e+00> : vector<8x96xf32>
    %7 = tpu.matmul %6, %3, %cst {dimension_numbers = #tpu.dot_dimension_numbers<[1], [0], [0], [1], [0, 0, 1, 1], [], []>} : vector<8x32xbf16>, vector<32x96xbf16>, vector<8x96xf32> -> vector<8x96xf32>
    %8 = vector.broadcast %4 : vector<1x96xf32> to vector<8x96xf32>
    %9 = arith.addf %7, %8 : vector<8x96xf32>
    %10 = arith.index_cast %c0_i32_6 : i32 to index
    %c0_7 = arith.constant 0 : index
    %c0_8 = arith.constant 0 : index
    %11 = vector.load %arg1[%10, %c0_7, %c0_8] : memref<8x8x96xf32, #tpu.memory_space<vmem>>, vector<1x8x96xf32>
    %12 = vector.shape_cast %11 : vector<1x8x96xf32> to vector<8x96xf32>
    %13 = vector.extract_strided_slice %12 {offsets = [0, 0], sizes = [8, 32], strides = [1, 1]} : vector<8x96xf32> to vector<8x32xf32>
    %14 = vector.extract_strided_slice %9 {offsets = [0, 0], sizes = [8, 32], strides = [1, 1]} : vector<8x96xf32> to vector<8x32xf32>
    %15 = arith.addf %13, %14 : vector<8x32xf32>
    %cst_9 = arith.constant 0.000000e+00 : f32
    %16 = vector.broadcast %cst_9 : f32 to vector<8x32xf32>
    %17 = arith.subf %16, %15 : vector<8x32xf32>
    %18 = math.exp %17 : vector<8x32xf32>
    %cst_10 = arith.constant 1.000000e+00 : f32
    %19 = vector.broadcast %cst_10 : f32 to vector<8x32xf32>
    %20 = arith.addf %19, %18 : vector<8x32xf32>
    %21 = tpu.reciprocal %20 {approx = true} : vector<8x32xf32> -> vector<8x32xf32>
    %22 = vector.extract_strided_slice %12 {offsets = [0, 32], sizes = [8, 32], strides = [1, 1]} : vector<8x96xf32> to vector<8x32xf32>
    %23 = vector.extract_strided_slice %9 {offsets = [0, 32], sizes = [8, 32], strides = [1, 1]} : vector<8x96xf32> to vector<8x32xf32>
    %24 = arith.addf %22, %23 : vector<8x32xf32>
    %cst_11 = arith.constant 0.000000e+00 : f32
    %25 = vector.broadcast %cst_11 : f32 to vector<8x32xf32>
    %26 = arith.subf %25, %24 : vector<8x32xf32>
    %27 = math.exp %26 : vector<8x32xf32>
    %cst_12 = arith.constant 1.000000e+00 : f32
    %28 = vector.broadcast %cst_12 : f32 to vector<8x32xf32>
    %29 = arith.addf %28, %27 : vector<8x32xf32>
    %30 = tpu.reciprocal %29 {approx = true} : vector<8x32xf32> -> vector<8x32xf32>
    %31 = vector.extract_strided_slice %12 {offsets = [0, 64], sizes = [8, 32], strides = [1, 1]} : vector<8x96xf32> to vector<8x32xf32>
    %32 = vector.extract_strided_slice %9 {offsets = [0, 64], sizes = [8, 32], strides = [1, 1]} : vector<8x96xf32> to vector<8x32xf32>
    %33 = arith.mulf %21, %32 : vector<8x32xf32>
    %34 = arith.addf %31, %33 : vector<8x32xf32>
    %35 = math.tanh %34 : vector<8x32xf32>
    %cst_13 = arith.constant 1.000000e+00 : f32
    %36 = vector.broadcast %cst_13 : f32 to vector<8x32xf32>
    %37 = arith.subf %36, %30 : vector<8x32xf32>
    %38 = arith.mulf %37, %35 : vector<8x32xf32>
    %39 = arith.mulf %30, %5 : vector<8x32xf32>
    %40 = arith.addf %38, %39 : vector<8x32xf32>
    %41 = arith.index_cast %c0_i32_6 : i32 to index
    %c0_14 = arith.constant 0 : index
    %c0_15 = arith.constant 0 : index
    %42 = vector.load %arg4[%41, %c0_14, %c0_15] : memref<8x8x32xf32, #tpu.memory_space<vmem>>, vector<1x8x32xf32>
    %43 = vector.shape_cast %42 : vector<1x8x32xf32> to vector<8x32xf32>
    %44 = vector.shape_cast %40 : vector<8x32xf32> to vector<1x8x32xf32>
    tpu.vector_store %arg4[%41, %c0_14, %c0_15], %44 {strides = array<i32>} : memref<8x8x32xf32, #tpu.memory_space<vmem>>, vector<1x8x32xf32>,
    %c1_i32 = arith.constant 1 : i32
    %45 = arith.truncf %40 : vector<8x32xf32> to vector<8x32xbf16>
    %cst_16 = arith.constant dense<0.000000e+00> : vector<8x96xf32>
    %46 = tpu.matmul %45, %3, %cst_16 {dimension_numbers = #tpu.dot_dimension_numbers<[1], [0], [0], [1], [0, 0, 1, 1], [], []>} : vector<8x32xbf16>, vector<32x96xbf16>, vector<8x96xf32> -> vector<8x96xf32>
    %47 = vector.broadcast %4 : vector<1x96xf32> to vector<8x96xf32>
    %48 = arith.addf %46, %47 : vector<8x96xf32>
    %49 = arith.index_cast %c1_i32 : i32 to index
    %c0_17 = arith.constant 0 : index
    %c0_18 = arith.constant 0 : index
    %50 = vector.load %arg1[%49, %c0_17, %c0_18] : memref<8x8x96xf32, #tpu.memory_space<vmem>>, vector<1x8x96xf32>
    %51 = vector.shape_cast %50 : vector<1x8x96xf32> to vector<8x96xf32>
    %52 = vector.extract_strided_slice %51 {offsets = [0, 0], sizes = [8, 32], strides = [1, 1]} : vector<8x96xf32> to vector<8x32xf32>
    %53 = vector.extract_strided_slice %48 {offsets = [0, 0], sizes = [8, 32], strides = [1, 1]} : vector<8x96xf32> to vector<8x32xf32>
    %54 = arith.addf %52, %53 : vector<8x32xf32>
    %cst_19 = arith.constant 0.000000e+00 : f32
    %55 = vector.broadcast %cst_19 : f32 to vector<8x32xf32>
    %56 = arith.subf %55, %54 : vector<8x32xf32>
    %57 = math.exp %56 : vector<8x32xf32>
    %cst_20 = arith.constant 1.000000e+00 : f32
    %58 = vector.broadcast %cst_20 : f32 to vector<8x32xf32>
    %59 = arith.addf %58, %57 : vector<8x32xf32>
    %60 = tpu.reciprocal %59 {approx = true} : vector<8x32xf32> -> vector<8x32xf32>
    %61 = vector.extract_strided_slice %51 {offsets = [0, 32], sizes = [8, 32], strides = [1, 1]} : vector<8x96xf32> to vector<8x32xf32>
    %62 = vector.extract_strided_slice %48 {offsets = [0, 32], sizes = [8, 32], strides = [1, 1]} : vector<8x96xf32> to vector<8x32xf32>
    %63 = arith.addf %61, %62 : vector<8x32xf32>
    %cst_21 = arith.constant 0.000000e+00 : f32
    %64 = vector.broadcast %cst_21 : f32 to vector<8x32xf32>
    %65 = arith.subf %64, %63 : vector<8x32xf32>
    %66 = math.exp %65 : vector<8x32xf32>
    %cst_22 = arith.constant 1.000000e+00 : f32
    %67 = vector.broadcast %cst_22 : f32 to vector<8x32xf32>
    %68 = arith.addf %67, %66 : vector<8x32xf32>
    %69 = tpu.reciprocal %68 {approx = true} : vector<8x32xf32> -> vector<8x32xf32>
    %70 = vector.extract_strided_slice %51 {offsets = [0, 64], sizes = [8, 32], strides = [1, 1]} : vector<8x96xf32> to vector<8x32xf32>
    %71 = vector.extract_strided_slice %48 {offsets = [0, 64], sizes = [8, 32], strides = [1, 1]} : vector<8x96xf32> to vector<8x32xf32>
    %72 = arith.mulf %60, %71 : vector<8x32xf32>
    %73 = arith.addf %70, %72 : vector<8x32xf32>
    %74 = math.tanh %73 : vector<8x32xf32>
    %cst_23 = arith.constant 1.000000e+00 : f32
    %75 = vector.broadcast %cst_23 : f32 to vector<8x32xf32>
    %76 = arith.subf %75, %69 : vector<8x32xf32>
    %77 = arith.mulf %76, %74 : vector<8x32xf32>
    %78 = arith.mulf %69, %40 : vector<8x32xf32>
    %79 = arith.addf %77, %78 : vector<8x32xf32>
    %80 = arith.index_cast %c1_i32 : i32 to index
    %c0_24 = arith.constant 0 : index
    %c0_25 = arith.constant 0 : index
    %81 = vector.load %arg4[%80, %c0_24, %c0_25] : memref<8x8x32xf32, #tpu.memory_space<vmem>>, vector<1x8x32xf32>
    %82 = vector.shape_cast %81 : vector<1x8x32xf32> to vector<8x32xf32>
    %83 = vector.shape_cast %79 : vector<8x32xf32> to vector<1x8x32xf32>
    tpu.vector_store %arg4[%80, %c0_24, %c0_25], %83 {strides = array<i32>} : memref<8x8x32xf32, #tpu.memory_space<vmem>>, vector<1x8x32xf32>,
    %c2_i32 = arith.constant 2 : i32
    %84 = arith.truncf %79 : vector<8x32xf32> to vector<8x32xbf16>
    %cst_26 = arith.constant dense<0.000000e+00> : vector<8x96xf32>
    %85 = tpu.matmul %84, %3, %cst_26 {dimension_numbers = #tpu.dot_dimension_numbers<[1], [0], [0], [1], [0, 0, 1, 1], [], []>} : vector<8x32xbf16>, vector<32x96xbf16>, vector<8x96xf32> -> vector<8x96xf32>
    %86 = vector.broadcast %4 : vector<1x96xf32> to vector<8x96xf32>
    %87 = arith.addf %85, %86 : vector<8x96xf32>
    %88 = arith.index_cast %c2_i32 : i32 to index
    %c0_27 = arith.constant 0 : index
    %c0_28 = arith.constant 0 : index
    %89 = vector.load %arg1[%88, %c0_27, %c0_28] : memref<8x8x96xf32, #tpu.memory_space<vmem>>, vector<1x8x96xf32>
    %90 = vector.shape_cast %89 : vector<1x8x96xf32> to vector<8x96xf32>
    %91 = vector.extract_strided_slice %90 {offsets = [0, 0], sizes = [8, 32], strides = [1, 1]} : vector<8x96xf32> to vector<8x32xf32>
    %92 = vector.extract_strided_slice %87 {offsets = [0, 0], sizes = [8, 32], strides = [1, 1]} : vector<8x96xf32> to vector<8x32xf32>
    %93 = arith.addf %91, %92 : vector<8x32xf32>
    %cst_29 = arith.constant 0.000000e+00 : f32
    %94 = vector.broadcast %cst_29 : f32 to vector<8x32xf32>
    %95 = arith.subf %94, %93 : vector<8x32xf32>
    %96 = math.exp %95 : vector<8x32xf32>
    %cst_30 = arith.constant 1.000000e+00 : f32
    %97 = vector.broadcast %cst_30 : f32 to vector<8x32xf32>
    %98 = arith.addf %97, %96 : vector<8x32xf32>
    %99 = tpu.reciprocal %98 {approx = true} : vector<8x32xf32> -> vector<8x32xf32>
    %100 = vector.extract_strided_slice %90 {offsets = [0, 32], sizes = [8, 32], strides = [1, 1]} : vector<8x96xf32> to vector<8x32xf32>
    %101 = vector.extract_strided_slice %87 {offsets = [0, 32], sizes = [8, 32], strides = [1, 1]} : vector<8x96xf32> to vector<8x32xf32>
    %102 = arith.addf %100, %101 : vector<8x32xf32>
    %cst_31 = arith.constant 0.000000e+00 : f32
    %103 = vector.broadcast %cst_31 : f32 to vector<8x32xf32>
    %104 = arith.subf %103, %102 : vector<8x32xf32>
    %105 = math.exp %104 : vector<8x32xf32>
    %cst_32 = arith.constant 1.000000e+00 : f32
    %106 = vector.broadcast %cst_32 : f32 to vector<8x32xf32>
    %107 = arith.addf %106, %105 : vector<8x32xf32>
    %108 = tpu.reciprocal %107 {approx = true} : vector<8x32xf32> -> vector<8x32xf32>
    %109 = vector.extract_strided_slice %90 {offsets = [0, 64], sizes = [8, 32], strides = [1, 1]} : vector<8x96xf32> to vector<8x32xf32>
    %110 = vector.extract_strided_slice %87 {offsets = [0, 64], sizes = [8, 32], strides = [1, 1]} : vector<8x96xf32> to vector<8x32xf32>
    %111 = arith.mulf %99, %110 : vector<8x32xf32>
    %112 = arith.addf %109, %111 : vector<8x32xf32>
    %113 = math.tanh %112 : vector<8x32xf32>
    %cst_33 = arith.constant 1.000000e+00 : f32
    %114 = vector.broadcast %cst_33 : f32 to vector<8x32xf32>
    %115 = arith.subf %114, %108 : vector<8x32xf32>
    %116 = arith.mulf %115, %113 : vector<8x32xf32>
    %117 = arith.mulf %108, %79 : vector<8x32xf32>
    %118 = arith.addf %116, %117 : vector<8x32xf32>
    %119 = arith.index_cast %c2_i32 : i32 to index
    %c0_34 = arith.constant 0 : index
    %c0_35 = arith.constant 0 : index
    %120 = vector.load %arg4[%119, %c0_34, %c0_35] : memref<8x8x32xf32, #tpu.memory_space<vmem>>, vector<1x8x32xf32>
    %121 = vector.shape_cast %120 : vector<1x8x32xf32> to vector<8x32xf32>
    %122 = vector.shape_cast %118 : vector<8x32xf32> to vector<1x8x32xf32>
    tpu.vector_store %arg4[%119, %c0_34, %c0_35], %122 {strides = array<i32>} : memref<8x8x32xf32, #tpu.memory_space<vmem>>, vector<1x8x32xf32>,
    %c3_i32 = arith.constant 3 : i32
    %123 = arith.truncf %118 : vector<8x32xf32> to vector<8x32xbf16>
    %cst_36 = arith.constant dense<0.000000e+00> : vector<8x96xf32>
    %124 = tpu.matmul %123, %3, %cst_36 {dimension_numbers = #tpu.dot_dimension_numbers<[1], [0], [0], [1], [0, 0, 1, 1], [], []>} : vector<8x32xbf16>, vector<32x96xbf16>, vector<8x96xf32> -> vector<8x96xf32>
    %125 = vector.broadcast %4 : vector<1x96xf32> to vector<8x96xf32>
    %126 = arith.addf %124, %125 : vector<8x96xf32>
    %127 = arith.index_cast %c3_i32 : i32 to index
    %c0_37 = arith.constant 0 : index
    %c0_38 = arith.constant 0 : index
    %128 = vector.load %arg1[%127, %c0_37, %c0_38] : memref<8x8x96xf32, #tpu.memory_space<vmem>>, vector<1x8x96xf32>
    %129 = vector.shape_cast %128 : vector<1x8x96xf32> to vector<8x96xf32>
    %130 = vector.extract_strided_slice %129 {offsets = [0, 0], sizes = [8, 32], strides = [1, 1]} : vector<8x96xf32> to vector<8x32xf32>
    %131 = vector.extract_strided_slice %126 {offsets = [0, 0], sizes = [8, 32], strides = [1, 1]} : vector<8x96xf32> to vector<8x32xf32>
    %132 = arith.addf %130, %131 : vector<8x32xf32>
    %cst_39 = arith.constant 0.000000e+00 : f32
    %133 = vector.broadcast %cst_39 : f32 to vector<8x32xf32>
    %134 = arith.subf %133, %132 : vector<8x32xf32>
    %135 = math.exp %134 : vector<8x32xf32>
    %cst_40 = arith.constant 1.000000e+00 : f32
    %136 = vector.broadcast %cst_40 : f32 to vector<8x32xf32>
    %137 = arith.addf %136, %135 : vector<8x32xf32>
    %138 = tpu.reciprocal %137 {approx = true} : vector<8x32xf32> -> vector<8x32xf32>
    %139 = vector.extract_strided_slice %129 {offsets = [0, 32], sizes = [8, 32], strides = [1, 1]} : vector<8x96xf32> to vector<8x32xf32>
    %140 = vector.extract_strided_slice %126 {offsets = [0, 32], sizes = [8, 32], strides = [1, 1]} : vector<8x96xf32> to vector<8x32xf32>
    %141 = arith.addf %139, %140 : vector<8x32xf32>
    %cst_41 = arith.constant 0.000000e+00 : f32
    %142 = vector.broadcast %cst_41 : f32 to vector<8x32xf32>
    %143 = arith.subf %142, %141 : vector<8x32xf32>
    %144 = math.exp %143 : vector<8x32xf32>
    %cst_42 = arith.constant 1.000000e+00 : f32
    %145 = vector.broadcast %cst_42 : f32 to vector<8x32xf32>
    %146 = arith.addf %145, %144 : vector<8x32xf32>
    %147 = tpu.reciprocal %146 {approx = true} : vector<8x32xf32> -> vector<8x32xf32>
    %148 = vector.extract_strided_slice %129 {offsets = [0, 64], sizes = [8, 32], strides = [1, 1]} : vector<8x96xf32> to vector<8x32xf32>
    %149 = vector.extract_strided_slice %126 {offsets = [0, 64], sizes = [8, 32], strides = [1, 1]} : vector<8x96xf32> to vector<8x32xf32>
    %150 = arith.mulf %138, %149 : vector<8x32xf32>
    %151 = arith.addf %148, %150 : vector<8x32xf32>
    %152 = math.tanh %151 : vector<8x32xf32>
    %cst_43 = arith.constant 1.000000e+00 : f32
    %153 = vector.broadcast %cst_43 : f32 to vector<8x32xf32>
    %154 = arith.subf %153, %147 : vector<8x32xf32>
    %155 = arith.mulf %154, %152 : vector<8x32xf32>
    %156 = arith.mulf %147, %118 : vector<8x32xf32>
    %157 = arith.addf %155, %156 : vector<8x32xf32>
    %158 = arith.index_cast %c3_i32 : i32 to index
    %c0_44 = arith.constant 0 : index
    %c0_45 = arith.constant 0 : index
    %159 = vector.load %arg4[%158, %c0_44, %c0_45] : memref<8x8x32xf32, #tpu.memory_space<vmem>>, vector<1x8x32xf32>
    %160 = vector.shape_cast %159 : vector<1x8x32xf32> to vector<8x32xf32>
    %161 = vector.shape_cast %157 : vector<8x32xf32> to vector<1x8x32xf32>
    tpu.vector_store %arg4[%158, %c0_44, %c0_45], %161 {strides = array<i32>} : memref<8x8x32xf32, #tpu.memory_space<vmem>>, vector<1x8x32xf32>,
    %c4_i32 = arith.constant 4 : i32
    %162 = arith.truncf %157 : vector<8x32xf32> to vector<8x32xbf16>
    %cst_46 = arith.constant dense<0.000000e+00> : vector<8x96xf32>
    %163 = tpu.matmul %162, %3, %cst_46 {dimension_numbers = #tpu.dot_dimension_numbers<[1], [0], [0], [1], [0, 0, 1, 1], [], []>} : vector<8x32xbf16>, vector<32x96xbf16>, vector<8x96xf32> -> vector<8x96xf32>
    %164 = vector.broadcast %4 : vector<1x96xf32> to vector<8x96xf32>
    %165 = arith.addf %163, %164 : vector<8x96xf32>
    %166 = arith.index_cast %c4_i32 : i32 to index
    %c0_47 = arith.constant 0 : index
    %c0_48 = arith.constant 0 : index
    %167 = vector.load %arg1[%166, %c0_47, %c0_48] : memref<8x8x96xf32, #tpu.memory_space<vmem>>, vector<1x8x96xf32>
    %168 = vector.shape_cast %167 : vector<1x8x96xf32> to vector<8x96xf32>
    %169 = vector.extract_strided_slice %168 {offsets = [0, 0], sizes = [8, 32], strides = [1, 1]} : vector<8x96xf32> to vector<8x32xf32>
    %170 = vector.extract_strided_slice %165 {offsets = [0, 0], sizes = [8, 32], strides = [1, 1]} : vector<8x96xf32> to vector<8x32xf32>
    %171 = arith.addf %169, %170 : vector<8x32xf32>
    %cst_49 = arith.constant 0.000000e+00 : f32
    %172 = vector.broadcast %cst_49 : f32 to vector<8x32xf32>
    %173 = arith.subf %172, %171 : vector<8x32xf32>
    %174 = math.exp %173 : vector<8x32xf32>
    %cst_50 = arith.constant 1.000000e+00 : f32
    %175 = vector.broadcast %cst_50 : f32 to vector<8x32xf32>
    %176 = arith.addf %175, %174 : vector<8x32xf32>
    %177 = tpu.reciprocal %176 {approx = true} : vector<8x32xf32> -> vector<8x32xf32>
    %178 = vector.extract_strided_slice %168 {offsets = [0, 32], sizes = [8, 32], strides = [1, 1]} : vector<8x96xf32> to vector<8x32xf32>
    %179 = vector.extract_strided_slice %165 {offsets = [0, 32], sizes = [8, 32], strides = [1, 1]} : vector<8x96xf32> to vector<8x32xf32>
    %180 = arith.addf %178, %179 : vector<8x32xf32>
    %cst_51 = arith.constant 0.000000e+00 : f32
    %181 = vector.broadcast %cst_51 : f32 to vector<8x32xf32>
    %182 = arith.subf %181, %180 : vector<8x32xf32>
    %183 = math.exp %182 : vector<8x32xf32>
    %cst_52 = arith.constant 1.000000e+00 : f32
    %184 = vector.broadcast %cst_52 : f32 to vector<8x32xf32>
    %185 = arith.addf %184, %183 : vector<8x32xf32>
    %186 = tpu.reciprocal %185 {approx = true} : vector<8x32xf32> -> vector<8x32xf32>
    %187 = vector.extract_strided_slice %168 {offsets = [0, 64], sizes = [8, 32], strides = [1, 1]} : vector<8x96xf32> to vector<8x32xf32>
    %188 = vector.extract_strided_slice %165 {offsets = [0, 64], sizes = [8, 32], strides = [1, 1]} : vector<8x96xf32> to vector<8x32xf32>
    %189 = arith.mulf %177, %188 : vector<8x32xf32>
    %190 = arith.addf %187, %189 : vector<8x32xf32>
    %191 = math.tanh %190 : vector<8x32xf32>
    %cst_53 = arith.constant 1.000000e+00 : f32
    %192 = vector.broadcast %cst_53 : f32 to vector<8x32xf32>
    %193 = arith.subf %192, %186 : vector<8x32xf32>
    %194 = arith.mulf %193, %191 : vector<8x32xf32>
    %195 = arith.mulf %186, %157 : vector<8x32xf32>
    %196 = arith.addf %194, %195 : vector<8x32xf32>
    %197 = arith.index_cast %c4_i32 : i32 to index
    %c0_54 = arith.constant 0 : index
    %c0_55 = arith.constant 0 : index
    %198 = vector.load %arg4[%197, %c0_54, %c0_55] : memref<8x8x32xf32, #tpu.memory_space<vmem>>, vector<1x8x32xf32>
    %199 = vector.shape_cast %198 : vector<1x8x32xf32> to vector<8x32xf32>
    %200 = vector.shape_cast %196 : vector<8x32xf32> to vector<1x8x32xf32>
    tpu.vector_store %arg4[%197, %c0_54, %c0_55], %200 {strides = array<i32>} : memref<8x8x32xf32, #tpu.memory_space<vmem>>, vector<1x8x32xf32>,
    %c5_i32 = arith.constant 5 : i32
    %201 = arith.truncf %196 : vector<8x32xf32> to vector<8x32xbf16>
    %cst_56 = arith.constant dense<0.000000e+00> : vector<8x96xf32>
    %202 = tpu.matmul %201, %3, %cst_56 {dimension_numbers = #tpu.dot_dimension_numbers<[1], [0], [0], [1], [0, 0, 1, 1], [], []>} : vector<8x32xbf16>, vector<32x96xbf16>, vector<8x96xf32> -> vector<8x96xf32>
    %203 = vector.broadcast %4 : vector<1x96xf32> to vector<8x96xf32>
    %204 = arith.addf %202, %203 : vector<8x96xf32>
    %205 = arith.index_cast %c5_i32 : i32 to index
    %c0_57 = arith.constant 0 : index
    %c0_58 = arith.constant 0 : index
    %206 = vector.load %arg1[%205, %c0_57, %c0_58] : memref<8x8x96xf32, #tpu.memory_space<vmem>>, vector<1x8x96xf32>
    %207 = vector.shape_cast %206 : vector<1x8x96xf32> to vector<8x96xf32>
    %208 = vector.extract_strided_slice %207 {offsets = [0, 0], sizes = [8, 32], strides = [1, 1]} : vector<8x96xf32> to vector<8x32xf32>
    %209 = vector.extract_strided_slice %204 {offsets = [0, 0], sizes = [8, 32], strides = [1, 1]} : vector<8x96xf32> to vector<8x32xf32>
    %210 = arith.addf %208, %209 : vector<8x32xf32>
    %cst_59 = arith.constant 0.000000e+00 : f32
    %211 = vector.broadcast %cst_59 : f32 to vector<8x32xf32>
    %212 = arith.subf %211, %210 : vector<8x32xf32>
    %213 = math.exp %212 : vector<8x32xf32>
    %cst_60 = arith.constant 1.000000e+00 : f32
    %214 = vector.broadcast %cst_60 : f32 to vector<8x32xf32>
    %215 = arith.addf %214, %213 : vector<8x32xf32>
    %216 = tpu.reciprocal %215 {approx = true} : vector<8x32xf32> -> vector<8x32xf32>
    %217 = vector.extract_strided_slice %207 {offsets = [0, 32], sizes = [8, 32], strides = [1, 1]} : vector<8x96xf32> to vector<8x32xf32>
    %218 = vector.extract_strided_slice %204 {offsets = [0, 32], sizes = [8, 32], strides = [1, 1]} : vector<8x96xf32> to vector<8x32xf32>
    %219 = arith.addf %217, %218 : vector<8x32xf32>
    %cst_61 = arith.constant 0.000000e+00 : f32
    %220 = vector.broadcast %cst_61 : f32 to vector<8x32xf32>
    %221 = arith.subf %220, %219 : vector<8x32xf32>
    %222 = math.exp %221 : vector<8x32xf32>
    %cst_62 = arith.constant 1.000000e+00 : f32
    %223 = vector.broadcast %cst_62 : f32 to vector<8x32xf32>
    %224 = arith.addf %223, %222 : vector<8x32xf32>
    %225 = tpu.reciprocal %224 {approx = true} : vector<8x32xf32> -> vector<8x32xf32>
    %226 = vector.extract_strided_slice %207 {offsets = [0, 64], sizes = [8, 32], strides = [1, 1]} : vector<8x96xf32> to vector<8x32xf32>
    %227 = vector.extract_strided_slice %204 {offsets = [0, 64], sizes = [8, 32], strides = [1, 1]} : vector<8x96xf32> to vector<8x32xf32>
    %228 = arith.mulf %216, %227 : vector<8x32xf32>
    %229 = arith.addf %226, %228 : vector<8x32xf32>
    %230 = math.tanh %229 : vector<8x32xf32>
    %cst_63 = arith.constant 1.000000e+00 : f32
    %231 = vector.broadcast %cst_63 : f32 to vector<8x32xf32>
    %232 = arith.subf %231, %225 : vector<8x32xf32>
    %233 = arith.mulf %232, %230 : vector<8x32xf32>
    %234 = arith.mulf %225, %196 : vector<8x32xf32>
    %235 = arith.addf %233, %234 : vector<8x32xf32>
    %236 = arith.index_cast %c5_i32 : i32 to index
    %c0_64 = arith.constant 0 : index
    %c0_65 = arith.constant 0 : index
    %237 = vector.load %arg4[%236, %c0_64, %c0_65] : memref<8x8x32xf32, #tpu.memory_space<vmem>>, vector<1x8x32xf32>
    %238 = vector.shape_cast %237 : vector<1x8x32xf32> to vector<8x32xf32>
    %239 = vector.shape_cast %235 : vector<8x32xf32> to vector<1x8x32xf32>
    tpu.vector_store %arg4[%236, %c0_64, %c0_65], %239 {strides = array<i32>} : memref<8x8x32xf32, #tpu.memory_space<vmem>>, vector<1x8x32xf32>,
    %c6_i32 = arith.constant 6 : i32
    %240 = arith.truncf %235 : vector<8x32xf32> to vector<8x32xbf16>
    %cst_66 = arith.constant dense<0.000000e+00> : vector<8x96xf32>
    %241 = tpu.matmul %240, %3, %cst_66 {dimension_numbers = #tpu.dot_dimension_numbers<[1], [0], [0], [1], [0, 0, 1, 1], [], []>} : vector<8x32xbf16>, vector<32x96xbf16>, vector<8x96xf32> -> vector<8x96xf32>
    %242 = vector.broadcast %4 : vector<1x96xf32> to vector<8x96xf32>
    %243 = arith.addf %241, %242 : vector<8x96xf32>
    %244 = arith.index_cast %c6_i32 : i32 to index
    %c0_67 = arith.constant 0 : index
    %c0_68 = arith.constant 0 : index
    %245 = vector.load %arg1[%244, %c0_67, %c0_68] : memref<8x8x96xf32, #tpu.memory_space<vmem>>, vector<1x8x96xf32>
    %246 = vector.shape_cast %245 : vector<1x8x96xf32> to vector<8x96xf32>
    %247 = vector.extract_strided_slice %246 {offsets = [0, 0], sizes = [8, 32], strides = [1, 1]} : vector<8x96xf32> to vector<8x32xf32>
    %248 = vector.extract_strided_slice %243 {offsets = [0, 0], sizes = [8, 32], strides = [1, 1]} : vector<8x96xf32> to vector<8x32xf32>
    %249 = arith.addf %247, %248 : vector<8x32xf32>
    %cst_69 = arith.constant 0.000000e+00 : f32
    %250 = vector.broadcast %cst_69 : f32 to vector<8x32xf32>
    %251 = arith.subf %250, %249 : vector<8x32xf32>
    %252 = math.exp %251 : vector<8x32xf32>
    %cst_70 = arith.constant 1.000000e+00 : f32
    %253 = vector.broadcast %cst_70 : f32 to vector<8x32xf32>
    %254 = arith.addf %253, %252 : vector<8x32xf32>
    %255 = tpu.reciprocal %254 {approx = true} : vector<8x32xf32> -> vector<8x32xf32>
    %256 = vector.extract_strided_slice %246 {offsets = [0, 32], sizes = [8, 32], strides = [1, 1]} : vector<8x96xf32> to vector<8x32xf32>
    %257 = vector.extract_strided_slice %243 {offsets = [0, 32], sizes = [8, 32], strides = [1, 1]} : vector<8x96xf32> to vector<8x32xf32>
    %258 = arith.addf %256, %257 : vector<8x32xf32>
    %cst_71 = arith.constant 0.000000e+00 : f32
    %259 = vector.broadcast %cst_71 : f32 to vector<8x32xf32>
    %260 = arith.subf %259, %258 : vector<8x32xf32>
    %261 = math.exp %260 : vector<8x32xf32>
    %cst_72 = arith.constant 1.000000e+00 : f32
    %262 = vector.broadcast %cst_72 : f32 to vector<8x32xf32>
    %263 = arith.addf %262, %261 : vector<8x32xf32>
    %264 = tpu.reciprocal %263 {approx = true} : vector<8x32xf32> -> vector<8x32xf32>
    %265 = vector.extract_strided_slice %246 {offsets = [0, 64], sizes = [8, 32], strides = [1, 1]} : vector<8x96xf32> to vector<8x32xf32>
    %266 = vector.extract_strided_slice %243 {offsets = [0, 64], sizes = [8, 32], strides = [1, 1]} : vector<8x96xf32> to vector<8x32xf32>
    %267 = arith.mulf %255, %266 : vector<8x32xf32>
    %268 = arith.addf %265, %267 : vector<8x32xf32>
    %269 = math.tanh %268 : vector<8x32xf32>
    %cst_73 = arith.constant 1.000000e+00 : f32
    %270 = vector.broadcast %cst_73 : f32 to vector<8x32xf32>
    %271 = arith.subf %270, %264 : vector<8x32xf32>
    %272 = arith.mulf %271, %269 : vector<8x32xf32>
    %273 = arith.mulf %264, %235 : vector<8x32xf32>
    %274 = arith.addf %272, %273 : vector<8x32xf32>
    %275 = arith.index_cast %c6_i32 : i32 to index
    %c0_74 = arith.constant 0 : index
    %c0_75 = arith.constant 0 : index
    %276 = vector.load %arg4[%275, %c0_74, %c0_75] : memref<8x8x32xf32, #tpu.memory_space<vmem>>, vector<1x8x32xf32>
    %277 = vector.shape_cast %276 : vector<1x8x32xf32> to vector<8x32xf32>
    %278 = vector.shape_cast %274 : vector<8x32xf32> to vector<1x8x32xf32>
    tpu.vector_store %arg4[%275, %c0_74, %c0_75], %278 {strides = array<i32>} : memref<8x8x32xf32, #tpu.memory_space<vmem>>, vector<1x8x32xf32>,
    %c7_i32 = arith.constant 7 : i32
    %279 = arith.truncf %274 : vector<8x32xf32> to vector<8x32xbf16>
    %cst_76 = arith.constant dense<0.000000e+00> : vector<8x96xf32>
    %280 = tpu.matmul %279, %3, %cst_76 {dimension_numbers = #tpu.dot_dimension_numbers<[1], [0], [0], [1], [0, 0, 1, 1], [], []>} : vector<8x32xbf16>, vector<32x96xbf16>, vector<8x96xf32> -> vector<8x96xf32>
    %281 = vector.broadcast %4 : vector<1x96xf32> to vector<8x96xf32>
    %282 = arith.addf %280, %281 : vector<8x96xf32>
    %283 = arith.index_cast %c7_i32 : i32 to index
    %c0_77 = arith.constant 0 : index
    %c0_78 = arith.constant 0 : index
    %284 = vector.load %arg1[%283, %c0_77, %c0_78] : memref<8x8x96xf32, #tpu.memory_space<vmem>>, vector<1x8x96xf32>
    %285 = vector.shape_cast %284 : vector<1x8x96xf32> to vector<8x96xf32>
    %286 = vector.extract_strided_slice %285 {offsets = [0, 0], sizes = [8, 32], strides = [1, 1]} : vector<8x96xf32> to vector<8x32xf32>
    %287 = vector.extract_strided_slice %282 {offsets = [0, 0], sizes = [8, 32], strides = [1, 1]} : vector<8x96xf32> to vector<8x32xf32>
    %288 = arith.addf %286, %287 : vector<8x32xf32>
    %cst_79 = arith.constant 0.000000e+00 : f32
    %289 = vector.broadcast %cst_79 : f32 to vector<8x32xf32>
    %290 = arith.subf %289, %288 : vector<8x32xf32>
    %291 = math.exp %290 : vector<8x32xf32>
    %cst_80 = arith.constant 1.000000e+00 : f32
    %292 = vector.broadcast %cst_80 : f32 to vector<8x32xf32>
    %293 = arith.addf %292, %291 : vector<8x32xf32>
    %294 = tpu.reciprocal %293 {approx = true} : vector<8x32xf32> -> vector<8x32xf32>
    %295 = vector.extract_strided_slice %285 {offsets = [0, 32], sizes = [8, 32], strides = [1, 1]} : vector<8x96xf32> to vector<8x32xf32>
    %296 = vector.extract_strided_slice %282 {offsets = [0, 32], sizes = [8, 32], strides = [1, 1]} : vector<8x96xf32> to vector<8x32xf32>
    %297 = arith.addf %295, %296 : vector<8x32xf32>
    %cst_81 = arith.constant 0.000000e+00 : f32
    %298 = vector.broadcast %cst_81 : f32 to vector<8x32xf32>
    %299 = arith.subf %298, %297 : vector<8x32xf32>
    %300 = math.exp %299 : vector<8x32xf32>
    %cst_82 = arith.constant 1.000000e+00 : f32
    %301 = vector.broadcast %cst_82 : f32 to vector<8x32xf32>
    %302 = arith.addf %301, %300 : vector<8x32xf32>
    %303 = tpu.reciprocal %302 {approx = true} : vector<8x32xf32> -> vector<8x32xf32>
    %304 = vector.extract_strided_slice %285 {offsets = [0, 64], sizes = [8, 32], strides = [1, 1]} : vector<8x96xf32> to vector<8x32xf32>
    %305 = vector.extract_strided_slice %282 {offsets = [0, 64], sizes = [8, 32], strides = [1, 1]} : vector<8x96xf32> to vector<8x32xf32>
    %306 = arith.mulf %294, %305 : vector<8x32xf32>
    %307 = arith.addf %304, %306 : vector<8x32xf32>
    %308 = math.tanh %307 : vector<8x32xf32>
    %cst_83 = arith.constant 1.000000e+00 : f32
    %309 = vector.broadcast %cst_83 : f32 to vector<8x32xf32>
    %310 = arith.subf %309, %303 : vector<8x32xf32>
    %311 = arith.mulf %310, %308 : vector<8x32xf32>
    %312 = arith.mulf %303, %274 : vector<8x32xf32>
    %313 = arith.addf %311, %312 : vector<8x32xf32>
    %314 = arith.index_cast %c7_i32 : i32 to index
    %c0_84 = arith.constant 0 : index
    %c0_85 = arith.constant 0 : index
    %315 = vector.load %arg4[%314, %c0_84, %c0_85] : memref<8x8x32xf32, #tpu.memory_space<vmem>>, vector<1x8x32xf32>
    %316 = vector.shape_cast %315 : vector<1x8x32xf32> to vector<8x32xf32>
    %317 = vector.shape_cast %313 : vector<8x32xf32> to vector<1x8x32xf32>
    tpu.vector_store %arg4[%314, %c0_84, %c0_85], %317 {strides = array<i32>} : memref<8x8x32xf32, #tpu.memory_space<vmem>>, vector<1x8x32xf32>,
    %c8_i32 = arith.constant 8 : i32
    %c0_86 = arith.constant 0 : index
    %c0_87 = arith.constant 0 : index
    %318 = vector.load %arg5[%c0_86, %c0_87] : memref<8x32xf32, #tpu.memory_space<vmem>>, vector<8x32xf32>
    tpu.vector_store %arg5[%c0_86, %c0_87], %313 {strides = array<i32>} : memref<8x32xf32, #tpu.memory_space<vmem>>, vector<8x32xf32>,
    return
  }
  func.func @transform_0(%arg0: i32) -> (i32, i32, i32) {
    %c0_i32 = arith.constant 0 : i32
    %c0_i32_0 = arith.constant 0 : i32
    %c0_i32_1 = arith.constant 0 : i32
    return %arg0, %c0_i32, %c0_i32_0 : i32, i32, i32
  }
  func.func @transform_1(%arg0: i32) -> (i32, i32) {
    %c0_i32 = arith.constant 0 : i32
    %c0_i32_0 = arith.constant 0 : i32
    %c0_i32_1 = arith.constant 0 : i32
    return %c0_i32, %c0_i32_0 : i32, i32
  }
  func.func @transform_2(%arg0: i32) -> (i32, i32) {
    %c0_i32 = arith.constant 0 : i32
    %c0_i32_0 = arith.constant 0 : i32
    %c0_i32_1 = arith.constant 0 : i32
    return %c0_i32, %c0_i32_0 : i32, i32
  }
  func.func @transform_3(%arg0: i32) -> (i32, i32, i32) {
    %c0_i32 = arith.constant 0 : i32
    %c0_i32_0 = arith.constant 0 : i32
    %c0_i32_1 = arith.constant 0 : i32
    return %arg0, %c0_i32, %c0_i32_0 : i32, i32, i32
  }
}

module attributes {stable_mosaic.version = 11 : i64} {
  func.func @_input_gi_kernel(%arg0: i32, %arg1: memref<16x18xf32, #tpu.memory_space<vmem>>, %arg2: memref<18x32xbf16, #tpu.memory_space<vmem>>, %arg3: memref<1x32xf32, #tpu.memory_space<vmem>>, %arg4: memref<32x96xbf16, #tpu.memory_space<vmem>>, %arg5: memref<1x96xf32, #tpu.memory_space<vmem>>, %arg6: memref<16x96xf32, #tpu.memory_space<vmem>>) attributes {dimension_semantics = [#tpu.dimension_semantics<parallel>], iteration_bounds = array<i64: 1>, scalar_prefetch = 0 : i64, scratch_operands = 0 : i64, tpu.core_type = #tpu.core_type<tc>, window_params = [{transform_indices = @transform_0, window_bounds = array<i64: 16, 18>}, {pipeline_mode = #tpu.pipeline_mode<synchronous>, transform_indices = @transform_1, window_bounds = array<i64: 18, 32>}, {pipeline_mode = #tpu.pipeline_mode<synchronous>, transform_indices = @transform_2, window_bounds = array<i64: 1, 32>}, {pipeline_mode = #tpu.pipeline_mode<synchronous>, transform_indices = @transform_3, window_bounds = array<i64: 32, 96>}, {pipeline_mode = #tpu.pipeline_mode<synchronous>, transform_indices = @transform_4, window_bounds = array<i64: 1, 96>}, {transform_indices = @transform_5, window_bounds = array<i64: 16, 96>}]} {
    %c0 = arith.constant 0 : index
    %c0_0 = arith.constant 0 : index
    %0 = vector.load %arg1[%c0, %c0_0] : memref<16x18xf32, #tpu.memory_space<vmem>>, vector<16x18xf32>
    %1 = arith.truncf %0 : vector<16x18xf32> to vector<16x18xbf16>
    %c0_1 = arith.constant 0 : index
    %c0_2 = arith.constant 0 : index
    %2 = vector.load %arg2[%c0_1, %c0_2] : memref<18x32xbf16, #tpu.memory_space<vmem>>, vector<18x32xbf16>
    %cst = arith.constant dense<0.000000e+00> : vector<16x32xf32>
    %3 = tpu.matmul %1, %2, %cst {dimension_numbers = #tpu.dot_dimension_numbers<[1], [0], [0], [1], [0, 0, 1, 1], [], []>} : vector<16x18xbf16>, vector<18x32xbf16>, vector<16x32xf32> -> vector<16x32xf32>
    %c0_3 = arith.constant 0 : index
    %c0_4 = arith.constant 0 : index
    %4 = vector.load %arg3[%c0_3, %c0_4] : memref<1x32xf32, #tpu.memory_space<vmem>>, vector<1x32xf32>
    %5 = vector.broadcast %4 : vector<1x32xf32> to vector<16x32xf32>
    %6 = arith.addf %3, %5 : vector<16x32xf32>
    %7 = math.tanh %6 : vector<16x32xf32>
    %8 = arith.truncf %7 : vector<16x32xf32> to vector<16x32xbf16>
    %c0_5 = arith.constant 0 : index
    %c0_6 = arith.constant 0 : index
    %9 = vector.load %arg4[%c0_5, %c0_6] : memref<32x96xbf16, #tpu.memory_space<vmem>>, vector<32x96xbf16>
    %cst_7 = arith.constant dense<0.000000e+00> : vector<16x96xf32>
    %10 = tpu.matmul %8, %9, %cst_7 {dimension_numbers = #tpu.dot_dimension_numbers<[1], [0], [0], [1], [0, 0, 1, 1], [], []>} : vector<16x32xbf16>, vector<32x96xbf16>, vector<16x96xf32> -> vector<16x96xf32>
    %c0_8 = arith.constant 0 : index
    %c0_9 = arith.constant 0 : index
    %11 = vector.load %arg5[%c0_8, %c0_9] : memref<1x96xf32, #tpu.memory_space<vmem>>, vector<1x96xf32>
    %12 = vector.broadcast %11 : vector<1x96xf32> to vector<16x96xf32>
    %13 = arith.addf %10, %12 : vector<16x96xf32>
    %c0_10 = arith.constant 0 : index
    %c0_11 = arith.constant 0 : index
    %14 = vector.load %arg6[%c0_10, %c0_11] : memref<16x96xf32, #tpu.memory_space<vmem>>, vector<16x96xf32>
    tpu.vector_store %arg6[%c0_10, %c0_11], %13 {strides = array<i32>} : memref<16x96xf32, #tpu.memory_space<vmem>>, vector<16x96xf32>,
    return
  }
  func.func @transform_0(%arg0: i32) -> (i32, i32) {
    %c0_i32 = arith.constant 0 : i32
    %c0_i32_0 = arith.constant 0 : i32
    return %arg0, %c0_i32 : i32, i32
  }
  func.func @transform_1(%arg0: i32) -> (i32, i32) {
    %c0_i32 = arith.constant 0 : i32
    %c0_i32_0 = arith.constant 0 : i32
    %c0_i32_1 = arith.constant 0 : i32
    return %c0_i32, %c0_i32_0 : i32, i32
  }
  func.func @transform_2(%arg0: i32) -> (i32, i32) {
    %c0_i32 = arith.constant 0 : i32
    %c0_i32_0 = arith.constant 0 : i32
    %c0_i32_1 = arith.constant 0 : i32
    return %c0_i32, %c0_i32_0 : i32, i32
  }
  func.func @transform_3(%arg0: i32) -> (i32, i32) {
    %c0_i32 = arith.constant 0 : i32
    %c0_i32_0 = arith.constant 0 : i32
    %c0_i32_1 = arith.constant 0 : i32
    return %c0_i32, %c0_i32_0 : i32, i32
  }
  func.func @transform_4(%arg0: i32) -> (i32, i32) {
    %c0_i32 = arith.constant 0 : i32
    %c0_i32_0 = arith.constant 0 : i32
    %c0_i32_1 = arith.constant 0 : i32
    return %c0_i32, %c0_i32_0 : i32, i32
  }
  func.func @transform_5(%arg0: i32) -> (i32, i32) {
    %c0_i32 = arith.constant 0 : i32
    %c0_i32_0 = arith.constant 0 : i32
    return %arg0, %c0_i32 : i32, i32
  }
}

module attributes {stable_mosaic.version = 11 : i64} {
  func.func @_gru_kernel(%arg0: i32, %arg1: memref<8x8x96xf32, #tpu.memory_space<vmem>>, %arg2: memref<32x96xbf16, #tpu.memory_space<vmem>>, %arg3: memref<1x96xf32, #tpu.memory_space<vmem>>, %arg4: memref<32x96xbf16, #tpu.memory_space<vmem>>, %arg5: memref<1x96xf32, #tpu.memory_space<vmem>>, %arg6: memref<8x8x96xf32, #tpu.memory_space<vmem>>, %arg7: memref<8x32xf32, #tpu.memory_space<vmem>>, %arg8: memref<8x8x32xf32, #tpu.memory_space<vmem>>) attributes {dimension_semantics = [#tpu.dimension_semantics<arbitrary>], iteration_bounds = array<i64: 1>, scalar_prefetch = 0 : i64, scratch_operands = 2 : i64, tpu.core_type = #tpu.core_type<tc>, window_params = [{transform_indices = @transform_0, window_bounds = array<i64: 8, 8, 96>}, {pipeline_mode = #tpu.pipeline_mode<synchronous>, transform_indices = @transform_1, window_bounds = array<i64: 32, 96>}, {pipeline_mode = #tpu.pipeline_mode<synchronous>, transform_indices = @transform_2, window_bounds = array<i64: 1, 96>}, {pipeline_mode = #tpu.pipeline_mode<synchronous>, transform_indices = @transform_3, window_bounds = array<i64: 32, 96>}, {pipeline_mode = #tpu.pipeline_mode<synchronous>, transform_indices = @transform_4, window_bounds = array<i64: 1, 96>}, {transform_indices = @transform_5, window_bounds = array<i64: 8, 8, 96>}]} {
    %c0_i32 = arith.constant 0 : i32
    %0 = arith.cmpi eq, %arg0, %c0_i32 : i32
    %1 = arith.extui %0 : i1 to i32
    %c0_i32_0 = arith.constant 0 : i32
    %2 = arith.cmpi ne, %1, %c0_i32_0 : i32
    scf.if %2 {
      %cst_99 = arith.constant 0.000000e+00 : f32
      %329 = vector.broadcast %cst_99 : f32 to vector<8x32xf32>
      %c0_100 = arith.constant 0 : index
      %c0_101 = arith.constant 0 : index
      %330 = vector.load %arg7[%c0_100, %c0_101] : memref<8x32xf32, #tpu.memory_space<vmem>>, vector<8x32xf32>
      tpu.vector_store %arg7[%c0_100, %c0_101], %329 {strides = array<i32>} : memref<8x32xf32, #tpu.memory_space<vmem>>, vector<8x32xf32>,
    } else {
    }
    %c0 = arith.constant 0 : index
    %c0_1 = arith.constant 0 : index
    %3 = vector.load %arg2[%c0, %c0_1] : memref<32x96xbf16, #tpu.memory_space<vmem>>, vector<32x96xbf16>
    %c0_2 = arith.constant 0 : index
    %c0_3 = arith.constant 0 : index
    %4 = vector.load %arg3[%c0_2, %c0_3] : memref<1x96xf32, #tpu.memory_space<vmem>>, vector<1x96xf32>
    %c0_4 = arith.constant 0 : index
    %c0_5 = arith.constant 0 : index
    %5 = vector.load %arg7[%c0_4, %c0_5] : memref<8x32xf32, #tpu.memory_space<vmem>>, vector<8x32xf32>
    %c0_i32_6 = arith.constant 0 : i32
    %6 = arith.truncf %5 : vector<8x32xf32> to vector<8x32xbf16>
    %cst = arith.constant dense<0.000000e+00> : vector<8x96xf32>
    %7 = tpu.matmul %6, %3, %cst {dimension_numbers = #tpu.dot_dimension_numbers<[1], [0], [0], [1], [0, 0, 1, 1], [], []>} : vector<8x32xbf16>, vector<32x96xbf16>, vector<8x96xf32> -> vector<8x96xf32>
    %8 = vector.broadcast %4 : vector<1x96xf32> to vector<8x96xf32>
    %9 = arith.addf %7, %8 : vector<8x96xf32>
    %10 = arith.index_cast %c0_i32_6 : i32 to index
    %c0_7 = arith.constant 0 : index
    %c0_8 = arith.constant 0 : index
    %11 = vector.load %arg1[%10, %c0_7, %c0_8] : memref<8x8x96xf32, #tpu.memory_space<vmem>>, vector<1x8x96xf32>
    %12 = vector.shape_cast %11 : vector<1x8x96xf32> to vector<8x96xf32>
    %13 = vector.extract_strided_slice %12 {offsets = [0, 0], sizes = [8, 32], strides = [1, 1]} : vector<8x96xf32> to vector<8x32xf32>
    %14 = vector.extract_strided_slice %9 {offsets = [0, 0], sizes = [8, 32], strides = [1, 1]} : vector<8x96xf32> to vector<8x32xf32>
    %15 = arith.addf %13, %14 : vector<8x32xf32>
    %cst_9 = arith.constant 0.000000e+00 : f32
    %16 = vector.broadcast %cst_9 : f32 to vector<8x32xf32>
    %17 = arith.subf %16, %15 : vector<8x32xf32>
    %18 = math.exp %17 : vector<8x32xf32>
    %cst_10 = arith.constant 1.000000e+00 : f32
    %19 = vector.broadcast %cst_10 : f32 to vector<8x32xf32>
    %20 = arith.addf %19, %18 : vector<8x32xf32>
    %21 = tpu.reciprocal %20 {approx = true} : vector<8x32xf32> -> vector<8x32xf32>
    %22 = vector.extract_strided_slice %12 {offsets = [0, 32], sizes = [8, 32], strides = [1, 1]} : vector<8x96xf32> to vector<8x32xf32>
    %23 = vector.extract_strided_slice %9 {offsets = [0, 32], sizes = [8, 32], strides = [1, 1]} : vector<8x96xf32> to vector<8x32xf32>
    %24 = arith.addf %22, %23 : vector<8x32xf32>
    %cst_11 = arith.constant 0.000000e+00 : f32
    %25 = vector.broadcast %cst_11 : f32 to vector<8x32xf32>
    %26 = arith.subf %25, %24 : vector<8x32xf32>
    %27 = math.exp %26 : vector<8x32xf32>
    %cst_12 = arith.constant 1.000000e+00 : f32
    %28 = vector.broadcast %cst_12 : f32 to vector<8x32xf32>
    %29 = arith.addf %28, %27 : vector<8x32xf32>
    %30 = tpu.reciprocal %29 {approx = true} : vector<8x32xf32> -> vector<8x32xf32>
    %31 = vector.extract_strided_slice %12 {offsets = [0, 64], sizes = [8, 32], strides = [1, 1]} : vector<8x96xf32> to vector<8x32xf32>
    %32 = vector.extract_strided_slice %9 {offsets = [0, 64], sizes = [8, 32], strides = [1, 1]} : vector<8x96xf32> to vector<8x32xf32>
    %33 = arith.mulf %21, %32 : vector<8x32xf32>
    %34 = arith.addf %31, %33 : vector<8x32xf32>
    %35 = math.tanh %34 : vector<8x32xf32>
    %cst_13 = arith.constant 1.000000e+00 : f32
    %36 = vector.broadcast %cst_13 : f32 to vector<8x32xf32>
    %37 = arith.subf %36, %30 : vector<8x32xf32>
    %38 = arith.mulf %37, %35 : vector<8x32xf32>
    %39 = arith.mulf %30, %5 : vector<8x32xf32>
    %40 = arith.addf %38, %39 : vector<8x32xf32>
    %41 = arith.index_cast %c0_i32_6 : i32 to index
    %c0_14 = arith.constant 0 : index
    %c0_15 = arith.constant 0 : index
    %42 = vector.load %arg8[%41, %c0_14, %c0_15] : memref<8x8x32xf32, #tpu.memory_space<vmem>>, vector<1x8x32xf32>
    %43 = vector.shape_cast %42 : vector<1x8x32xf32> to vector<8x32xf32>
    %44 = vector.shape_cast %40 : vector<8x32xf32> to vector<1x8x32xf32>
    tpu.vector_store %arg8[%41, %c0_14, %c0_15], %44 {strides = array<i32>} : memref<8x8x32xf32, #tpu.memory_space<vmem>>, vector<1x8x32xf32>,
    %c1_i32 = arith.constant 1 : i32
    %45 = arith.truncf %40 : vector<8x32xf32> to vector<8x32xbf16>
    %cst_16 = arith.constant dense<0.000000e+00> : vector<8x96xf32>
    %46 = tpu.matmul %45, %3, %cst_16 {dimension_numbers = #tpu.dot_dimension_numbers<[1], [0], [0], [1], [0, 0, 1, 1], [], []>} : vector<8x32xbf16>, vector<32x96xbf16>, vector<8x96xf32> -> vector<8x96xf32>
    %47 = vector.broadcast %4 : vector<1x96xf32> to vector<8x96xf32>
    %48 = arith.addf %46, %47 : vector<8x96xf32>
    %49 = arith.index_cast %c1_i32 : i32 to index
    %c0_17 = arith.constant 0 : index
    %c0_18 = arith.constant 0 : index
    %50 = vector.load %arg1[%49, %c0_17, %c0_18] : memref<8x8x96xf32, #tpu.memory_space<vmem>>, vector<1x8x96xf32>
    %51 = vector.shape_cast %50 : vector<1x8x96xf32> to vector<8x96xf32>
    %52 = vector.extract_strided_slice %51 {offsets = [0, 0], sizes = [8, 32], strides = [1, 1]} : vector<8x96xf32> to vector<8x32xf32>
    %53 = vector.extract_strided_slice %48 {offsets = [0, 0], sizes = [8, 32], strides = [1, 1]} : vector<8x96xf32> to vector<8x32xf32>
    %54 = arith.addf %52, %53 : vector<8x32xf32>
    %cst_19 = arith.constant 0.000000e+00 : f32
    %55 = vector.broadcast %cst_19 : f32 to vector<8x32xf32>
    %56 = arith.subf %55, %54 : vector<8x32xf32>
    %57 = math.exp %56 : vector<8x32xf32>
    %cst_20 = arith.constant 1.000000e+00 : f32
    %58 = vector.broadcast %cst_20 : f32 to vector<8x32xf32>
    %59 = arith.addf %58, %57 : vector<8x32xf32>
    %60 = tpu.reciprocal %59 {approx = true} : vector<8x32xf32> -> vector<8x32xf32>
    %61 = vector.extract_strided_slice %51 {offsets = [0, 32], sizes = [8, 32], strides = [1, 1]} : vector<8x96xf32> to vector<8x32xf32>
    %62 = vector.extract_strided_slice %48 {offsets = [0, 32], sizes = [8, 32], strides = [1, 1]} : vector<8x96xf32> to vector<8x32xf32>
    %63 = arith.addf %61, %62 : vector<8x32xf32>
    %cst_21 = arith.constant 0.000000e+00 : f32
    %64 = vector.broadcast %cst_21 : f32 to vector<8x32xf32>
    %65 = arith.subf %64, %63 : vector<8x32xf32>
    %66 = math.exp %65 : vector<8x32xf32>
    %cst_22 = arith.constant 1.000000e+00 : f32
    %67 = vector.broadcast %cst_22 : f32 to vector<8x32xf32>
    %68 = arith.addf %67, %66 : vector<8x32xf32>
    %69 = tpu.reciprocal %68 {approx = true} : vector<8x32xf32> -> vector<8x32xf32>
    %70 = vector.extract_strided_slice %51 {offsets = [0, 64], sizes = [8, 32], strides = [1, 1]} : vector<8x96xf32> to vector<8x32xf32>
    %71 = vector.extract_strided_slice %48 {offsets = [0, 64], sizes = [8, 32], strides = [1, 1]} : vector<8x96xf32> to vector<8x32xf32>
    %72 = arith.mulf %60, %71 : vector<8x32xf32>
    %73 = arith.addf %70, %72 : vector<8x32xf32>
    %74 = math.tanh %73 : vector<8x32xf32>
    %cst_23 = arith.constant 1.000000e+00 : f32
    %75 = vector.broadcast %cst_23 : f32 to vector<8x32xf32>
    %76 = arith.subf %75, %69 : vector<8x32xf32>
    %77 = arith.mulf %76, %74 : vector<8x32xf32>
    %78 = arith.mulf %69, %40 : vector<8x32xf32>
    %79 = arith.addf %77, %78 : vector<8x32xf32>
    %80 = arith.index_cast %c1_i32 : i32 to index
    %c0_24 = arith.constant 0 : index
    %c0_25 = arith.constant 0 : index
    %81 = vector.load %arg8[%80, %c0_24, %c0_25] : memref<8x8x32xf32, #tpu.memory_space<vmem>>, vector<1x8x32xf32>
    %82 = vector.shape_cast %81 : vector<1x8x32xf32> to vector<8x32xf32>
    %83 = vector.shape_cast %79 : vector<8x32xf32> to vector<1x8x32xf32>
    tpu.vector_store %arg8[%80, %c0_24, %c0_25], %83 {strides = array<i32>} : memref<8x8x32xf32, #tpu.memory_space<vmem>>, vector<1x8x32xf32>,
    %c2_i32 = arith.constant 2 : i32
    %84 = arith.truncf %79 : vector<8x32xf32> to vector<8x32xbf16>
    %cst_26 = arith.constant dense<0.000000e+00> : vector<8x96xf32>
    %85 = tpu.matmul %84, %3, %cst_26 {dimension_numbers = #tpu.dot_dimension_numbers<[1], [0], [0], [1], [0, 0, 1, 1], [], []>} : vector<8x32xbf16>, vector<32x96xbf16>, vector<8x96xf32> -> vector<8x96xf32>
    %86 = vector.broadcast %4 : vector<1x96xf32> to vector<8x96xf32>
    %87 = arith.addf %85, %86 : vector<8x96xf32>
    %88 = arith.index_cast %c2_i32 : i32 to index
    %c0_27 = arith.constant 0 : index
    %c0_28 = arith.constant 0 : index
    %89 = vector.load %arg1[%88, %c0_27, %c0_28] : memref<8x8x96xf32, #tpu.memory_space<vmem>>, vector<1x8x96xf32>
    %90 = vector.shape_cast %89 : vector<1x8x96xf32> to vector<8x96xf32>
    %91 = vector.extract_strided_slice %90 {offsets = [0, 0], sizes = [8, 32], strides = [1, 1]} : vector<8x96xf32> to vector<8x32xf32>
    %92 = vector.extract_strided_slice %87 {offsets = [0, 0], sizes = [8, 32], strides = [1, 1]} : vector<8x96xf32> to vector<8x32xf32>
    %93 = arith.addf %91, %92 : vector<8x32xf32>
    %cst_29 = arith.constant 0.000000e+00 : f32
    %94 = vector.broadcast %cst_29 : f32 to vector<8x32xf32>
    %95 = arith.subf %94, %93 : vector<8x32xf32>
    %96 = math.exp %95 : vector<8x32xf32>
    %cst_30 = arith.constant 1.000000e+00 : f32
    %97 = vector.broadcast %cst_30 : f32 to vector<8x32xf32>
    %98 = arith.addf %97, %96 : vector<8x32xf32>
    %99 = tpu.reciprocal %98 {approx = true} : vector<8x32xf32> -> vector<8x32xf32>
    %100 = vector.extract_strided_slice %90 {offsets = [0, 32], sizes = [8, 32], strides = [1, 1]} : vector<8x96xf32> to vector<8x32xf32>
    %101 = vector.extract_strided_slice %87 {offsets = [0, 32], sizes = [8, 32], strides = [1, 1]} : vector<8x96xf32> to vector<8x32xf32>
    %102 = arith.addf %100, %101 : vector<8x32xf32>
    %cst_31 = arith.constant 0.000000e+00 : f32
    %103 = vector.broadcast %cst_31 : f32 to vector<8x32xf32>
    %104 = arith.subf %103, %102 : vector<8x32xf32>
    %105 = math.exp %104 : vector<8x32xf32>
    %cst_32 = arith.constant 1.000000e+00 : f32
    %106 = vector.broadcast %cst_32 : f32 to vector<8x32xf32>
    %107 = arith.addf %106, %105 : vector<8x32xf32>
    %108 = tpu.reciprocal %107 {approx = true} : vector<8x32xf32> -> vector<8x32xf32>
    %109 = vector.extract_strided_slice %90 {offsets = [0, 64], sizes = [8, 32], strides = [1, 1]} : vector<8x96xf32> to vector<8x32xf32>
    %110 = vector.extract_strided_slice %87 {offsets = [0, 64], sizes = [8, 32], strides = [1, 1]} : vector<8x96xf32> to vector<8x32xf32>
    %111 = arith.mulf %99, %110 : vector<8x32xf32>
    %112 = arith.addf %109, %111 : vector<8x32xf32>
    %113 = math.tanh %112 : vector<8x32xf32>
    %cst_33 = arith.constant 1.000000e+00 : f32
    %114 = vector.broadcast %cst_33 : f32 to vector<8x32xf32>
    %115 = arith.subf %114, %108 : vector<8x32xf32>
    %116 = arith.mulf %115, %113 : vector<8x32xf32>
    %117 = arith.mulf %108, %79 : vector<8x32xf32>
    %118 = arith.addf %116, %117 : vector<8x32xf32>
    %119 = arith.index_cast %c2_i32 : i32 to index
    %c0_34 = arith.constant 0 : index
    %c0_35 = arith.constant 0 : index
    %120 = vector.load %arg8[%119, %c0_34, %c0_35] : memref<8x8x32xf32, #tpu.memory_space<vmem>>, vector<1x8x32xf32>
    %121 = vector.shape_cast %120 : vector<1x8x32xf32> to vector<8x32xf32>
    %122 = vector.shape_cast %118 : vector<8x32xf32> to vector<1x8x32xf32>
    tpu.vector_store %arg8[%119, %c0_34, %c0_35], %122 {strides = array<i32>} : memref<8x8x32xf32, #tpu.memory_space<vmem>>, vector<1x8x32xf32>,
    %c3_i32 = arith.constant 3 : i32
    %123 = arith.truncf %118 : vector<8x32xf32> to vector<8x32xbf16>
    %cst_36 = arith.constant dense<0.000000e+00> : vector<8x96xf32>
    %124 = tpu.matmul %123, %3, %cst_36 {dimension_numbers = #tpu.dot_dimension_numbers<[1], [0], [0], [1], [0, 0, 1, 1], [], []>} : vector<8x32xbf16>, vector<32x96xbf16>, vector<8x96xf32> -> vector<8x96xf32>
    %125 = vector.broadcast %4 : vector<1x96xf32> to vector<8x96xf32>
    %126 = arith.addf %124, %125 : vector<8x96xf32>
    %127 = arith.index_cast %c3_i32 : i32 to index
    %c0_37 = arith.constant 0 : index
    %c0_38 = arith.constant 0 : index
    %128 = vector.load %arg1[%127, %c0_37, %c0_38] : memref<8x8x96xf32, #tpu.memory_space<vmem>>, vector<1x8x96xf32>
    %129 = vector.shape_cast %128 : vector<1x8x96xf32> to vector<8x96xf32>
    %130 = vector.extract_strided_slice %129 {offsets = [0, 0], sizes = [8, 32], strides = [1, 1]} : vector<8x96xf32> to vector<8x32xf32>
    %131 = vector.extract_strided_slice %126 {offsets = [0, 0], sizes = [8, 32], strides = [1, 1]} : vector<8x96xf32> to vector<8x32xf32>
    %132 = arith.addf %130, %131 : vector<8x32xf32>
    %cst_39 = arith.constant 0.000000e+00 : f32
    %133 = vector.broadcast %cst_39 : f32 to vector<8x32xf32>
    %134 = arith.subf %133, %132 : vector<8x32xf32>
    %135 = math.exp %134 : vector<8x32xf32>
    %cst_40 = arith.constant 1.000000e+00 : f32
    %136 = vector.broadcast %cst_40 : f32 to vector<8x32xf32>
    %137 = arith.addf %136, %135 : vector<8x32xf32>
    %138 = tpu.reciprocal %137 {approx = true} : vector<8x32xf32> -> vector<8x32xf32>
    %139 = vector.extract_strided_slice %129 {offsets = [0, 32], sizes = [8, 32], strides = [1, 1]} : vector<8x96xf32> to vector<8x32xf32>
    %140 = vector.extract_strided_slice %126 {offsets = [0, 32], sizes = [8, 32], strides = [1, 1]} : vector<8x96xf32> to vector<8x32xf32>
    %141 = arith.addf %139, %140 : vector<8x32xf32>
    %cst_41 = arith.constant 0.000000e+00 : f32
    %142 = vector.broadcast %cst_41 : f32 to vector<8x32xf32>
    %143 = arith.subf %142, %141 : vector<8x32xf32>
    %144 = math.exp %143 : vector<8x32xf32>
    %cst_42 = arith.constant 1.000000e+00 : f32
    %145 = vector.broadcast %cst_42 : f32 to vector<8x32xf32>
    %146 = arith.addf %145, %144 : vector<8x32xf32>
    %147 = tpu.reciprocal %146 {approx = true} : vector<8x32xf32> -> vector<8x32xf32>
    %148 = vector.extract_strided_slice %129 {offsets = [0, 64], sizes = [8, 32], strides = [1, 1]} : vector<8x96xf32> to vector<8x32xf32>
    %149 = vector.extract_strided_slice %126 {offsets = [0, 64], sizes = [8, 32], strides = [1, 1]} : vector<8x96xf32> to vector<8x32xf32>
    %150 = arith.mulf %138, %149 : vector<8x32xf32>
    %151 = arith.addf %148, %150 : vector<8x32xf32>
    %152 = math.tanh %151 : vector<8x32xf32>
    %cst_43 = arith.constant 1.000000e+00 : f32
    %153 = vector.broadcast %cst_43 : f32 to vector<8x32xf32>
    %154 = arith.subf %153, %147 : vector<8x32xf32>
    %155 = arith.mulf %154, %152 : vector<8x32xf32>
    %156 = arith.mulf %147, %118 : vector<8x32xf32>
    %157 = arith.addf %155, %156 : vector<8x32xf32>
    %158 = arith.index_cast %c3_i32 : i32 to index
    %c0_44 = arith.constant 0 : index
    %c0_45 = arith.constant 0 : index
    %159 = vector.load %arg8[%158, %c0_44, %c0_45] : memref<8x8x32xf32, #tpu.memory_space<vmem>>, vector<1x8x32xf32>
    %160 = vector.shape_cast %159 : vector<1x8x32xf32> to vector<8x32xf32>
    %161 = vector.shape_cast %157 : vector<8x32xf32> to vector<1x8x32xf32>
    tpu.vector_store %arg8[%158, %c0_44, %c0_45], %161 {strides = array<i32>} : memref<8x8x32xf32, #tpu.memory_space<vmem>>, vector<1x8x32xf32>,
    %c4_i32 = arith.constant 4 : i32
    %162 = arith.truncf %157 : vector<8x32xf32> to vector<8x32xbf16>
    %cst_46 = arith.constant dense<0.000000e+00> : vector<8x96xf32>
    %163 = tpu.matmul %162, %3, %cst_46 {dimension_numbers = #tpu.dot_dimension_numbers<[1], [0], [0], [1], [0, 0, 1, 1], [], []>} : vector<8x32xbf16>, vector<32x96xbf16>, vector<8x96xf32> -> vector<8x96xf32>
    %164 = vector.broadcast %4 : vector<1x96xf32> to vector<8x96xf32>
    %165 = arith.addf %163, %164 : vector<8x96xf32>
    %166 = arith.index_cast %c4_i32 : i32 to index
    %c0_47 = arith.constant 0 : index
    %c0_48 = arith.constant 0 : index
    %167 = vector.load %arg1[%166, %c0_47, %c0_48] : memref<8x8x96xf32, #tpu.memory_space<vmem>>, vector<1x8x96xf32>
    %168 = vector.shape_cast %167 : vector<1x8x96xf32> to vector<8x96xf32>
    %169 = vector.extract_strided_slice %168 {offsets = [0, 0], sizes = [8, 32], strides = [1, 1]} : vector<8x96xf32> to vector<8x32xf32>
    %170 = vector.extract_strided_slice %165 {offsets = [0, 0], sizes = [8, 32], strides = [1, 1]} : vector<8x96xf32> to vector<8x32xf32>
    %171 = arith.addf %169, %170 : vector<8x32xf32>
    %cst_49 = arith.constant 0.000000e+00 : f32
    %172 = vector.broadcast %cst_49 : f32 to vector<8x32xf32>
    %173 = arith.subf %172, %171 : vector<8x32xf32>
    %174 = math.exp %173 : vector<8x32xf32>
    %cst_50 = arith.constant 1.000000e+00 : f32
    %175 = vector.broadcast %cst_50 : f32 to vector<8x32xf32>
    %176 = arith.addf %175, %174 : vector<8x32xf32>
    %177 = tpu.reciprocal %176 {approx = true} : vector<8x32xf32> -> vector<8x32xf32>
    %178 = vector.extract_strided_slice %168 {offsets = [0, 32], sizes = [8, 32], strides = [1, 1]} : vector<8x96xf32> to vector<8x32xf32>
    %179 = vector.extract_strided_slice %165 {offsets = [0, 32], sizes = [8, 32], strides = [1, 1]} : vector<8x96xf32> to vector<8x32xf32>
    %180 = arith.addf %178, %179 : vector<8x32xf32>
    %cst_51 = arith.constant 0.000000e+00 : f32
    %181 = vector.broadcast %cst_51 : f32 to vector<8x32xf32>
    %182 = arith.subf %181, %180 : vector<8x32xf32>
    %183 = math.exp %182 : vector<8x32xf32>
    %cst_52 = arith.constant 1.000000e+00 : f32
    %184 = vector.broadcast %cst_52 : f32 to vector<8x32xf32>
    %185 = arith.addf %184, %183 : vector<8x32xf32>
    %186 = tpu.reciprocal %185 {approx = true} : vector<8x32xf32> -> vector<8x32xf32>
    %187 = vector.extract_strided_slice %168 {offsets = [0, 64], sizes = [8, 32], strides = [1, 1]} : vector<8x96xf32> to vector<8x32xf32>
    %188 = vector.extract_strided_slice %165 {offsets = [0, 64], sizes = [8, 32], strides = [1, 1]} : vector<8x96xf32> to vector<8x32xf32>
    %189 = arith.mulf %177, %188 : vector<8x32xf32>
    %190 = arith.addf %187, %189 : vector<8x32xf32>
    %191 = math.tanh %190 : vector<8x32xf32>
    %cst_53 = arith.constant 1.000000e+00 : f32
    %192 = vector.broadcast %cst_53 : f32 to vector<8x32xf32>
    %193 = arith.subf %192, %186 : vector<8x32xf32>
    %194 = arith.mulf %193, %191 : vector<8x32xf32>
    %195 = arith.mulf %186, %157 : vector<8x32xf32>
    %196 = arith.addf %194, %195 : vector<8x32xf32>
    %197 = arith.index_cast %c4_i32 : i32 to index
    %c0_54 = arith.constant 0 : index
    %c0_55 = arith.constant 0 : index
    %198 = vector.load %arg8[%197, %c0_54, %c0_55] : memref<8x8x32xf32, #tpu.memory_space<vmem>>, vector<1x8x32xf32>
    %199 = vector.shape_cast %198 : vector<1x8x32xf32> to vector<8x32xf32>
    %200 = vector.shape_cast %196 : vector<8x32xf32> to vector<1x8x32xf32>
    tpu.vector_store %arg8[%197, %c0_54, %c0_55], %200 {strides = array<i32>} : memref<8x8x32xf32, #tpu.memory_space<vmem>>, vector<1x8x32xf32>,
    %c5_i32 = arith.constant 5 : i32
    %201 = arith.truncf %196 : vector<8x32xf32> to vector<8x32xbf16>
    %cst_56 = arith.constant dense<0.000000e+00> : vector<8x96xf32>
    %202 = tpu.matmul %201, %3, %cst_56 {dimension_numbers = #tpu.dot_dimension_numbers<[1], [0], [0], [1], [0, 0, 1, 1], [], []>} : vector<8x32xbf16>, vector<32x96xbf16>, vector<8x96xf32> -> vector<8x96xf32>
    %203 = vector.broadcast %4 : vector<1x96xf32> to vector<8x96xf32>
    %204 = arith.addf %202, %203 : vector<8x96xf32>
    %205 = arith.index_cast %c5_i32 : i32 to index
    %c0_57 = arith.constant 0 : index
    %c0_58 = arith.constant 0 : index
    %206 = vector.load %arg1[%205, %c0_57, %c0_58] : memref<8x8x96xf32, #tpu.memory_space<vmem>>, vector<1x8x96xf32>
    %207 = vector.shape_cast %206 : vector<1x8x96xf32> to vector<8x96xf32>
    %208 = vector.extract_strided_slice %207 {offsets = [0, 0], sizes = [8, 32], strides = [1, 1]} : vector<8x96xf32> to vector<8x32xf32>
    %209 = vector.extract_strided_slice %204 {offsets = [0, 0], sizes = [8, 32], strides = [1, 1]} : vector<8x96xf32> to vector<8x32xf32>
    %210 = arith.addf %208, %209 : vector<8x32xf32>
    %cst_59 = arith.constant 0.000000e+00 : f32
    %211 = vector.broadcast %cst_59 : f32 to vector<8x32xf32>
    %212 = arith.subf %211, %210 : vector<8x32xf32>
    %213 = math.exp %212 : vector<8x32xf32>
    %cst_60 = arith.constant 1.000000e+00 : f32
    %214 = vector.broadcast %cst_60 : f32 to vector<8x32xf32>
    %215 = arith.addf %214, %213 : vector<8x32xf32>
    %216 = tpu.reciprocal %215 {approx = true} : vector<8x32xf32> -> vector<8x32xf32>
    %217 = vector.extract_strided_slice %207 {offsets = [0, 32], sizes = [8, 32], strides = [1, 1]} : vector<8x96xf32> to vector<8x32xf32>
    %218 = vector.extract_strided_slice %204 {offsets = [0, 32], sizes = [8, 32], strides = [1, 1]} : vector<8x96xf32> to vector<8x32xf32>
    %219 = arith.addf %217, %218 : vector<8x32xf32>
    %cst_61 = arith.constant 0.000000e+00 : f32
    %220 = vector.broadcast %cst_61 : f32 to vector<8x32xf32>
    %221 = arith.subf %220, %219 : vector<8x32xf32>
    %222 = math.exp %221 : vector<8x32xf32>
    %cst_62 = arith.constant 1.000000e+00 : f32
    %223 = vector.broadcast %cst_62 : f32 to vector<8x32xf32>
    %224 = arith.addf %223, %222 : vector<8x32xf32>
    %225 = tpu.reciprocal %224 {approx = true} : vector<8x32xf32> -> vector<8x32xf32>
    %226 = vector.extract_strided_slice %207 {offsets = [0, 64], sizes = [8, 32], strides = [1, 1]} : vector<8x96xf32> to vector<8x32xf32>
    %227 = vector.extract_strided_slice %204 {offsets = [0, 64], sizes = [8, 32], strides = [1, 1]} : vector<8x96xf32> to vector<8x32xf32>
    %228 = arith.mulf %216, %227 : vector<8x32xf32>
    %229 = arith.addf %226, %228 : vector<8x32xf32>
    %230 = math.tanh %229 : vector<8x32xf32>
    %cst_63 = arith.constant 1.000000e+00 : f32
    %231 = vector.broadcast %cst_63 : f32 to vector<8x32xf32>
    %232 = arith.subf %231, %225 : vector<8x32xf32>
    %233 = arith.mulf %232, %230 : vector<8x32xf32>
    %234 = arith.mulf %225, %196 : vector<8x32xf32>
    %235 = arith.addf %233, %234 : vector<8x32xf32>
    %236 = arith.index_cast %c5_i32 : i32 to index
    %c0_64 = arith.constant 0 : index
    %c0_65 = arith.constant 0 : index
    %237 = vector.load %arg8[%236, %c0_64, %c0_65] : memref<8x8x32xf32, #tpu.memory_space<vmem>>, vector<1x8x32xf32>
    %238 = vector.shape_cast %237 : vector<1x8x32xf32> to vector<8x32xf32>
    %239 = vector.shape_cast %235 : vector<8x32xf32> to vector<1x8x32xf32>
    tpu.vector_store %arg8[%236, %c0_64, %c0_65], %239 {strides = array<i32>} : memref<8x8x32xf32, #tpu.memory_space<vmem>>, vector<1x8x32xf32>,
    %c6_i32 = arith.constant 6 : i32
    %240 = arith.truncf %235 : vector<8x32xf32> to vector<8x32xbf16>
    %cst_66 = arith.constant dense<0.000000e+00> : vector<8x96xf32>
    %241 = tpu.matmul %240, %3, %cst_66 {dimension_numbers = #tpu.dot_dimension_numbers<[1], [0], [0], [1], [0, 0, 1, 1], [], []>} : vector<8x32xbf16>, vector<32x96xbf16>, vector<8x96xf32> -> vector<8x96xf32>
    %242 = vector.broadcast %4 : vector<1x96xf32> to vector<8x96xf32>
    %243 = arith.addf %241, %242 : vector<8x96xf32>
    %244 = arith.index_cast %c6_i32 : i32 to index
    %c0_67 = arith.constant 0 : index
    %c0_68 = arith.constant 0 : index
    %245 = vector.load %arg1[%244, %c0_67, %c0_68] : memref<8x8x96xf32, #tpu.memory_space<vmem>>, vector<1x8x96xf32>
    %246 = vector.shape_cast %245 : vector<1x8x96xf32> to vector<8x96xf32>
    %247 = vector.extract_strided_slice %246 {offsets = [0, 0], sizes = [8, 32], strides = [1, 1]} : vector<8x96xf32> to vector<8x32xf32>
    %248 = vector.extract_strided_slice %243 {offsets = [0, 0], sizes = [8, 32], strides = [1, 1]} : vector<8x96xf32> to vector<8x32xf32>
    %249 = arith.addf %247, %248 : vector<8x32xf32>
    %cst_69 = arith.constant 0.000000e+00 : f32
    %250 = vector.broadcast %cst_69 : f32 to vector<8x32xf32>
    %251 = arith.subf %250, %249 : vector<8x32xf32>
    %252 = math.exp %251 : vector<8x32xf32>
    %cst_70 = arith.constant 1.000000e+00 : f32
    %253 = vector.broadcast %cst_70 : f32 to vector<8x32xf32>
    %254 = arith.addf %253, %252 : vector<8x32xf32>
    %255 = tpu.reciprocal %254 {approx = true} : vector<8x32xf32> -> vector<8x32xf32>
    %256 = vector.extract_strided_slice %246 {offsets = [0, 32], sizes = [8, 32], strides = [1, 1]} : vector<8x96xf32> to vector<8x32xf32>
    %257 = vector.extract_strided_slice %243 {offsets = [0, 32], sizes = [8, 32], strides = [1, 1]} : vector<8x96xf32> to vector<8x32xf32>
    %258 = arith.addf %256, %257 : vector<8x32xf32>
    %cst_71 = arith.constant 0.000000e+00 : f32
    %259 = vector.broadcast %cst_71 : f32 to vector<8x32xf32>
    %260 = arith.subf %259, %258 : vector<8x32xf32>
    %261 = math.exp %260 : vector<8x32xf32>
    %cst_72 = arith.constant 1.000000e+00 : f32
    %262 = vector.broadcast %cst_72 : f32 to vector<8x32xf32>
    %263 = arith.addf %262, %261 : vector<8x32xf32>
    %264 = tpu.reciprocal %263 {approx = true} : vector<8x32xf32> -> vector<8x32xf32>
    %265 = vector.extract_strided_slice %246 {offsets = [0, 64], sizes = [8, 32], strides = [1, 1]} : vector<8x96xf32> to vector<8x32xf32>
    %266 = vector.extract_strided_slice %243 {offsets = [0, 64], sizes = [8, 32], strides = [1, 1]} : vector<8x96xf32> to vector<8x32xf32>
    %267 = arith.mulf %255, %266 : vector<8x32xf32>
    %268 = arith.addf %265, %267 : vector<8x32xf32>
    %269 = math.tanh %268 : vector<8x32xf32>
    %cst_73 = arith.constant 1.000000e+00 : f32
    %270 = vector.broadcast %cst_73 : f32 to vector<8x32xf32>
    %271 = arith.subf %270, %264 : vector<8x32xf32>
    %272 = arith.mulf %271, %269 : vector<8x32xf32>
    %273 = arith.mulf %264, %235 : vector<8x32xf32>
    %274 = arith.addf %272, %273 : vector<8x32xf32>
    %275 = arith.index_cast %c6_i32 : i32 to index
    %c0_74 = arith.constant 0 : index
    %c0_75 = arith.constant 0 : index
    %276 = vector.load %arg8[%275, %c0_74, %c0_75] : memref<8x8x32xf32, #tpu.memory_space<vmem>>, vector<1x8x32xf32>
    %277 = vector.shape_cast %276 : vector<1x8x32xf32> to vector<8x32xf32>
    %278 = vector.shape_cast %274 : vector<8x32xf32> to vector<1x8x32xf32>
    tpu.vector_store %arg8[%275, %c0_74, %c0_75], %278 {strides = array<i32>} : memref<8x8x32xf32, #tpu.memory_space<vmem>>, vector<1x8x32xf32>,
    %c7_i32 = arith.constant 7 : i32
    %279 = arith.truncf %274 : vector<8x32xf32> to vector<8x32xbf16>
    %cst_76 = arith.constant dense<0.000000e+00> : vector<8x96xf32>
    %280 = tpu.matmul %279, %3, %cst_76 {dimension_numbers = #tpu.dot_dimension_numbers<[1], [0], [0], [1], [0, 0, 1, 1], [], []>} : vector<8x32xbf16>, vector<32x96xbf16>, vector<8x96xf32> -> vector<8x96xf32>
    %281 = vector.broadcast %4 : vector<1x96xf32> to vector<8x96xf32>
    %282 = arith.addf %280, %281 : vector<8x96xf32>
    %283 = arith.index_cast %c7_i32 : i32 to index
    %c0_77 = arith.constant 0 : index
    %c0_78 = arith.constant 0 : index
    %284 = vector.load %arg1[%283, %c0_77, %c0_78] : memref<8x8x96xf32, #tpu.memory_space<vmem>>, vector<1x8x96xf32>
    %285 = vector.shape_cast %284 : vector<1x8x96xf32> to vector<8x96xf32>
    %286 = vector.extract_strided_slice %285 {offsets = [0, 0], sizes = [8, 32], strides = [1, 1]} : vector<8x96xf32> to vector<8x32xf32>
    %287 = vector.extract_strided_slice %282 {offsets = [0, 0], sizes = [8, 32], strides = [1, 1]} : vector<8x96xf32> to vector<8x32xf32>
    %288 = arith.addf %286, %287 : vector<8x32xf32>
    %cst_79 = arith.constant 0.000000e+00 : f32
    %289 = vector.broadcast %cst_79 : f32 to vector<8x32xf32>
    %290 = arith.subf %289, %288 : vector<8x32xf32>
    %291 = math.exp %290 : vector<8x32xf32>
    %cst_80 = arith.constant 1.000000e+00 : f32
    %292 = vector.broadcast %cst_80 : f32 to vector<8x32xf32>
    %293 = arith.addf %292, %291 : vector<8x32xf32>
    %294 = tpu.reciprocal %293 {approx = true} : vector<8x32xf32> -> vector<8x32xf32>
    %295 = vector.extract_strided_slice %285 {offsets = [0, 32], sizes = [8, 32], strides = [1, 1]} : vector<8x96xf32> to vector<8x32xf32>
    %296 = vector.extract_strided_slice %282 {offsets = [0, 32], sizes = [8, 32], strides = [1, 1]} : vector<8x96xf32> to vector<8x32xf32>
    %297 = arith.addf %295, %296 : vector<8x32xf32>
    %cst_81 = arith.constant 0.000000e+00 : f32
    %298 = vector.broadcast %cst_81 : f32 to vector<8x32xf32>
    %299 = arith.subf %298, %297 : vector<8x32xf32>
    %300 = math.exp %299 : vector<8x32xf32>
    %cst_82 = arith.constant 1.000000e+00 : f32
    %301 = vector.broadcast %cst_82 : f32 to vector<8x32xf32>
    %302 = arith.addf %301, %300 : vector<8x32xf32>
    %303 = tpu.reciprocal %302 {approx = true} : vector<8x32xf32> -> vector<8x32xf32>
    %304 = vector.extract_strided_slice %285 {offsets = [0, 64], sizes = [8, 32], strides = [1, 1]} : vector<8x96xf32> to vector<8x32xf32>
    %305 = vector.extract_strided_slice %282 {offsets = [0, 64], sizes = [8, 32], strides = [1, 1]} : vector<8x96xf32> to vector<8x32xf32>
    %306 = arith.mulf %294, %305 : vector<8x32xf32>
    %307 = arith.addf %304, %306 : vector<8x32xf32>
    %308 = math.tanh %307 : vector<8x32xf32>
    %cst_83 = arith.constant 1.000000e+00 : f32
    %309 = vector.broadcast %cst_83 : f32 to vector<8x32xf32>
    %310 = arith.subf %309, %303 : vector<8x32xf32>
    %311 = arith.mulf %310, %308 : vector<8x32xf32>
    %312 = arith.mulf %303, %274 : vector<8x32xf32>
    %313 = arith.addf %311, %312 : vector<8x32xf32>
    %314 = arith.index_cast %c7_i32 : i32 to index
    %c0_84 = arith.constant 0 : index
    %c0_85 = arith.constant 0 : index
    %315 = vector.load %arg8[%314, %c0_84, %c0_85] : memref<8x8x32xf32, #tpu.memory_space<vmem>>, vector<1x8x32xf32>
    %316 = vector.shape_cast %315 : vector<1x8x32xf32> to vector<8x32xf32>
    %317 = vector.shape_cast %313 : vector<8x32xf32> to vector<1x8x32xf32>
    tpu.vector_store %arg8[%314, %c0_84, %c0_85], %317 {strides = array<i32>} : memref<8x8x32xf32, #tpu.memory_space<vmem>>, vector<1x8x32xf32>,
    %c8_i32 = arith.constant 8 : i32
    %c0_86 = arith.constant 0 : index
    %c0_87 = arith.constant 0 : index
    %318 = vector.load %arg7[%c0_86, %c0_87] : memref<8x32xf32, #tpu.memory_space<vmem>>, vector<8x32xf32>
    tpu.vector_store %arg7[%c0_86, %c0_87], %313 {strides = array<i32>} : memref<8x32xf32, #tpu.memory_space<vmem>>, vector<8x32xf32>,
    %c0_88 = arith.constant 0 : index
    %c0_89 = arith.constant 0 : index
    %c0_90 = arith.constant 0 : index
    %319 = vector.load %arg8[%c0_88, %c0_89, %c0_90] : memref<8x8x32xf32, #tpu.memory_space<vmem>>, vector<8x8x32xf32>
    %320 = vector.shape_cast %319 : vector<8x8x32xf32> to vector<64x32xf32>
    %321 = arith.truncf %320 : vector<64x32xf32> to vector<64x32xbf16>
    %c0_91 = arith.constant 0 : index
    %c0_92 = arith.constant 0 : index
    %322 = vector.load %arg4[%c0_91, %c0_92] : memref<32x96xbf16, #tpu.memory_space<vmem>>, vector<32x96xbf16>
    %cst_93 = arith.constant dense<0.000000e+00> : vector<64x96xf32>
    %323 = tpu.matmul %321, %322, %cst_93 {dimension_numbers = #tpu.dot_dimension_numbers<[1], [0], [0], [1], [0, 0, 1, 1], [], []>} : vector<64x32xbf16>, vector<32x96xbf16>, vector<64x96xf32> -> vector<64x96xf32>
    %c0_94 = arith.constant 0 : index
    %c0_95 = arith.constant 0 : index
    %324 = vector.load %arg5[%c0_94, %c0_95] : memref<1x96xf32, #tpu.memory_space<vmem>>, vector<1x96xf32>
    %325 = vector.broadcast %324 : vector<1x96xf32> to vector<64x96xf32>
    %326 = arith.addf %323, %325 : vector<64x96xf32>
    %327 = vector.shape_cast %326 : vector<64x96xf32> to vector<8x8x96xf32>
    %c0_96 = arith.constant 0 : index
    %c0_97 = arith.constant 0 : index
    %c0_98 = arith.constant 0 : index
    %328 = vector.load %arg6[%c0_96, %c0_97, %c0_98] : memref<8x8x96xf32, #tpu.memory_space<vmem>>, vector<8x8x96xf32>
    tpu.vector_store %arg6[%c0_96, %c0_97, %c0_98], %327 {strides = array<i32>} : memref<8x8x96xf32, #tpu.memory_space<vmem>>, vector<8x8x96xf32>,
    return
  }
  func.func @transform_0(%arg0: i32) -> (i32, i32, i32) {
    %c0_i32 = arith.constant 0 : i32
    %c0_i32_0 = arith.constant 0 : i32
    %c0_i32_1 = arith.constant 0 : i32
    return %arg0, %c0_i32, %c0_i32_0 : i32, i32, i32
  }
  func.func @transform_1(%arg0: i32) -> (i32, i32) {
    %c0_i32 = arith.constant 0 : i32
    %c0_i32_0 = arith.constant 0 : i32
    %c0_i32_1 = arith.constant 0 : i32
    return %c0_i32, %c0_i32_0 : i32, i32
  }
  func.func @transform_2(%arg0: i32) -> (i32, i32) {
    %c0_i32 = arith.constant 0 : i32
    %c0_i32_0 = arith.constant 0 : i32
    %c0_i32_1 = arith.constant 0 : i32
    return %c0_i32, %c0_i32_0 : i32, i32
  }
  func.func @transform_3(%arg0: i32) -> (i32, i32) {
    %c0_i32 = arith.constant 0 : i32
    %c0_i32_0 = arith.constant 0 : i32
    %c0_i32_1 = arith.constant 0 : i32
    return %c0_i32, %c0_i32_0 : i32, i32
  }
  func.func @transform_4(%arg0: i32) -> (i32, i32) {
    %c0_i32 = arith.constant 0 : i32
    %c0_i32_0 = arith.constant 0 : i32
    %c0_i32_1 = arith.constant 0 : i32
    return %c0_i32, %c0_i32_0 : i32, i32
  }
  func.func @transform_5(%arg0: i32) -> (i32, i32, i32) {
    %c0_i32 = arith.constant 0 : i32
    %c0_i32_0 = arith.constant 0 : i32
    %c0_i32_1 = arith.constant 0 : i32
    return %arg0, %c0_i32, %c0_i32_0 : i32, i32, i32
  }
}

module attributes {stable_mosaic.version = 11 : i64} {
  func.func @_conv_pool_out_kernel(%arg0: i32, %arg1: memref<1x16x128xf32, #tpu.memory_space<vmem>>, %arg2: memref<4x36xf32, #tpu.memory_space<smem>>, %arg3: memref<4xf32, #tpu.memory_space<smem>>, %arg4: memref<4x32x128xbf16, #tpu.memory_space<vmem>>, %arg5: memref<1x128xf32, #tpu.memory_space<vmem>>, %arg6: memref<1x8x128xf32, #tpu.memory_space<vmem>>, %arg7: memref<1x8x128xf32, #tpu.memory_space<vmem>>) attributes {dimension_semantics = [#tpu.dimension_semantics<parallel>], iteration_bounds = array<i64: 2>, scalar_prefetch = 0 : i64, scratch_operands = 0 : i64, tpu.core_type = #tpu.core_type<tc>, window_params = [{transform_indices = @transform_0, window_bounds = array<i64: 1, 16, 128>}, {transform_indices = @transform_1, window_bounds = array<i64: 4, 36>}, {transform_indices = @transform_2, window_bounds = array<i64: 4>}, {pipeline_mode = #tpu.pipeline_mode<synchronous>, transform_indices = @transform_3, window_bounds = array<i64: 4, 32, 128>}, {pipeline_mode = #tpu.pipeline_mode<synchronous>, transform_indices = @transform_4, window_bounds = array<i64: 1, 128>}, {transform_indices = @transform_5, window_bounds = array<i64: 1, 8, 128>}, {transform_indices = @transform_6, window_bounds = array<i64: 1, 8, 128>}]} {
    %c0 = arith.constant 0 : index
    %c0_0 = arith.constant 0 : index
    %c0_1 = arith.constant 0 : index
    %0 = vector.load %arg1[%c0, %c0_0, %c0_1] : memref<1x16x128xf32, #tpu.memory_space<vmem>>, vector<1x16x128xf32>
    %1 = vector.shape_cast %0 : vector<1x16x128xf32> to vector<16x128xf32>
    %2 = vector.extract_strided_slice %1 {offsets = [0, 0], sizes = [10, 128], strides = [1, 1]} : vector<16x128xf32> to vector<10x128xf32>
    %3 = vector.extract_strided_slice %1 {offsets = [1, 0], sizes = [10, 128], strides = [1, 1]} : vector<16x128xf32> to vector<10x128xf32>
    %4 = vector.extract_strided_slice %1 {offsets = [2, 0], sizes = [10, 128], strides = [1, 1]} : vector<16x128xf32> to vector<10x128xf32>
    %5 = vector.extract_strided_slice %1 {offsets = [3, 0], sizes = [10, 128], strides = [1, 1]} : vector<16x128xf32> to vector<10x128xf32>
    %6 = vector.extract_strided_slice %1 {offsets = [4, 0], sizes = [10, 128], strides = [1, 1]} : vector<16x128xf32> to vector<10x128xf32>
    %7 = vector.extract_strided_slice %1 {offsets = [5, 0], sizes = [10, 128], strides = [1, 1]} : vector<16x128xf32> to vector<10x128xf32>
    %8 = tpu.iota {dimensions = array<i32: 0>} : vector<10x34xi32>
    %9 = tpu.iota {dimensions = array<i32: 1>} : vector<10x34xi32>
    %c1_i32 = arith.constant 1 : i32
    %10 = vector.broadcast %c1_i32 : i32 to vector<10x34xi32>
    %11 = arith.cmpi sge, %8, %10 : vector<10x34xi32>
    %c8_i32 = arith.constant 8 : i32
    %12 = vector.broadcast %c8_i32 : i32 to vector<10x34xi32>
    %13 = arith.cmpi sle, %8, %12 : vector<10x34xi32>
    %14 = arith.andi %11, %13 : vector<10x34xi1>
    %c1_i32_2 = arith.constant 1 : i32
    %15 = vector.broadcast %c1_i32_2 : i32 to vector<10x34xi32>
    %16 = arith.cmpi sge, %9, %15 : vector<10x34xi32>
    %17 = arith.andi %14, %16 : vector<10x34xi1>
    %c32_i32 = arith.constant 32 : i32
    %18 = vector.broadcast %c32_i32 : i32 to vector<10x34xi32>
    %19 = arith.cmpi sle, %9, %18 : vector<10x34xi32>
    %20 = arith.andi %17, %19 : vector<10x34xi1>
    %cst = arith.constant 0.000000e+00 : f32
    %21 = vector.broadcast %cst : f32 to vector<8x128xf32>
    %cst_3 = arith.constant 0.000000e+00 : f32
    %22 = vector.broadcast %cst_3 : f32 to vector<10x34xf32>
    %c0_4 = arith.constant 0 : index
    %c0_5 = arith.constant 0 : index
    %23 = memref.load %arg2[%c0_4, %c0_5] : memref<4x36xf32, #tpu.memory_space<smem>>
    %24 = vector.extract_strided_slice %2 {offsets = [0, 0], sizes = [10, 34], strides = [1, 1]} : vector<10x128xf32> to vector<10x34xf32>
    %25 = vector.broadcast %23 : f32 to vector<10x34xf32>
    %26 = arith.mulf %25, %24 : vector<10x34xf32>
    %27 = arith.addf %22, %26 : vector<10x34xf32>
    %c0_6 = arith.constant 0 : index
    %c1 = arith.constant 1 : index
    %28 = memref.load %arg2[%c0_6, %c1] : memref<4x36xf32, #tpu.memory_space<smem>>
    %29 = vector.extract_strided_slice %2 {offsets = [0, 1], sizes = [10, 34], strides = [1, 1]} : vector<10x128xf32> to vector<10x34xf32>
    %30 = vector.broadcast %28 : f32 to vector<10x34xf32>
    %31 = arith.mulf %30, %29 : vector<10x34xf32>
    %32 = arith.addf %27, %31 : vector<10x34xf32>
    %c0_7 = arith.constant 0 : index
    %c2 = arith.constant 2 : index
    %33 = memref.load %arg2[%c0_7, %c2] : memref<4x36xf32, #tpu.memory_space<smem>>
    %34 = vector.extract_strided_slice %2 {offsets = [0, 2], sizes = [10, 34], strides = [1, 1]} : vector<10x128xf32> to vector<10x34xf32>
    %35 = vector.broadcast %33 : f32 to vector<10x34xf32>
    %36 = arith.mulf %35, %34 : vector<10x34xf32>
    %37 = arith.addf %32, %36 : vector<10x34xf32>
    %c0_8 = arith.constant 0 : index
    %c3 = arith.constant 3 : index
    %38 = memref.load %arg2[%c0_8, %c3] : memref<4x36xf32, #tpu.memory_space<smem>>
    %39 = vector.extract_strided_slice %2 {offsets = [0, 3], sizes = [10, 34], strides = [1, 1]} : vector<10x128xf32> to vector<10x34xf32>
    %40 = vector.broadcast %38 : f32 to vector<10x34xf32>
    %41 = arith.mulf %40, %39 : vector<10x34xf32>
    %42 = arith.addf %37, %41 : vector<10x34xf32>
    %c0_9 = arith.constant 0 : index
    %c4 = arith.constant 4 : index
    %43 = memref.load %arg2[%c0_9, %c4] : memref<4x36xf32, #tpu.memory_space<smem>>
    %44 = vector.extract_strided_slice %2 {offsets = [0, 4], sizes = [10, 34], strides = [1, 1]} : vector<10x128xf32> to vector<10x34xf32>
    %45 = vector.broadcast %43 : f32 to vector<10x34xf32>
    %46 = arith.mulf %45, %44 : vector<10x34xf32>
    %47 = arith.addf %42, %46 : vector<10x34xf32>
    %c0_10 = arith.constant 0 : index
    %c5 = arith.constant 5 : index
    %48 = memref.load %arg2[%c0_10, %c5] : memref<4x36xf32, #tpu.memory_space<smem>>
    %49 = vector.extract_strided_slice %2 {offsets = [0, 5], sizes = [10, 34], strides = [1, 1]} : vector<10x128xf32> to vector<10x34xf32>
    %50 = vector.broadcast %48 : f32 to vector<10x34xf32>
    %51 = arith.mulf %50, %49 : vector<10x34xf32>
    %52 = arith.addf %47, %51 : vector<10x34xf32>
    %c0_11 = arith.constant 0 : index
    %c6 = arith.constant 6 : index
    %53 = memref.load %arg2[%c0_11, %c6] : memref<4x36xf32, #tpu.memory_space<smem>>
    %54 = vector.extract_strided_slice %3 {offsets = [0, 0], sizes = [10, 34], strides = [1, 1]} : vector<10x128xf32> to vector<10x34xf32>
    %55 = vector.broadcast %53 : f32 to vector<10x34xf32>
    %56 = arith.mulf %55, %54 : vector<10x34xf32>
    %57 = arith.addf %52, %56 : vector<10x34xf32>
    %c0_12 = arith.constant 0 : index
    %c7 = arith.constant 7 : index
    %58 = memref.load %arg2[%c0_12, %c7] : memref<4x36xf32, #tpu.memory_space<smem>>
    %59 = vector.extract_strided_slice %3 {offsets = [0, 1], sizes = [10, 34], strides = [1, 1]} : vector<10x128xf32> to vector<10x34xf32>
    %60 = vector.broadcast %58 : f32 to vector<10x34xf32>
    %61 = arith.mulf %60, %59 : vector<10x34xf32>
    %62 = arith.addf %57, %61 : vector<10x34xf32>
    %c0_13 = arith.constant 0 : index
    %c8 = arith.constant 8 : index
    %63 = memref.load %arg2[%c0_13, %c8] : memref<4x36xf32, #tpu.memory_space<smem>>
    %64 = vector.extract_strided_slice %3 {offsets = [0, 2], sizes = [10, 34], strides = [1, 1]} : vector<10x128xf32> to vector<10x34xf32>
    %65 = vector.broadcast %63 : f32 to vector<10x34xf32>
    %66 = arith.mulf %65, %64 : vector<10x34xf32>
    %67 = arith.addf %62, %66 : vector<10x34xf32>
    %c0_14 = arith.constant 0 : index
    %c9 = arith.constant 9 : index
    %68 = memref.load %arg2[%c0_14, %c9] : memref<4x36xf32, #tpu.memory_space<smem>>
    %69 = vector.extract_strided_slice %3 {offsets = [0, 3], sizes = [10, 34], strides = [1, 1]} : vector<10x128xf32> to vector<10x34xf32>
    %70 = vector.broadcast %68 : f32 to vector<10x34xf32>
    %71 = arith.mulf %70, %69 : vector<10x34xf32>
    %72 = arith.addf %67, %71 : vector<10x34xf32>
    %c0_15 = arith.constant 0 : index
    %c10 = arith.constant 10 : index
    %73 = memref.load %arg2[%c0_15, %c10] : memref<4x36xf32, #tpu.memory_space<smem>>
    %74 = vector.extract_strided_slice %3 {offsets = [0, 4], sizes = [10, 34], strides = [1, 1]} : vector<10x128xf32> to vector<10x34xf32>
    %75 = vector.broadcast %73 : f32 to vector<10x34xf32>
    %76 = arith.mulf %75, %74 : vector<10x34xf32>
    %77 = arith.addf %72, %76 : vector<10x34xf32>
    %c0_16 = arith.constant 0 : index
    %c11 = arith.constant 11 : index
    %78 = memref.load %arg2[%c0_16, %c11] : memref<4x36xf32, #tpu.memory_space<smem>>
    %79 = vector.extract_strided_slice %3 {offsets = [0, 5], sizes = [10, 34], strides = [1, 1]} : vector<10x128xf32> to vector<10x34xf32>
    %80 = vector.broadcast %78 : f32 to vector<10x34xf32>
    %81 = arith.mulf %80, %79 : vector<10x34xf32>
    %82 = arith.addf %77, %81 : vector<10x34xf32>
    %c0_17 = arith.constant 0 : index
    %c12 = arith.constant 12 : index
    %83 = memref.load %arg2[%c0_17, %c12] : memref<4x36xf32, #tpu.memory_space<smem>>
    %84 = vector.extract_strided_slice %4 {offsets = [0, 0], sizes = [10, 34], strides = [1, 1]} : vector<10x128xf32> to vector<10x34xf32>
    %85 = vector.broadcast %83 : f32 to vector<10x34xf32>
    %86 = arith.mulf %85, %84 : vector<10x34xf32>
    %87 = arith.addf %82, %86 : vector<10x34xf32>
    %c0_18 = arith.constant 0 : index
    %c13 = arith.constant 13 : index
    %88 = memref.load %arg2[%c0_18, %c13] : memref<4x36xf32, #tpu.memory_space<smem>>
    %89 = vector.extract_strided_slice %4 {offsets = [0, 1], sizes = [10, 34], strides = [1, 1]} : vector<10x128xf32> to vector<10x34xf32>
    %90 = vector.broadcast %88 : f32 to vector<10x34xf32>
    %91 = arith.mulf %90, %89 : vector<10x34xf32>
    %92 = arith.addf %87, %91 : vector<10x34xf32>
    %c0_19 = arith.constant 0 : index
    %c14 = arith.constant 14 : index
    %93 = memref.load %arg2[%c0_19, %c14] : memref<4x36xf32, #tpu.memory_space<smem>>
    %94 = vector.extract_strided_slice %4 {offsets = [0, 2], sizes = [10, 34], strides = [1, 1]} : vector<10x128xf32> to vector<10x34xf32>
    %95 = vector.broadcast %93 : f32 to vector<10x34xf32>
    %96 = arith.mulf %95, %94 : vector<10x34xf32>
    %97 = arith.addf %92, %96 : vector<10x34xf32>
    %c0_20 = arith.constant 0 : index
    %c15 = arith.constant 15 : index
    %98 = memref.load %arg2[%c0_20, %c15] : memref<4x36xf32, #tpu.memory_space<smem>>
    %99 = vector.extract_strided_slice %4 {offsets = [0, 3], sizes = [10, 34], strides = [1, 1]} : vector<10x128xf32> to vector<10x34xf32>
    %100 = vector.broadcast %98 : f32 to vector<10x34xf32>
    %101 = arith.mulf %100, %99 : vector<10x34xf32>
    %102 = arith.addf %97, %101 : vector<10x34xf32>
    %c0_21 = arith.constant 0 : index
    %c16 = arith.constant 16 : index
    %103 = memref.load %arg2[%c0_21, %c16] : memref<4x36xf32, #tpu.memory_space<smem>>
    %104 = vector.extract_strided_slice %4 {offsets = [0, 4], sizes = [10, 34], strides = [1, 1]} : vector<10x128xf32> to vector<10x34xf32>
    %105 = vector.broadcast %103 : f32 to vector<10x34xf32>
    %106 = arith.mulf %105, %104 : vector<10x34xf32>
    %107 = arith.addf %102, %106 : vector<10x34xf32>
    %c0_22 = arith.constant 0 : index
    %c17 = arith.constant 17 : index
    %108 = memref.load %arg2[%c0_22, %c17] : memref<4x36xf32, #tpu.memory_space<smem>>
    %109 = vector.extract_strided_slice %4 {offsets = [0, 5], sizes = [10, 34], strides = [1, 1]} : vector<10x128xf32> to vector<10x34xf32>
    %110 = vector.broadcast %108 : f32 to vector<10x34xf32>
    %111 = arith.mulf %110, %109 : vector<10x34xf32>
    %112 = arith.addf %107, %111 : vector<10x34xf32>
    %c0_23 = arith.constant 0 : index
    %c18 = arith.constant 18 : index
    %113 = memref.load %arg2[%c0_23, %c18] : memref<4x36xf32, #tpu.memory_space<smem>>
    %114 = vector.extract_strided_slice %5 {offsets = [0, 0], sizes = [10, 34], strides = [1, 1]} : vector<10x128xf32> to vector<10x34xf32>
    %115 = vector.broadcast %113 : f32 to vector<10x34xf32>
    %116 = arith.mulf %115, %114 : vector<10x34xf32>
    %117 = arith.addf %112, %116 : vector<10x34xf32>
    %c0_24 = arith.constant 0 : index
    %c19 = arith.constant 19 : index
    %118 = memref.load %arg2[%c0_24, %c19] : memref<4x36xf32, #tpu.memory_space<smem>>
    %119 = vector.extract_strided_slice %5 {offsets = [0, 1], sizes = [10, 34], strides = [1, 1]} : vector<10x128xf32> to vector<10x34xf32>
    %120 = vector.broadcast %118 : f32 to vector<10x34xf32>
    %121 = arith.mulf %120, %119 : vector<10x34xf32>
    %122 = arith.addf %117, %121 : vector<10x34xf32>
    %c0_25 = arith.constant 0 : index
    %c20 = arith.constant 20 : index
    %123 = memref.load %arg2[%c0_25, %c20] : memref<4x36xf32, #tpu.memory_space<smem>>
    %124 = vector.extract_strided_slice %5 {offsets = [0, 2], sizes = [10, 34], strides = [1, 1]} : vector<10x128xf32> to vector<10x34xf32>
    %125 = vector.broadcast %123 : f32 to vector<10x34xf32>
    %126 = arith.mulf %125, %124 : vector<10x34xf32>
    %127 = arith.addf %122, %126 : vector<10x34xf32>
    %c0_26 = arith.constant 0 : index
    %c21 = arith.constant 21 : index
    %128 = memref.load %arg2[%c0_26, %c21] : memref<4x36xf32, #tpu.memory_space<smem>>
    %129 = vector.extract_strided_slice %5 {offsets = [0, 3], sizes = [10, 34], strides = [1, 1]} : vector<10x128xf32> to vector<10x34xf32>
    %130 = vector.broadcast %128 : f32 to vector<10x34xf32>
    %131 = arith.mulf %130, %129 : vector<10x34xf32>
    %132 = arith.addf %127, %131 : vector<10x34xf32>
    %c0_27 = arith.constant 0 : index
    %c22 = arith.constant 22 : index
    %133 = memref.load %arg2[%c0_27, %c22] : memref<4x36xf32, #tpu.memory_space<smem>>
    %134 = vector.extract_strided_slice %5 {offsets = [0, 4], sizes = [10, 34], strides = [1, 1]} : vector<10x128xf32> to vector<10x34xf32>
    %135 = vector.broadcast %133 : f32 to vector<10x34xf32>
    %136 = arith.mulf %135, %134 : vector<10x34xf32>
    %137 = arith.addf %132, %136 : vector<10x34xf32>
    %c0_28 = arith.constant 0 : index
    %c23 = arith.constant 23 : index
    %138 = memref.load %arg2[%c0_28, %c23] : memref<4x36xf32, #tpu.memory_space<smem>>
    %139 = vector.extract_strided_slice %5 {offsets = [0, 5], sizes = [10, 34], strides = [1, 1]} : vector<10x128xf32> to vector<10x34xf32>
    %140 = vector.broadcast %138 : f32 to vector<10x34xf32>
    %141 = arith.mulf %140, %139 : vector<10x34xf32>
    %142 = arith.addf %137, %141 : vector<10x34xf32>
    %c0_29 = arith.constant 0 : index
    %c24 = arith.constant 24 : index
    %143 = memref.load %arg2[%c0_29, %c24] : memref<4x36xf32, #tpu.memory_space<smem>>
    %144 = vector.extract_strided_slice %6 {offsets = [0, 0], sizes = [10, 34], strides = [1, 1]} : vector<10x128xf32> to vector<10x34xf32>
    %145 = vector.broadcast %143 : f32 to vector<10x34xf32>
    %146 = arith.mulf %145, %144 : vector<10x34xf32>
    %147 = arith.addf %142, %146 : vector<10x34xf32>
    %c0_30 = arith.constant 0 : index
    %c25 = arith.constant 25 : index
    %148 = memref.load %arg2[%c0_30, %c25] : memref<4x36xf32, #tpu.memory_space<smem>>
    %149 = vector.extract_strided_slice %6 {offsets = [0, 1], sizes = [10, 34], strides = [1, 1]} : vector<10x128xf32> to vector<10x34xf32>
    %150 = vector.broadcast %148 : f32 to vector<10x34xf32>
    %151 = arith.mulf %150, %149 : vector<10x34xf32>
    %152 = arith.addf %147, %151 : vector<10x34xf32>
    %c0_31 = arith.constant 0 : index
    %c26 = arith.constant 26 : index
    %153 = memref.load %arg2[%c0_31, %c26] : memref<4x36xf32, #tpu.memory_space<smem>>
    %154 = vector.extract_strided_slice %6 {offsets = [0, 2], sizes = [10, 34], strides = [1, 1]} : vector<10x128xf32> to vector<10x34xf32>
    %155 = vector.broadcast %153 : f32 to vector<10x34xf32>
    %156 = arith.mulf %155, %154 : vector<10x34xf32>
    %157 = arith.addf %152, %156 : vector<10x34xf32>
    %c0_32 = arith.constant 0 : index
    %c27 = arith.constant 27 : index
    %158 = memref.load %arg2[%c0_32, %c27] : memref<4x36xf32, #tpu.memory_space<smem>>
    %159 = vector.extract_strided_slice %6 {offsets = [0, 3], sizes = [10, 34], strides = [1, 1]} : vector<10x128xf32> to vector<10x34xf32>
    %160 = vector.broadcast %158 : f32 to vector<10x34xf32>
    %161 = arith.mulf %160, %159 : vector<10x34xf32>
    %162 = arith.addf %157, %161 : vector<10x34xf32>
    %c0_33 = arith.constant 0 : index
    %c28 = arith.constant 28 : index
    %163 = memref.load %arg2[%c0_33, %c28] : memref<4x36xf32, #tpu.memory_space<smem>>
    %164 = vector.extract_strided_slice %6 {offsets = [0, 4], sizes = [10, 34], strides = [1, 1]} : vector<10x128xf32> to vector<10x34xf32>
    %165 = vector.broadcast %163 : f32 to vector<10x34xf32>
    %166 = arith.mulf %165, %164 : vector<10x34xf32>
    %167 = arith.addf %162, %166 : vector<10x34xf32>
    %c0_34 = arith.constant 0 : index
    %c29 = arith.constant 29 : index
    %168 = memref.load %arg2[%c0_34, %c29] : memref<4x36xf32, #tpu.memory_space<smem>>
    %169 = vector.extract_strided_slice %6 {offsets = [0, 5], sizes = [10, 34], strides = [1, 1]} : vector<10x128xf32> to vector<10x34xf32>
    %170 = vector.broadcast %168 : f32 to vector<10x34xf32>
    %171 = arith.mulf %170, %169 : vector<10x34xf32>
    %172 = arith.addf %167, %171 : vector<10x34xf32>
    %c0_35 = arith.constant 0 : index
    %c30 = arith.constant 30 : index
    %173 = memref.load %arg2[%c0_35, %c30] : memref<4x36xf32, #tpu.memory_space<smem>>
    %174 = vector.extract_strided_slice %7 {offsets = [0, 0], sizes = [10, 34], strides = [1, 1]} : vector<10x128xf32> to vector<10x34xf32>
    %175 = vector.broadcast %173 : f32 to vector<10x34xf32>
    %176 = arith.mulf %175, %174 : vector<10x34xf32>
    %177 = arith.addf %172, %176 : vector<10x34xf32>
    %c0_36 = arith.constant 0 : index
    %c31 = arith.constant 31 : index
    %178 = memref.load %arg2[%c0_36, %c31] : memref<4x36xf32, #tpu.memory_space<smem>>
    %179 = vector.extract_strided_slice %7 {offsets = [0, 1], sizes = [10, 34], strides = [1, 1]} : vector<10x128xf32> to vector<10x34xf32>
    %180 = vector.broadcast %178 : f32 to vector<10x34xf32>
    %181 = arith.mulf %180, %179 : vector<10x34xf32>
    %182 = arith.addf %177, %181 : vector<10x34xf32>
    %c0_37 = arith.constant 0 : index
    %c32 = arith.constant 32 : index
    %183 = memref.load %arg2[%c0_37, %c32] : memref<4x36xf32, #tpu.memory_space<smem>>
    %184 = vector.extract_strided_slice %7 {offsets = [0, 2], sizes = [10, 34], strides = [1, 1]} : vector<10x128xf32> to vector<10x34xf32>
    %185 = vector.broadcast %183 : f32 to vector<10x34xf32>
    %186 = arith.mulf %185, %184 : vector<10x34xf32>
    %187 = arith.addf %182, %186 : vector<10x34xf32>
    %c0_38 = arith.constant 0 : index
    %c33 = arith.constant 33 : index
    %188 = memref.load %arg2[%c0_38, %c33] : memref<4x36xf32, #tpu.memory_space<smem>>
    %189 = vector.extract_strided_slice %7 {offsets = [0, 3], sizes = [10, 34], strides = [1, 1]} : vector<10x128xf32> to vector<10x34xf32>
    %190 = vector.broadcast %188 : f32 to vector<10x34xf32>
    %191 = arith.mulf %190, %189 : vector<10x34xf32>
    %192 = arith.addf %187, %191 : vector<10x34xf32>
    %c0_39 = arith.constant 0 : index
    %c34 = arith.constant 34 : index
    %193 = memref.load %arg2[%c0_39, %c34] : memref<4x36xf32, #tpu.memory_space<smem>>
    %194 = vector.extract_strided_slice %7 {offsets = [0, 4], sizes = [10, 34], strides = [1, 1]} : vector<10x128xf32> to vector<10x34xf32>
    %195 = vector.broadcast %193 : f32 to vector<10x34xf32>
    %196 = arith.mulf %195, %194 : vector<10x34xf32>
    %197 = arith.addf %192, %196 : vector<10x34xf32>
    %c0_40 = arith.constant 0 : index
    %c35 = arith.constant 35 : index
    %198 = memref.load %arg2[%c0_40, %c35] : memref<4x36xf32, #tpu.memory_space<smem>>
    %199 = vector.extract_strided_slice %7 {offsets = [0, 5], sizes = [10, 34], strides = [1, 1]} : vector<10x128xf32> to vector<10x34xf32>
    %200 = vector.broadcast %198 : f32 to vector<10x34xf32>
    %201 = arith.mulf %200, %199 : vector<10x34xf32>
    %202 = arith.addf %197, %201 : vector<10x34xf32>
    %c0_41 = arith.constant 0 : index
    %203 = memref.load %arg3[%c0_41] : memref<4xf32, #tpu.memory_space<smem>>
    %204 = vector.broadcast %203 : f32 to vector<10x34xf32>
    %205 = arith.addf %202, %204 : vector<10x34xf32>
    %206 = math.tanh %205 : vector<10x34xf32>
    %cst_42 = arith.constant -1.000000e+30 : f32
    %207 = vector.broadcast %cst_42 : f32 to vector<10x34xf32>
    %208 = arith.select %20, %206, %207 : vector<10x34xi1>, vector<10x34xf32>
    %209 = vector.extract_strided_slice %208 {offsets = [0, 0], sizes = [10, 32], strides = [1, 1]} : vector<10x34xf32> to vector<10x32xf32>
    %210 = vector.extract_strided_slice %208 {offsets = [0, 1], sizes = [10, 32], strides = [1, 1]} : vector<10x34xf32> to vector<10x32xf32>
    %211 = arith.maximumf %209, %210 : vector<10x32xf32>
    %212 = vector.extract_strided_slice %208 {offsets = [0, 2], sizes = [10, 32], strides = [1, 1]} : vector<10x34xf32> to vector<10x32xf32>
    %213 = arith.maximumf %211, %212 : vector<10x32xf32>
    %214 = vector.extract_strided_slice %213 {offsets = [0, 0], sizes = [8, 32], strides = [1, 1]} : vector<10x32xf32> to vector<8x32xf32>
    %215 = vector.extract_strided_slice %213 {offsets = [1, 0], sizes = [8, 32], strides = [1, 1]} : vector<10x32xf32> to vector<8x32xf32>
    %216 = arith.maximumf %214, %215 : vector<8x32xf32>
    %217 = vector.extract_strided_slice %213 {offsets = [2, 0], sizes = [8, 32], strides = [1, 1]} : vector<10x32xf32> to vector<8x32xf32>
    %218 = arith.maximumf %216, %217 : vector<8x32xf32>
    %219 = arith.truncf %218 : vector<8x32xf32> to vector<8x32xbf16>
    %c0_43 = arith.constant 0 : index
    %c0_44 = arith.constant 0 : index
    %c0_45 = arith.constant 0 : index
    %220 = vector.load %arg4[%c0_43, %c0_44, %c0_45] : memref<4x32x128xbf16, #tpu.memory_space<vmem>>, vector<1x32x128xbf16>
    %221 = vector.shape_cast %220 : vector<1x32x128xbf16> to vector<32x128xbf16>
    %cst_46 = arith.constant dense<0.000000e+00> : vector<8x128xf32>
    %222 = tpu.matmul %219, %221, %cst_46 {dimension_numbers = #tpu.dot_dimension_numbers<[1], [0], [0], [1], [0, 0, 1, 1], [], []>} : vector<8x32xbf16>, vector<32x128xbf16>, vector<8x128xf32> -> vector<8x128xf32>
    %223 = arith.addf %21, %222 : vector<8x128xf32>
    %cst_47 = arith.constant 0.000000e+00 : f32
    %224 = vector.broadcast %cst_47 : f32 to vector<10x34xf32>
    %c1_48 = arith.constant 1 : index
    %c0_49 = arith.constant 0 : index
    %225 = memref.load %arg2[%c1_48, %c0_49] : memref<4x36xf32, #tpu.memory_space<smem>>
    %226 = vector.extract_strided_slice %2 {offsets = [0, 0], sizes = [10, 34], strides = [1, 1]} : vector<10x128xf32> to vector<10x34xf32>
    %227 = vector.broadcast %225 : f32 to vector<10x34xf32>
    %228 = arith.mulf %227, %226 : vector<10x34xf32>
    %229 = arith.addf %224, %228 : vector<10x34xf32>
    %c1_50 = arith.constant 1 : index
    %c1_51 = arith.constant 1 : index
    %230 = memref.load %arg2[%c1_50, %c1_51] : memref<4x36xf32, #tpu.memory_space<smem>>
    %231 = vector.extract_strided_slice %2 {offsets = [0, 1], sizes = [10, 34], strides = [1, 1]} : vector<10x128xf32> to vector<10x34xf32>
    %232 = vector.broadcast %230 : f32 to vector<10x34xf32>
    %233 = arith.mulf %232, %231 : vector<10x34xf32>
    %234 = arith.addf %229, %233 : vector<10x34xf32>
    %c1_52 = arith.constant 1 : index
    %c2_53 = arith.constant 2 : index
    %235 = memref.load %arg2[%c1_52, %c2_53] : memref<4x36xf32, #tpu.memory_space<smem>>
    %236 = vector.extract_strided_slice %2 {offsets = [0, 2], sizes = [10, 34], strides = [1, 1]} : vector<10x128xf32> to vector<10x34xf32>
    %237 = vector.broadcast %235 : f32 to vector<10x34xf32>
    %238 = arith.mulf %237, %236 : vector<10x34xf32>
    %239 = arith.addf %234, %238 : vector<10x34xf32>
    %c1_54 = arith.constant 1 : index
    %c3_55 = arith.constant 3 : index
    %240 = memref.load %arg2[%c1_54, %c3_55] : memref<4x36xf32, #tpu.memory_space<smem>>
    %241 = vector.extract_strided_slice %2 {offsets = [0, 3], sizes = [10, 34], strides = [1, 1]} : vector<10x128xf32> to vector<10x34xf32>
    %242 = vector.broadcast %240 : f32 to vector<10x34xf32>
    %243 = arith.mulf %242, %241 : vector<10x34xf32>
    %244 = arith.addf %239, %243 : vector<10x34xf32>
    %c1_56 = arith.constant 1 : index
    %c4_57 = arith.constant 4 : index
    %245 = memref.load %arg2[%c1_56, %c4_57] : memref<4x36xf32, #tpu.memory_space<smem>>
    %246 = vector.extract_strided_slice %2 {offsets = [0, 4], sizes = [10, 34], strides = [1, 1]} : vector<10x128xf32> to vector<10x34xf32>
    %247 = vector.broadcast %245 : f32 to vector<10x34xf32>
    %248 = arith.mulf %247, %246 : vector<10x34xf32>
    %249 = arith.addf %244, %248 : vector<10x34xf32>
    %c1_58 = arith.constant 1 : index
    %c5_59 = arith.constant 5 : index
    %250 = memref.load %arg2[%c1_58, %c5_59] : memref<4x36xf32, #tpu.memory_space<smem>>
    %251 = vector.extract_strided_slice %2 {offsets = [0, 5], sizes = [10, 34], strides = [1, 1]} : vector<10x128xf32> to vector<10x34xf32>
    %252 = vector.broadcast %250 : f32 to vector<10x34xf32>
    %253 = arith.mulf %252, %251 : vector<10x34xf32>
    %254 = arith.addf %249, %253 : vector<10x34xf32>
    %c1_60 = arith.constant 1 : index
    %c6_61 = arith.constant 6 : index
    %255 = memref.load %arg2[%c1_60, %c6_61] : memref<4x36xf32, #tpu.memory_space<smem>>
    %256 = vector.extract_strided_slice %3 {offsets = [0, 0], sizes = [10, 34], strides = [1, 1]} : vector<10x128xf32> to vector<10x34xf32>
    %257 = vector.broadcast %255 : f32 to vector<10x34xf32>
    %258 = arith.mulf %257, %256 : vector<10x34xf32>
    %259 = arith.addf %254, %258 : vector<10x34xf32>
    %c1_62 = arith.constant 1 : index
    %c7_63 = arith.constant 7 : index
    %260 = memref.load %arg2[%c1_62, %c7_63] : memref<4x36xf32, #tpu.memory_space<smem>>
    %261 = vector.extract_strided_slice %3 {offsets = [0, 1], sizes = [10, 34], strides = [1, 1]} : vector<10x128xf32> to vector<10x34xf32>
    %262 = vector.broadcast %260 : f32 to vector<10x34xf32>
    %263 = arith.mulf %262, %261 : vector<10x34xf32>
    %264 = arith.addf %259, %263 : vector<10x34xf32>
    %c1_64 = arith.constant 1 : index
    %c8_65 = arith.constant 8 : index
    %265 = memref.load %arg2[%c1_64, %c8_65] : memref<4x36xf32, #tpu.memory_space<smem>>
    %266 = vector.extract_strided_slice %3 {offsets = [0, 2], sizes = [10, 34], strides = [1, 1]} : vector<10x128xf32> to vector<10x34xf32>
    %267 = vector.broadcast %265 : f32 to vector<10x34xf32>
    %268 = arith.mulf %267, %266 : vector<10x34xf32>
    %269 = arith.addf %264, %268 : vector<10x34xf32>
    %c1_66 = arith.constant 1 : index
    %c9_67 = arith.constant 9 : index
    %270 = memref.load %arg2[%c1_66, %c9_67] : memref<4x36xf32, #tpu.memory_space<smem>>
    %271 = vector.extract_strided_slice %3 {offsets = [0, 3], sizes = [10, 34], strides = [1, 1]} : vector<10x128xf32> to vector<10x34xf32>
    %272 = vector.broadcast %270 : f32 to vector<10x34xf32>
    %273 = arith.mulf %272, %271 : vector<10x34xf32>
    %274 = arith.addf %269, %273 : vector<10x34xf32>
    %c1_68 = arith.constant 1 : index
    %c10_69 = arith.constant 10 : index
    %275 = memref.load %arg2[%c1_68, %c10_69] : memref<4x36xf32, #tpu.memory_space<smem>>
    %276 = vector.extract_strided_slice %3 {offsets = [0, 4], sizes = [10, 34], strides = [1, 1]} : vector<10x128xf32> to vector<10x34xf32>
    %277 = vector.broadcast %275 : f32 to vector<10x34xf32>
    %278 = arith.mulf %277, %276 : vector<10x34xf32>
    %279 = arith.addf %274, %278 : vector<10x34xf32>
    %c1_70 = arith.constant 1 : index
    %c11_71 = arith.constant 11 : index
    %280 = memref.load %arg2[%c1_70, %c11_71] : memref<4x36xf32, #tpu.memory_space<smem>>
    %281 = vector.extract_strided_slice %3 {offsets = [0, 5], sizes = [10, 34], strides = [1, 1]} : vector<10x128xf32> to vector<10x34xf32>
    %282 = vector.broadcast %280 : f32 to vector<10x34xf32>
    %283 = arith.mulf %282, %281 : vector<10x34xf32>
    %284 = arith.addf %279, %283 : vector<10x34xf32>
    %c1_72 = arith.constant 1 : index
    %c12_73 = arith.constant 12 : index
    %285 = memref.load %arg2[%c1_72, %c12_73] : memref<4x36xf32, #tpu.memory_space<smem>>
    %286 = vector.extract_strided_slice %4 {offsets = [0, 0], sizes = [10, 34], strides = [1, 1]} : vector<10x128xf32> to vector<10x34xf32>
    %287 = vector.broadcast %285 : f32 to vector<10x34xf32>
    %288 = arith.mulf %287, %286 : vector<10x34xf32>
    %289 = arith.addf %284, %288 : vector<10x34xf32>
    %c1_74 = arith.constant 1 : index
    %c13_75 = arith.constant 13 : index
    %290 = memref.load %arg2[%c1_74, %c13_75] : memref<4x36xf32, #tpu.memory_space<smem>>
    %291 = vector.extract_strided_slice %4 {offsets = [0, 1], sizes = [10, 34], strides = [1, 1]} : vector<10x128xf32> to vector<10x34xf32>
    %292 = vector.broadcast %290 : f32 to vector<10x34xf32>
    %293 = arith.mulf %292, %291 : vector<10x34xf32>
    %294 = arith.addf %289, %293 : vector<10x34xf32>
    %c1_76 = arith.constant 1 : index
    %c14_77 = arith.constant 14 : index
    %295 = memref.load %arg2[%c1_76, %c14_77] : memref<4x36xf32, #tpu.memory_space<smem>>
    %296 = vector.extract_strided_slice %4 {offsets = [0, 2], sizes = [10, 34], strides = [1, 1]} : vector<10x128xf32> to vector<10x34xf32>
    %297 = vector.broadcast %295 : f32 to vector<10x34xf32>
    %298 = arith.mulf %297, %296 : vector<10x34xf32>
    %299 = arith.addf %294, %298 : vector<10x34xf32>
    %c1_78 = arith.constant 1 : index
    %c15_79 = arith.constant 15 : index
    %300 = memref.load %arg2[%c1_78, %c15_79] : memref<4x36xf32, #tpu.memory_space<smem>>
    %301 = vector.extract_strided_slice %4 {offsets = [0, 3], sizes = [10, 34], strides = [1, 1]} : vector<10x128xf32> to vector<10x34xf32>
    %302 = vector.broadcast %300 : f32 to vector<10x34xf32>
    %303 = arith.mulf %302, %301 : vector<10x34xf32>
    %304 = arith.addf %299, %303 : vector<10x34xf32>
    %c1_80 = arith.constant 1 : index
    %c16_81 = arith.constant 16 : index
    %305 = memref.load %arg2[%c1_80, %c16_81] : memref<4x36xf32, #tpu.memory_space<smem>>
    %306 = vector.extract_strided_slice %4 {offsets = [0, 4], sizes = [10, 34], strides = [1, 1]} : vector<10x128xf32> to vector<10x34xf32>
    %307 = vector.broadcast %305 : f32 to vector<10x34xf32>
    %308 = arith.mulf %307, %306 : vector<10x34xf32>
    %309 = arith.addf %304, %308 : vector<10x34xf32>
    %c1_82 = arith.constant 1 : index
    %c17_83 = arith.constant 17 : index
    %310 = memref.load %arg2[%c1_82, %c17_83] : memref<4x36xf32, #tpu.memory_space<smem>>
    %311 = vector.extract_strided_slice %4 {offsets = [0, 5], sizes = [10, 34], strides = [1, 1]} : vector<10x128xf32> to vector<10x34xf32>
    %312 = vector.broadcast %310 : f32 to vector<10x34xf32>
    %313 = arith.mulf %312, %311 : vector<10x34xf32>
    %314 = arith.addf %309, %313 : vector<10x34xf32>
    %c1_84 = arith.constant 1 : index
    %c18_85 = arith.constant 18 : index
    %315 = memref.load %arg2[%c1_84, %c18_85] : memref<4x36xf32, #tpu.memory_space<smem>>
    %316 = vector.extract_strided_slice %5 {offsets = [0, 0], sizes = [10, 34], strides = [1, 1]} : vector<10x128xf32> to vector<10x34xf32>
    %317 = vector.broadcast %315 : f32 to vector<10x34xf32>
    %318 = arith.mulf %317, %316 : vector<10x34xf32>
    %319 = arith.addf %314, %318 : vector<10x34xf32>
    %c1_86 = arith.constant 1 : index
    %c19_87 = arith.constant 19 : index
    %320 = memref.load %arg2[%c1_86, %c19_87] : memref<4x36xf32, #tpu.memory_space<smem>>
    %321 = vector.extract_strided_slice %5 {offsets = [0, 1], sizes = [10, 34], strides = [1, 1]} : vector<10x128xf32> to vector<10x34xf32>
    %322 = vector.broadcast %320 : f32 to vector<10x34xf32>
    %323 = arith.mulf %322, %321 : vector<10x34xf32>
    %324 = arith.addf %319, %323 : vector<10x34xf32>
    %c1_88 = arith.constant 1 : index
    %c20_89 = arith.constant 20 : index
    %325 = memref.load %arg2[%c1_88, %c20_89] : memref<4x36xf32, #tpu.memory_space<smem>>
    %326 = vector.extract_strided_slice %5 {offsets = [0, 2], sizes = [10, 34], strides = [1, 1]} : vector<10x128xf32> to vector<10x34xf32>
    %327 = vector.broadcast %325 : f32 to vector<10x34xf32>
    %328 = arith.mulf %327, %326 : vector<10x34xf32>
    %329 = arith.addf %324, %328 : vector<10x34xf32>
    %c1_90 = arith.constant 1 : index
    %c21_91 = arith.constant 21 : index
    %330 = memref.load %arg2[%c1_90, %c21_91] : memref<4x36xf32, #tpu.memory_space<smem>>
    %331 = vector.extract_strided_slice %5 {offsets = [0, 3], sizes = [10, 34], strides = [1, 1]} : vector<10x128xf32> to vector<10x34xf32>
    %332 = vector.broadcast %330 : f32 to vector<10x34xf32>
    %333 = arith.mulf %332, %331 : vector<10x34xf32>
    %334 = arith.addf %329, %333 : vector<10x34xf32>
    %c1_92 = arith.constant 1 : index
    %c22_93 = arith.constant 22 : index
    %335 = memref.load %arg2[%c1_92, %c22_93] : memref<4x36xf32, #tpu.memory_space<smem>>
    %336 = vector.extract_strided_slice %5 {offsets = [0, 4], sizes = [10, 34], strides = [1, 1]} : vector<10x128xf32> to vector<10x34xf32>
    %337 = vector.broadcast %335 : f32 to vector<10x34xf32>
    %338 = arith.mulf %337, %336 : vector<10x34xf32>
    %339 = arith.addf %334, %338 : vector<10x34xf32>
    %c1_94 = arith.constant 1 : index
    %c23_95 = arith.constant 23 : index
    %340 = memref.load %arg2[%c1_94, %c23_95] : memref<4x36xf32, #tpu.memory_space<smem>>
    %341 = vector.extract_strided_slice %5 {offsets = [0, 5], sizes = [10, 34], strides = [1, 1]} : vector<10x128xf32> to vector<10x34xf32>
    %342 = vector.broadcast %340 : f32 to vector<10x34xf32>
    %343 = arith.mulf %342, %341 : vector<10x34xf32>
    %344 = arith.addf %339, %343 : vector<10x34xf32>
    %c1_96 = arith.constant 1 : index
    %c24_97 = arith.constant 24 : index
    %345 = memref.load %arg2[%c1_96, %c24_97] : memref<4x36xf32, #tpu.memory_space<smem>>
    %346 = vector.extract_strided_slice %6 {offsets = [0, 0], sizes = [10, 34], strides = [1, 1]} : vector<10x128xf32> to vector<10x34xf32>
    %347 = vector.broadcast %345 : f32 to vector<10x34xf32>
    %348 = arith.mulf %347, %346 : vector<10x34xf32>
    %349 = arith.addf %344, %348 : vector<10x34xf32>
    %c1_98 = arith.constant 1 : index
    %c25_99 = arith.constant 25 : index
    %350 = memref.load %arg2[%c1_98, %c25_99] : memref<4x36xf32, #tpu.memory_space<smem>>
    %351 = vector.extract_strided_slice %6 {offsets = [0, 1], sizes = [10, 34], strides = [1, 1]} : vector<10x128xf32> to vector<10x34xf32>
    %352 = vector.broadcast %350 : f32 to vector<10x34xf32>
    %353 = arith.mulf %352, %351 : vector<10x34xf32>
    %354 = arith.addf %349, %353 : vector<10x34xf32>
    %c1_100 = arith.constant 1 : index
    %c26_101 = arith.constant 26 : index
    %355 = memref.load %arg2[%c1_100, %c26_101] : memref<4x36xf32, #tpu.memory_space<smem>>
    %356 = vector.extract_strided_slice %6 {offsets = [0, 2], sizes = [10, 34], strides = [1, 1]} : vector<10x128xf32> to vector<10x34xf32>
    %357 = vector.broadcast %355 : f32 to vector<10x34xf32>
    %358 = arith.mulf %357, %356 : vector<10x34xf32>
    %359 = arith.addf %354, %358 : vector<10x34xf32>
    %c1_102 = arith.constant 1 : index
    %c27_103 = arith.constant 27 : index
    %360 = memref.load %arg2[%c1_102, %c27_103] : memref<4x36xf32, #tpu.memory_space<smem>>
    %361 = vector.extract_strided_slice %6 {offsets = [0, 3], sizes = [10, 34], strides = [1, 1]} : vector<10x128xf32> to vector<10x34xf32>
    %362 = vector.broadcast %360 : f32 to vector<10x34xf32>
    %363 = arith.mulf %362, %361 : vector<10x34xf32>
    %364 = arith.addf %359, %363 : vector<10x34xf32>
    %c1_104 = arith.constant 1 : index
    %c28_105 = arith.constant 28 : index
    %365 = memref.load %arg2[%c1_104, %c28_105] : memref<4x36xf32, #tpu.memory_space<smem>>
    %366 = vector.extract_strided_slice %6 {offsets = [0, 4], sizes = [10, 34], strides = [1, 1]} : vector<10x128xf32> to vector<10x34xf32>
    %367 = vector.broadcast %365 : f32 to vector<10x34xf32>
    %368 = arith.mulf %367, %366 : vector<10x34xf32>
    %369 = arith.addf %364, %368 : vector<10x34xf32>
    %c1_106 = arith.constant 1 : index
    %c29_107 = arith.constant 29 : index
    %370 = memref.load %arg2[%c1_106, %c29_107] : memref<4x36xf32, #tpu.memory_space<smem>>
    %371 = vector.extract_strided_slice %6 {offsets = [0, 5], sizes = [10, 34], strides = [1, 1]} : vector<10x128xf32> to vector<10x34xf32>
    %372 = vector.broadcast %370 : f32 to vector<10x34xf32>
    %373 = arith.mulf %372, %371 : vector<10x34xf32>
    %374 = arith.addf %369, %373 : vector<10x34xf32>
    %c1_108 = arith.constant 1 : index
    %c30_109 = arith.constant 30 : index
    %375 = memref.load %arg2[%c1_108, %c30_109] : memref<4x36xf32, #tpu.memory_space<smem>>
    %376 = vector.extract_strided_slice %7 {offsets = [0, 0], sizes = [10, 34], strides = [1, 1]} : vector<10x128xf32> to vector<10x34xf32>
    %377 = vector.broadcast %375 : f32 to vector<10x34xf32>
    %378 = arith.mulf %377, %376 : vector<10x34xf32>
    %379 = arith.addf %374, %378 : vector<10x34xf32>
    %c1_110 = arith.constant 1 : index
    %c31_111 = arith.constant 31 : index
    %380 = memref.load %arg2[%c1_110, %c31_111] : memref<4x36xf32, #tpu.memory_space<smem>>
    %381 = vector.extract_strided_slice %7 {offsets = [0, 1], sizes = [10, 34], strides = [1, 1]} : vector<10x128xf32> to vector<10x34xf32>
    %382 = vector.broadcast %380 : f32 to vector<10x34xf32>
    %383 = arith.mulf %382, %381 : vector<10x34xf32>
    %384 = arith.addf %379, %383 : vector<10x34xf32>
    %c1_112 = arith.constant 1 : index
    %c32_113 = arith.constant 32 : index
    %385 = memref.load %arg2[%c1_112, %c32_113] : memref<4x36xf32, #tpu.memory_space<smem>>
    %386 = vector.extract_strided_slice %7 {offsets = [0, 2], sizes = [10, 34], strides = [1, 1]} : vector<10x128xf32> to vector<10x34xf32>
    %387 = vector.broadcast %385 : f32 to vector<10x34xf32>
    %388 = arith.mulf %387, %386 : vector<10x34xf32>
    %389 = arith.addf %384, %388 : vector<10x34xf32>
    %c1_114 = arith.constant 1 : index
    %c33_115 = arith.constant 33 : index
    %390 = memref.load %arg2[%c1_114, %c33_115] : memref<4x36xf32, #tpu.memory_space<smem>>
    %391 = vector.extract_strided_slice %7 {offsets = [0, 3], sizes = [10, 34], strides = [1, 1]} : vector<10x128xf32> to vector<10x34xf32>
    %392 = vector.broadcast %390 : f32 to vector<10x34xf32>
    %393 = arith.mulf %392, %391 : vector<10x34xf32>
    %394 = arith.addf %389, %393 : vector<10x34xf32>
    %c1_116 = arith.constant 1 : index
    %c34_117 = arith.constant 34 : index
    %395 = memref.load %arg2[%c1_116, %c34_117] : memref<4x36xf32, #tpu.memory_space<smem>>
    %396 = vector.extract_strided_slice %7 {offsets = [0, 4], sizes = [10, 34], strides = [1, 1]} : vector<10x128xf32> to vector<10x34xf32>
    %397 = vector.broadcast %395 : f32 to vector<10x34xf32>
    %398 = arith.mulf %397, %396 : vector<10x34xf32>
    %399 = arith.addf %394, %398 : vector<10x34xf32>
    %c1_118 = arith.constant 1 : index
    %c35_119 = arith.constant 35 : index
    %400 = memref.load %arg2[%c1_118, %c35_119] : memref<4x36xf32, #tpu.memory_space<smem>>
    %401 = vector.extract_strided_slice %7 {offsets = [0, 5], sizes = [10, 34], strides = [1, 1]} : vector<10x128xf32> to vector<10x34xf32>
    %402 = vector.broadcast %400 : f32 to vector<10x34xf32>
    %403 = arith.mulf %402, %401 : vector<10x34xf32>
    %404 = arith.addf %399, %403 : vector<10x34xf32>
    %c1_120 = arith.constant 1 : index
    %405 = memref.load %arg3[%c1_120] : memref<4xf32, #tpu.memory_space<smem>>
    %406 = vector.broadcast %405 : f32 to vector<10x34xf32>
    %407 = arith.addf %404, %406 : vector<10x34xf32>
    %408 = math.tanh %407 : vector<10x34xf32>
    %cst_121 = arith.constant -1.000000e+30 : f32
    %409 = vector.broadcast %cst_121 : f32 to vector<10x34xf32>
    %410 = arith.select %20, %408, %409 : vector<10x34xi1>, vector<10x34xf32>
    %411 = vector.extract_strided_slice %410 {offsets = [0, 0], sizes = [10, 32], strides = [1, 1]} : vector<10x34xf32> to vector<10x32xf32>
    %412 = vector.extract_strided_slice %410 {offsets = [0, 1], sizes = [10, 32], strides = [1, 1]} : vector<10x34xf32> to vector<10x32xf32>
    %413 = arith.maximumf %411, %412 : vector<10x32xf32>
    %414 = vector.extract_strided_slice %410 {offsets = [0, 2], sizes = [10, 32], strides = [1, 1]} : vector<10x34xf32> to vector<10x32xf32>
    %415 = arith.maximumf %413, %414 : vector<10x32xf32>
    %416 = vector.extract_strided_slice %415 {offsets = [0, 0], sizes = [8, 32], strides = [1, 1]} : vector<10x32xf32> to vector<8x32xf32>
    %417 = vector.extract_strided_slice %415 {offsets = [1, 0], sizes = [8, 32], strides = [1, 1]} : vector<10x32xf32> to vector<8x32xf32>
    %418 = arith.maximumf %416, %417 : vector<8x32xf32>
    %419 = vector.extract_strided_slice %415 {offsets = [2, 0], sizes = [8, 32], strides = [1, 1]} : vector<10x32xf32> to vector<8x32xf32>
    %420 = arith.maximumf %418, %419 : vector<8x32xf32>
    %421 = arith.truncf %420 : vector<8x32xf32> to vector<8x32xbf16>
    %c1_122 = arith.constant 1 : index
    %c0_123 = arith.constant 0 : index
    %c0_124 = arith.constant 0 : index
    %422 = vector.load %arg4[%c1_122, %c0_123, %c0_124] : memref<4x32x128xbf16, #tpu.memory_space<vmem>>, vector<1x32x128xbf16>
    %423 = vector.shape_cast %422 : vector<1x32x128xbf16> to vector<32x128xbf16>
    %cst_125 = arith.constant dense<0.000000e+00> : vector<8x128xf32>
    %424 = tpu.matmul %421, %423, %cst_125 {dimension_numbers = #tpu.dot_dimension_numbers<[1], [0], [0], [1], [0, 0, 1, 1], [], []>} : vector<8x32xbf16>, vector<32x128xbf16>, vector<8x128xf32> -> vector<8x128xf32>
    %425 = arith.addf %223, %424 : vector<8x128xf32>
    %cst_126 = arith.constant 0.000000e+00 : f32
    %426 = vector.broadcast %cst_126 : f32 to vector<10x34xf32>
    %c2_127 = arith.constant 2 : index
    %c0_128 = arith.constant 0 : index
    %427 = memref.load %arg2[%c2_127, %c0_128] : memref<4x36xf32, #tpu.memory_space<smem>>
    %428 = vector.extract_strided_slice %2 {offsets = [0, 0], sizes = [10, 34], strides = [1, 1]} : vector<10x128xf32> to vector<10x34xf32>
    %429 = vector.broadcast %427 : f32 to vector<10x34xf32>
    %430 = arith.mulf %429, %428 : vector<10x34xf32>
    %431 = arith.addf %426, %430 : vector<10x34xf32>
    %c2_129 = arith.constant 2 : index
    %c1_130 = arith.constant 1 : index
    %432 = memref.load %arg2[%c2_129, %c1_130] : memref<4x36xf32, #tpu.memory_space<smem>>
    %433 = vector.extract_strided_slice %2 {offsets = [0, 1], sizes = [10, 34], strides = [1, 1]} : vector<10x128xf32> to vector<10x34xf32>
    %434 = vector.broadcast %432 : f32 to vector<10x34xf32>
    %435 = arith.mulf %434, %433 : vector<10x34xf32>
    %436 = arith.addf %431, %435 : vector<10x34xf32>
    %c2_131 = arith.constant 2 : index
    %c2_132 = arith.constant 2 : index
    %437 = memref.load %arg2[%c2_131, %c2_132] : memref<4x36xf32, #tpu.memory_space<smem>>
    %438 = vector.extract_strided_slice %2 {offsets = [0, 2], sizes = [10, 34], strides = [1, 1]} : vector<10x128xf32> to vector<10x34xf32>
    %439 = vector.broadcast %437 : f32 to vector<10x34xf32>
    %440 = arith.mulf %439, %438 : vector<10x34xf32>
    %441 = arith.addf %436, %440 : vector<10x34xf32>
    %c2_133 = arith.constant 2 : index
    %c3_134 = arith.constant 3 : index
    %442 = memref.load %arg2[%c2_133, %c3_134] : memref<4x36xf32, #tpu.memory_space<smem>>
    %443 = vector.extract_strided_slice %2 {offsets = [0, 3], sizes = [10, 34], strides = [1, 1]} : vector<10x128xf32> to vector<10x34xf32>
    %444 = vector.broadcast %442 : f32 to vector<10x34xf32>
    %445 = arith.mulf %444, %443 : vector<10x34xf32>
    %446 = arith.addf %441, %445 : vector<10x34xf32>
    %c2_135 = arith.constant 2 : index
    %c4_136 = arith.constant 4 : index
    %447 = memref.load %arg2[%c2_135, %c4_136] : memref<4x36xf32, #tpu.memory_space<smem>>
    %448 = vector.extract_strided_slice %2 {offsets = [0, 4], sizes = [10, 34], strides = [1, 1]} : vector<10x128xf32> to vector<10x34xf32>
    %449 = vector.broadcast %447 : f32 to vector<10x34xf32>
    %450 = arith.mulf %449, %448 : vector<10x34xf32>
    %451 = arith.addf %446, %450 : vector<10x34xf32>
    %c2_137 = arith.constant 2 : index
    %c5_138 = arith.constant 5 : index
    %452 = memref.load %arg2[%c2_137, %c5_138] : memref<4x36xf32, #tpu.memory_space<smem>>
    %453 = vector.extract_strided_slice %2 {offsets = [0, 5], sizes = [10, 34], strides = [1, 1]} : vector<10x128xf32> to vector<10x34xf32>
    %454 = vector.broadcast %452 : f32 to vector<10x34xf32>
    %455 = arith.mulf %454, %453 : vector<10x34xf32>
    %456 = arith.addf %451, %455 : vector<10x34xf32>
    %c2_139 = arith.constant 2 : index
    %c6_140 = arith.constant 6 : index
    %457 = memref.load %arg2[%c2_139, %c6_140] : memref<4x36xf32, #tpu.memory_space<smem>>
    %458 = vector.extract_strided_slice %3 {offsets = [0, 0], sizes = [10, 34], strides = [1, 1]} : vector<10x128xf32> to vector<10x34xf32>
    %459 = vector.broadcast %457 : f32 to vector<10x34xf32>
    %460 = arith.mulf %459, %458 : vector<10x34xf32>
    %461 = arith.addf %456, %460 : vector<10x34xf32>
    %c2_141 = arith.constant 2 : index
    %c7_142 = arith.constant 7 : index
    %462 = memref.load %arg2[%c2_141, %c7_142] : memref<4x36xf32, #tpu.memory_space<smem>>
    %463 = vector.extract_strided_slice %3 {offsets = [0, 1], sizes = [10, 34], strides = [1, 1]} : vector<10x128xf32> to vector<10x34xf32>
    %464 = vector.broadcast %462 : f32 to vector<10x34xf32>
    %465 = arith.mulf %464, %463 : vector<10x34xf32>
    %466 = arith.addf %461, %465 : vector<10x34xf32>
    %c2_143 = arith.constant 2 : index
    %c8_144 = arith.constant 8 : index
    %467 = memref.load %arg2[%c2_143, %c8_144] : memref<4x36xf32, #tpu.memory_space<smem>>
    %468 = vector.extract_strided_slice %3 {offsets = [0, 2], sizes = [10, 34], strides = [1, 1]} : vector<10x128xf32> to vector<10x34xf32>
    %469 = vector.broadcast %467 : f32 to vector<10x34xf32>
    %470 = arith.mulf %469, %468 : vector<10x34xf32>
    %471 = arith.addf %466, %470 : vector<10x34xf32>
    %c2_145 = arith.constant 2 : index
    %c9_146 = arith.constant 9 : index
    %472 = memref.load %arg2[%c2_145, %c9_146] : memref<4x36xf32, #tpu.memory_space<smem>>
    %473 = vector.extract_strided_slice %3 {offsets = [0, 3], sizes = [10, 34], strides = [1, 1]} : vector<10x128xf32> to vector<10x34xf32>
    %474 = vector.broadcast %472 : f32 to vector<10x34xf32>
    %475 = arith.mulf %474, %473 : vector<10x34xf32>
    %476 = arith.addf %471, %475 : vector<10x34xf32>
    %c2_147 = arith.constant 2 : index
    %c10_148 = arith.constant 10 : index
    %477 = memref.load %arg2[%c2_147, %c10_148] : memref<4x36xf32, #tpu.memory_space<smem>>
    %478 = vector.extract_strided_slice %3 {offsets = [0, 4], sizes = [10, 34], strides = [1, 1]} : vector<10x128xf32> to vector<10x34xf32>
    %479 = vector.broadcast %477 : f32 to vector<10x34xf32>
    %480 = arith.mulf %479, %478 : vector<10x34xf32>
    %481 = arith.addf %476, %480 : vector<10x34xf32>
    %c2_149 = arith.constant 2 : index
    %c11_150 = arith.constant 11 : index
    %482 = memref.load %arg2[%c2_149, %c11_150] : memref<4x36xf32, #tpu.memory_space<smem>>
    %483 = vector.extract_strided_slice %3 {offsets = [0, 5], sizes = [10, 34], strides = [1, 1]} : vector<10x128xf32> to vector<10x34xf32>
    %484 = vector.broadcast %482 : f32 to vector<10x34xf32>
    %485 = arith.mulf %484, %483 : vector<10x34xf32>
    %486 = arith.addf %481, %485 : vector<10x34xf32>
    %c2_151 = arith.constant 2 : index
    %c12_152 = arith.constant 12 : index
    %487 = memref.load %arg2[%c2_151, %c12_152] : memref<4x36xf32, #tpu.memory_space<smem>>
    %488 = vector.extract_strided_slice %4 {offsets = [0, 0], sizes = [10, 34], strides = [1, 1]} : vector<10x128xf32> to vector<10x34xf32>
    %489 = vector.broadcast %487 : f32 to vector<10x34xf32>
    %490 = arith.mulf %489, %488 : vector<10x34xf32>
    %491 = arith.addf %486, %490 : vector<10x34xf32>
    %c2_153 = arith.constant 2 : index
    %c13_154 = arith.constant 13 : index
    %492 = memref.load %arg2[%c2_153, %c13_154] : memref<4x36xf32, #tpu.memory_space<smem>>
    %493 = vector.extract_strided_slice %4 {offsets = [0, 1], sizes = [10, 34], strides = [1, 1]} : vector<10x128xf32> to vector<10x34xf32>
    %494 = vector.broadcast %492 : f32 to vector<10x34xf32>
    %495 = arith.mulf %494, %493 : vector<10x34xf32>
    %496 = arith.addf %491, %495 : vector<10x34xf32>
    %c2_155 = arith.constant 2 : index
    %c14_156 = arith.constant 14 : index
    %497 = memref.load %arg2[%c2_155, %c14_156] : memref<4x36xf32, #tpu.memory_space<smem>>
    %498 = vector.extract_strided_slice %4 {offsets = [0, 2], sizes = [10, 34], strides = [1, 1]} : vector<10x128xf32> to vector<10x34xf32>
    %499 = vector.broadcast %497 : f32 to vector<10x34xf32>
    %500 = arith.mulf %499, %498 : vector<10x34xf32>
    %501 = arith.addf %496, %500 : vector<10x34xf32>
    %c2_157 = arith.constant 2 : index
    %c15_158 = arith.constant 15 : index
    %502 = memref.load %arg2[%c2_157, %c15_158] : memref<4x36xf32, #tpu.memory_space<smem>>
    %503 = vector.extract_strided_slice %4 {offsets = [0, 3], sizes = [10, 34], strides = [1, 1]} : vector<10x128xf32> to vector<10x34xf32>
    %504 = vector.broadcast %502 : f32 to vector<10x34xf32>
    %505 = arith.mulf %504, %503 : vector<10x34xf32>
    %506 = arith.addf %501, %505 : vector<10x34xf32>
    %c2_159 = arith.constant 2 : index
    %c16_160 = arith.constant 16 : index
    %507 = memref.load %arg2[%c2_159, %c16_160] : memref<4x36xf32, #tpu.memory_space<smem>>
    %508 = vector.extract_strided_slice %4 {offsets = [0, 4], sizes = [10, 34], strides = [1, 1]} : vector<10x128xf32> to vector<10x34xf32>
    %509 = vector.broadcast %507 : f32 to vector<10x34xf32>
    %510 = arith.mulf %509, %508 : vector<10x34xf32>
    %511 = arith.addf %506, %510 : vector<10x34xf32>
    %c2_161 = arith.constant 2 : index
    %c17_162 = arith.constant 17 : index
    %512 = memref.load %arg2[%c2_161, %c17_162] : memref<4x36xf32, #tpu.memory_space<smem>>
    %513 = vector.extract_strided_slice %4 {offsets = [0, 5], sizes = [10, 34], strides = [1, 1]} : vector<10x128xf32> to vector<10x34xf32>
    %514 = vector.broadcast %512 : f32 to vector<10x34xf32>
    %515 = arith.mulf %514, %513 : vector<10x34xf32>
    %516 = arith.addf %511, %515 : vector<10x34xf32>
    %c2_163 = arith.constant 2 : index
    %c18_164 = arith.constant 18 : index
    %517 = memref.load %arg2[%c2_163, %c18_164] : memref<4x36xf32, #tpu.memory_space<smem>>
    %518 = vector.extract_strided_slice %5 {offsets = [0, 0], sizes = [10, 34], strides = [1, 1]} : vector<10x128xf32> to vector<10x34xf32>
    %519 = vector.broadcast %517 : f32 to vector<10x34xf32>
    %520 = arith.mulf %519, %518 : vector<10x34xf32>
    %521 = arith.addf %516, %520 : vector<10x34xf32>
    %c2_165 = arith.constant 2 : index
    %c19_166 = arith.constant 19 : index
    %522 = memref.load %arg2[%c2_165, %c19_166] : memref<4x36xf32, #tpu.memory_space<smem>>
    %523 = vector.extract_strided_slice %5 {offsets = [0, 1], sizes = [10, 34], strides = [1, 1]} : vector<10x128xf32> to vector<10x34xf32>
    %524 = vector.broadcast %522 : f32 to vector<10x34xf32>
    %525 = arith.mulf %524, %523 : vector<10x34xf32>
    %526 = arith.addf %521, %525 : vector<10x34xf32>
    %c2_167 = arith.constant 2 : index
    %c20_168 = arith.constant 20 : index
    %527 = memref.load %arg2[%c2_167, %c20_168] : memref<4x36xf32, #tpu.memory_space<smem>>
    %528 = vector.extract_strided_slice %5 {offsets = [0, 2], sizes = [10, 34], strides = [1, 1]} : vector<10x128xf32> to vector<10x34xf32>
    %529 = vector.broadcast %527 : f32 to vector<10x34xf32>
    %530 = arith.mulf %529, %528 : vector<10x34xf32>
    %531 = arith.addf %526, %530 : vector<10x34xf32>
    %c2_169 = arith.constant 2 : index
    %c21_170 = arith.constant 21 : index
    %532 = memref.load %arg2[%c2_169, %c21_170] : memref<4x36xf32, #tpu.memory_space<smem>>
    %533 = vector.extract_strided_slice %5 {offsets = [0, 3], sizes = [10, 34], strides = [1, 1]} : vector<10x128xf32> to vector<10x34xf32>
    %534 = vector.broadcast %532 : f32 to vector<10x34xf32>
    %535 = arith.mulf %534, %533 : vector<10x34xf32>
    %536 = arith.addf %531, %535 : vector<10x34xf32>
    %c2_171 = arith.constant 2 : index
    %c22_172 = arith.constant 22 : index
    %537 = memref.load %arg2[%c2_171, %c22_172] : memref<4x36xf32, #tpu.memory_space<smem>>
    %538 = vector.extract_strided_slice %5 {offsets = [0, 4], sizes = [10, 34], strides = [1, 1]} : vector<10x128xf32> to vector<10x34xf32>
    %539 = vector.broadcast %537 : f32 to vector<10x34xf32>
    %540 = arith.mulf %539, %538 : vector<10x34xf32>
    %541 = arith.addf %536, %540 : vector<10x34xf32>
    %c2_173 = arith.constant 2 : index
    %c23_174 = arith.constant 23 : index
    %542 = memref.load %arg2[%c2_173, %c23_174] : memref<4x36xf32, #tpu.memory_space<smem>>
    %543 = vector.extract_strided_slice %5 {offsets = [0, 5], sizes = [10, 34], strides = [1, 1]} : vector<10x128xf32> to vector<10x34xf32>
    %544 = vector.broadcast %542 : f32 to vector<10x34xf32>
    %545 = arith.mulf %544, %543 : vector<10x34xf32>
    %546 = arith.addf %541, %545 : vector<10x34xf32>
    %c2_175 = arith.constant 2 : index
    %c24_176 = arith.constant 24 : index
    %547 = memref.load %arg2[%c2_175, %c24_176] : memref<4x36xf32, #tpu.memory_space<smem>>
    %548 = vector.extract_strided_slice %6 {offsets = [0, 0], sizes = [10, 34], strides = [1, 1]} : vector<10x128xf32> to vector<10x34xf32>
    %549 = vector.broadcast %547 : f32 to vector<10x34xf32>
    %550 = arith.mulf %549, %548 : vector<10x34xf32>
    %551 = arith.addf %546, %550 : vector<10x34xf32>
    %c2_177 = arith.constant 2 : index
    %c25_178 = arith.constant 25 : index
    %552 = memref.load %arg2[%c2_177, %c25_178] : memref<4x36xf32, #tpu.memory_space<smem>>
    %553 = vector.extract_strided_slice %6 {offsets = [0, 1], sizes = [10, 34], strides = [1, 1]} : vector<10x128xf32> to vector<10x34xf32>
    %554 = vector.broadcast %552 : f32 to vector<10x34xf32>
    %555 = arith.mulf %554, %553 : vector<10x34xf32>
    %556 = arith.addf %551, %555 : vector<10x34xf32>
    %c2_179 = arith.constant 2 : index
    %c26_180 = arith.constant 26 : index
    %557 = memref.load %arg2[%c2_179, %c26_180] : memref<4x36xf32, #tpu.memory_space<smem>>
    %558 = vector.extract_strided_slice %6 {offsets = [0, 2], sizes = [10, 34], strides = [1, 1]} : vector<10x128xf32> to vector<10x34xf32>
    %559 = vector.broadcast %557 : f32 to vector<10x34xf32>
    %560 = arith.mulf %559, %558 : vector<10x34xf32>
    %561 = arith.addf %556, %560 : vector<10x34xf32>
    %c2_181 = arith.constant 2 : index
    %c27_182 = arith.constant 27 : index
    %562 = memref.load %arg2[%c2_181, %c27_182] : memref<4x36xf32, #tpu.memory_space<smem>>
    %563 = vector.extract_strided_slice %6 {offsets = [0, 3], sizes = [10, 34], strides = [1, 1]} : vector<10x128xf32> to vector<10x34xf32>
    %564 = vector.broadcast %562 : f32 to vector<10x34xf32>
    %565 = arith.mulf %564, %563 : vector<10x34xf32>
    %566 = arith.addf %561, %565 : vector<10x34xf32>
    %c2_183 = arith.constant 2 : index
    %c28_184 = arith.constant 28 : index
    %567 = memref.load %arg2[%c2_183, %c28_184] : memref<4x36xf32, #tpu.memory_space<smem>>
    %568 = vector.extract_strided_slice %6 {offsets = [0, 4], sizes = [10, 34], strides = [1, 1]} : vector<10x128xf32> to vector<10x34xf32>
    %569 = vector.broadcast %567 : f32 to vector<10x34xf32>
    %570 = arith.mulf %569, %568 : vector<10x34xf32>
    %571 = arith.addf %566, %570 : vector<10x34xf32>
    %c2_185 = arith.constant 2 : index
    %c29_186 = arith.constant 29 : index
    %572 = memref.load %arg2[%c2_185, %c29_186] : memref<4x36xf32, #tpu.memory_space<smem>>
    %573 = vector.extract_strided_slice %6 {offsets = [0, 5], sizes = [10, 34], strides = [1, 1]} : vector<10x128xf32> to vector<10x34xf32>
    %574 = vector.broadcast %572 : f32 to vector<10x34xf32>
    %575 = arith.mulf %574, %573 : vector<10x34xf32>
    %576 = arith.addf %571, %575 : vector<10x34xf32>
    %c2_187 = arith.constant 2 : index
    %c30_188 = arith.constant 30 : index
    %577 = memref.load %arg2[%c2_187, %c30_188] : memref<4x36xf32, #tpu.memory_space<smem>>
    %578 = vector.extract_strided_slice %7 {offsets = [0, 0], sizes = [10, 34], strides = [1, 1]} : vector<10x128xf32> to vector<10x34xf32>
    %579 = vector.broadcast %577 : f32 to vector<10x34xf32>
    %580 = arith.mulf %579, %578 : vector<10x34xf32>
    %581 = arith.addf %576, %580 : vector<10x34xf32>
    %c2_189 = arith.constant 2 : index
    %c31_190 = arith.constant 31 : index
    %582 = memref.load %arg2[%c2_189, %c31_190] : memref<4x36xf32, #tpu.memory_space<smem>>
    %583 = vector.extract_strided_slice %7 {offsets = [0, 1], sizes = [10, 34], strides = [1, 1]} : vector<10x128xf32> to vector<10x34xf32>
    %584 = vector.broadcast %582 : f32 to vector<10x34xf32>
    %585 = arith.mulf %584, %583 : vector<10x34xf32>
    %586 = arith.addf %581, %585 : vector<10x34xf32>
    %c2_191 = arith.constant 2 : index
    %c32_192 = arith.constant 32 : index
    %587 = memref.load %arg2[%c2_191, %c32_192] : memref<4x36xf32, #tpu.memory_space<smem>>
    %588 = vector.extract_strided_slice %7 {offsets = [0, 2], sizes = [10, 34], strides = [1, 1]} : vector<10x128xf32> to vector<10x34xf32>
    %589 = vector.broadcast %587 : f32 to vector<10x34xf32>
    %590 = arith.mulf %589, %588 : vector<10x34xf32>
    %591 = arith.addf %586, %590 : vector<10x34xf32>
    %c2_193 = arith.constant 2 : index
    %c33_194 = arith.constant 33 : index
    %592 = memref.load %arg2[%c2_193, %c33_194] : memref<4x36xf32, #tpu.memory_space<smem>>
    %593 = vector.extract_strided_slice %7 {offsets = [0, 3], sizes = [10, 34], strides = [1, 1]} : vector<10x128xf32> to vector<10x34xf32>
    %594 = vector.broadcast %592 : f32 to vector<10x34xf32>
    %595 = arith.mulf %594, %593 : vector<10x34xf32>
    %596 = arith.addf %591, %595 : vector<10x34xf32>
    %c2_195 = arith.constant 2 : index
    %c34_196 = arith.constant 34 : index
    %597 = memref.load %arg2[%c2_195, %c34_196] : memref<4x36xf32, #tpu.memory_space<smem>>
    %598 = vector.extract_strided_slice %7 {offsets = [0, 4], sizes = [10, 34], strides = [1, 1]} : vector<10x128xf32> to vector<10x34xf32>
    %599 = vector.broadcast %597 : f32 to vector<10x34xf32>
    %600 = arith.mulf %599, %598 : vector<10x34xf32>
    %601 = arith.addf %596, %600 : vector<10x34xf32>
    %c2_197 = arith.constant 2 : index
    %c35_198 = arith.constant 35 : index
    %602 = memref.load %arg2[%c2_197, %c35_198] : memref<4x36xf32, #tpu.memory_space<smem>>
    %603 = vector.extract_strided_slice %7 {offsets = [0, 5], sizes = [10, 34], strides = [1, 1]} : vector<10x128xf32> to vector<10x34xf32>
    %604 = vector.broadcast %602 : f32 to vector<10x34xf32>
    %605 = arith.mulf %604, %603 : vector<10x34xf32>
    %606 = arith.addf %601, %605 : vector<10x34xf32>
    %c2_199 = arith.constant 2 : index
    %607 = memref.load %arg3[%c2_199] : memref<4xf32, #tpu.memory_space<smem>>
    %608 = vector.broadcast %607 : f32 to vector<10x34xf32>
    %609 = arith.addf %606, %608 : vector<10x34xf32>
    %610 = math.tanh %609 : vector<10x34xf32>
    %cst_200 = arith.constant -1.000000e+30 : f32
    %611 = vector.broadcast %cst_200 : f32 to vector<10x34xf32>
    %612 = arith.select %20, %610, %611 : vector<10x34xi1>, vector<10x34xf32>
    %613 = vector.extract_strided_slice %612 {offsets = [0, 0], sizes = [10, 32], strides = [1, 1]} : vector<10x34xf32> to vector<10x32xf32>
    %614 = vector.extract_strided_slice %612 {offsets = [0, 1], sizes = [10, 32], strides = [1, 1]} : vector<10x34xf32> to vector<10x32xf32>
    %615 = arith.maximumf %613, %614 : vector<10x32xf32>
    %616 = vector.extract_strided_slice %612 {offsets = [0, 2], sizes = [10, 32], strides = [1, 1]} : vector<10x34xf32> to vector<10x32xf32>
    %617 = arith.maximumf %615, %616 : vector<10x32xf32>
    %618 = vector.extract_strided_slice %617 {offsets = [0, 0], sizes = [8, 32], strides = [1, 1]} : vector<10x32xf32> to vector<8x32xf32>
    %619 = vector.extract_strided_slice %617 {offsets = [1, 0], sizes = [8, 32], strides = [1, 1]} : vector<10x32xf32> to vector<8x32xf32>
    %620 = arith.maximumf %618, %619 : vector<8x32xf32>
    %621 = vector.extract_strided_slice %617 {offsets = [2, 0], sizes = [8, 32], strides = [1, 1]} : vector<10x32xf32> to vector<8x32xf32>
    %622 = arith.maximumf %620, %621 : vector<8x32xf32>
    %623 = arith.truncf %622 : vector<8x32xf32> to vector<8x32xbf16>
    %c2_201 = arith.constant 2 : index
    %c0_202 = arith.constant 0 : index
    %c0_203 = arith.constant 0 : index
    %624 = vector.load %arg4[%c2_201, %c0_202, %c0_203] : memref<4x32x128xbf16, #tpu.memory_space<vmem>>, vector<1x32x128xbf16>
    %625 = vector.shape_cast %624 : vector<1x32x128xbf16> to vector<32x128xbf16>
    %cst_204 = arith.constant dense<0.000000e+00> : vector<8x128xf32>
    %626 = tpu.matmul %623, %625, %cst_204 {dimension_numbers = #tpu.dot_dimension_numbers<[1], [0], [0], [1], [0, 0, 1, 1], [], []>} : vector<8x32xbf16>, vector<32x128xbf16>, vector<8x128xf32> -> vector<8x128xf32>
    %627 = arith.addf %425, %626 : vector<8x128xf32>
    %cst_205 = arith.constant 0.000000e+00 : f32
    %628 = vector.broadcast %cst_205 : f32 to vector<10x34xf32>
    %c3_206 = arith.constant 3 : index
    %c0_207 = arith.constant 0 : index
    %629 = memref.load %arg2[%c3_206, %c0_207] : memref<4x36xf32, #tpu.memory_space<smem>>
    %630 = vector.extract_strided_slice %2 {offsets = [0, 0], sizes = [10, 34], strides = [1, 1]} : vector<10x128xf32> to vector<10x34xf32>
    %631 = vector.broadcast %629 : f32 to vector<10x34xf32>
    %632 = arith.mulf %631, %630 : vector<10x34xf32>
    %633 = arith.addf %628, %632 : vector<10x34xf32>
    %c3_208 = arith.constant 3 : index
    %c1_209 = arith.constant 1 : index
    %634 = memref.load %arg2[%c3_208, %c1_209] : memref<4x36xf32, #tpu.memory_space<smem>>
    %635 = vector.extract_strided_slice %2 {offsets = [0, 1], sizes = [10, 34], strides = [1, 1]} : vector<10x128xf32> to vector<10x34xf32>
    %636 = vector.broadcast %634 : f32 to vector<10x34xf32>
    %637 = arith.mulf %636, %635 : vector<10x34xf32>
    %638 = arith.addf %633, %637 : vector<10x34xf32>
    %c3_210 = arith.constant 3 : index
    %c2_211 = arith.constant 2 : index
    %639 = memref.load %arg2[%c3_210, %c2_211] : memref<4x36xf32, #tpu.memory_space<smem>>
    %640 = vector.extract_strided_slice %2 {offsets = [0, 2], sizes = [10, 34], strides = [1, 1]} : vector<10x128xf32> to vector<10x34xf32>
    %641 = vector.broadcast %639 : f32 to vector<10x34xf32>
    %642 = arith.mulf %641, %640 : vector<10x34xf32>
    %643 = arith.addf %638, %642 : vector<10x34xf32>
    %c3_212 = arith.constant 3 : index
    %c3_213 = arith.constant 3 : index
    %644 = memref.load %arg2[%c3_212, %c3_213] : memref<4x36xf32, #tpu.memory_space<smem>>
    %645 = vector.extract_strided_slice %2 {offsets = [0, 3], sizes = [10, 34], strides = [1, 1]} : vector<10x128xf32> to vector<10x34xf32>
    %646 = vector.broadcast %644 : f32 to vector<10x34xf32>
    %647 = arith.mulf %646, %645 : vector<10x34xf32>
    %648 = arith.addf %643, %647 : vector<10x34xf32>
    %c3_214 = arith.constant 3 : index
    %c4_215 = arith.constant 4 : index
    %649 = memref.load %arg2[%c3_214, %c4_215] : memref<4x36xf32, #tpu.memory_space<smem>>
    %650 = vector.extract_strided_slice %2 {offsets = [0, 4], sizes = [10, 34], strides = [1, 1]} : vector<10x128xf32> to vector<10x34xf32>
    %651 = vector.broadcast %649 : f32 to vector<10x34xf32>
    %652 = arith.mulf %651, %650 : vector<10x34xf32>
    %653 = arith.addf %648, %652 : vector<10x34xf32>
    %c3_216 = arith.constant 3 : index
    %c5_217 = arith.constant 5 : index
    %654 = memref.load %arg2[%c3_216, %c5_217] : memref<4x36xf32, #tpu.memory_space<smem>>
    %655 = vector.extract_strided_slice %2 {offsets = [0, 5], sizes = [10, 34], strides = [1, 1]} : vector<10x128xf32> to vector<10x34xf32>
    %656 = vector.broadcast %654 : f32 to vector<10x34xf32>
    %657 = arith.mulf %656, %655 : vector<10x34xf32>
    %658 = arith.addf %653, %657 : vector<10x34xf32>
    %c3_218 = arith.constant 3 : index
    %c6_219 = arith.constant 6 : index
    %659 = memref.load %arg2[%c3_218, %c6_219] : memref<4x36xf32, #tpu.memory_space<smem>>
    %660 = vector.extract_strided_slice %3 {offsets = [0, 0], sizes = [10, 34], strides = [1, 1]} : vector<10x128xf32> to vector<10x34xf32>
    %661 = vector.broadcast %659 : f32 to vector<10x34xf32>
    %662 = arith.mulf %661, %660 : vector<10x34xf32>
    %663 = arith.addf %658, %662 : vector<10x34xf32>
    %c3_220 = arith.constant 3 : index
    %c7_221 = arith.constant 7 : index
    %664 = memref.load %arg2[%c3_220, %c7_221] : memref<4x36xf32, #tpu.memory_space<smem>>
    %665 = vector.extract_strided_slice %3 {offsets = [0, 1], sizes = [10, 34], strides = [1, 1]} : vector<10x128xf32> to vector<10x34xf32>
    %666 = vector.broadcast %664 : f32 to vector<10x34xf32>
    %667 = arith.mulf %666, %665 : vector<10x34xf32>
    %668 = arith.addf %663, %667 : vector<10x34xf32>
    %c3_222 = arith.constant 3 : index
    %c8_223 = arith.constant 8 : index
    %669 = memref.load %arg2[%c3_222, %c8_223] : memref<4x36xf32, #tpu.memory_space<smem>>
    %670 = vector.extract_strided_slice %3 {offsets = [0, 2], sizes = [10, 34], strides = [1, 1]} : vector<10x128xf32> to vector<10x34xf32>
    %671 = vector.broadcast %669 : f32 to vector<10x34xf32>
    %672 = arith.mulf %671, %670 : vector<10x34xf32>
    %673 = arith.addf %668, %672 : vector<10x34xf32>
    %c3_224 = arith.constant 3 : index
    %c9_225 = arith.constant 9 : index
    %674 = memref.load %arg2[%c3_224, %c9_225] : memref<4x36xf32, #tpu.memory_space<smem>>
    %675 = vector.extract_strided_slice %3 {offsets = [0, 3], sizes = [10, 34], strides = [1, 1]} : vector<10x128xf32> to vector<10x34xf32>
    %676 = vector.broadcast %674 : f32 to vector<10x34xf32>
    %677 = arith.mulf %676, %675 : vector<10x34xf32>
    %678 = arith.addf %673, %677 : vector<10x34xf32>
    %c3_226 = arith.constant 3 : index
    %c10_227 = arith.constant 10 : index
    %679 = memref.load %arg2[%c3_226, %c10_227] : memref<4x36xf32, #tpu.memory_space<smem>>
    %680 = vector.extract_strided_slice %3 {offsets = [0, 4], sizes = [10, 34], strides = [1, 1]} : vector<10x128xf32> to vector<10x34xf32>
    %681 = vector.broadcast %679 : f32 to vector<10x34xf32>
    %682 = arith.mulf %681, %680 : vector<10x34xf32>
    %683 = arith.addf %678, %682 : vector<10x34xf32>
    %c3_228 = arith.constant 3 : index
    %c11_229 = arith.constant 11 : index
    %684 = memref.load %arg2[%c3_228, %c11_229] : memref<4x36xf32, #tpu.memory_space<smem>>
    %685 = vector.extract_strided_slice %3 {offsets = [0, 5], sizes = [10, 34], strides = [1, 1]} : vector<10x128xf32> to vector<10x34xf32>
    %686 = vector.broadcast %684 : f32 to vector<10x34xf32>
    %687 = arith.mulf %686, %685 : vector<10x34xf32>
    %688 = arith.addf %683, %687 : vector<10x34xf32>
    %c3_230 = arith.constant 3 : index
    %c12_231 = arith.constant 12 : index
    %689 = memref.load %arg2[%c3_230, %c12_231] : memref<4x36xf32, #tpu.memory_space<smem>>
    %690 = vector.extract_strided_slice %4 {offsets = [0, 0], sizes = [10, 34], strides = [1, 1]} : vector<10x128xf32> to vector<10x34xf32>
    %691 = vector.broadcast %689 : f32 to vector<10x34xf32>
    %692 = arith.mulf %691, %690 : vector<10x34xf32>
    %693 = arith.addf %688, %692 : vector<10x34xf32>
    %c3_232 = arith.constant 3 : index
    %c13_233 = arith.constant 13 : index
    %694 = memref.load %arg2[%c3_232, %c13_233] : memref<4x36xf32, #tpu.memory_space<smem>>
    %695 = vector.extract_strided_slice %4 {offsets = [0, 1], sizes = [10, 34], strides = [1, 1]} : vector<10x128xf32> to vector<10x34xf32>
    %696 = vector.broadcast %694 : f32 to vector<10x34xf32>
    %697 = arith.mulf %696, %695 : vector<10x34xf32>
    %698 = arith.addf %693, %697 : vector<10x34xf32>
    %c3_234 = arith.constant 3 : index
    %c14_235 = arith.constant 14 : index
    %699 = memref.load %arg2[%c3_234, %c14_235] : memref<4x36xf32, #tpu.memory_space<smem>>
    %700 = vector.extract_strided_slice %4 {offsets = [0, 2], sizes = [10, 34], strides = [1, 1]} : vector<10x128xf32> to vector<10x34xf32>
    %701 = vector.broadcast %699 : f32 to vector<10x34xf32>
    %702 = arith.mulf %701, %700 : vector<10x34xf32>
    %703 = arith.addf %698, %702 : vector<10x34xf32>
    %c3_236 = arith.constant 3 : index
    %c15_237 = arith.constant 15 : index
    %704 = memref.load %arg2[%c3_236, %c15_237] : memref<4x36xf32, #tpu.memory_space<smem>>
    %705 = vector.extract_strided_slice %4 {offsets = [0, 3], sizes = [10, 34], strides = [1, 1]} : vector<10x128xf32> to vector<10x34xf32>
    %706 = vector.broadcast %704 : f32 to vector<10x34xf32>
    %707 = arith.mulf %706, %705 : vector<10x34xf32>
    %708 = arith.addf %703, %707 : vector<10x34xf32>
    %c3_238 = arith.constant 3 : index
    %c16_239 = arith.constant 16 : index
    %709 = memref.load %arg2[%c3_238, %c16_239] : memref<4x36xf32, #tpu.memory_space<smem>>
    %710 = vector.extract_strided_slice %4 {offsets = [0, 4], sizes = [10, 34], strides = [1, 1]} : vector<10x128xf32> to vector<10x34xf32>
    %711 = vector.broadcast %709 : f32 to vector<10x34xf32>
    %712 = arith.mulf %711, %710 : vector<10x34xf32>
    %713 = arith.addf %708, %712 : vector<10x34xf32>
    %c3_240 = arith.constant 3 : index
    %c17_241 = arith.constant 17 : index
    %714 = memref.load %arg2[%c3_240, %c17_241] : memref<4x36xf32, #tpu.memory_space<smem>>
    %715 = vector.extract_strided_slice %4 {offsets = [0, 5], sizes = [10, 34], strides = [1, 1]} : vector<10x128xf32> to vector<10x34xf32>
    %716 = vector.broadcast %714 : f32 to vector<10x34xf32>
    %717 = arith.mulf %716, %715 : vector<10x34xf32>
    %718 = arith.addf %713, %717 : vector<10x34xf32>
    %c3_242 = arith.constant 3 : index
    %c18_243 = arith.constant 18 : index
    %719 = memref.load %arg2[%c3_242, %c18_243] : memref<4x36xf32, #tpu.memory_space<smem>>
    %720 = vector.extract_strided_slice %5 {offsets = [0, 0], sizes = [10, 34], strides = [1, 1]} : vector<10x128xf32> to vector<10x34xf32>
    %721 = vector.broadcast %719 : f32 to vector<10x34xf32>
    %722 = arith.mulf %721, %720 : vector<10x34xf32>
    %723 = arith.addf %718, %722 : vector<10x34xf32>
    %c3_244 = arith.constant 3 : index
    %c19_245 = arith.constant 19 : index
    %724 = memref.load %arg2[%c3_244, %c19_245] : memref<4x36xf32, #tpu.memory_space<smem>>
    %725 = vector.extract_strided_slice %5 {offsets = [0, 1], sizes = [10, 34], strides = [1, 1]} : vector<10x128xf32> to vector<10x34xf32>
    %726 = vector.broadcast %724 : f32 to vector<10x34xf32>
    %727 = arith.mulf %726, %725 : vector<10x34xf32>
    %728 = arith.addf %723, %727 : vector<10x34xf32>
    %c3_246 = arith.constant 3 : index
    %c20_247 = arith.constant 20 : index
    %729 = memref.load %arg2[%c3_246, %c20_247] : memref<4x36xf32, #tpu.memory_space<smem>>
    %730 = vector.extract_strided_slice %5 {offsets = [0, 2], sizes = [10, 34], strides = [1, 1]} : vector<10x128xf32> to vector<10x34xf32>
    %731 = vector.broadcast %729 : f32 to vector<10x34xf32>
    %732 = arith.mulf %731, %730 : vector<10x34xf32>
    %733 = arith.addf %728, %732 : vector<10x34xf32>
    %c3_248 = arith.constant 3 : index
    %c21_249 = arith.constant 21 : index
    %734 = memref.load %arg2[%c3_248, %c21_249] : memref<4x36xf32, #tpu.memory_space<smem>>
    %735 = vector.extract_strided_slice %5 {offsets = [0, 3], sizes = [10, 34], strides = [1, 1]} : vector<10x128xf32> to vector<10x34xf32>
    %736 = vector.broadcast %734 : f32 to vector<10x34xf32>
    %737 = arith.mulf %736, %735 : vector<10x34xf32>
    %738 = arith.addf %733, %737 : vector<10x34xf32>
    %c3_250 = arith.constant 3 : index
    %c22_251 = arith.constant 22 : index
    %739 = memref.load %arg2[%c3_250, %c22_251] : memref<4x36xf32, #tpu.memory_space<smem>>
    %740 = vector.extract_strided_slice %5 {offsets = [0, 4], sizes = [10, 34], strides = [1, 1]} : vector<10x128xf32> to vector<10x34xf32>
    %741 = vector.broadcast %739 : f32 to vector<10x34xf32>
    %742 = arith.mulf %741, %740 : vector<10x34xf32>
    %743 = arith.addf %738, %742 : vector<10x34xf32>
    %c3_252 = arith.constant 3 : index
    %c23_253 = arith.constant 23 : index
    %744 = memref.load %arg2[%c3_252, %c23_253] : memref<4x36xf32, #tpu.memory_space<smem>>
    %745 = vector.extract_strided_slice %5 {offsets = [0, 5], sizes = [10, 34], strides = [1, 1]} : vector<10x128xf32> to vector<10x34xf32>
    %746 = vector.broadcast %744 : f32 to vector<10x34xf32>
    %747 = arith.mulf %746, %745 : vector<10x34xf32>
    %748 = arith.addf %743, %747 : vector<10x34xf32>
    %c3_254 = arith.constant 3 : index
    %c24_255 = arith.constant 24 : index
    %749 = memref.load %arg2[%c3_254, %c24_255] : memref<4x36xf32, #tpu.memory_space<smem>>
    %750 = vector.extract_strided_slice %6 {offsets = [0, 0], sizes = [10, 34], strides = [1, 1]} : vector<10x128xf32> to vector<10x34xf32>
    %751 = vector.broadcast %749 : f32 to vector<10x34xf32>
    %752 = arith.mulf %751, %750 : vector<10x34xf32>
    %753 = arith.addf %748, %752 : vector<10x34xf32>
    %c3_256 = arith.constant 3 : index
    %c25_257 = arith.constant 25 : index
    %754 = memref.load %arg2[%c3_256, %c25_257] : memref<4x36xf32, #tpu.memory_space<smem>>
    %755 = vector.extract_strided_slice %6 {offsets = [0, 1], sizes = [10, 34], strides = [1, 1]} : vector<10x128xf32> to vector<10x34xf32>
    %756 = vector.broadcast %754 : f32 to vector<10x34xf32>
    %757 = arith.mulf %756, %755 : vector<10x34xf32>
    %758 = arith.addf %753, %757 : vector<10x34xf32>
    %c3_258 = arith.constant 3 : index
    %c26_259 = arith.constant 26 : index
    %759 = memref.load %arg2[%c3_258, %c26_259] : memref<4x36xf32, #tpu.memory_space<smem>>
    %760 = vector.extract_strided_slice %6 {offsets = [0, 2], sizes = [10, 34], strides = [1, 1]} : vector<10x128xf32> to vector<10x34xf32>
    %761 = vector.broadcast %759 : f32 to vector<10x34xf32>
    %762 = arith.mulf %761, %760 : vector<10x34xf32>
    %763 = arith.addf %758, %762 : vector<10x34xf32>
    %c3_260 = arith.constant 3 : index
    %c27_261 = arith.constant 27 : index
    %764 = memref.load %arg2[%c3_260, %c27_261] : memref<4x36xf32, #tpu.memory_space<smem>>
    %765 = vector.extract_strided_slice %6 {offsets = [0, 3], sizes = [10, 34], strides = [1, 1]} : vector<10x128xf32> to vector<10x34xf32>
    %766 = vector.broadcast %764 : f32 to vector<10x34xf32>
    %767 = arith.mulf %766, %765 : vector<10x34xf32>
    %768 = arith.addf %763, %767 : vector<10x34xf32>
    %c3_262 = arith.constant 3 : index
    %c28_263 = arith.constant 28 : index
    %769 = memref.load %arg2[%c3_262, %c28_263] : memref<4x36xf32, #tpu.memory_space<smem>>
    %770 = vector.extract_strided_slice %6 {offsets = [0, 4], sizes = [10, 34], strides = [1, 1]} : vector<10x128xf32> to vector<10x34xf32>
    %771 = vector.broadcast %769 : f32 to vector<10x34xf32>
    %772 = arith.mulf %771, %770 : vector<10x34xf32>
    %773 = arith.addf %768, %772 : vector<10x34xf32>
    %c3_264 = arith.constant 3 : index
    %c29_265 = arith.constant 29 : index
    %774 = memref.load %arg2[%c3_264, %c29_265] : memref<4x36xf32, #tpu.memory_space<smem>>
    %775 = vector.extract_strided_slice %6 {offsets = [0, 5], sizes = [10, 34], strides = [1, 1]} : vector<10x128xf32> to vector<10x34xf32>
    %776 = vector.broadcast %774 : f32 to vector<10x34xf32>
    %777 = arith.mulf %776, %775 : vector<10x34xf32>
    %778 = arith.addf %773, %777 : vector<10x34xf32>
    %c3_266 = arith.constant 3 : index
    %c30_267 = arith.constant 30 : index
    %779 = memref.load %arg2[%c3_266, %c30_267] : memref<4x36xf32, #tpu.memory_space<smem>>
    %780 = vector.extract_strided_slice %7 {offsets = [0, 0], sizes = [10, 34], strides = [1, 1]} : vector<10x128xf32> to vector<10x34xf32>
    %781 = vector.broadcast %779 : f32 to vector<10x34xf32>
    %782 = arith.mulf %781, %780 : vector<10x34xf32>
    %783 = arith.addf %778, %782 : vector<10x34xf32>
    %c3_268 = arith.constant 3 : index
    %c31_269 = arith.constant 31 : index
    %784 = memref.load %arg2[%c3_268, %c31_269] : memref<4x36xf32, #tpu.memory_space<smem>>
    %785 = vector.extract_strided_slice %7 {offsets = [0, 1], sizes = [10, 34], strides = [1, 1]} : vector<10x128xf32> to vector<10x34xf32>
    %786 = vector.broadcast %784 : f32 to vector<10x34xf32>
    %787 = arith.mulf %786, %785 : vector<10x34xf32>
    %788 = arith.addf %783, %787 : vector<10x34xf32>
    %c3_270 = arith.constant 3 : index
    %c32_271 = arith.constant 32 : index
    %789 = memref.load %arg2[%c3_270, %c32_271] : memref<4x36xf32, #tpu.memory_space<smem>>
    %790 = vector.extract_strided_slice %7 {offsets = [0, 2], sizes = [10, 34], strides = [1, 1]} : vector<10x128xf32> to vector<10x34xf32>
    %791 = vector.broadcast %789 : f32 to vector<10x34xf32>
    %792 = arith.mulf %791, %790 : vector<10x34xf32>
    %793 = arith.addf %788, %792 : vector<10x34xf32>
    %c3_272 = arith.constant 3 : index
    %c33_273 = arith.constant 33 : index
    %794 = memref.load %arg2[%c3_272, %c33_273] : memref<4x36xf32, #tpu.memory_space<smem>>
    %795 = vector.extract_strided_slice %7 {offsets = [0, 3], sizes = [10, 34], strides = [1, 1]} : vector<10x128xf32> to vector<10x34xf32>
    %796 = vector.broadcast %794 : f32 to vector<10x34xf32>
    %797 = arith.mulf %796, %795 : vector<10x34xf32>
    %798 = arith.addf %793, %797 : vector<10x34xf32>
    %c3_274 = arith.constant 3 : index
    %c34_275 = arith.constant 34 : index
    %799 = memref.load %arg2[%c3_274, %c34_275] : memref<4x36xf32, #tpu.memory_space<smem>>
    %800 = vector.extract_strided_slice %7 {offsets = [0, 4], sizes = [10, 34], strides = [1, 1]} : vector<10x128xf32> to vector<10x34xf32>
    %801 = vector.broadcast %799 : f32 to vector<10x34xf32>
    %802 = arith.mulf %801, %800 : vector<10x34xf32>
    %803 = arith.addf %798, %802 : vector<10x34xf32>
    %c3_276 = arith.constant 3 : index
    %c35_277 = arith.constant 35 : index
    %804 = memref.load %arg2[%c3_276, %c35_277] : memref<4x36xf32, #tpu.memory_space<smem>>
    %805 = vector.extract_strided_slice %7 {offsets = [0, 5], sizes = [10, 34], strides = [1, 1]} : vector<10x128xf32> to vector<10x34xf32>
    %806 = vector.broadcast %804 : f32 to vector<10x34xf32>
    %807 = arith.mulf %806, %805 : vector<10x34xf32>
    %808 = arith.addf %803, %807 : vector<10x34xf32>
    %c3_278 = arith.constant 3 : index
    %809 = memref.load %arg3[%c3_278] : memref<4xf32, #tpu.memory_space<smem>>
    %810 = vector.broadcast %809 : f32 to vector<10x34xf32>
    %811 = arith.addf %808, %810 : vector<10x34xf32>
    %812 = math.tanh %811 : vector<10x34xf32>
    %cst_279 = arith.constant -1.000000e+30 : f32
    %813 = vector.broadcast %cst_279 : f32 to vector<10x34xf32>
    %814 = arith.select %20, %812, %813 : vector<10x34xi1>, vector<10x34xf32>
    %815 = vector.extract_strided_slice %814 {offsets = [0, 0], sizes = [10, 32], strides = [1, 1]} : vector<10x34xf32> to vector<10x32xf32>
    %816 = vector.extract_strided_slice %814 {offsets = [0, 1], sizes = [10, 32], strides = [1, 1]} : vector<10x34xf32> to vector<10x32xf32>
    %817 = arith.maximumf %815, %816 : vector<10x32xf32>
    %818 = vector.extract_strided_slice %814 {offsets = [0, 2], sizes = [10, 32], strides = [1, 1]} : vector<10x34xf32> to vector<10x32xf32>
    %819 = arith.maximumf %817, %818 : vector<10x32xf32>
    %820 = vector.extract_strided_slice %819 {offsets = [0, 0], sizes = [8, 32], strides = [1, 1]} : vector<10x32xf32> to vector<8x32xf32>
    %821 = vector.extract_strided_slice %819 {offsets = [1, 0], sizes = [8, 32], strides = [1, 1]} : vector<10x32xf32> to vector<8x32xf32>
    %822 = arith.maximumf %820, %821 : vector<8x32xf32>
    %823 = vector.extract_strided_slice %819 {offsets = [2, 0], sizes = [8, 32], strides = [1, 1]} : vector<10x32xf32> to vector<8x32xf32>
    %824 = arith.maximumf %822, %823 : vector<8x32xf32>
    %825 = arith.truncf %824 : vector<8x32xf32> to vector<8x32xbf16>
    %c3_280 = arith.constant 3 : index
    %c0_281 = arith.constant 0 : index
    %c0_282 = arith.constant 0 : index
    %826 = vector.load %arg4[%c3_280, %c0_281, %c0_282] : memref<4x32x128xbf16, #tpu.memory_space<vmem>>, vector<1x32x128xbf16>
    %827 = vector.shape_cast %826 : vector<1x32x128xbf16> to vector<32x128xbf16>
    %cst_283 = arith.constant dense<0.000000e+00> : vector<8x128xf32>
    %828 = tpu.matmul %825, %827, %cst_283 {dimension_numbers = #tpu.dot_dimension_numbers<[1], [0], [0], [1], [0, 0, 1, 1], [], []>} : vector<8x32xbf16>, vector<32x128xbf16>, vector<8x128xf32> -> vector<8x128xf32>
    %829 = arith.addf %627, %828 : vector<8x128xf32>
    %c0_284 = arith.constant 0 : index
    %c0_285 = arith.constant 0 : index
    %830 = vector.load %arg5[%c0_284, %c0_285] : memref<1x128xf32, #tpu.memory_space<vmem>>, vector<1x128xf32>
    %831 = vector.broadcast %830 : vector<1x128xf32> to vector<8x128xf32>
    %832 = arith.addf %829, %831 : vector<8x128xf32>
    %cst_286 = arith.constant 0.000000e+00 : f32
    %833 = vector.broadcast %cst_286 : f32 to vector<8x128xf32>
    %834 = arith.subf %833, %832 : vector<8x128xf32>
    %835 = math.exp %834 : vector<8x128xf32>
    %cst_287 = arith.constant 1.000000e+00 : f32
    %836 = vector.broadcast %cst_287 : f32 to vector<8x128xf32>
    %837 = arith.addf %836, %835 : vector<8x128xf32>
    %838 = tpu.reciprocal %837 {approx = true} : vector<8x128xf32> -> vector<8x128xf32>
    %c0_288 = arith.constant 0 : index
    %c0_289 = arith.constant 0 : index
    %c0_290 = arith.constant 0 : index
    %839 = vector.load %arg6[%c0_288, %c0_289, %c0_290] : memref<1x8x128xf32, #tpu.memory_space<vmem>>, vector<1x8x128xf32>
    %840 = vector.shape_cast %839 : vector<1x8x128xf32> to vector<8x128xf32>
    %841 = arith.mulf %838, %840 : vector<8x128xf32>
    %c0_291 = arith.constant 0 : index
    %c0_292 = arith.constant 0 : index
    %c0_293 = arith.constant 0 : index
    %842 = vector.load %arg7[%c0_291, %c0_292, %c0_293] : memref<1x8x128xf32, #tpu.memory_space<vmem>>, vector<1x8x128xf32>
    %843 = vector.shape_cast %842 : vector<1x8x128xf32> to vector<8x128xf32>
    %844 = vector.shape_cast %841 : vector<8x128xf32> to vector<1x8x128xf32>
    tpu.vector_store %arg7[%c0_291, %c0_292, %c0_293], %844 {strides = array<i32>} : memref<1x8x128xf32, #tpu.memory_space<vmem>>, vector<1x8x128xf32>,
    return
  }
  func.func @transform_0(%arg0: i32) -> (i32, i32, i32) {
    %c0_i32 = arith.constant 0 : i32
    %c0_i32_0 = arith.constant 0 : i32
    %c0_i32_1 = arith.constant 0 : i32
    return %arg0, %c0_i32, %c0_i32_0 : i32, i32, i32
  }
  func.func @transform_1(%arg0: i32) -> (i32, i32) {
    %c0_i32 = arith.constant 0 : i32
    %c0_i32_0 = arith.constant 0 : i32
    %c0_i32_1 = arith.constant 0 : i32
    return %c0_i32, %c0_i32_0 : i32, i32
  }
  func.func @transform_2(%arg0: i32) -> i32 {
    %c0_i32 = arith.constant 0 : i32
    %c0_i32_0 = arith.constant 0 : i32
    return %c0_i32 : i32
  }
  func.func @transform_3(%arg0: i32) -> (i32, i32, i32) {
    %c0_i32 = arith.constant 0 : i32
    %c0_i32_0 = arith.constant 0 : i32
    %c0_i32_1 = arith.constant 0 : i32
    %c0_i32_2 = arith.constant 0 : i32
    return %c0_i32, %c0_i32_0, %c0_i32_1 : i32, i32, i32
  }
  func.func @transform_4(%arg0: i32) -> (i32, i32) {
    %c0_i32 = arith.constant 0 : i32
    %c0_i32_0 = arith.constant 0 : i32
    %c0_i32_1 = arith.constant 0 : i32
    return %c0_i32, %c0_i32_0 : i32, i32
  }
  func.func @transform_5(%arg0: i32) -> (i32, i32, i32) {
    %c0_i32 = arith.constant 0 : i32
    %c0_i32_0 = arith.constant 0 : i32
    %c0_i32_1 = arith.constant 0 : i32
    return %arg0, %c0_i32, %c0_i32_0 : i32, i32, i32
  }
  func.func @transform_6(%arg0: i32) -> (i32, i32, i32) {
    %c0_i32 = arith.constant 0 : i32
    %c0_i32_0 = arith.constant 0 : i32
    %c0_i32_1 = arith.constant 0 : i32
    return %arg0, %c0_i32, %c0_i32_0 : i32, i32, i32
  }
}

</mosaic_0001>

<bundles_post_ra>
// kernel: cldnn_forward.4
= control target key start
LH: loop header
LB: loop body
LE: loop exit
PB: predicated region body
PF: predicated region fallthrough
CT: control target
= control target key end

     0   :  { %v210_v0 = vmov 0.0   ;;  %vm47_vm0 = vcmask 1040384   ;;  %vm211_vm1 = vmmov 0   ;;  %vm43_vm2 = vcmask 146432   ;;  %s272_s1 = inlined_call_operand.vmem [shape: bf16[18,32], index: 1, kind: input, shape index: {}]   ;;  %s273_s0 = inlined_call_operand.vmem [shape: f32[16,18], index: 0, kind: input, shape index: {}]   ;;  %s274_s3 = inlined_call_operand.vmem [shape: bf16[32,96], index: 3, kind: input, shape index: {}]   ;;  %s275_s2 = inlined_call_operand.vmem [shape: f32[1,32], index: 2, kind: input, shape index: {}]   ;;  %s276_s4 = inlined_call_operand.vmem [shape: f32[1,96], index: 4, kind: input, shape index: {}]   ;;  %s277_s5 = inlined_call_operand.vmem [shape: f32[16,96], index: 5, kind: output, shape index: {}]  }
   0x1   :  { %184 = vmatprep.subr.bf16.mxu0 %v210_v0  ;;  %v202_v1 = vld [vmem:[%s272_s1] sm:$0xff]   ;;  %188 = vmatprep.mubr.msk.bf16.mxu0 %vm211_vm1, %v210_v0  ;;  %v203_v2 = vld [vmem:[%s272_s1 + $0x8] ss:$0 sps:$4 sm:$0x11]   ;;  %vm118_vm3 = vcmask 261120   ;;  %vm163_vm4 = vcmask 785408  }
   0x2   :  { %192 = vmatprep.subr.bf16.mxu1 %v210_v0  ;;  %196 = vmatprep.mubr.msk.bf16.mxu1 %vm211_vm1, %v210_v0  ;;  %v21_v3 = vld [vmem:[%s273_s0] sm:$0xff]  ;;  %v22_v4 = vld [vmem:[%s273_s0 + $0x8] sm:$0xff]  ;;  %v49_v5 = vsel %vm47_vm0, %v203_v2, 0 }
   0x3   :  { %185 = vmatpush3.bf16.msra.mxu0 %v202_v1  ;;  %v23_v6 = vpack.c.bf16 %v22_v4, %v21_v3  ;;  %v204_v7 = vld [vmem:[%s274_s3] sm:$0xff]   ;;  %v205_v8 = vld [vmem:[%s274_s3 + $0x8] sm:$0xff]  }
   0x4   :  { %186 = vmatprep.subr.bf16.mxu0 %v210_v0  ;;  %193 = vmatpush3.bf16.msra.mxu1 %v204_v7  ;;  %v170_v9 = vld [vmem:[%s275_s2] ss:$0 sm:$0xff] }
   0x5   :  { %194 = vmatprep.subr.bf16.mxu1 %v210_v0  ;;  %v174_v19 = vld [vmem:[%s276_s4] ss:$0 sm:$0xff] }
   0x7   :  { %187 = vmatpush3.bf16.msra.mxu0 %v49_v5 }
   0x8   :  { %195 = vmatpush3.bf16.msra.mxu1 %v205_v8 }
   0xa   :  { %189 = vmatmul.mubr.msk.bf16.vlgmr.msra.gmra.mrb[0].mxu0 %vm43_vm2, %v23_v6 }
  0xdd   :  { %v85_v10 = vpop.f32.mrb[0].mxu0 }
  0xde   :  { %v86_v11 = vadd.f32 %v170_v9, %v85_v10  ;;  %v190_v12 = vpop.f32.mrb[1].mxu0 }
  0xdf   :  { %v88_v13 = vpop.f32.mrb[2].mxu0 }
  0xe0   :  { %v89_v14 = vadd.f32 %v170_v9, %v88_v13  ;;  %v191_v15 = vpop.f32.mrb[3].mxu0  ;;  %206 = vtanh.f32 %v86_v11 }
  0xe2   :  { %208 = vtanh.f32 %v89_v14 }
  0xea   :  { %v207_v16 = vpop.eup %206 }
  0xec   :  { %v209_v17 = vpop.eup %208 }
  0xed   :  { %v94_v18 = vpack.c.bf16 %v209_v17, %v207_v16 }
  0xef   :  { %197 = vmatmul.mubr.msk.bf16.vlgmr.msra.gmra.mrb[0].mxu1 %vm118_vm3, %v94_v18 }
 0x1c2   :  { %v156_v20 = vpop.f32.mrb[0].mxu1 }
 0x1c3   :  { %v157_v21 = vadd.f32 %v174_v19, %v156_v20  ;;  %v198_v22 = vpop.f32.mrb[1].mxu1 }
 0x1c4   :  { %v159_v23 = vpop.f32.mrb[2].mxu1 }
 0x1c5   :  { %164 = vst.msk [vmem:[%s277_s5] sm:$0xff] %vm163_vm4, %v157_v21  ;;  %v160_v24 = vadd.f32 %v174_v19, %v159_v23  ;;  %v199_v25 = vpop.f32.mrb[3].mxu1 }
 0x1c7   :  { %165 = vst.msk [vmem:[%s277_s5 + $0x8] sm:$0xff] %vm163_vm4, %v160_v24 }

// kernel: cldnn_forward.6
= control target key start
LH: loop header
LB: loop body
LE: loop exit
PB: predicated region body
PF: predicated region fallthrough
CT: control target
= control target key end

     0   :  { %vm19_vm0 = vcmask 261120   ;;  %v858_v0 = vmov 0.0   ;;  %vm859_vm1 = vmmov 0   ;;  %s860_s17 = smov 64   ;;  %s862_s20 = smov 32   ;;  %s1096_s1 = inlined_call_operand.vmem [shape: bf16[32,96], index: 1, kind: input, shape index: {}]   ;;  %s1097_s2 = inlined_call_operand.vmem [shape: f32[1,96], index: 2, kind: input, shape index: {}]   ;;  %s1098_s0 = inlined_call_operand.vmem [shape: f32[8,8,96], index: 0, kind: input, shape index: {}]   ;;  %s1099_s3 = inlined_call_operand.vmem [shape: f32[8,8,32], index: 3, kind: output, shape index: {}]  }
   0x1   :  { %739 = vmatprep.subr.bf16.mxu0 %v858_v0  ;;  %v887_v1 = vld [vmem:[%s1096_s1] sm:$0xff]   ;;  %743 = vmatprep.mubr.msk.bf16.mxu0 %vm859_vm1, %v858_v0  ;;  %20 = vst.msk [vmem:[#allocation2] sm:$0xff] %vm19_vm0, %v858_v0  ;;  %v900_v2 = vld [vmem:[%s1096_s1 + $0x8] sm:$0xff]   ;;  %v698_v60 = vld [vmem:[%s1098_s0 + $0x10] sm:$0xff] }
   0x2   :  { %747 = vmatprep.subr.bf16.mxu1 %v858_v0  ;;  %751 = vmatprep.mubr.msk.bf16.mxu1 %vm859_vm1, %v858_v0  ;;  %v919_v5 = vld [vmem:[%s1097_s2] ss:$0 sm:$0xff]  ;;  %s861_s2 = smov 96   ;;  %v695_v36 = vld [vmem:[%s1098_s0 + $0x8] sm:$0xff] }
   0x3   :  { %740 = vmatpush3.bf16.msra.mxu0 %v887_v1  ;;  %748 = vmatpush3.bf16.msra.mxu1 %v887_v1  ;;  %v90_v11 = vld [vmem:[%s1098_s0] sm:$0xff] }
   0x4   :  { %741 = vmatprep.subr.bf16.mxu0 %v858_v0  ;;  %749 = vmatprep.subr.bf16.mxu1 %v858_v0 }
   0x7   :  { %742 = vmatpush3.bf16.msra.mxu0 %v900_v2  ;;  %750 = vmatpush3.bf16.msra.mxu1 %v900_v2 }
   0x8   :  { %v26_v3 = vld [vmem:[#allocation2] sm:$0xff]  ;;  %755 = vmatprep.subr.bf16.mxu0 %v858_v0  ;;  %763 = vmatprep.subr.bf16.mxu1 %v858_v0 }
   0x9   :  { %v27_v4 = vpack.c.bf16 %v26_v3, %v26_v3 }
   0xb   :  { %744 = vmatmul.mubr.msk.bf16.vlgmr.msra.gmra.mrb[0].mxu0 %vm19_vm0, %v27_v4 }
   0xc   :  { %756 = vmatpush3.bf16.msra.mxu0 %v887_v1  ;;  %759 = vmatprep.mubr.msk.bf16.mxu0 %vm859_vm1, %v858_v0 }
   0xd   :  { %757 = vmatprep.subr.bf16.mxu0 %v858_v0 }
  0x10   :  { %758 = vmatpush3.bf16.msra.mxu0 %v900_v2 }
  0x11   :  { %771 = vmatprep.subr.bf16.mxu0 %v858_v0 }
  0xde   :  { %v84_v6 = vpop.f32.mrb[0].mxu0 }
  0xdf   :  { %v85_v7 = vadd.f32 %v919_v5, %v84_v6  ;;  %v745_v8 = vpop.f32.mrb[1].mxu0 }
  0xe0   :  { %v87_v9 = vpop.f32.mrb[2].mxu0 }
  0xe1   :  { %98 = vrot.lane.b32.xlu0 %v85_v7, %s860_s17  ;;  %v746_v10 = vpop.f32.mrb[3].mxu0  ;;  %v91_v12 = vadd.f32 %v90_v11, %v85_v7 }
  0xe3   :  { %v92_v13 = vsub.f32 0.0, %v91_v12 }
  0xe5   :  { %v93_v14 = vmul.f32 1.442695, %v92_v13 }
  0xe7   :  { %810 = vpow2.f32 %v93_v14 }
  0xf1   :  { %v811_v15 = vpop.eup %810 }
  0xf2   :  { %v95_v16 = vadd.f32 1.0, %v811_v15 }
  0xf4   :  { %812 = vrcp.f32 %v95_v16 }
  0xfe   :  { %v813_v17 = vpop.eup %812 }
  0xff   :  { %v108_v24 = vsub.f32 1.0, %v813_v17 }
 0x153   :  { %v99_v18 = vpop.permute.xlu0 %98 }
 0x154   :  { %v101_v19 = vmul.f32 %v813_v17, %v99_v18 }
 0x156   :  { %103 = vrot.lane.b32.xlu0 %v101_v19, %s860_s17 }
 0x1c8   :  { %v104_v20 = vpop.permute.xlu0 %103 }
 0x1c9   :  { %v106_v21 = vadd.f32 %v104_v20, %v90_v11 }
 0x1cb   :  { %814 = vtanh.f32 %v106_v21 }
 0x1d5   :  { %v815_v22 = vpop.eup %814 }
 0x1d6   :  { %110 = vrot.lane.b32.xlu1 %v815_v22, %s861_s2 }
 0x1da   :  { %115 = vrot.lane.b32.xlu1 %v26_v3, %s862_s20 }
 0x248   :  { %v111_v23 = vpop.permute.xlu1 %110 }
 0x249   :  { %v113_v26 = vmul.f32 %v111_v23, %v108_v24  ;;  %v701_v24 = vld [vmem:[%s1098_s0 + $0x18] sm:$0xff] }
 0x24c   :  { %v116_v25 = vpop.permute.xlu1 %115 }
 0x24d   :  { %v118_v27 = vmul.f32 %v813_v17, %v116_v25 }
 0x24f   :  { %v928_v28 = vadd.f32 %v118_v27, %v113_v26 }
 0x251   :  { %v125_v29 = vpack.c.bf16 %v928_v28, %v928_v28 }
 0x253   :  { %127 = vrot.lane.b32.xlu0 %v125_v29, %s861_s2 }
 0x2c5   :  { %v128_v30 = vpop.permute.xlu0 %127 }
 0x2c6   :  { %752 = vmatmul.mubr.msk.bf16.vlgmr.msra.gmra.mrb[0].mxu1 %vm19_vm0, %v128_v30 }
 0x2c7   :  { %764 = vmatpush3.bf16.msra.mxu1 %v887_v1  ;;  %767 = vmatprep.mubr.msk.bf16.mxu1 %vm859_vm1, %v858_v0 }
 0x2c8   :  { %765 = vmatprep.subr.bf16.mxu1 %v858_v0 }
 0x2cb   :  { %766 = vmatpush3.bf16.msra.mxu1 %v900_v2 }
 0x2cc   :  { %779 = vmatprep.subr.bf16.mxu1 %v858_v0 }
 0x399   :  { %v166_v31 = vpop.f32.mrb[0].mxu1 }
 0x39a   :  { %v167_v32 = vadd.f32 %v919_v5, %v166_v31  ;;  %v753_v33 = vpop.f32.mrb[1].mxu1 }
 0x39b   :  { %v169_v34 = vpop.f32.mrb[2].mxu1 }
 0x39c   :  { %181 = vrot.lane.b32.xlu1 %v167_v32, %s860_s17  ;;  %v754_v35 = vpop.f32.mrb[3].mxu1  ;;  %v174_v37 = vadd.f32 %v695_v36, %v167_v32 }
 0x39e   :  { %v175_v38 = vsub.f32 0.0, %v174_v37 }
 0x3a0   :  { %v176_v39 = vmul.f32 1.442695, %v175_v38 }
 0x3a2   :  { %816 = vpow2.f32 %v176_v39 }
 0x3ac   :  { %v817_v40 = vpop.eup %816 }
 0x3ad   :  { %v178_v41 = vadd.f32 1.0, %v817_v40 }
 0x3af   :  { %818 = vrcp.f32 %v178_v41 }
 0x3b9   :  { %v819_v42 = vpop.eup %818 }
 0x3ba   :  { %v191_v48 = vsub.f32 1.0, %v819_v42  ;;  %v197_v50 = vmul.f32 %v819_v42, %v928_v28 }
 0x40e   :  { %v182_v43 = vpop.permute.xlu1 %181 }
 0x40f   :  { %v184_v44 = vmul.f32 %v819_v42, %v182_v43 }
 0x411   :  { %186 = vrot.lane.b32.xlu0 %v184_v44, %s860_s17 }
 0x483   :  { %v187_v45 = vpop.permute.xlu0 %186 }
 0x484   :  { %v189_v46 = vadd.f32 %v695_v36, %v187_v45 }
 0x486   :  { %820 = vtanh.f32 %v189_v46 }
 0x490   :  { %v821_v47 = vpop.eup %820 }
 0x491   :  { %193 = vrot.lane.b32.xlu1 %v821_v47, %s861_s2 }
 0x503   :  { %v194_v49 = vpop.permute.xlu1 %193 }
 0x504   :  { %v196_v51 = vmul.f32 %v194_v49, %v191_v48  ;;  %v704_v49 = vld [vmem:[%s1098_s0 + $0x20] sm:$0xff] }
 0x506   :  { %v948_v52 = vadd.f32 %v197_v50, %v196_v51 }
 0x508   :  { %v205_v53 = vpack.c.bf16 %v948_v52, %v948_v52 }
 0x50a   :  { %207 = vrot.lane.b32.xlu0 %v205_v53, %s861_s2 }
 0x57c   :  { %v208_v54 = vpop.permute.xlu0 %207 }
 0x57d   :  { %760 = vmatmul.mubr.msk.bf16.vlgmr.msra.gmra.mrb[4].mxu0 %vm19_vm0, %v208_v54 }
 0x57e   :  { %772 = vmatpush3.bf16.msra.mxu0 %v887_v1  ;;  %775 = vmatprep.mubr.msk.bf16.mxu0 %vm859_vm1, %v858_v0 }
 0x57f   :  { %773 = vmatprep.subr.bf16.mxu0 %v858_v0 }
 0x582   :  { %774 = vmatpush3.bf16.msra.mxu0 %v900_v2 }
 0x583   :  { %787 = vmatprep.subr.bf16.mxu0 %v858_v0 }
 0x650   :  { %v246_v55 = vpop.f32.mrb[4].mxu0 }
 0x651   :  { %v247_v56 = vadd.f32 %v919_v5, %v246_v55  ;;  %v761_v57 = vpop.f32.mrb[5].mxu0 }
 0x652   :  { %v249_v58 = vpop.f32.mrb[6].mxu0 }
 0x653   :  { %261 = vrot.lane.b32.xlu1 %v247_v56, %s860_s17  ;;  %v762_v59 = vpop.f32.mrb[7].mxu0  ;;  %v254_v61 = vadd.f32 %v698_v60, %v247_v56 }
 0x655   :  { %v255_v62 = vsub.f32 0.0, %v254_v61 }
 0x657   :  { %v256_v63 = vmul.f32 1.442695, %v255_v62 }
 0x659   :  { %822 = vpow2.f32 %v256_v63 }
 0x663   :  { %v823_v3 = vpop.eup %822 }
 0x664   :  { %v258_v4 = vadd.f32 1.0, %v823_v3 }
 0x666   :  { %824 = vrcp.f32 %v258_v4 }
 0x670   :  { %v825_v6 = vpop.eup %824 }
 0x671   :  { %v271_v12 = vsub.f32 1.0, %v825_v6  ;;  %v277_v14 = vmul.f32 %v825_v6, %v948_v52 }
 0x6c5   :  { %v262_v7 = vpop.permute.xlu1 %261 }
 0x6c6   :  { %v264_v8 = vmul.f32 %v825_v6, %v262_v7 }
 0x6c8   :  { %266 = vrot.lane.b32.xlu0 %v264_v8, %s860_s17 }
 0x73a   :  { %v267_v9 = vpop.permute.xlu0 %266 }
 0x73b   :  { %v269_v10 = vadd.f32 %v698_v60, %v267_v9 }
 0x73d   :  { %826 = vtanh.f32 %v269_v10 }
 0x747   :  { %v827_v11 = vpop.eup %826 }
 0x748   :  { %273 = vrot.lane.b32.xlu1 %v827_v11, %s861_s2 }
 0x7ba   :  { %v274_v13 = vpop.permute.xlu1 %273 }
 0x7bb   :  { %v276_v15 = vmul.f32 %v274_v13, %v271_v12 }
 0x7bd   :  { %v968_v16 = vadd.f32 %v277_v14, %v276_v15  ;;  %v707_v14 = vld [vmem:[%s1098_s0 + $0x28] sm:$0xff] }
 0x7bf   :  { %v285_v17 = vpack.c.bf16 %v968_v16, %v968_v16 }
 0x7c1   :  { %287 = vrot.lane.b32.xlu0 %v285_v17, %s861_s2 }
 0x833   :  { %v288_v18 = vpop.permute.xlu0 %287 }
 0x834   :  { %768 = vmatmul.mubr.msk.bf16.vlgmr.msra.gmra.mrb[4].mxu1 %vm19_vm0, %v288_v18 }
 0x835   :  { %780 = vmatpush3.bf16.msra.mxu1 %v887_v1  ;;  %783 = vmatprep.mubr.msk.bf16.mxu1 %vm859_vm1, %v858_v0 }
 0x836   :  { %781 = vmatprep.subr.bf16.mxu1 %v858_v0 }
 0x839   :  { %782 = vmatpush3.bf16.msra.mxu1 %v900_v2 }
 0x83a   :  { %795 = vmatprep.subr.bf16.mxu1 %v858_v0 }
 0x907   :  { %v326_v19 = vpop.f32.mrb[4].mxu1 }
 0x908   :  { %v327_v20 = vadd.f32 %v919_v5, %v326_v19  ;;  %v769_v21 = vpop.f32.mrb[5].mxu1 }
 0x909   :  { %v329_v22 = vpop.f32.mrb[6].mxu1 }
 0x90a   :  { %341 = vrot.lane.b32.xlu1 %v327_v20, %s860_s17  ;;  %v770_v23 = vpop.f32.mrb[7].mxu1  ;;  %v334_v25 = vadd.f32 %v701_v24, %v327_v20 }
 0x90c   :  { %v335_v26 = vsub.f32 0.0, %v334_v25 }
 0x90e   :  { %v336_v27 = vmul.f32 1.442695, %v335_v26 }
 0x910   :  { %828 = vpow2.f32 %v336_v27 }
 0x91a   :  { %v829_v29 = vpop.eup %828 }
 0x91b   :  { %v338_v30 = vadd.f32 1.0, %v829_v29 }
 0x91d   :  { %830 = vrcp.f32 %v338_v30 }
 0x927   :  { %v831_v31 = vpop.eup %830 }
 0x928   :  { %v351_v37 = vsub.f32 1.0, %v831_v31  ;;  %v357_v39 = vmul.f32 %v831_v31, %v968_v16 }
 0x97c   :  { %v342_v32 = vpop.permute.xlu1 %341 }
 0x97d   :  { %v344_v33 = vmul.f32 %v831_v31, %v342_v32 }
 0x97f   :  { %346 = vrot.lane.b32.xlu0 %v344_v33, %s860_s17 }
 0x9f1   :  { %v347_v34 = vpop.permute.xlu0 %346 }
 0x9f2   :  { %v349_v35 = vadd.f32 %v701_v24, %v347_v34 }
 0x9f4   :  { %832 = vtanh.f32 %v349_v35 }
 0x9fe   :  { %v833_v36 = vpop.eup %832 }
 0x9ff   :  { %353 = vrot.lane.b32.xlu1 %v833_v36, %s861_s2 }
 0xa71   :  { %v354_v38 = vpop.permute.xlu1 %353 }
 0xa72   :  { %v356_v40 = vmul.f32 %v354_v38, %v351_v37  ;;  %v710_v37 = vld [vmem:[%s1098_s0 + $0x30] sm:$0xff] }
 0xa74   :  { %v988_v41 = vadd.f32 %v357_v39, %v356_v40 }
 0xa76   :  { %v365_v42 = vpack.c.bf16 %v988_v41, %v988_v41 }
 0xa78   :  { %367 = vrot.lane.b32.xlu0 %v365_v42, %s861_s2 }
 0xaea   :  { %v368_v43 = vpop.permute.xlu0 %367 }
 0xaeb   :  { %776 = vmatmul.mubr.msk.bf16.vlgmr.msra.gmra.mrb[8].mxu0 %vm19_vm0, %v368_v43 }
 0xaec   :  { %788 = vmatpush3.bf16.msra.mxu0 %v887_v1  ;;  %791 = vmatprep.mubr.msk.bf16.mxu0 %vm859_vm1, %v858_v0 }
 0xaed   :  { %789 = vmatprep.subr.bf16.mxu0 %v858_v0 }
 0xaf0   :  { %790 = vmatpush3.bf16.msra.mxu0 %v900_v2 }
 0xbbe   :  { %v406_v44 = vpop.f32.mrb[8].mxu0 }
 0xbbf   :  { %v407_v45 = vadd.f32 %v919_v5, %v406_v44  ;;  %v777_v46 = vpop.f32.mrb[9].mxu0 }
 0xbc0   :  { %v409_v47 = vpop.f32.mrb[10].mxu0 }
 0xbc1   :  { %421 = vrot.lane.b32.xlu1 %v407_v45, %s860_s17  ;;  %v778_v48 = vpop.f32.mrb[11].mxu0  ;;  %v414_v50 = vadd.f32 %v704_v49, %v407_v45 }
 0xbc3   :  { %v415_v51 = vsub.f32 0.0, %v414_v50 }
 0xbc5   :  { %v416_v53 = vmul.f32 1.442695, %v415_v51 }
 0xbc7   :  { %834 = vpow2.f32 %v416_v53 }
 0xbd1   :  { %v835_v54 = vpop.eup %834 }
 0xbd2   :  { %v418_v55 = vadd.f32 1.0, %v835_v54 }
 0xbd4   :  { %836 = vrcp.f32 %v418_v55 }
 0xbde   :  { %v837_v56 = vpop.eup %836 }
 0xbdf   :  { %v431_v62 = vsub.f32 1.0, %v837_v56  ;;  %v437_v3 = vmul.f32 %v837_v56, %v988_v41 }
 0xc33   :  { %v422_v57 = vpop.permute.xlu1 %421 }
 0xc34   :  { %v424_v58 = vmul.f32 %v837_v56, %v422_v57 }
 0xc36   :  { %426 = vrot.lane.b32.xlu0 %v424_v58, %s860_s17 }
 0xca8   :  { %v427_v59 = vpop.permute.xlu0 %426 }
 0xca9   :  { %v429_v60 = vadd.f32 %v704_v49, %v427_v59 }
 0xcab   :  { %838 = vtanh.f32 %v429_v60 }
 0xcb5   :  { %v839_v61 = vpop.eup %838 }
 0xcb6   :  { %433 = vrot.lane.b32.xlu1 %v839_v61, %s861_s2 }
 0xd28   :  { %v434_v63 = vpop.permute.xlu1 %433 }
 0xd29   :  { %v436_v4 = vmul.f32 %v434_v63, %v431_v62  ;;  %v713_v63 = vld [vmem:[%s1098_s0 + $0x38] sm:$0xff] }
 0xd2b   :  { %v1007_v6 = vadd.f32 %v437_v3, %v436_v4 }
 0xd2d   :  { %v445_v7 = vpack.c.bf16 %v1007_v6, %v1007_v6 }
 0xd2f   :  { %447 = vrot.lane.b32.xlu0 %v445_v7, %s861_s2 }
 0xda1   :  { %v448_v8 = vpop.permute.xlu0 %447 }
 0xda2   :  { %784 = vmatmul.mubr.msk.bf16.vlgmr.msra.gmra.mrb[8].mxu1 %vm19_vm0, %v448_v8 }
 0xda3   :  { %796 = vmatpush3.bf16.msra.mxu1 %v887_v1  ;;  %799 = vmatprep.mubr.msk.bf16.mxu1 %vm859_vm1, %v858_v0 }
 0xda4   :  { %797 = vmatprep.subr.bf16.mxu1 %v858_v0 }
 0xda7   :  { %798 = vmatpush3.bf16.msra.mxu1 %v900_v2 }
 0xe75   :  { %v486_v9 = vpop.f32.mrb[8].mxu1 }
 0xe76   :  { %v487_v10 = vadd.f32 %v919_v5, %v486_v9  ;;  %v785_v11 = vpop.f32.mrb[9].mxu1 }
 0xe77   :  { %v489_v12 = vpop.f32.mrb[10].mxu1 }
 0xe78   :  { %501 = vrot.lane.b32.xlu1 %v487_v10, %s860_s17  ;;  %v786_v13 = vpop.f32.mrb[11].mxu1  ;;  %v494_v1 = vadd.f32 %v707_v14, %v487_v10 }
 0xe7a   :  { %v495_v15 = vsub.f32 0.0, %v494_v1 }
 0xe7c   :  { %v496_v17 = vmul.f32 1.442695, %v495_v15 }
 0xe7e   :  { %840 = vpow2.f32 %v496_v17 }
 0xe88   :  { %v841_v18 = vpop.eup %840 }
 0xe89   :  { %v498_v0 = vadd.f32 1.0, %v841_v18 }
 0xe8b   :  { %842 = vrcp.f32 %v498_v0 }
 0xe95   :  { %v843_v2 = vpop.eup %842 }
 0xe96   :  { %v511_v24 = vsub.f32 1.0, %v843_v2  ;;  %v517_v26 = vmul.f32 %v843_v2, %v1007_v6 }
 0xeea   :  { %v502_v19 = vpop.permute.xlu1 %501 }
 0xeeb   :  { %v504_v20 = vmul.f32 %v843_v2, %v502_v19 }
 0xeed   :  { %506 = vrot.lane.b32.xlu0 %v504_v20, %s860_s17 }
 0xf5f   :  { %v507_v21 = vpop.permute.xlu0 %506 }
 0xf60   :  { %v509_v22 = vadd.f32 %v707_v14, %v507_v21 }
 0xf62   :  { %844 = vtanh.f32 %v509_v22 }
 0xf6c   :  { %v845_v23 = vpop.eup %844 }
 0xf6d   :  { %513 = vrot.lane.b32.xlu1 %v845_v23, %s861_s2 }
 0xfdf   :  { %v514_v25 = vpop.permute.xlu1 %513 }
 0xfe0   :  { %v516_v27 = vmul.f32 %v514_v25, %v511_v24 }
 0xfe2   :  { %v1026_v29 = vadd.f32 %v517_v26, %v516_v27 }
 0xfe4   :  { %v525_v30 = vpack.c.bf16 %v1026_v29, %v1026_v29 }
 0xfe6   :  { %527 = vrot.lane.b32.xlu0 %v525_v30, %s861_s2 }
0x1058   :  { %v528_v31 = vpop.permute.xlu0 %527 }
0x1059   :  { %792 = vmatmul.mubr.msk.bf16.vlgmr.msra.gmra.mrb[12].mxu0 %vm19_vm0, %v528_v31 }
0x112c   :  { %v566_v32 = vpop.f32.mrb[12].mxu0 }
0x112d   :  { %v567_v33 = vadd.f32 %v919_v5, %v566_v32  ;;  %v793_v34 = vpop.f32.mrb[13].mxu0 }
0x112e   :  { %v569_v35 = vpop.f32.mrb[14].mxu0 }
0x112f   :  { %581 = vrot.lane.b32.xlu1 %v567_v33, %s860_s17  ;;  %v794_v36 = vpop.f32.mrb[15].mxu0  ;;  %v574_v38 = vadd.f32 %v710_v37, %v567_v33 }
0x1131   :  { %v575_v39 = vsub.f32 0.0, %v574_v38 }
0x1133   :  { %v576_v40 = vmul.f32 1.442695, %v575_v39 }
0x1135   :  { %846 = vpow2.f32 %v576_v40 }
0x113f   :  { %v847_v42 = vpop.eup %846 }
0x1140   :  { %v578_v43 = vadd.f32 1.0, %v847_v42 }
0x1142   :  { %848 = vrcp.f32 %v578_v43 }
0x114c   :  { %v849_v44 = vpop.eup %848 }
0x114d   :  { %v591_v50 = vsub.f32 1.0, %v849_v44  ;;  %v597_v53 = vmul.f32 %v849_v44, %v1026_v29 }
0x11a1   :  { %v582_v45 = vpop.permute.xlu1 %581 }
0x11a2   :  { %v584_v46 = vmul.f32 %v849_v44, %v582_v45 }
0x11a4   :  { %586 = vrot.lane.b32.xlu0 %v584_v46, %s860_s17 }
0x1216   :  { %v587_v47 = vpop.permute.xlu0 %586 }
0x1217   :  { %v589_v48 = vadd.f32 %v710_v37, %v587_v47 }
0x1219   :  { %850 = vtanh.f32 %v589_v48 }
0x1223   :  { %v851_v49 = vpop.eup %850 }
0x1224   :  { %593 = vrot.lane.b32.xlu1 %v851_v49, %s861_s2 }
0x1296   :  { %v594_v51 = vpop.permute.xlu1 %593 }
0x1297   :  { %v596_v54 = vmul.f32 %v594_v51, %v591_v50 }
0x1299   :  { %v598_v55 = vadd.f32 %v597_v53, %v596_v54 }
0x129b   :  { %v605_v56 = vpack.c.bf16 %v598_v55, %v598_v55 }
0x129d   :  { %607 = vrot.lane.b32.xlu0 %v605_v56, %s861_s2 }
0x130f   :  { %v608_v57 = vpop.permute.xlu0 %607 }
0x1310   :  { %800 = vmatmul.mubr.msk.bf16.vlgmr.msra.gmra.mrb[12].mxu1 %vm19_vm0, %v608_v57 }
0x13e3   :  { %v646_v58 = vpop.f32.mrb[12].mxu1 }
0x13e4   :  { %v647_v59 = vadd.f32 %v919_v5, %v646_v58  ;;  %v801_v60 = vpop.f32.mrb[13].mxu1 }
0x13e5   :  { %v649_v61 = vpop.f32.mrb[14].mxu1 }
0x13e6   :  { %661 = vrot.lane.b32.xlu1 %v647_v59, %s860_s17  ;;  %v802_v62 = vpop.f32.mrb[15].mxu1  ;;  %v654_v3 = vadd.f32 %v713_v63, %v647_v59 }
0x13e8   :  { %v655_v4 = vsub.f32 0.0, %v654_v3 }
0x13ea   :  { %v656_v7 = vmul.f32 1.442695, %v655_v4 }
0x13ec   :  { %852 = vpow2.f32 %v656_v7 }
0x13f6   :  { %v853_v8 = vpop.eup %852 }
0x13f7   :  { %v658_v9 = vadd.f32 1.0, %v853_v8 }
0x13f9   :  { %854 = vrcp.f32 %v658_v9 }
0x1403   :  { %v855_v10 = vpop.eup %854 }
0x1404   :  { %v671_v15 = vsub.f32 1.0, %v855_v10  ;;  %v677_v18 = vmul.f32 %v855_v10, %v598_v55 }
0x1458   :  { %v662_v11 = vpop.permute.xlu1 %661 }
0x1459   :  { %v664_v12 = vmul.f32 %v855_v10, %v662_v11 }
0x145b   :  { %666 = vrot.lane.b32.xlu0 %v664_v12, %s860_s17 }
0x145f   :  { %121 = vrot.lane.b32.xlu0 %v928_v28, %s861_s2 }
0x1463   :  { %280 = vrot.lane.b32.xlu0 %v968_v16, %s861_s2 }
0x1467   :  { %440 = vrot.lane.b32.xlu0 %v1007_v6, %s861_s2 }
0x146b   :  { %600 = vrot.lane.b32.xlu0 %v598_v55, %s861_s2 }
0x14cd   :  { %v667_v5 = vpop.permute.xlu0 %666 }
0x14ce   :  { %v669_v13 = vadd.f32 %v713_v63, %v667_v5 }
0x14d0   :  { %856 = vtanh.f32 %v669_v13 }
0x14d1   :  { %v122_v14 = vpop.permute.xlu0 %121 }
0x14d2   :  { %124 = vst.msk [vmem:[%s1099_s3] sm:$0xff] %vm19_vm0, %v122_v14 }
0x14d5   :  { %v281_v1 = vpop.permute.xlu0 %280 }
0x14d6   :  { %699 = vst.msk [vmem:[%s1099_s3 + $0x10] sm:$0xff] %vm19_vm0, %v281_v1 }
0x14d9   :  { %v441_v28 = vpop.permute.xlu0 %440 }
0x14da   :  { %v857_v16 = vpop.eup %856  ;;  %705 = vst.msk [vmem:[%s1099_s3 + $0x20] sm:$0xff] %vm19_vm0, %v441_v28 }
0x14db   :  { %673 = vrot.lane.b32.xlu1 %v857_v16, %s861_s2 }
0x14dd   :  { %v601_v6 = vpop.permute.xlu0 %600 }
0x14de   :  { %711 = vst.msk [vmem:[%s1099_s3 + $0x30] sm:$0xff] %vm19_vm0, %v601_v6 }
0x14df   :  { %200 = vrot.lane.b32.xlu1 %v948_v52, %s861_s2 }
0x14e3   :  { %360 = vrot.lane.b32.xlu1 %v988_v41, %s861_s2 }
0x14e7   :  { %520 = vrot.lane.b32.xlu1 %v1026_v29, %s861_s2 }
0x154d   :  { %v674_v17 = vpop.permute.xlu1 %673 }
0x154e   :  { %v676_v0 = vmul.f32 %v674_v17, %v671_v15 }
0x1550   :  { %v678_v2 = vadd.f32 %v677_v18, %v676_v0 }
0x1551   :  { %v201_v19 = vpop.permute.xlu1 %200 }
0x1552   :  { %696 = vst.msk [vmem:[%s1099_s3 + $0x8] sm:$0xff] %vm19_vm0, %v201_v19  ;;  %680 = vrot.lane.b32.xlu1 %v678_v2, %s861_s2 }
0x1555   :  { %v361_v52 = vpop.permute.xlu1 %360 }
0x1556   :  { %702 = vst.msk [vmem:[%s1099_s3 + $0x18] sm:$0xff] %vm19_vm0, %v361_v52 }
0x1559   :  { %v521_v41 = vpop.permute.xlu1 %520 }
0x155a   :  { %708 = vst.msk [vmem:[%s1099_s3 + $0x28] sm:$0xff] %vm19_vm0, %v521_v41 }
0x15c4   :  { %v681_v20 = vpop.permute.xlu1 %680 }
0x15c5   :  { %714 = vst.msk [vmem:[%s1099_s3 + $0x38] sm:$0xff] %vm19_vm0, %v681_v20  ;;  %685 = vst.msk [vmem:[#allocation2] sm:$0xff] %vm19_vm0, %v681_v20 }

// kernel: cldnn_forward.5
= control target key start
LH: loop header
LB: loop body
LE: loop exit
PB: predicated region body
PF: predicated region fallthrough
CT: control target
= control target key end

     0   :  { %vm25_vm0 = vcmask 261120   ;;  %v1005_v0 = vmov 0.0   ;;  %vm1006_vm1 = vmmov 0   ;;  %s1007_s23 = smov 64   ;;  %s1009_s26 = smov 32   ;;  %vm804_vm2 = vcmask 785408   ;;  %s1274_s1 = inlined_call_operand.vmem [shape: bf16[32,96], index: 1, kind: input, shape index: {}]   ;;  %s1275_s2 = inlined_call_operand.vmem [shape: f32[1,96], index: 2, kind: input, shape index: {}]   ;;  %s1276_s0 = inlined_call_operand.vmem [shape: f32[8,8,96], index: 0, kind: input, shape index: {}]   ;;  %s1277_s3 = inlined_call_operand.vmem [shape: bf16[32,96], index: 3, kind: input, shape index: {}]   ;;  %s1278_s4 = inlined_call_operand.vmem [shape: f32[1,96], index: 4, kind: input, shape index: {}]   ;;  %s1279_s5 = inlined_call_operand.vmem [shape: f32[8,8,96], index: 5, kind: output, shape index: {}]  }
   0x1   :  { %872 = vmatprep.subr.bf16.mxu1 %v1005_v0  ;;  %v1044_v1 = vld [vmem:[%s1274_s1] sm:$0xff]   ;;  %876 = vmatprep.mubr.msk.bf16.mxu1 %vm1006_vm1, %v1005_v0  ;;  %26 = vst.msk [vmem:[#allocation2] sm:$0xff] %vm25_vm0, %v1005_v0  ;;  %v1057_v2 = vld [vmem:[%s1274_s1 + $0x8] sm:$0xff]   ;;  %v824_v60 = vld [vmem:[%s1276_s0 + $0x10] sm:$0xff] }
   0x2   :  { %888 = vmatprep.subr.bf16.mxu0 %v1005_v0  ;;  %892 = vmatprep.mubr.msk.bf16.mxu0 %vm1006_vm1, %v1005_v0  ;;  %v1076_v5 = vld [vmem:[%s1275_s2] ss:$0 sm:$0xff]  ;;  %s1008_s2 = smov 96   ;;  %v822_v36 = vld [vmem:[%s1276_s0 + $0x8] sm:$0xff] }
   0x3   :  { %873 = vmatpush3.bf16.msra.mxu1 %v1044_v1  ;;  %889 = vmatpush3.bf16.msra.mxu0 %v1044_v1  ;;  %v96_v11 = vld [vmem:[%s1276_s0] sm:$0xff] }
   0x4   :  { %874 = vmatprep.subr.bf16.mxu1 %v1005_v0  ;;  %890 = vmatprep.subr.bf16.mxu0 %v1005_v0 }
   0x7   :  { %875 = vmatpush3.bf16.msra.mxu1 %v1057_v2  ;;  %891 = vmatpush3.bf16.msra.mxu0 %v1057_v2 }
   0x8   :  { %v32_v3 = vld [vmem:[#allocation2] sm:$0xff]  ;;  %880 = vmatprep.subr.bf16.mxu1 %v1005_v0  ;;  %904 = vmatprep.subr.bf16.mxu0 %v1005_v0 }
   0x9   :  { %v33_v4 = vpack.c.bf16 %v32_v3, %v32_v3 }
   0xb   :  { %877 = vmatmul.mubr.msk.bf16.vlgmr.msra.gmra.mrb[0].mxu1 %vm25_vm0, %v33_v4 }
   0xc   :  { %881 = vmatpush3.bf16.msra.mxu1 %v1044_v1  ;;  %884 = vmatprep.mubr.msk.bf16.mxu1 %vm1006_vm1, %v1005_v0 }
   0xd   :  { %882 = vmatprep.subr.bf16.mxu1 %v1005_v0 }
  0x10   :  { %883 = vmatpush3.bf16.msra.mxu1 %v1057_v2 }
  0x11   :  { %896 = vmatprep.subr.bf16.mxu1 %v1005_v0 }
  0xde   :  { %v90_v6 = vpop.f32.mrb[0].mxu1 }
  0xdf   :  { %v91_v7 = vadd.f32 %v1076_v5, %v90_v6  ;;  %v878_v8 = vpop.f32.mrb[1].mxu1 }
  0xe0   :  { %v93_v9 = vpop.f32.mrb[2].mxu1 }
  0xe1   :  { %104 = vrot.lane.b32.xlu0 %v91_v7, %s1007_s23  ;;  %v879_v10 = vpop.f32.mrb[3].mxu1  ;;  %v97_v12 = vadd.f32 %v96_v11, %v91_v7 }
  0xe3   :  { %v98_v13 = vsub.f32 0.0, %v97_v12 }
  0xe5   :  { %v99_v14 = vmul.f32 1.442695, %v98_v13 }
  0xe7   :  { %957 = vpow2.f32 %v99_v14 }
  0xf1   :  { %v958_v15 = vpop.eup %957 }
  0xf2   :  { %v101_v16 = vadd.f32 1.0, %v958_v15 }
  0xf4   :  { %959 = vrcp.f32 %v101_v16 }
  0xfe   :  { %v960_v17 = vpop.eup %959 }
  0xff   :  { %v114_v24 = vsub.f32 1.0, %v960_v17 }
 0x153   :  { %v105_v18 = vpop.permute.xlu0 %104 }
 0x154   :  { %v107_v19 = vmul.f32 %v960_v17, %v105_v18 }
 0x156   :  { %109 = vrot.lane.b32.xlu0 %v107_v19, %s1007_s23 }
 0x1c8   :  { %v110_v20 = vpop.permute.xlu0 %109 }
 0x1c9   :  { %v112_v21 = vadd.f32 %v110_v20, %v96_v11 }
 0x1cb   :  { %961 = vtanh.f32 %v112_v21 }
 0x1d5   :  { %v962_v22 = vpop.eup %961 }
 0x1d6   :  { %116 = vrot.lane.b32.xlu1 %v962_v22, %s1008_s2 }
 0x1da   :  { %121 = vrot.lane.b32.xlu1 %v32_v3, %s1009_s26 }
 0x248   :  { %v117_v23 = vpop.permute.xlu1 %116 }
 0x249   :  { %v119_v26 = vmul.f32 %v117_v23, %v114_v24  ;;  %v826_v24 = vld [vmem:[%s1276_s0 + $0x18] sm:$0xff] }
 0x24c   :  { %v122_v25 = vpop.permute.xlu1 %121 }
 0x24d   :  { %v124_v27 = vmul.f32 %v960_v17, %v122_v25 }
 0x24f   :  { %v1085_v28 = vadd.f32 %v124_v27, %v119_v26 }
 0x251   :  { %v131_v29 = vpack.c.bf16 %v1085_v28, %v1085_v28 }
 0x253   :  { %133 = vrot.lane.b32.xlu0 %v131_v29, %s1008_s2 }
 0x2c5   :  { %v134_v30 = vpop.permute.xlu0 %133 }
 0x2c6   :  { %885 = vmatmul.mubr.msk.bf16.vlgmr.msra.gmra.mrb[4].mxu1 %vm25_vm0, %v134_v30 }
 0x2c7   :  { %897 = vmatpush3.bf16.msra.mxu1 %v1044_v1  ;;  %900 = vmatprep.mubr.msk.bf16.mxu1 %vm1006_vm1, %v1005_v0 }
 0x2c8   :  { %898 = vmatprep.subr.bf16.mxu1 %v1005_v0 }
 0x2cb   :  { %899 = vmatpush3.bf16.msra.mxu1 %v1057_v2 }
 0x2cc   :  { %912 = vmatprep.subr.bf16.mxu1 %v1005_v0 }
 0x399   :  { %v172_v31 = vpop.f32.mrb[4].mxu1 }
 0x39a   :  { %v173_v32 = vadd.f32 %v1076_v5, %v172_v31  ;;  %v886_v33 = vpop.f32.mrb[5].mxu1 }
 0x39b   :  { %v175_v34 = vpop.f32.mrb[6].mxu1 }
 0x39c   :  { %187 = vrot.lane.b32.xlu1 %v173_v32, %s1007_s23  ;;  %v887_v35 = vpop.f32.mrb[7].mxu1  ;;  %v180_v37 = vadd.f32 %v822_v36, %v173_v32 }
 0x39e   :  { %v181_v38 = vsub.f32 0.0, %v180_v37 }
 0x3a0   :  { %v182_v39 = vmul.f32 1.442695, %v181_v38 }
 0x3a2   :  { %963 = vpow2.f32 %v182_v39 }
 0x3ac   :  { %v964_v40 = vpop.eup %963 }
 0x3ad   :  { %v184_v41 = vadd.f32 1.0, %v964_v40 }
 0x3af   :  { %965 = vrcp.f32 %v184_v41 }
 0x3b9   :  { %v966_v42 = vpop.eup %965 }
 0x3ba   :  { %v197_v48 = vsub.f32 1.0, %v966_v42  ;;  %v203_v50 = vmul.f32 %v966_v42, %v1085_v28 }
 0x40e   :  { %v188_v43 = vpop.permute.xlu1 %187 }
 0x40f   :  { %v190_v44 = vmul.f32 %v966_v42, %v188_v43 }
 0x411   :  { %192 = vrot.lane.b32.xlu0 %v190_v44, %s1007_s23 }
 0x483   :  { %v193_v45 = vpop.permute.xlu0 %192 }
 0x484   :  { %v195_v46 = vadd.f32 %v822_v36, %v193_v45 }
 0x486   :  { %967 = vtanh.f32 %v195_v46 }
 0x490   :  { %v968_v47 = vpop.eup %967 }
 0x491   :  { %199 = vrot.lane.b32.xlu1 %v968_v47, %s1008_s2 }
 0x503   :  { %v200_v49 = vpop.permute.xlu1 %199 }
 0x504   :  { %v202_v51 = vmul.f32 %v200_v49, %v197_v48  ;;  %v828_v49 = vld [vmem:[%s1276_s0 + $0x20] sm:$0xff] }
 0x506   :  { %v1105_v52 = vadd.f32 %v203_v50, %v202_v51 }
 0x508   :  { %v211_v53 = vpack.c.bf16 %v1105_v52, %v1105_v52 }
 0x50a   :  { %213 = vrot.lane.b32.xlu0 %v211_v53, %s1008_s2 }
 0x57c   :  { %v214_v54 = vpop.permute.xlu0 %213 }
 0x57d   :  { %893 = vmatmul.mubr.msk.bf16.vlgmr.msra.gmra.mrb[0].mxu0 %vm25_vm0, %v214_v54 }
 0x57e   :  { %905 = vmatpush3.bf16.msra.mxu0 %v1044_v1  ;;  %908 = vmatprep.mubr.msk.bf16.mxu0 %vm1006_vm1, %v1005_v0 }
 0x57f   :  { %906 = vmatprep.subr.bf16.mxu0 %v1005_v0 }
 0x582   :  { %907 = vmatpush3.bf16.msra.mxu0 %v1057_v2 }
 0x583   :  { %920 = vmatprep.subr.bf16.mxu0 %v1005_v0 }
 0x650   :  { %v252_v55 = vpop.f32.mrb[0].mxu0 }
 0x651   :  { %v253_v56 = vadd.f32 %v1076_v5, %v252_v55  ;;  %v894_v57 = vpop.f32.mrb[1].mxu0 }
 0x652   :  { %v255_v58 = vpop.f32.mrb[2].mxu0 }
 0x653   :  { %267 = vrot.lane.b32.xlu1 %v253_v56, %s1007_s23  ;;  %v895_v59 = vpop.f32.mrb[3].mxu0  ;;  %v260_v61 = vadd.f32 %v824_v60, %v253_v56 }
 0x655   :  { %v261_v62 = vsub.f32 0.0, %v260_v61 }
 0x657   :  { %v262_v63 = vmul.f32 1.442695, %v261_v62 }
 0x659   :  { %969 = vpow2.f32 %v262_v63 }
 0x663   :  { %v970_v3 = vpop.eup %969 }
 0x664   :  { %v264_v4 = vadd.f32 1.0, %v970_v3 }
 0x666   :  { %971 = vrcp.f32 %v264_v4 }
 0x670   :  { %v972_v6 = vpop.eup %971 }
 0x671   :  { %v277_v12 = vsub.f32 1.0, %v972_v6  ;;  %v283_v14 = vmul.f32 %v972_v6, %v1105_v52 }
 0x6c5   :  { %v268_v7 = vpop.permute.xlu1 %267 }
 0x6c6   :  { %v270_v8 = vmul.f32 %v972_v6, %v268_v7 }
 0x6c8   :  { %272 = vrot.lane.b32.xlu0 %v270_v8, %s1007_s23 }
 0x73a   :  { %v273_v9 = vpop.permute.xlu0 %272 }
 0x73b   :  { %v275_v10 = vadd.f32 %v824_v60, %v273_v9 }
 0x73d   :  { %973 = vtanh.f32 %v275_v10 }
 0x747   :  { %v974_v11 = vpop.eup %973 }
 0x748   :  { %279 = vrot.lane.b32.xlu1 %v974_v11, %s1008_s2 }
 0x7ba   :  { %v280_v13 = vpop.permute.xlu1 %279 }
 0x7bb   :  { %v282_v15 = vmul.f32 %v280_v13, %v277_v12 }
 0x7bd   :  { %v1125_v16 = vadd.f32 %v283_v14, %v282_v15  ;;  %v830_v14 = vld [vmem:[%s1276_s0 + $0x28] sm:$0xff] }
 0x7bf   :  { %v291_v17 = vpack.c.bf16 %v1125_v16, %v1125_v16 }
 0x7c1   :  { %293 = vrot.lane.b32.xlu0 %v291_v17, %s1008_s2 }
 0x833   :  { %v294_v18 = vpop.permute.xlu0 %293 }
 0x834   :  { %901 = vmatmul.mubr.msk.bf16.vlgmr.msra.gmra.mrb[8].mxu1 %vm25_vm0, %v294_v18 }
 0x835   :  { %913 = vmatpush3.bf16.msra.mxu1 %v1044_v1  ;;  %916 = vmatprep.mubr.msk.bf16.mxu1 %vm1006_vm1, %v1005_v0 }
 0x836   :  { %914 = vmatprep.subr.bf16.mxu1 %v1005_v0 }
 0x839   :  { %915 = vmatpush3.bf16.msra.mxu1 %v1057_v2 }
 0x83a   :  { %928 = vmatprep.subr.bf16.mxu1 %v1005_v0 }
 0x907   :  { %v332_v19 = vpop.f32.mrb[8].mxu1 }
 0x908   :  { %v333_v20 = vadd.f32 %v1076_v5, %v332_v19  ;;  %v902_v21 = vpop.f32.mrb[9].mxu1 }
 0x909   :  { %v335_v22 = vpop.f32.mrb[10].mxu1 }
 0x90a   :  { %347 = vrot.lane.b32.xlu1 %v333_v20, %s1007_s23  ;;  %v903_v23 = vpop.f32.mrb[11].mxu1  ;;  %v340_v25 = vadd.f32 %v826_v24, %v333_v20 }
 0x90c   :  { %v341_v26 = vsub.f32 0.0, %v340_v25 }
 0x90e   :  { %v342_v27 = vmul.f32 1.442695, %v341_v26 }
 0x910   :  { %975 = vpow2.f32 %v342_v27 }
 0x91a   :  { %v976_v29 = vpop.eup %975 }
 0x91b   :  { %v344_v30 = vadd.f32 1.0, %v976_v29 }
 0x91d   :  { %977 = vrcp.f32 %v344_v30 }
 0x927   :  { %v978_v31 = vpop.eup %977 }
 0x928   :  { %v357_v37 = vsub.f32 1.0, %v978_v31  ;;  %v363_v39 = vmul.f32 %v978_v31, %v1125_v16 }
 0x97c   :  { %v348_v32 = vpop.permute.xlu1 %347 }
 0x97d   :  { %v350_v33 = vmul.f32 %v978_v31, %v348_v32 }
 0x97f   :  { %352 = vrot.lane.b32.xlu0 %v350_v33, %s1007_s23 }
 0x9f1   :  { %v353_v34 = vpop.permute.xlu0 %352 }
 0x9f2   :  { %v355_v35 = vadd.f32 %v826_v24, %v353_v34 }
 0x9f4   :  { %979 = vtanh.f32 %v355_v35 }
 0x9fe   :  { %v980_v36 = vpop.eup %979 }
 0x9ff   :  { %359 = vrot.lane.b32.xlu1 %v980_v36, %s1008_s2 }
 0xa71   :  { %v360_v38 = vpop.permute.xlu1 %359 }
 0xa72   :  { %v362_v40 = vmul.f32 %v360_v38, %v357_v37  ;;  %v832_v37 = vld [vmem:[%s1276_s0 + $0x30] sm:$0xff] }
 0xa74   :  { %v1145_v41 = vadd.f32 %v363_v39, %v362_v40 }
 0xa76   :  { %v371_v42 = vpack.c.bf16 %v1145_v41, %v1145_v41 }
 0xa78   :  { %373 = vrot.lane.b32.xlu0 %v371_v42, %s1008_s2 }
 0xaea   :  { %v374_v43 = vpop.permute.xlu0 %373 }
 0xaeb   :  { %909 = vmatmul.mubr.msk.bf16.vlgmr.msra.gmra.mrb[4].mxu0 %vm25_vm0, %v374_v43 }
 0xaec   :  { %921 = vmatpush3.bf16.msra.mxu0 %v1044_v1  ;;  %924 = vmatprep.mubr.msk.bf16.mxu0 %vm1006_vm1, %v1005_v0 }
 0xaed   :  { %922 = vmatprep.subr.bf16.mxu0 %v1005_v0 }
 0xaf0   :  { %923 = vmatpush3.bf16.msra.mxu0 %v1057_v2 }
 0xbbe   :  { %v412_v44 = vpop.f32.mrb[4].mxu0 }
 0xbbf   :  { %v413_v45 = vadd.f32 %v1076_v5, %v412_v44  ;;  %v910_v46 = vpop.f32.mrb[5].mxu0 }
 0xbc0   :  { %v415_v47 = vpop.f32.mrb[6].mxu0 }
 0xbc1   :  { %427 = vrot.lane.b32.xlu1 %v413_v45, %s1007_s23  ;;  %v911_v48 = vpop.f32.mrb[7].mxu0  ;;  %v420_v50 = vadd.f32 %v828_v49, %v413_v45 }
 0xbc3   :  { %v421_v51 = vsub.f32 0.0, %v420_v50 }
 0xbc5   :  { %v422_v53 = vmul.f32 1.442695, %v421_v51 }
 0xbc7   :  { %981 = vpow2.f32 %v422_v53 }
 0xbd1   :  { %v982_v54 = vpop.eup %981 }
 0xbd2   :  { %v424_v55 = vadd.f32 1.0, %v982_v54 }
 0xbd4   :  { %983 = vrcp.f32 %v424_v55 }
 0xbde   :  { %v984_v56 = vpop.eup %983 }
 0xbdf   :  { %v437_v62 = vsub.f32 1.0, %v984_v56  ;;  %v443_v3 = vmul.f32 %v984_v56, %v1145_v41 }
 0xc33   :  { %v428_v57 = vpop.permute.xlu1 %427 }
 0xc34   :  { %v430_v58 = vmul.f32 %v984_v56, %v428_v57 }
 0xc36   :  { %432 = vrot.lane.b32.xlu0 %v430_v58, %s1007_s23 }
 0xca8   :  { %v433_v59 = vpop.permute.xlu0 %432 }
 0xca9   :  { %v435_v60 = vadd.f32 %v828_v49, %v433_v59 }
 0xcab   :  { %985 = vtanh.f32 %v435_v60 }
 0xcb5   :  { %v986_v61 = vpop.eup %985 }
 0xcb6   :  { %439 = vrot.lane.b32.xlu1 %v986_v61, %s1008_s2 }
 0xd28   :  { %v440_v63 = vpop.permute.xlu1 %439 }
 0xd29   :  { %v442_v4 = vmul.f32 %v440_v63, %v437_v62  ;;  %v834_v63 = vld [vmem:[%s1276_s0 + $0x38] sm:$0xff] }
 0xd2b   :  { %v1164_v6 = vadd.f32 %v443_v3, %v442_v4 }
 0xd2d   :  { %v451_v7 = vpack.c.bf16 %v1164_v6, %v1164_v6 }
 0xd2f   :  { %453 = vrot.lane.b32.xlu0 %v451_v7, %s1008_s2 }
 0xda1   :  { %v454_v8 = vpop.permute.xlu0 %453 }
 0xda2   :  { %917 = vmatmul.mubr.msk.bf16.vlgmr.msra.gmra.mrb[12].mxu1 %vm25_vm0, %v454_v8 }
 0xda3   :  { %929 = vmatpush3.bf16.msra.mxu1 %v1044_v1  ;;  %932 = vmatprep.mubr.msk.bf16.mxu1 %vm1006_vm1, %v1005_v0 }
 0xda4   :  { %930 = vmatprep.subr.bf16.mxu1 %v1005_v0 }
 0xda7   :  { %931 = vmatpush3.bf16.msra.mxu1 %v1057_v2 }
 0xe75   :  { %v492_v9 = vpop.f32.mrb[12].mxu1 }
 0xe76   :  { %v493_v10 = vadd.f32 %v1076_v5, %v492_v9  ;;  %v918_v11 = vpop.f32.mrb[13].mxu1 }
 0xe77   :  { %v495_v12 = vpop.f32.mrb[14].mxu1 }
 0xe78   :  { %507 = vrot.lane.b32.xlu1 %v493_v10, %s1007_s23  ;;  %v919_v13 = vpop.f32.mrb[15].mxu1  ;;  %v500_v1 = vadd.f32 %v830_v14, %v493_v10 }
 0xe7a   :  { %v501_v15 = vsub.f32 0.0, %v500_v1 }
 0xe7c   :  { %v502_v17 = vmul.f32 1.442695, %v501_v15 }
 0xe7e   :  { %987 = vpow2.f32 %v502_v17 }
 0xe88   :  { %v988_v18 = vpop.eup %987 }
 0xe89   :  { %v504_v0 = vadd.f32 1.0, %v988_v18 }
 0xe8b   :  { %989 = vrcp.f32 %v504_v0 }
 0xe95   :  { %v990_v2 = vpop.eup %989 }
 0xe96   :  { %v517_v24 = vsub.f32 1.0, %v990_v2  ;;  %v523_v26 = vmul.f32 %v990_v2, %v1164_v6 }
 0xeea   :  { %v508_v19 = vpop.permute.xlu1 %507 }
 0xeeb   :  { %v510_v20 = vmul.f32 %v990_v2, %v508_v19 }
 0xeed   :  { %512 = vrot.lane.b32.xlu0 %v510_v20, %s1007_s23 }
 0xf5f   :  { %v513_v21 = vpop.permute.xlu0 %512 }
 0xf60   :  { %v515_v22 = vadd.f32 %v830_v14, %v513_v21 }
 0xf62   :  { %991 = vtanh.f32 %v515_v22 }
 0xf6c   :  { %v992_v23 = vpop.eup %991 }
 0xf6d   :  { %519 = vrot.lane.b32.xlu1 %v992_v23, %s1008_s2 }
 0xfdf   :  { %v520_v25 = vpop.permute.xlu1 %519 }
 0xfe0   :  { %v522_v27 = vmul.f32 %v520_v25, %v517_v24 }
 0xfe2   :  { %v1183_v29 = vadd.f32 %v523_v26, %v522_v27 }
 0xfe4   :  { %v531_v30 = vpack.c.bf16 %v1183_v29, %v1183_v29 }
 0xfe6   :  { %533 = vrot.lane.b32.xlu0 %v531_v30, %s1008_s2 }
0x1058   :  { %v534_v31 = vpop.permute.xlu0 %533 }
0x1059   :  { %925 = vmatmul.mubr.msk.bf16.vlgmr.msra.gmra.mrb[8].mxu0 %vm25_vm0, %v534_v31 }
0x112c   :  { %v572_v32 = vpop.f32.mrb[8].mxu0 }
0x112d   :  { %v573_v33 = vadd.f32 %v1076_v5, %v572_v32  ;;  %v926_v34 = vpop.f32.mrb[9].mxu0 }
0x112e   :  { %v575_v35 = vpop.f32.mrb[10].mxu0 }
0x112f   :  { %587 = vrot.lane.b32.xlu1 %v573_v33, %s1007_s23  ;;  %v927_v36 = vpop.f32.mrb[11].mxu0  ;;  %v580_v38 = vadd.f32 %v832_v37, %v573_v33 }
0x1130   :  { %v835_v36 = vld [vmem:[%s1278_s4] ss:$0 sm:$0xff] }
0x1131   :  { %v581_v39 = vsub.f32 0.0, %v580_v38 }
0x1133   :  { %v582_v40 = vmul.f32 1.442695, %v581_v39 }
0x1135   :  { %993 = vpow2.f32 %v582_v40 }
0x113f   :  { %v994_v42 = vpop.eup %993 }
0x1140   :  { %v584_v43 = vadd.f32 1.0, %v994_v42 }
0x1142   :  { %995 = vrcp.f32 %v584_v43 }
0x114c   :  { %v996_v44 = vpop.eup %995 }
0x114d   :  { %v597_v50 = vsub.f32 1.0, %v996_v44  ;;  %v603_v53 = vmul.f32 %v996_v44, %v1183_v29 }
0x11a1   :  { %v588_v45 = vpop.permute.xlu1 %587 }
0x11a2   :  { %v590_v46 = vmul.f32 %v996_v44, %v588_v45 }
0x11a4   :  { %592 = vrot.lane.b32.xlu0 %v590_v46, %s1007_s23 }
0x1216   :  { %v593_v47 = vpop.permute.xlu0 %592 }
0x1217   :  { %v595_v48 = vadd.f32 %v832_v37, %v593_v47 }
0x1219   :  { %997 = vtanh.f32 %v595_v48 }
0x1223   :  { %v998_v49 = vpop.eup %997 }
0x1224   :  { %599 = vrot.lane.b32.xlu1 %v998_v49, %s1008_s2 }
0x1296   :  { %v600_v51 = vpop.permute.xlu1 %599 }
0x1297   :  { %v602_v54 = vmul.f32 %v600_v51, %v597_v50 }
0x1299   :  { %v604_v55 = vadd.f32 %v603_v53, %v602_v54 }
0x129b   :  { %v611_v56 = vpack.c.bf16 %v604_v55, %v604_v55 }
0x129d   :  { %613 = vrot.lane.b32.xlu0 %v611_v56, %s1008_s2 }
0x130f   :  { %v614_v57 = vpop.permute.xlu0 %613 }
0x1310   :  { %933 = vmatmul.mubr.msk.bf16.vlgmr.msra.gmra.mrb[16].mxu1 %vm25_vm0, %v614_v57 }
0x13e3   :  { %v652_v58 = vpop.f32.mrb[16].mxu1 }
0x13e4   :  { %v653_v59 = vadd.f32 %v1076_v5, %v652_v58  ;;  %v934_v60 = vpop.f32.mrb[17].mxu1 }
0x13e5   :  { %v655_v61 = vpop.f32.mrb[18].mxu1 }
0x13e6   :  { %667 = vrot.lane.b32.xlu1 %v653_v59, %s1007_s23  ;;  %v935_v62 = vpop.f32.mrb[19].mxu1  ;;  %v660_v3 = vadd.f32 %v834_v63, %v653_v59 }
0x13e8   :  { %v661_v4 = vsub.f32 0.0, %v660_v3 }
0x13ea   :  { %v662_v7 = vmul.f32 1.442695, %v661_v4 }
0x13ec   :  { %999 = vpow2.f32 %v662_v7 }
0x13f6   :  { %v1000_v8 = vpop.eup %999 }
0x13f7   :  { %v664_v9 = vadd.f32 1.0, %v1000_v8 }
0x13f9   :  { %1001 = vrcp.f32 %v664_v9 }
0x1403   :  { %v1002_v10 = vpop.eup %1001 }
0x1404   :  { %v677_v18 = vsub.f32 1.0, %v1002_v10  ;;  %v683_v2 = vmul.f32 %v1002_v10, %v604_v55 }
0x1458   :  { %v668_v11 = vpop.permute.xlu1 %667 }
0x1459   :  { %v670_v12 = vmul.f32 %v1002_v10, %v668_v11 }
0x145b   :  { %672 = vrot.lane.b32.xlu0 %v670_v12, %s1007_s23 }
0x145f   :  { %127 = vrot.lane.b32.xlu0 %v1085_v28, %s1008_s2  ;;  %v955_v28 = vld [vmem:[%s1277_s3] sm:$0xff]  }
0x1460   :  { %936 = vmatprep.subr.bf16.mxu0 %v955_v28 }
0x1461   :  { %937 = vmatpush3.bf16.msra.mxu0 %v955_v28 }
0x1463   :  { %286 = vrot.lane.b32.xlu0 %v1125_v16, %s1008_s2 }
0x1467   :  { %446 = vrot.lane.b32.xlu0 %v1164_v6, %s1008_s2  ;;  %v956_v6 = vld [vmem:[%s1277_s3 + $0x8] sm:$0xff]  }
0x1468   :  { %938 = vmatprep.subr.bf16.mxu0 %v956_v6 }
0x1469   :  { %939 = vmatpush3.bf16.msra.mxu0 %v956_v6 }
0x146b   :  { %606 = vrot.lane.b32.xlu0 %v604_v55, %s1008_s2 }
0x14cd   :  { %v673_v5 = vpop.permute.xlu0 %672 }
0x14ce   :  { %v675_v13 = vadd.f32 %v834_v63, %v673_v5 }
0x14d0   :  { %1003 = vtanh.f32 %v675_v13 }
0x14d1   :  { %v128_v14 = vpop.permute.xlu0 %127 }
0x14d2   :  { %130 = vst.msk [vmem:[#allocation3] sm:$0xff] %vm25_vm0, %v128_v14 }
0x14d5   :  { %v287_v1 = vpop.permute.xlu0 %286 }
0x14d6   :  { %290 = vst.msk [vmem:[#allocation3 + $0x10] sm:$0xff] %vm25_vm0, %v287_v1 }
0x14d9   :  { %v447_v16 = vpop.permute.xlu0 %446  ;;  %v692_v23 = vld [vmem:[#allocation3] sm:$0xff] }
0x14da   :  { %v1004_v15 = vpop.eup %1003  ;;  %450 = vst.msk [vmem:[#allocation3 + $0x20] sm:$0xff] %vm25_vm0, %v447_v16 }
0x14db   :  { %679 = vrot.lane.b32.xlu1 %v1004_v15, %s1008_s2 }
0x14dd   :  { %v607_v17 = vpop.permute.xlu0 %606  ;;  %v694_v25 = vld [vmem:[#allocation3 + $0x10] sm:$0xff] }
0x14de   :  { %610 = vst.msk [vmem:[#allocation3 + $0x30] sm:$0xff] %vm25_vm0, %v607_v17 }
0x14df   :  { %206 = vrot.lane.b32.xlu1 %v1105_v52, %s1008_s2 }
0x14e3   :  { %366 = vrot.lane.b32.xlu1 %v1145_v41, %s1008_s2 }
0x14e5   :  { %v698_v33 = vld [vmem:[#allocation3 + $0x30] sm:$0xff] }
0x14e7   :  { %526 = vrot.lane.b32.xlu1 %v1183_v29, %s1008_s2  ;;  %v696_v29 = vld [vmem:[#allocation3 + $0x20] sm:$0xff] }
0x154d   :  { %v680_v0 = vpop.permute.xlu1 %679 }
0x154e   :  { %v682_v19 = vmul.f32 %v680_v0, %v677_v18 }
0x1550   :  { %v684_v20 = vadd.f32 %v683_v2, %v682_v19 }
0x1551   :  { %v207_v21 = vpop.permute.xlu1 %206 }
0x1552   :  { %210 = vst.msk [vmem:[#allocation3 + $0x8] sm:$0xff] %vm25_vm0, %v207_v21  ;;  %686 = vrot.lane.b32.xlu1 %v684_v20, %s1008_s2 }
0x1555   :  { %v367_v22 = vpop.permute.xlu1 %366 }
0x1556   :  { %370 = vst.msk [vmem:[#allocation3 + $0x18] sm:$0xff] %vm25_vm0, %v367_v22 }
0x1559   :  { %v527_v52 = vpop.permute.xlu1 %526  ;;  %v693_v24 = vld [vmem:[#allocation3 + $0x8] sm:$0xff] }
0x155a   :  { %530 = vst.msk [vmem:[#allocation3 + $0x28] sm:$0xff] %vm25_vm0, %v527_v52  ;;  %v700_v41 = vpack.c.bf16 %v693_v24, %v692_v23 }
0x155c   :  { %940 = vmatprep.mubr.msk.bf16.mxu0 %vm25_vm0, %v700_v41 }
0x155d   :  { %v695_v26 = vld [vmem:[#allocation3 + $0x18] sm:$0xff] }
0x155e   :  { %v701_v27 = vpack.c.bf16 %v695_v26, %v694_v25 }
0x1560   :  { %941 = vmatmul.mubr.msk.bf16.vlgmr.msra.gmra.mrb[12].mxu0 %vm25_vm0, %v701_v27 }
0x1561   :  { %v697_v30 = vld [vmem:[#allocation3 + $0x28] sm:$0xff] }
0x1562   :  { %v702_v31 = vpack.c.bf16 %v697_v30, %v696_v29 }
0x1564   :  { %944 = vmatprep.mubr.msk.bf16.mxu0 %vm25_vm0, %v702_v31 }
0x15c4   :  { %v687_v32 = vpop.permute.xlu1 %686 }
0x15c5   :  { %690 = vst.msk [vmem:[#allocation3 + $0x38] sm:$0xff] %vm25_vm0, %v687_v32  ;;  %691 = vst.msk [vmem:[#allocation2] sm:$0xff] %vm25_vm0, %v687_v32 }
0x15cc   :  { %v699_v34 = vld [vmem:[#allocation3 + $0x38] sm:$0xff] }
0x15cd   :  { %v703_v35 = vpack.c.bf16 %v699_v34, %v698_v33 }
0x15cf   :  { %945 = vmatmul.mubr.msk.bf16.gmra.mrb[16].mxu0 %vm25_vm0, %v703_v35 }
0x1633   :  { %v942_v37 = vpop.f32.mrb[12].mxu0 }
0x1634   :  { %v782_v38 = vadd.f32 %v942_v37, %v835_v36  ;;  %v773_v39 = vpop.f32.mrb[13].mxu0 }
0x1635   :  { %v774_v40 = vadd.f32 %v835_v36, %v773_v39  ;;  %v943_v42 = vpop.f32.mrb[14].mxu0 }
0x1636   :  { %807 = vst.msk [vmem:[%s1279_s5 + $0x10] sm:$0xff] %vm804_vm2, %v782_v38  ;;  %v785_v43 = vadd.f32 %v943_v42, %v835_v36  ;;  %v776_v44 = vpop.f32.mrb[15].mxu0 }
0x1637   :  { %805 = vst.msk [vmem:[%s1279_s5] sm:$0xff] %vm804_vm2, %v774_v40  ;;  %v777_v45 = vadd.f32 %v835_v36, %v776_v44 }
0x1638   :  { %808 = vst.msk [vmem:[%s1279_s5 + $0x18] sm:$0xff] %vm804_vm2, %v785_v43 }
0x1639   :  { %806 = vst.msk [vmem:[%s1279_s5 + $0x8] sm:$0xff] %vm804_vm2, %v777_v45 }
0x16a2   :  { %v946_v46 = vpop.f32.mrb[16].mxu0 }
0x16a3   :  { %v798_v47 = vadd.f32 %v946_v46, %v835_v36  ;;  %v789_v48 = vpop.f32.mrb[17].mxu0 }
0x16a4   :  { %v790_v49 = vadd.f32 %v835_v36, %v789_v48  ;;  %v947_v50 = vpop.f32.mrb[18].mxu0 }
0x16a5   :  { %811 = vst.msk [vmem:[%s1279_s5 + $0x30] sm:$0xff] %vm804_vm2, %v798_v47  ;;  %v801_v51 = vadd.f32 %v947_v50, %v835_v36  ;;  %v792_v53 = vpop.f32.mrb[19].mxu0 }
0x16a6   :  { %809 = vst.msk [vmem:[%s1279_s5 + $0x20] sm:$0xff] %vm804_vm2, %v790_v49  ;;  %v793_v54 = vadd.f32 %v835_v36, %v792_v53 }
0x16a7   :  { %812 = vst.msk [vmem:[%s1279_s5 + $0x38] sm:$0xff] %vm804_vm2, %v801_v51 }
0x16a8   :  { %810 = vst.msk [vmem:[%s1279_s5 + $0x28] sm:$0xff] %vm804_vm2, %v793_v54 }

// kernel: cldnn_forward.7
= control target key start
LH: loop header
LB: loop body
LE: loop exit
PB: predicated region body
PF: predicated region fallthrough
CT: control target
= control target key end

     0   :  { %11 = vsyncpa [#allocation4], 0  ;;  %s5591_s0 = inlined_call_operand.vmem [shape: f32[8,16,128], index: 0, kind: input, shape index: {}]   ;;  %s5592_s1 = inlined_call_operand.vmem [shape: f32[4,36], index: 1, kind: input, shape index: {}]   ;;  %s5593_s2 = inlined_call_operand.vmem [shape: f32[4], index: 2, kind: input, shape index: {}]   ;;  %s5594_s3 = inlined_call_operand.vmem [shape: bf16[4,32,128], index: 3, kind: input, shape index: {}]   ;;  %s5595_s4 = inlined_call_operand.vmem [shape: f32[1,128], index: 4, kind: input, shape index: {}]   ;;  %s5596_s5 = inlined_call_operand.vmem [shape: f32[2,8,128], index: 5, kind: input, shape index: {}]   ;;  %s5597_s6 = inlined_call_operand.hbm [shape: f32[2,8,128], index: 6, kind: output, shape index: {}]  }
   0x1   :  { %12 = vsyncpa [#allocation6], 0 }
   0x2   :  { %13 = vsyncpa [#allocation3], 0 }
   0x3   :  { %15 = vsyncpa [#allocation3 + $0x1], 0  ;;  %s3624_s21 = smov 0   ;;  %s3626_s22 = smov 0  }
   0x4   :  { %s3628_s23 = smov 0   ;;  %s3630_s24 = smov 0  }
   0x5 LB: > { %s3645_s25 = sadd.s32 4294967295, %s3577_s24   ;;  %s3104_s26 = sadd.s32 4294967294, %s3577_s24   ;;  %s3577_s24 = sphi %s3630_s24, %s5838_s24   ;;  %s3573_s23 = sphi %s3628_s23, %s5837_s23   ;;  %s3569_s22 = sphi %s3626_s22, %s5836_s22   ;;  %s3565_s21 = sphi %s3624_s21, %s5835_s21  }
   0x6   : > { %s3649_s27 = sadd.s32 1, %s3577_s24   ;;  %s164_s28 = sadd.s32 1, %s3573_s23 }
   0x7   : > { %s161_s29 = ssub.s32 %s3577_s24, %s3649_s27  ;;  %p174_p0 = scmp.ne.s32.totalorder %s3573_s23, %s3569_s22 }
   0x8   : > { %p162_p1 = scmp.eq.s32.totalorder %s161_s29, 0  ;;  %p175_p2 = scmp.eq.s32.totalorder %s3645_s25, 1 }
   0x9   : > { %p180_p3 = scmp.ne.s32.totalorder %s3569_s22, %s3565_s21  ;;  %p181_p4 = scmp.eq.s32.totalorder %s3104_s26, 1 }
   0xa   : > { %s3660_s30 = scalar_select %p162_p1, %s3573_s23, %s164_s28  }
   0xb   : > { %p3662_p5 = por %p175_p2, %p174_p0  ;;  %p3666_p6 = por %p181_p4, %p180_p3 }
   0xc   : > { %p3105_p7 = scmp.ge.s32.totalorder %s3577_s24, 1  ;;  %p188_p8 = scmp.lt.s32.totalorder %s3577_s24, 3 }
   0xd   : > { %s5613_s7 = scalar_select %p3662_p5, 1, 0 }
   0xe   : > { %s5614_s8 = scalar_select %p3666_p6, 1, 0 }
   0xf   : > { %p5598_p9 = scmp.eq.s32.totalorder %s3645_s25, 0  ;;  %p3673_p10 = pnand %p3105_p7, %p188_p8 }
  0x10   : > { %s201_s12 = sshll.u32 %s5592_s1, 4  ;;  %s212_s15 = sshll.u32 %s5593_s2, 4  ;;  %s202_s12 = int_to_ptr.vmem [resolvable:$true] %s201_s12  ;;  %s213_s15 = int_to_ptr.vmem [resolvable:$true] %s212_s15 }
  0x11   : > { %s5615_s9 = scalar_select %p3673_p10, 1, 0 }
  0x12   : > { %p3346_p11 = pneg %p3673_p10  ;;  %s3477_s17 = scalar_lea.vmem %s202_s12, 64 }
  0x13   : > { %p3478_p13 = scmp.ne.s32.totalorder %s202_s12, %s3477_s17  ;;  %p3485_p3 = scmp.lt.s32.totalorder %s202_s12, %s202_s12 }
  0x14   : > { %p3687_p12 = pnand %p5598_p9, %p3346_p11  ;;  %p3486_p4 = scmp.lt.s32.totalorder %s3477_s17, %s3477_s17 }
  0x16   : > { %p3479_p0 = pneg %p3687_p12  ;;  %p3487_p7 = por %p3486_p4, %p3485_p3 }
  0x18   : > { %p3480_p1 = pnand %p3479_p0, %p3478_p13 }
  0x1a   : > { %p3481_p2 = pneg %p3480_p1 }
  0x1c   : > { %p3488_p8 = pnand %p3487_p7, %p3481_p2 }
  0x1e   : > { %3491 = shalt.err (!%p3488_p8)
}
  0x1f   : > { %s3579_s18 = smov [#allocation2]   ;;  %s3492_s19 = scalar_lea.vmem %s213_s15, 16 }
  0x20   : > { %3349 = dma.vmem_to_smem (!%p3687_p12), %s202_s12, 64, %s3579_s18, [#allocation4]  }
  0x21   : > { %p3493_p11 = scmp.ne.s32.totalorder %s213_s15, %s3492_s19  ;;  %p3500_p5 = scmp.lt.s32.totalorder %s213_s15, %s213_s15 }
  0x22   : > { %p3501_p10 = scmp.lt.s32.totalorder %s3492_s19, %s3492_s19 }
  0x23   : > { %p3495_p9 = pnand %p3493_p11, %p3479_p0 }
  0x24   : > { %p3502_p13 = por %p3501_p10, %p3500_p5 }
  0x25   : > { %p3496_p6 = pneg %p3495_p9 }
  0x27   : > { %p3503_p1 = pnand %p3502_p13, %p3496_p6 }
  0x29   : > { %3506 = shalt.err (!%p3503_p1)
}
  0x2a   : > { %s3580_s20 = smov [#allocation5]   ;;  %p5617_p2 = scmp.ne.s32.totalorder %s5615_s9, 0 }
  0x2b   : > { %3352 = dma.vmem_to_smem (!%p3687_p12), %s213_s15, 16, %s3580_s20, [#allocation6]  }
  0x2c   : > { %246 = sbr.rel (%p5617_p2) target bundleno = 1069 (0x42d), region = 44 }
  0x33   : > { %p5618_p3 = scmp.eq.s32.totalorder %s3645_s25, 0 }
  0x35   : > { %3552 = dma.done.wait (%p5618_p3), [#allocation4], 64   ;;  %p5619_p4 = pmov %p5618_p3 }
  0x36   : > { %p5620_p9 = pmov %p5618_p3 }
  0x37   : > { %3554 = vsyncadd (%p5619_p4), [#allocation4], 4294967232 }
  0x38   : > { %3556 = dma.done.wait (%p5620_p9), [#allocation6], 16   ;;  %p5621_p5 = pmov %p5618_p3 }
  0x3a   : > { %3558 = vsyncadd (%p5621_p5), [#allocation6], 4294967280 }
  0x3b   : > { %256 = sfence }
  0x3c   : > { %p285_p6 = scmp.lt.s32.totalorder %s3645_s25, 7  ;;  %s3117_s26 = sld [smem:[#allocation2 + $0x2]]  ;;  %vm396_vm0 = vcmask 1046528   ;;  %vm495_vm1 = vcmask 1045504   ;;  %vm594_vm2 = vcmask 1044480   ;;  %vm693_vm3 = vcmask 1043456  }
  0x3d   : > { %s3116_s28 = sld [smem:[#allocation2 + $0x1]]  ;;  %s3118_s9 = sld [smem:[#allocation2 + $0x3]]  ;;  %vm792_vm4 = vcmask 1042432   ;;  %vm3587_vm13 = vmmov 0   ;;  %vm1550_vm14 = vcmask 261120  }
  0x3e   : > { %s286_s29 = scalar_select %p285_p6, %s3645_s25, 7 }
  0x3f   : > { %s3119_s14 = sld [smem:[#allocation2 + $0x4]]  ;;  %s3122_s15 = sld [smem:[#allocation2 + $0x7]] }
  0x40   : > { %s3291_s10 = sshll.u32 %s286_s29, 4  ;;  %s3581_s16 = smov 126  }
  0x41   : > { %s3712_s13 = scalar_lea.vmem %s5591_s0, %s3291_s10  ;;  %s3582_s17 = smov 127  }
  0x42   : > { %v3715_v0 = vld [vmem:[%s3712_s13] sm:$0xff]  ;;  %v3718_v1 = vld [vmem:[%s3712_s13 + $0x8] sm:$0xff]  ;;  %v335_v2 = vstv %s3117_s26  ;;  %s3120_s18 = sld [smem:[#allocation2 + $0x5]]  ;;  %s3123_s19 = sld [smem:[#allocation2 + $0x8]] }
  0x43   : > { %v336_v3 = vmul.f32 %v335_v2, %v3715_v0  ;;  %v321_v4 = vstv %s3116_s28  ;;  %v337_v6 = vmul.f32 %v335_v2, %v3718_v1  ;;  %v349_v8 = vstv %s3118_s9  ;;  %s3730_s20 = sld [smem:[#allocation2 + $0x9]]  ;;  %s3583_s26 = smov 125  }
  0x44   : > { %v322_v5 = vmul.f32 %v321_v4, %v3715_v0  ;;  %v323_v7 = vmul.f32 %v321_v4, %v3718_v1  ;;  %v351_v9 = vmul.f32 %v349_v8, %v3718_v1  ;;  %v350_v10 = vmul.f32 %v349_v8, %v3715_v0  ;;  %s3125_s28 = sld [smem:[#allocation2 + $0xa]]  ;;  %s3584_s29 = smov 124  }
  0x45   : > { %340 = vrot.lane.b32.xlu1 %v336_v3, %s3581_s16  ;;  %v363_v11 = vstv %s3119_s14  ;;  %v405_v12 = vstv %s3122_s15  ;;  %s3743_s9 = sld [smem:[#allocation2 + $0xb]]  ;;  %s3585_s10 = smov 123  }
  0x46   : > { %326 = vrot.lane.b32.xlu0 %v322_v5, %s3582_s17  ;;  %v365_v13 = vmul.f32 %v363_v11, %v3718_v1  ;;  %v364_v14 = vmul.f32 %v363_v11, %v3715_v0  ;;  %v406_v16 = vmul.f32 %v405_v12, %v3715_v0  ;;  %v407_v17 = vmul.f32 %v405_v12, %v3718_v1  ;;  %s3128_s11 = sld [smem:[#allocation2 + $0xd]]  ;;  %s3761_s12 = sld [smem:[#allocation2 + $0x81]] }
  0x47   : > { %s3153_s14 = sld [smem:[#allocation2 + $0x82]]  ;;  %s3154_s15 = sld [smem:[#allocation2 + $0x83]] }
  0x48   : > { %v377_v15 = vstv %s3120_s18  ;;  %v422_v18 = vstv %s3123_s19  ;;  %v411_v22 = vrot.slane %v407_v17, 1  ;;  %v410_v23 = vrot.slane %v406_v16, 1  ;;  %s3155_s18 = sld [smem:[#allocation2 + $0x84]]  ;;  %s3156_s19 = sld [smem:[#allocation2 + $0x85]] }
  0x49   : > { %342 = vrot.lane.b32.xlu1 %v337_v6, %s3581_s16  ;;  %v379_v19 = vmul.f32 %v377_v15, %v3718_v1  ;;  %v378_v20 = vmul.f32 %v377_v15, %v3715_v0  ;;  %v439_v21 = vstv %s3730_s20  ;;  %v423_v24 = vmul.f32 %v422_v18, %v3715_v0  ;;  %s3199_s20 = sld [smem:[#allocation2 + $0x101]]  ;;  %p290_p10 = scmp.lt.s32.totalorder %s3645_s25, 1 }
  0x4a   : > { %328 = vrot.lane.b32.xlu0 %v323_v7, %s3582_s17  ;;  %v424_v25 = vmul.f32 %v422_v18, %v3718_v1  ;;  %v441_v26 = vmul.f32 %v439_v21, %v3718_v1  ;;  %v412_v27 = vsel %vm396_vm0, %v410_v23, %v411_v22  ;;  %v440_v30 = vmul.f32 %v439_v21, %v3715_v0  ;;  %p5833_p0 = scmp.ne.s32.totalorder %s5613_s7, 0 }
  0x4b   : > { %v427_v29 = vrot.slane %v423_v24, 1  ;;  %v456_v31 = vstv %s3125_s28  ;;  %v473_v33 = vstv %s3743_s9  ;;  %s3200_s28 = sld [smem:[#allocation2 + $0x102]]  ;;  %s3158_s9 = sld [smem:[#allocation2 + $0x87]] }
  0x4c   : > { %v428_v28 = vrot.slane %v424_v25, 1  ;;  %v445_v32 = vrot.slane %v441_v26, 1  ;;  %v444_v35 = vrot.slane %v440_v30, 1  ;;  %v457_v36 = vmul.f32 %v456_v31, %v3715_v0 }
  0x4d   : > { %356 = vrot.lane.b32.xlu1 %v351_v9, %s3583_s26  ;;  %v458_v37 = vmul.f32 %v456_v31, %v3718_v1  ;;  %v474_v38 = vmul.f32 %v473_v33, %v3715_v0  ;;  %v475_v42 = vmul.f32 %v473_v33, %v3718_v1  ;;  %v504_v43 = vstv %s3128_s11  ;;  %s3243_s11 = sld [smem:[#allocation2 + $0x181]] }
  0x4e   : > { %354 = vrot.lane.b32.xlu0 %v350_v10, %s3583_s26  ;;  %v429_v34 = vsel %vm396_vm0, %v427_v29, %v428_v28  ;;  %v446_v39 = vsel %vm396_vm0, %v444_v35, %v445_v32  ;;  %v461_v41 = vrot.slane %v457_v36, 1  ;;  %v505_v47 = vmul.f32 %v504_v43, %v3715_v0 }
  0x4f   : > { %v462_v40 = vrot.slane %v458_v37, 1  ;;  %v478_v44 = vrot.slane %v474_v38, 1  ;;  %v479_v46 = vrot.slane %v475_v42, 1  ;;  %v3770_v48 = vmul.f32 %v504_v43, %v3718_v1 }
  0x50   : > { %v935_v49 = vstv %s3761_s12  ;;  %v509_v51 = vrot.slane %v505_v47, 2  ;;  %v949_v54 = vstv %s3153_s14  ;;  %v963_v58 = vstv %s3154_s15  ;;  %s3201_s12 = sld [smem:[#allocation2 + $0x103]]  ;;  %s3159_s14 = sld [smem:[#allocation2 + $0x88]] }
  0x51   : > { %370 = vrot.lane.b32.xlu1 %v365_v13, %s3584_s29  ;;  %v463_v45 = vsel %vm396_vm0, %v461_v41, %v462_v40  ;;  %v480_v50 = vsel %vm396_vm0, %v478_v44, %v479_v46  ;;  %v510_v52 = vrot.slane %v3770_v48, 2  ;;  %v936_v53 = vmul.f32 %v935_v49, %v3715_v0  ;;  %s3244_s15 = sld [smem:[#allocation2 + $0x182]] }
  0x52   : > { %368 = vrot.lane.b32.xlu0 %v364_v14, %s3584_s29  ;;  %v950_v56 = vmul.f32 %v949_v54, %v3715_v0  ;;  %v937_v57 = vmul.f32 %v935_v49, %v3718_v1  ;;  %v964_v59 = vmul.f32 %v963_v58, %v3715_v0  ;;  %v951_v60 = vmul.f32 %v949_v54, %v3718_v1 }
  0x53   : > { %v511_v55 = vsel %vm495_vm1, %v509_v51, %v510_v52  ;;  %v977_v61 = vstv %s3155_s18  ;;  %v965_v63 = vmul.f32 %v963_v58, %v3718_v1  ;;  %v991_v2 = vstv %s3156_s19  ;;  %s3202_s18 = sld [smem:[#allocation2 + $0x104]]  ;;  %s3160_s19 = sld [smem:[#allocation2 + $0x89]] }
  0x54   : > { %v978_v62 = vmul.f32 %v977_v61, %v3715_v0  ;;  %v992_v3 = vmul.f32 %v991_v2, %v3715_v0  ;;  %v979_v4 = vmul.f32 %v977_v61, %v3718_v1  ;;  %v1656_v5 = vstv %s3199_s20  ;;  %s3245_s20 = sld [smem:[#allocation2 + $0x183]] }
  0x55   : > { %384 = vrot.lane.b32.xlu1 %v379_v19, %s3585_s10  ;;  %v1657_v6 = vmul.f32 %v1656_v5, %v3715_v0  ;;  %v993_v7 = vmul.f32 %v991_v2, %v3718_v1  ;;  %v1670_v8 = vstv %s3200_s28  ;;  %v1018_v9 = vstv %s3158_s9  ;;  %s3203_s28 = sld [smem:[#allocation2 + $0x105]]  ;;  %s3161_s9 = sld [smem:[#allocation2 + $0x8a]] }
  0x56   : > { %382 = vrot.lane.b32.xlu0 %v378_v20, %s3585_s10  ;;  %v1671_v10 = vmul.f32 %v1670_v8, %v3715_v0  ;;  %v1658_v11 = vmul.f32 %v1656_v5, %v3718_v1  ;;  %v2322_v12 = vstv %s3243_s11  ;;  %v1019_v13 = vmul.f32 %v1018_v9, %v3715_v0  ;;  %s3246_s11 = sld [smem:[#allocation2 + $0x184]] }
  0x57   : > { %v1020_v14 = vmul.f32 %v1018_v9, %v3718_v1  ;;  %v2323_v15 = vmul.f32 %v2322_v12, %v3715_v0  ;;  %v1672_v16 = vmul.f32 %v1670_v8, %v3718_v1  ;;  %v2324_v20 = vmul.f32 %v2322_v12, %v3718_v1 }
  0x58   : > { %v1023_v17 = vrot.slane %v1019_v13, 1  ;;  %v1684_v21 = vstv %s3201_s12  ;;  %v2336_v24 = vstv %s3244_s15  ;;  %s3162_s12 = sld [smem:[#allocation2 + $0x8b]]  ;;  %s3205_s15 = sld [smem:[#allocation2 + $0x107]] }
  0x59   : > { %415 = vrot.lane.b32.xlu1 %v411_v22, %s3582_s17  ;;  %v1024_v18 = vrot.slane %v1020_v14, 1  ;;  %v1035_v22 = vstv %s3159_s14  ;;  %v1685_v23 = vmul.f32 %v1684_v21, %v3715_v0  ;;  %v1698_v33 = vstv %s3202_s18  ;;  %s3845_s14 = sld [smem:[#allocation2 + $0x185]]  ;;  %s3206_s18 = sld [smem:[#allocation2 + $0x108]] }
  0x5a   : > { %413 = vrot.lane.b32.xlu0 %v412_v27, %s3582_s17  ;;  %v1036_v25 = vmul.f32 %v1035_v22, %v3715_v0  ;;  %v1037_v26 = vmul.f32 %v1035_v22, %v3718_v1  ;;  %v2337_v27 = vmul.f32 %v2336_v24, %v3715_v0  ;;  %v1699_v35 = vmul.f32 %v1698_v33, %v3715_v0 }
  0x5b   : > { %v1025_v19 = vsel %vm396_vm0, %v1023_v17, %v1024_v18  ;;  %v2350_v36 = vstv %s3245_s20  ;;  %s3866_s20 = sld [smem:[#allocation2 + $0x8d]] }
  0x5c   : > { %v1040_v29 = vrot.slane %v1036_v25, 1  ;;  %v1041_v30 = vrot.slane %v1037_v26, 1  ;;  %v2352_v44 = vmul.f32 %v2350_v36, %v3718_v1  ;;  %v2364_v49 = vstv %s3246_s11  ;;  %s3165_s11 = sld [smem:[#allocation2 + $0x8e]] }
  0x5d   : > { %432 = vrot.lane.b32.xlu1 %v428_v28, %s3581_s16  ;;  %v1686_v28 = vmul.f32 %v1684_v21, %v3718_v1  ;;  %v2366_v58 = vmul.f32 %v2364_v49, %v3718_v1 }
  0x5e   : > { %430 = vrot.lane.b32.xlu0 %v429_v34, %s3581_s16  ;;  %v1042_v31 = vsel %vm396_vm0, %v1040_v29, %v1041_v30  ;;  %v1052_v34 = vstv %s3160_s19  ;;  %s3857_s19 = sld [smem:[#allocation2 + $0x187]] }
  0x5f   : > { %v1053_v37 = vmul.f32 %v1052_v34, %v3715_v0  ;;  %v1054_v38 = vmul.f32 %v1052_v34, %v3718_v1 }
  0x61   : > { %449 = vrot.lane.b32.xlu1 %v445_v32, %s3583_s26  ;;  %v2338_v32 = vmul.f32 %v2336_v24, %v3718_v1  ;;  %v1057_v41 = vrot.slane %v1053_v37, 1  ;;  %v1058_v42 = vrot.slane %v1054_v38, 1 }
  0x62   : > { %447 = vrot.lane.b32.xlu0 %v446_v39, %s3583_s26  ;;  %v2351_v39 = vmul.f32 %v2350_v36, %v3715_v0 }
  0x63   : > { %v1059_v43 = vsel %vm396_vm0, %v1057_v41, %v1058_v42 }
  0x65   : > { %466 = vrot.lane.b32.xlu1 %v462_v40, %s3584_s29  ;;  %v1700_v40 = vmul.f32 %v1698_v33, %v3718_v1 }
  0x66   : > { %464 = vrot.lane.b32.xlu0 %v463_v45, %s3584_s29  ;;  %v1712_v45 = vstv %s3203_s28  ;;  %s3207_s28 = sld [smem:[#allocation2 + $0x109]] }
  0x67   : > { %v1713_v47 = vmul.f32 %v1712_v45, %v3715_v0  ;;  %v1714_v54 = vmul.f32 %v1712_v45, %v3718_v1 }
  0x69   : > { %483 = vrot.lane.b32.xlu1 %v479_v46, %s3585_s10  ;;  %v1069_v46 = vstv %s3161_s9  ;;  %s3250_s9 = sld [smem:[#allocation2 + $0x188]] }
  0x6a   : > { %481 = vrot.lane.b32.xlu0 %v480_v50, %s3585_s10  ;;  %v1070_v50 = vmul.f32 %v1069_v46, %v3715_v0  ;;  %v1071_v51 = vmul.f32 %v1069_v46, %v3718_v1 }
  0x6d   : > { %940 = vrot.lane.b32.xlu1 %v936_v53, %s3582_s17  ;;  %v2365_v53 = vmul.f32 %v2364_v49, %v3715_v0 }
  0x6e   : > { %512 = vrot.lane.b32.xlu0 %v511_v55, %s3582_s17  ;;  %v1074_v55 = vrot.slane %v1070_v50, 1 }
  0x71   : > { %954 = vrot.lane.b32.xlu1 %v950_v56, %s3581_s16  ;;  %v1075_v56 = vrot.slane %v1071_v51, 1 }
  0x72   : > { %942 = vrot.lane.b32.xlu0 %v937_v57, %s3582_s17  ;;  %v1086_v57 = vstv %s3162_s12  ;;  %s3208_s12 = sld [smem:[#allocation2 + $0x10a]] }
  0x73   : > { %v1087_v61 = vmul.f32 %v1086_v57, %v3715_v0 }
  0x75   : > { %968 = vrot.lane.b32.xlu1 %v964_v59, %s3583_s26  ;;  %v2378_v59 = vstv %s3845_s14  ;;  %s3251_s14 = sld [smem:[#allocation2 + $0x189]] }
  0x76   : > { %956 = vrot.lane.b32.xlu0 %v951_v60, %s3581_s16  ;;  %v1076_v60 = vsel %vm396_vm0, %v1074_v55, %v1075_v56  ;;  %v2379_v2 = vmul.f32 %v2378_v59, %v3715_v0  ;;  %v2380_v8 = vmul.f32 %v2378_v59, %v3718_v1  ;;  %v1133_v55 = vstv %s3165_s11  ;;  %s3253_s11 = sld [smem:[#allocation2 + $0x18b]] }
  0x77   : > { %v1135_v59 = vmul.f32 %v1133_v55, %v3718_v1 }
  0x79   : > { %982 = vrot.lane.b32.xlu1 %v978_v62, %s3584_s29  ;;  %v1088_v62 = vmul.f32 %v1086_v57, %v3718_v1 }
  0x7a   : > { %970 = vrot.lane.b32.xlu0 %v965_v63, %s3583_s26  ;;  %v1739_v63 = vstv %s3205_s15  ;;  %s3129_s15 = sld [smem:[#allocation2 + $0xe]] }
  0x7b   : > { %v1092_v5 = vrot.slane %v1088_v62, 1 }
  0x7d   : > { %996 = vrot.lane.b32.xlu1 %v992_v3, %s3585_s10  ;;  %v1740_v3 = vmul.f32 %v1739_v63, %v3715_v0 }
  0x7e   : > { %984 = vrot.lane.b32.xlu0 %v979_v4, %s3584_s29  ;;  %v1091_v4 = vrot.slane %v1087_v61, 1 }
  0x7f   : > { %v1744_v9 = vrot.slane %v1740_v3, 1  ;;  %v1139_v3 = vrot.slane %v1135_v59, 2 }
  0x81   : > { %1661 = vrot.lane.b32.xlu1 %v1657_v6, %s3582_s17  ;;  %v1741_v6 = vmul.f32 %v1739_v63, %v3718_v1 }
  0x82   : > { %998 = vrot.lane.b32.xlu0 %v993_v7, %s3585_s10  ;;  %v1756_v7 = vstv %s3206_s18  ;;  %s3938_s18 = sld [smem:[#allocation2 + $0x8f]] }
  0x83   : > { %v1745_v12 = vrot.slane %v1741_v6, 1  ;;  %v1757_v13 = vmul.f32 %v1756_v7, %v3715_v0  ;;  %v1758_v14 = vmul.f32 %v1756_v7, %v3718_v1  ;;  %v2439_v6 = vstv %s3251_s14  ;;  %s4016_s14 = sld [smem:[#allocation2 + $0x91]] }
  0x85   : > { %1675 = vrot.lane.b32.xlu1 %v1671_v10, %s3581_s16  ;;  %v2405_v10 = vstv %s3857_s19  ;;  %v1762_v21 = vrot.slane %v1758_v14, 1  ;;  %s3953_s19 = sld [smem:[#allocation2 + $0x10b]]  ;;  %v521_v14 = vstv %s3129_s15  ;;  %s4022_s15 = sld [smem:[#allocation2 + $0x10d]] }
  0x86   : > { %1663 = vrot.lane.b32.xlu0 %v1658_v11, %s3582_s17  ;;  %v1093_v11 = vsel %vm396_vm0, %v1091_v4, %v1092_v5  ;;  %v2406_v17 = vmul.f32 %v2405_v10, %v3715_v0  ;;  %v2407_v22 = vmul.f32 %v2405_v10, %v3718_v1 }
  0x88   : > { %v2411_v29 = vrot.slane %v2407_v22, 1 }
  0x89   : > { %2327 = vrot.lane.b32.xlu1 %v2323_v15, %s3582_s17 }
  0x8a   : > { %1677 = vrot.lane.b32.xlu0 %v1672_v16, %s3581_s16 }
  0x8d   : > { %1026 = vrot.lane.b32.xlu1 %v1025_v19, %s3582_s17  ;;  %v1746_v19 = vsel %vm396_vm0, %v1744_v9, %v1745_v12 }
  0x8e   : > { %2329 = vrot.lane.b32.xlu0 %v2324_v20, %s3582_s17  ;;  %v1761_v20 = vrot.slane %v1757_v13, 1 }
  0x91   : > { %1689 = vrot.lane.b32.xlu1 %v1685_v23, %s3583_s26 }
  0x92   : > { %1028 = vrot.lane.b32.xlu0 %v1024_v18, %s3582_s17  ;;  %v1116_v18 = vstv %s3866_s20  ;;  %s3252_s20 = sld [smem:[#allocation2 + $0x18a]] }
  0x93   : > { %v1117_v25 = vmul.f32 %v1116_v18, %v3715_v0  ;;  %v1118_v26 = vmul.f32 %v1116_v18, %v3718_v1 }
  0x95   : > { %2341 = vrot.lane.b32.xlu1 %v2337_v27, %s3581_s16  ;;  %v1763_v27 = vsel %vm396_vm0, %v1761_v20, %v1762_v21  ;;  %v1121_v33 = vrot.slane %v1117_v25, 2  ;;  %v1122_v34 = vrot.slane %v1118_v26, 2  ;;  %v522_v20 = vmul.f32 %v521_v14, %v3715_v0 }
  0x96   : > { %1691 = vrot.lane.b32.xlu0 %v1686_v28, %s3583_s26  ;;  %v2410_v28 = vrot.slane %v2406_v17, 1 }
  0x97   : > { %v1123_v41 = vsel %vm495_vm1, %v1121_v33, %v1122_v34  ;;  %v1807_v33 = vstv %s3953_s19  ;;  %s3212_s19 = sld [smem:[#allocation2 + $0x10e]] }
  0x99   : > { %1043 = vrot.lane.b32.xlu1 %v1042_v31, %s3581_s16  ;;  %v1773_v31 = vstv %s3207_s28  ;;  %s3975_s28 = sld [smem:[#allocation2 + $0xf]] }
  0x9a   : > { %2343 = vrot.lane.b32.xlu0 %v2338_v32, %s3581_s16  ;;  %v1774_v36 = vmul.f32 %v1773_v31, %v3715_v0  ;;  %v1775_v37 = vmul.f32 %v1773_v31, %v3718_v1  ;;  %v526_v31 = vrot.slane %v522_v20, 2 }
  0x9d   : > { %1703 = vrot.lane.b32.xlu1 %v1699_v35, %s3584_s29  ;;  %v2412_v35 = vsel %vm396_vm0, %v2410_v28, %v2411_v29 }
  0x9e   : > { %1045 = vrot.lane.b32.xlu0 %v1041_v30, %s3581_s16 }
  0xa1   : > { %2355 = vrot.lane.b32.xlu1 %v2351_v39, %s3583_s26  ;;  %v2422_v39 = vstv %s3250_s9  ;;  %s3167_s9 = sld [smem:[#allocation2 + $0x90]] }
  0xa2   : > { %1705 = vrot.lane.b32.xlu0 %v1700_v40, %s3584_s29  ;;  %v2424_v45 = vmul.f32 %v2422_v39, %v3718_v1 }
  0xa4   : > { %v2428_v51 = vrot.slane %v2424_v45, 1 }
  0xa5   : > { %1060 = vrot.lane.b32.xlu1 %v1059_v43, %s3583_s26  ;;  %v1779_v43 = vrot.slane %v1775_v37, 1 }
  0xa6   : > { %2357 = vrot.lane.b32.xlu0 %v2352_v44, %s3583_s26  ;;  %v2423_v44 = vmul.f32 %v2422_v39, %v3715_v0 }
  0xa8   : > { %v2427_v50 = vrot.slane %v2423_v44, 1 }
  0xa9   : > { %1717 = vrot.lane.b32.xlu1 %v1713_v47, %s3585_s10 }
  0xaa   : > { %1062 = vrot.lane.b32.xlu0 %v1058_v42, %s3583_s26  ;;  %v1778_v42 = vrot.slane %v1774_v36, 1  ;;  %v1808_v36 = vmul.f32 %v1807_v33, %v3715_v0 }
  0xac   : > { %v1780_v49 = vsel %vm396_vm0, %v1778_v42, %v1779_v43  ;;  %v1809_v42 = vmul.f32 %v1807_v33, %v3718_v1 }
  0xad   : > { %2369 = vrot.lane.b32.xlu1 %v2365_v53, %s3584_s29 }
  0xae   : > { %1719 = vrot.lane.b32.xlu0 %v1714_v54, %s3585_s10 }
  0xb1   : > { %1077 = vrot.lane.b32.xlu1 %v1076_v60, %s3584_s29  ;;  %v1790_v60 = vstv %s3208_s12  ;;  %s3131_s12 = sld [smem:[#allocation2 + $0x10]] }
  0xb2   : > { %2371 = vrot.lane.b32.xlu0 %v2366_v58, %s3584_s29  ;;  %v1134_v58 = vmul.f32 %v1133_v55, %v3715_v0  ;;  %v1791_v62 = vmul.f32 %v1790_v60, %v3715_v0  ;;  %v1792_v63 = vmul.f32 %v1790_v60, %v3718_v1  ;;  %v1813_v55 = vrot.slane %v1809_v42, 1 }
  0xb4   : > { %v1138_v4 = vrot.slane %v1134_v58, 2  ;;  %v1796_v7 = vrot.slane %v1792_v63, 1  ;;  %v538_v58 = vstv %s3975_s28  ;;  %s4068_s28 = sld [smem:[#allocation2 + $0x93]] }
  0xb5   : > { %2383 = vrot.lane.b32.xlu1 %v2379_v2, %s3585_s10  ;;  %v539_v63 = vmul.f32 %v538_v58, %v3715_v0 }
  0xb6   : > { %1079 = vrot.lane.b32.xlu0 %v1075_v56, %s3584_s29  ;;  %v2429_v56 = vsel %vm396_vm0, %v2427_v50, %v2428_v51  ;;  %v1140_v10 = vsel %vm495_vm1, %v1138_v4, %v1139_v3 }
  0xb7   : > { %v3877_v15 = vpop.permute.xlu1 %340  ;;  %v555_v33 = vstv %s3131_s12  ;;  %s4098_s12 = sld [smem:[#allocation2 + $0x13]] }
  0xb8   : > { %v3879_v16 = vpop.permute.xlu0 %326  ;;  %v556_v42 = vmul.f32 %v555_v33, %v3715_v0 }
  0xb9   : > { %1094 = vrot.lane.b32.xlu1 %v1093_v11, %s3585_s10  ;;  %v2440_v11 = vmul.f32 %v2439_v6, %v3715_v0 }
  0xba   : > { %2385 = vrot.lane.b32.xlu0 %v2380_v8, %s3585_s10  ;;  %v1795_v8 = vrot.slane %v1791_v62, 1 }
  0xbb   : > { %v3887_v23 = vpop.permute.xlu1 %342 }
  0xbc   : > { %v3889_v24 = vpop.permute.xlu0 %328  ;;  %v1797_v48 = vsel %vm396_vm0, %v1795_v8, %v1796_v7  ;;  %v1167_v8 = vstv %s3167_s9  ;;  %s3213_s9 = sld [smem:[#allocation2 + $0x10f]] }
  0xbd   : > { %1747 = vrot.lane.b32.xlu1 %v1746_v19, %s3582_s17  ;;  %v2444_v19 = vrot.slane %v2440_v11, 1  ;;  %v543_v11 = vrot.slane %v539_v63, 2 }
  0xbe   : > { %1096 = vrot.lane.b32.xlu0 %v1092_v5, %s3585_s10 }
  0xbf   : > { %v3896_v30 = vpop.permute.xlu1 %356 }
  0xc0   : > { %v3898_v32 = vpop.permute.xlu0 %354 }
  0xc1   : > { %1764 = vrot.lane.b32.xlu1 %v1763_v27, %s3581_s16 }
  0xc2   : > { %1749 = vrot.lane.b32.xlu0 %v1745_v12, %s3582_s17  ;;  %v2441_v12 = vmul.f32 %v2439_v6, %v3718_v1  ;;  %v540_v6 = vmul.f32 %v538_v58, %v3718_v1 }
  0xc3   : > { %v3905_v38 = vpop.permute.xlu1 %370 }
  0xc4   : > { %v3907_v40 = vpop.permute.xlu0 %368  ;;  %v2445_v18 = vrot.slane %v2441_v12, 1 }
  0xc5   : > { %2413 = vrot.lane.b32.xlu1 %v2412_v35, %s3582_s17 }
  0xc6   : > { %1766 = vrot.lane.b32.xlu0 %v1762_v21, %s3581_s16  ;;  %v523_v21 = vmul.f32 %v521_v14, %v3718_v1  ;;  %v2446_v28 = vsel %vm396_vm0, %v2444_v19, %v2445_v18  ;;  %v544_v14 = vrot.slane %v540_v6, 2 }
  0xc7   : > { %v3914_v46 = vpop.permute.xlu1 %384 }
  0xc8   : > { %v3916_v47 = vpop.permute.xlu0 %382 }
  0xc9   : > { %1124 = vrot.lane.b32.xlu1 %v1123_v41, %s3582_s17 }
  0xca   : > { %2415 = vrot.lane.b32.xlu0 %v2411_v29, %s3582_s17  ;;  %v527_v29 = vrot.slane %v523_v21, 2 }
  0xcb   : > { %v3921_v53 = vpop.permute.xlu1 %415 }
  0xcc   : > { %v3923_v54 = vpop.permute.xlu0 %413  ;;  %v528_v39 = vsel %vm495_vm1, %v526_v31, %v527_v29 }
  0xcd   : > { %1781 = vrot.lane.b32.xlu1 %v1780_v49, %s3583_s26 }
  0xce   : > { %1126 = vrot.lane.b32.xlu0 %v1122_v34, %s3582_s17 }
  0xcf   : > { %v3928_v57 = vpop.permute.xlu1 %432 }
  0xd0   : > { %v3932_v61 = vpop.permute.xlu0 %430 }
  0xd1   : > { %2430 = vrot.lane.b32.xlu1 %v2429_v56, %s3581_s16  ;;  %v1812_v56 = vrot.slane %v1808_v36, 1 }
  0xd2   : > { %1783 = vrot.lane.b32.xlu0 %v1779_v43, %s3583_s26  ;;  %v2456_v43 = vstv %s3252_s20  ;;  %s3255_s20 = sld [smem:[#allocation2 + $0x18d]] }
  0xd3   : > { %v3940_v2 = vpop.permute.xlu1 %449  ;;  %v2457_v45 = vmul.f32 %v2456_v43, %v3715_v0  ;;  %v2458_v49 = vmul.f32 %v2456_v43, %v3718_v1  ;;  %v1814_v4 = vsel %vm396_vm0, %v1812_v56, %v1813_v55  ;;  %v557_v43 = vmul.f32 %v555_v33, %v3718_v1 }
  0xd4   : > { %v3942_v5 = vpop.permute.xlu0 %447 }
  0xd5   : > { %514 = vrot.lane.b32.xlu1 %v510_v52, %s3582_s17  ;;  %v1150_v52 = vstv %s3938_s18  ;;  %v2462_v60 = vrot.slane %v2458_v49, 1  ;;  %v2461_v62 = vrot.slane %v2457_v45, 1  ;;  %s4036_s18 = sld [smem:[#allocation2 + $0x11]]  ;;  %v1184_v49 = vstv %s4016_s14  ;;  %s4111_s14 = sld [smem:[#allocation2 + $0x94]] }
  0xd6   : > { %2432 = vrot.lane.b32.xlu0 %v2428_v51, %s3581_s16  ;;  %v1151_v25 = vmul.f32 %v1150_v52, %v3715_v0  ;;  %v1152_v26 = vmul.f32 %v1150_v52, %v3718_v1  ;;  %v1169_v52 = vmul.f32 %v1167_v8, %v3718_v1  ;;  %v561_v58 = vrot.slane %v557_v43, 2 }
  0xd7   : > { %v3948_v9 = vpop.permute.xlu1 %466  ;;  %v1186_v63 = vmul.f32 %v1184_v49, %v3718_v1 }
  0xd8   : > { %v3955_v13 = vpop.permute.xlu0 %464  ;;  %v1156_v35 = vrot.slane %v1152_v26, 2  ;;  %v1155_v41 = vrot.slane %v1151_v25, 2  ;;  %v545_v26 = vsel %vm495_vm1, %v543_v11, %v544_v14 }
  0xd9   : > { %1143 = vrot.lane.b32.xlu1 %v1139_v3, %s3581_s16 }
  0xda   : > { %1141 = vrot.lane.b32.xlu0 %v1140_v10, %s3581_s16  ;;  %v1157_v51 = vsel %vm495_vm1, %v1155_v41, %v1156_v35  ;;  %v2463_v10 = vsel %vm396_vm0, %v2461_v62, %v2462_v60  ;;  %v1185_v62 = vmul.f32 %v1184_v49, %v3715_v0 }
  0xdb   : > { %v3961_v17 = vpop.permute.xlu1 %483 }
  0xdc   : > { %v3965_v22 = vpop.permute.xlu0 %481 }
  0xdd   : > { %1800 = vrot.lane.b32.xlu1 %v1796_v7, %s3584_s29 }
  0xde   : > { %1798 = vrot.lane.b32.xlu0 %v1797_v48, %s3584_s29  ;;  %v1168_v48 = vmul.f32 %v1167_v8, %v3715_v0 }
  0xdf   : > { %v3971_v27 = vpop.permute.xlu1 %940 }
  0xe0   : > { %v3977_v34 = vpop.permute.xlu0 %512 }
  0xe1   : > { %2449 = vrot.lane.b32.xlu1 %v2445_v18, %s3583_s26  ;;  %v2473_v18 = vstv %s3253_s11  ;;  %s3256_s11 = sld [smem:[#allocation2 + $0x18e]] }
  0xe2   : > { %2447 = vrot.lane.b32.xlu0 %v2446_v28, %s3583_s26  ;;  %v2474_v20 = vmul.f32 %v2473_v18, %v3715_v0  ;;  %v2475_v21 = vmul.f32 %v2473_v18, %v3718_v1  ;;  %v1173_v28 = vrot.slane %v1169_v52, 2  ;;  %v572_v52 = vstv %s4036_s18  ;;  %s4130_s18 = sld [smem:[#allocation2 + $0x18f]] }
  0xe3   : > { %v3982_v37 = vpop.permute.xlu1 %954  ;;  %v573_v33 = vmul.f32 %v572_v52, %v3715_v0 }
  0xe4   : > { %v3986_v44 = vpop.permute.xlu0 %942  ;;  %v2478_v36 = vrot.slane %v2474_v20, 1 }
  0xe5   : > { %531 = vrot.lane.b32.xlu1 %v527_v29, %s3581_s16  ;;  %v1172_v29 = vrot.slane %v1168_v48, 2  ;;  %v1189_v48 = vrot.slane %v1185_v62, 2  ;;  %v577_v49 = vrot.slane %v573_v33, 2 }
  0xe6   : > { %529 = vrot.lane.b32.xlu0 %v528_v39, %s3581_s16 }
  0xe7   : > { %v3992_v50 = vpop.permute.xlu1 %968  ;;  %v1174_v41 = vsel %vm495_vm1, %v1172_v29, %v1173_v28 }
  0xe8   : > { %v3996_v59 = vpop.permute.xlu0 %956 }
  0xe9   : > { %1160 = vrot.lane.b32.xlu1 %v1156_v35, %s3583_s26  ;;  %v2479_v35 = vrot.slane %v2475_v21, 1 }
  0xea   : > { %1158 = vrot.lane.b32.xlu0 %v1157_v51, %s3583_s26 }
  0xeb   : > { %v4001_v3 = vpop.permute.xlu1 %982  ;;  %v2480_v51 = vsel %vm396_vm0, %v2478_v36, %v2479_v35  ;;  %v1854_v36 = vstv %s3212_s19  ;;  %s3135_s19 = sld [smem:[#allocation2 + $0x14]] }
  0xec   : > { %v4005_v7 = vpop.permute.xlu0 %970 }
  0xed   : > { %1817 = vrot.lane.b32.xlu1 %v1813_v55, %s3585_s10  ;;  %v1837_v55 = vstv %s4022_s15  ;;  %s3214_s15 = sld [smem:[#allocation2 + $0x110]] }
  0xee   : > { %1815 = vrot.lane.b32.xlu0 %v1814_v4, %s3585_s10  ;;  %v1839_v6 = vmul.f32 %v1837_v55, %v3718_v1  ;;  %v1838_v8 = vmul.f32 %v1837_v55, %v3715_v0  ;;  %v1855_v55 = vmul.f32 %v1854_v36, %v3715_v0 }
  0xef   : > { %v4010_v12 = vpop.permute.xlu1 %996 }
  0xf0   : > { %v4014_v19 = vpop.permute.xlu0 %984  ;;  %v1843_v20 = vrot.slane %v1839_v6, 2  ;;  %v1842_v21 = vrot.slane %v1838_v8, 2 }
  0xf1   : > { %2466 = vrot.lane.b32.xlu1 %v2462_v60, %s3584_s29  ;;  %v560_v60 = vrot.slane %v556_v42, 2 }
  0xf2   : > { %2464 = vrot.lane.b32.xlu0 %v2463_v10, %s3584_s29 }
  0xf3   : > { %v4024_v25 = vpop.permute.xlu1 %1661  ;;  %v562_v11 = vsel %vm495_vm1, %v560_v60, %v561_v58 }
  0xf4   : > { %v4027_v31 = vpop.permute.xlu0 %998 }
  0xf5   : > { %548 = vrot.lane.b32.xlu1 %v544_v14, %s3583_s26  ;;  %v1190_v14 = vrot.slane %v1186_v63, 2 }
  0xf6   : > { %546 = vrot.lane.b32.xlu0 %v545_v26, %s3583_s26  ;;  %v574_v26 = vmul.f32 %v572_v52, %v3718_v1 }
  0xf7   : > { %v4031_v39 = vpop.permute.xlu1 %1675  ;;  %v1191_v29 = vsel %vm495_vm1, %v1189_v48, %v1190_v14  ;;  %v1214_v48 = vstv %s4068_s28  ;;  %s4167_s28 = sld [smem:[#allocation2 + $0x111]] }
  0xf8   : > { %v4038_v45 = vpop.permute.xlu0 %1663  ;;  %v578_v42 = vrot.slane %v574_v26, 2  ;;  %v1216_v26 = vmul.f32 %v1214_v48, %v3718_v1 }
  0xf9   : > { %1177 = vrot.lane.b32.xlu1 %v1173_v28, %s3584_s29 }
  0xfa   : > { %1175 = vrot.lane.b32.xlu0 %v1174_v41, %s3584_s29  ;;  %v1844_v41 = vsel %vm495_vm1, %v1842_v21, %v1843_v20  ;;  %v579_v8 = vsel %vm495_vm1, %v577_v49, %v578_v42  ;;  %v1871_v49 = vstv %s3213_s9  ;;  %s3258_s9 = sld [smem:[#allocation2 + $0x190]] }
  0xfb   : > { %v4045_v56 = vpop.permute.xlu1 %2327 }
  0xfc   : > { %v4049_v4 = vpop.permute.xlu0 %1677 }
  0xfd   : > { %2483 = vrot.lane.b32.xlu1 %v2479_v35, %s3585_s10 }
  0xfe   : > { %2481 = vrot.lane.b32.xlu0 %v2480_v51, %s3585_s10  ;;  %v1856_v51 = vmul.f32 %v1854_v36, %v3718_v1  ;;  %v1215_v36 = vmul.f32 %v1214_v48, %v3715_v0 }
  0xff   : > { %v4055_v10 = vpop.permute.xlu1 %1026 }
 0x100   : > { %v4059_v18 = vpop.permute.xlu0 %2329 }
 0x101   : > { %565 = vrot.lane.b32.xlu1 %v561_v58, %s3584_s29  ;;  %v2503_v58 = vstv %s3255_s20  ;;  %s3172_s20 = sld [smem:[#allocation2 + $0x95]] }
 0x102   : > { %563 = vrot.lane.b32.xlu0 %v562_v11, %s3584_s29  ;;  %v2505_v62 = vmul.f32 %v2503_v58, %v3718_v1  ;;  %v2504_v63 = vmul.f32 %v2503_v58, %v3715_v0  ;;  %v1860_v11 = vrot.slane %v1856_v51, 2  ;;  %v1220_v51 = vrot.slane %v1216_v26, 3 }
 0x103   : > { %v4064_v28 = vpop.permute.xlu1 %1689  ;;  %v1219_v58 = vrot.slane %v1215_v36, 3 }
 0x104   : > { %v4070_v35 = vpop.permute.xlu0 %1028  ;;  %v2508_v21 = vrot.slane %v2504_v63, 2  ;;  %v1872_v63 = vmul.f32 %v1871_v49, %v3715_v0 }
 0x105   : > { %5622 = vst [vmem:[#allocation11_spill] sm:$0xff] %v4070_v35  ;;  %1194 = vrot.lane.b32.xlu1 %v1190_v14, %s3585_s10  ;;  %v1859_v14 = vrot.slane %v1855_v55, 2  ;;  %v1221_v26 = vsel %vm594_vm2, %v1219_v58, %v1220_v51 }
 0x106   : > { %1192 = vrot.lane.b32.xlu0 %v1191_v29, %s3585_s10  ;;  %v1876_v36 = vrot.slane %v1872_v63, 2 }
 0x107   : > { %v4075_v43 = vpop.permute.xlu1 %2341  ;;  %v1861_v33 = vsel %vm495_vm1, %v1859_v14, %v1860_v11 }
 0x108   : > { %v4079_v60 = vpop.permute.xlu0 %1691 }
 0x109   : > { %1847 = vrot.lane.b32.xlu1 %v1843_v20, %s3582_s17  ;;  %v2509_v20 = vrot.slane %v2505_v62, 2  ;;  %v1873_v62 = vmul.f32 %v1871_v49, %v3718_v1  ;;  %v603_v49 = vstv %s4098_s12  ;;  %s4197_s12 = sld [smem:[#allocation2 + $0x96]] }
 0x10a   : > { %1845 = vrot.lane.b32.xlu0 %v1844_v41, %s3582_s17 }
 0x10b   : > { %v4085_v6 = vpop.permute.xlu1 %1043 }
 0x10c   : > { %5623 = vst [vmem:[#allocation12_spill] sm:$0xff] %v4085_v6  ;;  %v4089_v52 = vpop.permute.xlu0 %2343 }
 0x10d   : > { %5624 = vst [vmem:[#allocation13_spill] sm:$0xff] %v4089_v52  ;;  %582 = vrot.lane.b32.xlu1 %v578_v42, %s3585_s10  ;;  %v2510_v42 = vsel %vm495_vm1, %v2508_v21, %v2509_v20 }
 0x10e   : > { %580 = vrot.lane.b32.xlu0 %v579_v8, %s3585_s10  ;;  %v2520_v8 = vstv %s3256_s11  ;;  %s3136_s11 = sld [smem:[#allocation2 + $0x15]] }
 0x10f   : > { %v4094_v29 = vpop.permute.xlu1 %1703  ;;  %v2521_v48 = vmul.f32 %v2520_v8, %v3715_v0 }
 0x110   : > { %5625 = vst [vmem:[#allocation14_spill] sm:$0xff] %v4094_v29  ;;  %v4100_v41 = vpop.permute.xlu0 %1045 }
 0x111   : > { %5626 = vst [vmem:[#allocation15_spill] sm:$0xff] %v4100_v41  ;;  %1864 = vrot.lane.b32.xlu1 %v1860_v11, %s3581_s16  ;;  %v2522_v11 = vmul.f32 %v2520_v8, %v3718_v1  ;;  %v605_v8 = vmul.f32 %v603_v49, %v3718_v1 }
 0x112   : > { %1862 = vrot.lane.b32.xlu0 %v1861_v33, %s3581_s16  ;;  %v1877_v33 = vrot.slane %v1873_v62, 2  ;;  %v604_v62 = vmul.f32 %v603_v49, %v3715_v0 }
 0x113   : > { %v4105_v55 = vpop.permute.xlu1 %2355 }
 0x114   : > { %5627 = vst [vmem:[#allocation16_spill] sm:$0xff] %v4105_v55  ;;  %v4109_v14 = vpop.permute.xlu0 %1705  ;;  %v1878_v58 = vsel %vm495_vm1, %v1876_v36, %v1877_v33  ;;  %v608_v1 = vrot.slane %v604_v62, 3  ;;  %v4145_v36 = vld [vmem:[%s3712_s13] sm:$0xff] }
 0x115   : > { %5628 = vst [vmem:[#allocation17_spill] sm:$0xff] %v4109_v14  ;;  %2513 = vrot.lane.b32.xlu1 %v2509_v20, %s3582_s17  ;;  %v2526_v20 = vrot.slane %v2522_v11, 2  ;;  %v609_v11 = vrot.slane %v605_v8, 3  ;;  %v2537_v14 = vstv %s4130_s18  ;;  %s4227_s18 = sld [smem:[#allocation2 + $0x97]] }
 0x116   : > { %2511 = vrot.lane.b32.xlu0 %v2510_v42, %s3582_s17  ;;  %v2525_v42 = vrot.slane %v2521_v48, 2 }
 0x117   : > { %v4117_v21 = vpop.permute.xlu1 %1060 }
 0x118   : > { %5629 = vst [vmem:[#allocation18_spill] sm:$0xff] %v4117_v21  ;;  %v4121_v41 = vpop.permute.xlu0 %2357 }
 0x119   : > { %5630 = vst [vmem:[#allocation19_spill] sm:$0xff] %v4121_v41  ;;  %1224 = vrot.lane.b32.xlu1 %v1220_v51, %s3582_s17  ;;  %v1231_v41 = vstv %s4111_s14  ;;  %v2527_v51 = vsel %vm495_vm1, %v2525_v42, %v2526_v20  ;;  %s3259_s14 = sld [smem:[#allocation2 + $0x191]] }
 0x11a   : > { %1222 = vrot.lane.b32.xlu0 %v1221_v26, %s3582_s17  ;;  %v4141_v26 = vld [vmem:[%s3712_s13 + $0x8] sm:$0xff]  ;;  %v1232_v49 = vmul.f32 %v4145_v36, %v1231_v41 }
 0x11b   : > { %v4126_v21 = vpop.permute.xlu1 %1717  ;;  %v1233_v0 = vmul.f32 %v4141_v26, %v1231_v41 }
 0x11c   : > { %5631 = vst [vmem:[#allocation20_spill] sm:$0xff] %v4126_v21  ;;  %v4132_v63 = vpop.permute.xlu0 %1062 }
 0x11d   : > { %5632 = vst [vmem:[#allocation21_spill] sm:$0xff] %v4132_v63  ;;  %1881 = vrot.lane.b32.xlu1 %v1877_v33, %s3583_s26  ;;  %v1888_v63 = vstv %s3214_s15  ;;  %v1237_v62 = vrot.slane %v1233_v0, 3  ;;  %s3137_s15 = sld [smem:[#allocation2 + $0x16]] }
 0x11e   : > { %1879 = vrot.lane.b32.xlu0 %v1878_v58, %s3583_s26  ;;  %v1890_v33 = vmul.f32 %v4141_v26, %v1888_v63  ;;  %v1889_v42 = vmul.f32 %v4145_v36, %v1888_v63  ;;  %v610_v58 = vsel %vm594_vm2, %v608_v1, %v609_v11  ;;  %v2538_v1 = vmul.f32 %v4145_v36, %v2537_v14 }
 0x11f   : > { %v4138_v48 = vpop.permute.xlu1 %2369 }
 0x120   : > { %5633 = vst [vmem:[#allocation22_spill] sm:$0xff] %v4138_v48  ;;  %v4148_v21 = vpop.permute.xlu0 %1719  ;;  %v1236_v48 = vrot.slane %v1232_v49, 3  ;;  %v620_v49 = vstv %s3135_s19  ;;  %s3217_s19 = sld [smem:[#allocation2 + $0x113]] }
 0x121   : > { %5634 = vst [vmem:[#allocation23_spill] sm:$0xff] %v4148_v21  ;;  %2530 = vrot.lane.b32.xlu1 %v2526_v20, %s3581_s16  ;;  %v1894_v20 = vrot.slane %v1890_v33, 2  ;;  %v2539_v21 = vmul.f32 %v4141_v26, %v2537_v14  ;;  %v621_v14 = vmul.f32 %v4145_v36, %v620_v49 }
 0x122   : > { %2528 = vrot.lane.b32.xlu0 %v2527_v51, %s3581_s16  ;;  %v1893_v51 = vrot.slane %v1889_v42, 2  ;;  %v1238_v63 = vsel %vm594_vm2, %v1236_v48, %v1237_v62  ;;  %v622_v48 = vmul.f32 %v4141_v26, %v620_v49 }
 0x123   : > { %v4154_v8 = vpop.permute.xlu1 %1077  ;;  %v2543_v33 = vrot.slane %v2539_v21, 2 }
 0x124   : > { %5635 = vst [vmem:[#allocation24_spill] sm:$0xff] %v4154_v8  ;;  %v4158_v41 = vpop.permute.xlu0 %2371 }
 0x125   : > { %5636 = vst [vmem:[#allocation25_spill] sm:$0xff] %v4158_v41  ;;  %613 = vrot.lane.b32.xlu1 %v609_v11, %s3582_s17  ;;  %v1895_v11 = vsel %vm495_vm1, %v1893_v51, %v1894_v20  ;;  %v1248_v41 = vstv %s3172_s20  ;;  %s3138_s20 = sld [smem:[#allocation2 + $0x17]] }
 0x126   : > { %611 = vrot.lane.b32.xlu0 %v610_v58, %s3582_s17  ;;  %v2542_v58 = vrot.slane %v2538_v1, 2  ;;  %v1249_v21 = vmul.f32 %v4145_v36, %v1248_v41  ;;  %v626_v1 = vrot.slane %v622_v48, 3 }
 0x127   : > { %v4163_v55 = vpop.permute.xlu1 %2383 }
 0x128   : > { %5637 = vst [vmem:[#allocation26_spill] sm:$0xff] %v4163_v55  ;;  %v4169_v0 = vpop.permute.xlu0 %1079 }
 0x129   : > { %5638 = vst [vmem:[#allocation27_spill] sm:$0xff] %v4169_v0  ;;  %1241 = vrot.lane.b32.xlu1 %v1237_v62, %s3581_s16  ;;  %v1250_v62 = vmul.f32 %v4141_v26, %v1248_v41  ;;  %v1905_v0 = vstv %s4167_s28  ;;  %s4257_s28 = sld [smem:[#allocation2 + $0x114]] }
 0x12a   : > { %1239 = vrot.lane.b32.xlu0 %v1238_v63, %s3581_s16  ;;  %v2544_v63 = vsel %vm495_vm1, %v2542_v58, %v2543_v33  ;;  %v1906_v58 = vmul.f32 %v4145_v36, %v1905_v0 }
 0x12b   : > { %v4174_v42 = vpop.permute.xlu1 %1094 }
 0x12c   : > { %5639 = vst [vmem:[#allocation28_spill] sm:$0xff] %v4174_v42  ;;  %v4178_v8 = vpop.permute.xlu0 %2385  ;;  %v625_v42 = vrot.slane %v621_v14, 3  ;;  %v2554_v14 = vstv %s3258_s9  ;;  %s3261_s9 = sld [smem:[#allocation2 + $0x193]] }
 0x12d   : > { %5640 = vst [vmem:[#allocation29_spill] sm:$0xff] %v4178_v8  ;;  %1898 = vrot.lane.b32.xlu1 %v1894_v20, %s3584_s29  ;;  %v1254_v20 = vrot.slane %v1250_v62, 3  ;;  %v1907_v8 = vmul.f32 %v4141_v26, %v1905_v0  ;;  %v2555_v0 = vmul.f32 %v4145_v36, %v2554_v14 }
 0x12e   : > { %1896 = vrot.lane.b32.xlu0 %v1895_v11, %s3584_s29  ;;  %v1253_v11 = vrot.slane %v1249_v21, 3  ;;  %v627_v41 = vsel %vm594_vm2, %v625_v42, %v626_v1  ;;  %v2556_v42 = vmul.f32 %v4141_v26, %v2554_v14 }
 0x12f   : > { %v4184_v51 = vpop.permute.xlu1 %1747  ;;  %v1911_v62 = vrot.slane %v1907_v8, 2 }
 0x130   : > { %5641 = vst [vmem:[#allocation30_spill] sm:$0xff] %v4184_v51  ;;  %v4188_v49 = vpop.permute.xlu0 %1096 }
 0x131   : > { %5642 = vst [vmem:[#allocation31_spill] sm:$0xff] %v4188_v49  ;;  %2547 = vrot.lane.b32.xlu1 %v2543_v33, %s3583_s26  ;;  %v1255_v33 = vsel %vm594_vm2, %v1253_v11, %v1254_v20 }
 0x132   : > { %2545 = vrot.lane.b32.xlu0 %v2544_v63, %s3583_s26  ;;  %v1910_v63 = vrot.slane %v1906_v58, 2  ;;  %v2560_v58 = vrot.slane %v2556_v42, 2 }
 0x133   : > { %v4193_v55 = vpop.permute.xlu1 %1764 }
 0x134   : > { %5643 = vst [vmem:[#allocation32_spill] sm:$0xff] %v4193_v55  ;;  %v4199_v48 = vpop.permute.xlu0 %1749  ;;  %v637_v55 = vstv %s3136_s11  ;;  %s3176_s11 = sld [smem:[#allocation2 + $0x99]] }
 0x135   : > { %5644 = vst [vmem:[#allocation33_spill] sm:$0xff] %v4199_v48  ;;  %630 = vrot.lane.b32.xlu1 %v626_v1, %s3581_s16  ;;  %v639_v1 = vmul.f32 %v4141_v26, %v637_v55  ;;  %v638_v8 = vmul.f32 %v4145_v36, %v637_v55  ;;  %v1265_v48 = vstv %s4197_s12  ;;  %s4287_s12 = sld [smem:[#allocation2 + $0x115]] }
 0x136   : > { %628 = vrot.lane.b32.xlu0 %v627_v41, %s3581_s16  ;;  %v1912_v41 = vsel %vm495_vm1, %v1910_v63, %v1911_v62  ;;  %v1266_v63 = vmul.f32 %v4145_v36, %v1265_v48 }
 0x137   : > { %v4204_v21 = vpop.permute.xlu1 %2413 }
 0x138   : > { %5645 = vst [vmem:[#allocation34_spill] sm:$0xff] %v4204_v21  ;;  %v4208_v51 = vpop.permute.xlu0 %1766  ;;  %v2559_v21 = vrot.slane %v2555_v0, 2  ;;  %v2571_v0 = vstv %s3259_s14  ;;  %s4300_s14 = sld [smem:[#allocation2 + $0x194]] }
 0x139   : > { %5646 = vst [vmem:[#allocation35_spill] sm:$0xff] %v4208_v51  ;;  %1258 = vrot.lane.b32.xlu1 %v1254_v20, %s3583_s26  ;;  %v643_v20 = vrot.slane %v639_v1, 3  ;;  %v1267_v51 = vmul.f32 %v4141_v26, %v1265_v48  ;;  %v2572_v48 = vmul.f32 %v4145_v36, %v2571_v0 }
 0x13a   : > { %1256 = vrot.lane.b32.xlu0 %v1255_v33, %s3583_s26  ;;  %v642_v33 = vrot.slane %v638_v8, 3  ;;  %v2561_v55 = vsel %vm495_vm1, %v2559_v21, %v2560_v58  ;;  %v2573_v21 = vmul.f32 %v4141_v26, %v2571_v0 }
 0x13b   : > { %v4214_v11 = vpop.permute.xlu1 %1124  ;;  %v1271_v1 = vrot.slane %v1267_v51, 3 }
 0x13c   : > { %5647 = vst [vmem:[#allocation36_spill] sm:$0xff] %v4214_v11  ;;  %v4218_v14 = vpop.permute.xlu0 %2415 }
 0x13d   : > { %5648 = vst [vmem:[#allocation37_spill] sm:$0xff] %v4218_v14  ;;  %1915 = vrot.lane.b32.xlu1 %v1911_v62, %s3585_s10  ;;  %v644_v62 = vsel %vm594_vm2, %v642_v33, %v643_v20 }
 0x13e   : > { %1913 = vrot.lane.b32.xlu0 %v1912_v41, %s3585_s10  ;;  %v1270_v41 = vrot.slane %v1266_v63, 3  ;;  %v2577_v63 = vrot.slane %v2573_v21, 2 }
 0x13f   : > { %v4223_v49 = vpop.permute.xlu1 %1781 }
 0x140   : > { %5649 = vst [vmem:[#allocation38_spill] sm:$0xff] %v4223_v49  ;;  %v4229_v42 = vpop.permute.xlu0 %1126  ;;  %v654_v49 = vstv %s3137_s15  ;;  %s3140_s15 = sld [smem:[#allocation2 + $0x19]] }
 0x141   : > { %5650 = vst [vmem:[#allocation39_spill] sm:$0xff] %v4229_v42  ;;  %2564 = vrot.lane.b32.xlu1 %v2560_v58, %s3584_s29  ;;  %v656_v58 = vmul.f32 %v4141_v26, %v654_v49  ;;  %v655_v51 = vmul.f32 %v4145_v36, %v654_v49  ;;  %v1282_v42 = vstv %s4227_s18  ;;  %s4319_s18 = sld [smem:[#allocation2 + $0x9a]] }
 0x142   : > { %2562 = vrot.lane.b32.xlu0 %v2561_v55, %s3584_s29  ;;  %v1272_v55 = vsel %vm594_vm2, %v1270_v41, %v1271_v1  ;;  %v1283_v41 = vmul.f32 %v4145_v36, %v1282_v42 }
 0x143   : > { %v4234_v8 = vpop.permute.xlu1 %2430 }
 0x144   : > { %5651 = vst [vmem:[#allocation40_spill] sm:$0xff] %v4234_v8  ;;  %v4238_v14 = vpop.permute.xlu0 %1783  ;;  %v2576_v8 = vrot.slane %v2572_v48, 2  ;;  %v1935_v48 = vstv %s3217_s19  ;;  %s3220_s19 = sld [smem:[#allocation2 + $0x116]] }
 0x145   : > { %5652 = vst [vmem:[#allocation41_spill] sm:$0xff] %v4238_v14  ;;  %647 = vrot.lane.b32.xlu1 %v643_v20, %s3583_s26  ;;  %v660_v20 = vrot.slane %v656_v58, 3  ;;  %v1284_v14 = vmul.f32 %v4141_v26, %v1282_v42  ;;  %v1936_v42 = vmul.f32 %v4145_v36, %v1935_v48 }
 0x146   : > { %645 = vrot.lane.b32.xlu0 %v644_v62, %s3583_s26  ;;  %v659_v62 = vrot.slane %v655_v51, 3  ;;  %v2578_v49 = vsel %vm495_vm1, %v2576_v8, %v2577_v63  ;;  %v1937_v8 = vmul.f32 %v4141_v26, %v1935_v48 }
 0x147   : > { %v4244_v33 = vpop.permute.xlu1 %514  ;;  %v1288_v58 = vrot.slane %v1284_v14, 3 }
 0x148   : > { %5653 = vst [vmem:[#allocation42_spill] sm:$0xff] %v4244_v33  ;;  %v4248_v0 = vpop.permute.xlu0 %2432 }
 0x149   : > { %5654 = vst [vmem:[#allocation43_spill] sm:$0xff] %v4248_v0  ;;  %1275 = vrot.lane.b32.xlu1 %v1271_v1, %s3584_s29  ;;  %v661_v1 = vsel %vm594_vm2, %v659_v62, %v660_v20 }
 0x14a   : > { %1273 = vrot.lane.b32.xlu0 %v1272_v55, %s3584_s29  ;;  %v1287_v55 = vrot.slane %v1283_v41, 3  ;;  %v1941_v41 = vrot.slane %v1937_v8, 3 }
 0x14b   : > { %v4253_v11 = vpop.permute.xlu1 %1143 }
 0x14c   : > { %5655 = vst [vmem:[#allocation44_spill] sm:$0xff] %v4253_v11  ;;  %v4259_v21 = vpop.permute.xlu0 %1141  ;;  %v671_v11 = vstv %s3138_s20  ;;  %s3263_s20 = sld [smem:[#allocation2 + $0x195]] }
 0x14d   : > { %5656 = vst [vmem:[#allocation45_spill] sm:$0xff] %v4259_v21  ;;  %2581 = vrot.lane.b32.xlu1 %v2577_v63, %s3585_s10  ;;  %v673_v63 = vmul.f32 %v4141_v26, %v671_v11  ;;  %v672_v14 = vmul.f32 %v4145_v36, %v671_v11  ;;  %v1952_v21 = vstv %s4257_s28  ;;  %s4350_s28 = sld [smem:[#allocation2 + $0x1a]] }
 0x14e   : > { %2579 = vrot.lane.b32.xlu0 %v2578_v49, %s3585_s10  ;;  %v1289_v49 = vsel %vm594_vm2, %v1287_v55, %v1288_v58  ;;  %v1953_v55 = vmul.f32 %v4145_v36, %v1952_v21 }
 0x14f   : > { %v4264_v51 = vpop.permute.xlu1 %1800 }
 0x150   : > { %5657 = vst [vmem:[#allocation46_spill] sm:$0xff] %v4264_v51  ;;  %v4268_v0 = vpop.permute.xlu0 %1798  ;;  %v1940_v51 = vrot.slane %v1936_v42, 3  ;;  %v2601_v42 = vstv %s3261_s9  ;;  %s4363_s9 = sld [smem:[#allocation2 + $0x9b]] }
 0x151   : > { %5658 = vst [vmem:[#allocation47_spill] sm:$0xff] %v4268_v0  ;;  %664 = vrot.lane.b32.xlu1 %v660_v20, %s3584_s29  ;;  %v677_v20 = vrot.slane %v673_v63, 3  ;;  %v1954_v0 = vmul.f32 %v4141_v26, %v1952_v21  ;;  %v2602_v21 = vmul.f32 %v4145_v36, %v2601_v42 }
 0x152   : > { %662 = vrot.lane.b32.xlu0 %v661_v1, %s3584_s29  ;;  %v676_v1 = vrot.slane %v672_v14, 3  ;;  %v1942_v11 = vsel %vm594_vm2, %v1940_v51, %v1941_v41  ;;  %v2603_v51 = vmul.f32 %v4141_v26, %v2601_v42 }
 0x153   : > { %v4274_v62 = vpop.permute.xlu1 %2449  ;;  %v1958_v63 = vrot.slane %v1954_v0, 3  ;;  %v2606_v42 = vrot.slane %v2602_v21, 3  ;;  %v2618_v21 = vstv %s4300_s14  ;;  %s4386_s14 = sld [smem:[#allocation2 + $0x196]] }
 0x154   : > { %5659 = vst [vmem:[#allocation48_spill] sm:$0xff] %v4274_v62  ;;  %v4278_v48 = vpop.permute.xlu0 %2447 }
 0x155   : > { %5660 = vst [vmem:[#allocation49_spill] sm:$0xff] %v4278_v48  ;;  %1292 = vrot.lane.b32.xlu1 %v1288_v58, %s3585_s10  ;;  %v678_v58 = vsel %vm594_vm2, %v676_v1, %v677_v20 }
 0x156   : > { %1290 = vrot.lane.b32.xlu0 %v1289_v49, %s3585_s10  ;;  %v1957_v49 = vrot.slane %v1953_v55, 3  ;;  %v2607_v55 = vrot.slane %v2603_v51, 3 }
 0x157   : > { %v4283_v33 = vpop.permute.xlu1 %531 }
 0x158   : > { %5661 = vst [vmem:[#allocation50_spill] sm:$0xff] %v4283_v33  ;;  %v4289_v8 = vpop.permute.xlu0 %529  ;;  %v1312_v33 = vstv %s3176_s11  ;;  %s4373_s11 = sld [smem:[#allocation2 + $0x117]] }
 0x159   : > { %5662 = vst [vmem:[#allocation51_spill] sm:$0xff] %v4289_v8  ;;  %1945 = vrot.lane.b32.xlu1 %v1941_v41, %s3582_s17  ;;  %v1314_v41 = vmul.f32 %v4141_v26, %v1312_v33  ;;  %v1313_v0 = vmul.f32 %v4145_v36, %v1312_v33 }
 0x15a   : > { %1943 = vrot.lane.b32.xlu0 %v1942_v11, %s3582_s17  ;;  %v1959_v11 = vsel %vm594_vm2, %v1957_v49, %v1958_v63 }
 0x15b   : > { %v4294_v14 = vpop.permute.xlu1 %1160 }
 0x15c   : > { %5663 = vst [vmem:[#allocation52_spill] sm:$0xff] %v4294_v14  ;;  %v4298_v48 = vpop.permute.xlu0 %1158  ;;  %v1969_v14 = vstv %s4287_s12  ;;  %s4377_s12 = sld [smem:[#allocation2]] }
 0x15d   : > { %5664 = vst [vmem:[#allocation53_spill] sm:$0xff] %v4298_v48  ;;  %681 = vrot.lane.b32.xlu1 %v677_v20, %s3585_s10  ;;  %v1318_v20 = vrot.slane %v1314_v41, 4  ;;  %v1971_v8 = vmul.f32 %v4141_v26, %v1969_v14  ;;  %v1970_v49 = vmul.f32 %v4145_v36, %v1969_v14  ;;  %v2619_v14 = vmul.f32 %v4145_v36, %v2618_v21 }
 0x15e   : > { %679 = vrot.lane.b32.xlu0 %v678_v58, %s3585_s10  ;;  %v1317_v58 = vrot.slane %v1313_v0, 4 }
 0x15f   : > { %v4306_v1 = vpop.permute.xlu1 %1817  ;;  %v1975_v41 = vrot.slane %v1971_v8, 3 }
 0x160   : > { %5665 = vst [vmem:[#allocation54_spill] sm:$0xff] %v4306_v1  ;;  %v4310_v48 = vpop.permute.xlu0 %1815  ;;  %v2608_v1 = vsel %vm594_vm2, %v2606_v42, %v2607_v55  ;;  %v2620_v42 = vmul.f32 %v4141_v26, %v2618_v21 }
 0x161   : > { %5666 = vst [vmem:[#allocation55_spill] sm:$0xff] %v4310_v48  ;;  %1962 = vrot.lane.b32.xlu1 %v1958_v63, %s3581_s16  ;;  %v1319_v63 = vsel %vm693_vm3, %v1317_v58, %v1318_v20  ;;  %v702_v48 = vstv %s3140_s15  ;;  %s4392_s15 = sld [smem:[#allocation2 + $0x6]] }
 0x162   : > { %1960 = vrot.lane.b32.xlu0 %v1959_v11, %s3581_s16  ;;  %v1974_v11 = vrot.slane %v1970_v49, 3  ;;  %v703_v8 = vmul.f32 %v4145_v36, %v702_v48  ;;  %v2624_v49 = vrot.slane %v2620_v42, 3 }
 0x163   : > { %v4315_v33 = vpop.permute.xlu1 %2466 }
 0x164   : > { %5667 = vst [vmem:[#allocation56_spill] sm:$0xff] %v4315_v33  ;;  %v4321_v51 = vpop.permute.xlu0 %2464  ;;  %v1976_v58 = vsel %vm594_vm2, %v1974_v11, %v1975_v41 }
 0x165   : > { %5668 = vst [vmem:[#allocation57_spill] sm:$0xff] %v4321_v51  ;;  %2611 = vrot.lane.b32.xlu1 %v2607_v55, %s3582_s17  ;;  %v1329_v51 = vstv %s4319_s18  ;;  %s4403_s18 = sld [smem:[#allocation2 + $0x1b]] }
 0x166   : > { %2609 = vrot.lane.b32.xlu0 %v2608_v1, %s3582_s17  ;;  %v704_v1 = vmul.f32 %v4141_v26, %v702_v48  ;;  %v1330_v11 = vmul.f32 %v4145_v36, %v1329_v51 }
 0x167   : > { %v4327_v0 = vpop.permute.xlu1 %548 }
 0x168   : > { %5669 = vst [vmem:[#allocation58_spill] sm:$0xff] %v4327_v0  ;;  %v4331_v33 = vpop.permute.xlu0 %546  ;;  %v2623_v0 = vrot.slane %v2619_v14, 3  ;;  %v1986_v14 = vstv %s3220_s19  ;;  %s4406_s19 = sld [smem:[#allocation2 + $0xc]] }
 0x169   : > { %5670 = vst [vmem:[#allocation59_spill] sm:$0xff] %v4331_v33  ;;  %1322 = vrot.lane.b32.xlu1 %v1318_v20, %s3582_s17  ;;  %v708_v20 = vrot.slane %v704_v1, 4  ;;  %v1331_v33 = vmul.f32 %v4141_v26, %v1329_v51  ;;  %v1987_v51 = vmul.f32 %v4145_v36, %v1986_v14 }
 0x16a   : > { %1320 = vrot.lane.b32.xlu0 %v1319_v63, %s3582_s17  ;;  %v707_v63 = vrot.slane %v703_v8, 4  ;;  %v2625_v48 = vsel %vm594_vm2, %v2623_v0, %v2624_v49  ;;  %v1988_v0 = vmul.f32 %v4141_v26, %v1986_v14 }
 0x16b   : > { %v4337_v55 = vpop.permute.xlu1 %1177  ;;  %v1335_v1 = vrot.slane %v1331_v33, 4  ;;  %v1991_v14 = vrot.slane %v1987_v51, 3 }
 0x16c   : > { %5671 = vst [vmem:[#allocation60_spill] sm:$0xff] %v4337_v55  ;;  %v4341_v21 = vpop.permute.xlu0 %1175 }
 0x16d   : > { %5672 = vst [vmem:[#allocation61_spill] sm:$0xff] %v4341_v21  ;;  %1979 = vrot.lane.b32.xlu1 %v1975_v41, %s3583_s26  ;;  %v709_v41 = vsel %vm693_vm3, %v707_v63, %v708_v20  ;;  %v2635_v21 = vstv %s3263_s20  ;;  %s4416_s20 = sld [smem:[#allocation2 + $0x9c]] }
 0x16e   : > { %1977 = vrot.lane.b32.xlu0 %v1976_v58, %s3583_s26  ;;  %v1334_v58 = vrot.slane %v1330_v11, 4  ;;  %v2636_v33 = vmul.f32 %v4145_v36, %v2635_v21  ;;  %v1992_v11 = vrot.slane %v1988_v0, 3 }
 0x16f   : > { %v4346_v62 = vpop.permute.xlu1 %2483 }
 0x170   : > { %5673 = vst [vmem:[#allocation62_spill] sm:$0xff] %v4346_v62  ;;  %v4352_v42 = vpop.permute.xlu0 %2481  ;;  %v1993_v0 = vsel %vm594_vm2, %v1991_v14, %v1992_v11 }
 0x171   : > { %5674 = vst [vmem:[#allocation63_spill] sm:$0xff] %v4352_v42  ;;  %2628 = vrot.lane.b32.xlu1 %v2624_v49, %s3581_s16  ;;  %v2637_v49 = vmul.f32 %v4141_v26, %v2635_v21  ;;  %v2640_v21 = vrot.slane %v2636_v33, 3 }
 0x172   : > { %2626 = vrot.lane.b32.xlu0 %v2625_v48, %s3581_s16  ;;  %v1336_v48 = vsel %vm693_vm3, %v1334_v58, %v1335_v1 }
 0x173   : > { %v4357_v8 = vpop.permute.xlu1 %565 }
 0x174   : > { %5675 = vst [vmem:[#allocation64_spill] sm:$0xff] %v4357_v8  ;;  %v4361_v55 = vpop.permute.xlu0 %563  ;;  %v719_v8 = vstv %s4350_s28  ;;  %s4430_s28 = sld [smem:[#allocation2 + $0x197]] }
 0x175   : > { %5676 = vst [vmem:[#allocation65_spill] sm:$0xff] %v4361_v55  ;;  %712 = vrot.lane.b32.xlu1 %v708_v20, %s3582_s17  ;;  %v2641_v20 = vrot.slane %v2637_v49, 3  ;;  %v720_v51 = vmul.f32 %v4145_v36, %v719_v8 }
 0x176   : > { %710 = vrot.lane.b32.xlu0 %v709_v41, %s3582_s17  ;;  %v721_v41 = vmul.f32 %v4141_v26, %v719_v8 }
 0x177   : > { %v4369_v63 = vpop.permute.xlu1 %1194 }
 0x178   : > { %5677 = vst [vmem:[#allocation66_spill] sm:$0xff] %v4369_v63  ;;  %v4375_v55 = vpop.permute.xlu0 %1192  ;;  %v1346_v63 = vstv %s4363_s9  ;;  %v725_v49 = vrot.slane %v721_v41, 4  ;;  %s4440_s9 = sld [smem:[#allocation2 + $0x80]] }
 0x179   : > { %5678 = vst [vmem:[#allocation67_spill] sm:$0xff] %v4375_v55  ;;  %1339 = vrot.lane.b32.xlu1 %v1335_v1, %s3581_s16  ;;  %v2642_v1 = vsel %vm594_vm2, %v2640_v21, %v2641_v20  ;;  %v1348_v8 = vmul.f32 %v4141_v26, %v1346_v63  ;;  %v1347_v14 = vmul.f32 %v4145_v36, %v1346_v63 }
 0x17a   : > { %1337 = vrot.lane.b32.xlu0 %v1336_v48, %s3581_s16  ;;  %v724_v48 = vrot.slane %v720_v51, 4 }
 0x17b   : > { %v4382_v58 = vpop.permute.xlu1 %1847  ;;  %v1352_v51 = vrot.slane %v1348_v8, 4 }
 0x17c   : > { %5679 = vst [vmem:[#allocation68_spill] sm:$0xff] %v4382_v58  ;;  %v4388_v55 = vpop.permute.xlu0 %1845  ;;  %v2003_v58 = vstv %s4373_s11  ;;  %v726_v63 = vsel %vm693_vm3, %v724_v48, %v725_v49  ;;  %s4457_s11 = sld [smem:[#allocation2 + $0x86]] }
 0x17d   : > { %5680 = vst [vmem:[#allocation69_spill] sm:$0xff] %v4388_v55  ;;  %1996 = vrot.lane.b32.xlu1 %v1992_v11, %s3584_s29  ;;  %v315_v11 = vstv %s4377_s12  ;;  %v2005_v21 = vmul.f32 %v4141_v26, %v2003_v58  ;;  %v2004_v41 = vmul.f32 %v4145_v36, %v2003_v58  ;;  %v391_v58 = vstv %s4392_s15  ;;  %s4461_s12 = sld [smem:[#allocation2 + $0x1c]]  ;;  %s4467_s15 = sld [smem:[#allocation2 + $0x180]] }
 0x17e   : > { %1994 = vrot.lane.b32.xlu0 %v1993_v0, %s3584_s29  ;;  %v316_v42 = vmul.f32 %v4145_v36, %v315_v11 }
 0x17f   : > { %v4396_v33 = vpop.permute.xlu1 %582  ;;  %v2008_v48 = vrot.slane %v2004_v41, 3  ;;  %v490_v41 = vstv %s4406_s19  ;;  %s4480_s19 = sld [smem:[#allocation2 + $0x9d]] }
 0x180   : > { %5681 = vst [vmem:[#allocation70_spill] sm:$0xff] %v4396_v33  ;;  %v4401_v55 = vpop.permute.xlu0 %580  ;;  %v2652_v33 = vstv %s4386_s14  ;;  %v491_v6 = vmul.f32 %v4145_v36, %v490_v41  ;;  %s4465_s14 = sld [smem:[#allocation2 + $0x100]] }
 0x181   : > { %5682 = vst [vmem:[#allocation71_spill] sm:$0xff] %v4401_v55  ;;  %2645 = vrot.lane.b32.xlu1 %v2641_v20, %s3583_s26  ;;  %v1351_v55 = vrot.slane %v1347_v14, 4  ;;  %v317_v20 = vmul.f32 %v4141_v26, %v315_v11  ;;  %v2654_v8 = vmul.f32 %v4141_v26, %v2652_v33  ;;  %v2653_v29 = vmul.f32 %v4145_v36, %v2652_v33 }
 0x182   : > { %2643 = vrot.lane.b32.xlu0 %v2642_v1, %s3583_s26  ;;  %v2009_v1 = vrot.slane %v2005_v21, 3  ;;  %v332_v11 = vadd.f32 %v3879_v16, %v316_v42  ;;  %v4438_v21 = vmul.f32 %v4141_v26, %v391_v58 }
 0x183   : > { %v4412_v0 = vpop.permute.xlu1 %1864  ;;  %v2658_v42 = vrot.slane %v2654_v8, 3 }
 0x184   : > { %5683 = vst [vmem:[#allocation72_spill] sm:$0xff] %v4412_v0  ;;  %v4419_v62 = vpop.permute.xlu0 %1862  ;;  %v1353_v0 = vsel %vm693_vm3, %v1351_v55, %v1352_v51  ;;  %v392_v55 = vmul.f32 %v4145_v36, %v391_v58  ;;  %v2010_v16 = vsel %vm594_vm2, %v2008_v48, %v2009_v1  ;;  %v346_v52 = vadd.f32 %v3877_v15, %v332_v11 }
 0x185   : > { %5684 = vst [vmem:[#allocation73_spill] sm:$0xff] %v4419_v62  ;;  %729 = vrot.lane.b32.xlu1 %v725_v49, %s3581_s16  ;;  %v736_v62 = vstv %s4403_s18  ;;  %v398_v58 = vrot.slane %v4438_v21, 1  ;;  %s4471_s18 = sld [smem:[#allocation2 + $0x106]] }
 0x186   : > { %727 = vrot.lane.b32.xlu0 %v726_v63, %s3581_s16  ;;  %v333_v63 = vadd.f32 %v3889_v24, %v317_v20  ;;  %v738_v24 = vmul.f32 %v4141_v26, %v736_v62  ;;  %v737_v20 = vmul.f32 %v4145_v36, %v736_v62  ;;  %v360_v15 = vadd.f32 %v3898_v32, %v346_v52 }
 0x187   : > { %v4426_v14 = vpop.permute.xlu1 %2513  ;;  %v397_v62 = vrot.slane %v392_v55, 1  ;;  %v496_v52 = vrot.slane %v491_v6, 2 }
 0x188   : > { %5685 = vst [vmem:[#allocation74_spill] sm:$0xff] %v4426_v14  ;;  %v4433_v49 = vpop.permute.xlu0 %2511  ;;  %v1363_v14 = vstv %s4416_s20  ;;  %v741_v21 = vrot.slane %v737_v20, 4  ;;  %v374_v32 = vadd.f32 %v3907_v40, %v360_v15  ;;  %s4488_s20 = sld [smem:[#allocation2 + $0x186]] }
 0x189   : > { %5686 = vst [vmem:[#allocation75_spill] sm:$0xff] %v4433_v49  ;;  %1356 = vrot.lane.b32.xlu1 %v1352_v51, %s3583_s26  ;;  %v2657_v49 = vrot.slane %v2653_v29, 3  ;;  %v4455_v51 = vmul.f32 %v4141_v26, %v490_v41  ;;  %v347_v29 = vadd.f32 %v3887_v23, %v333_v63  ;;  %v1365_v48 = vmul.f32 %v4141_v26, %v1363_v14 }
 0x18a   : > { %1354 = vrot.lane.b32.xlu0 %v1353_v0, %s3583_s26  ;;  %v1364_v23 = vmul.f32 %v4145_v36, %v1363_v14  ;;  %v742_v63 = vrot.slane %v738_v24, 4  ;;  %v2669_v41 = vstv %s4430_s28  ;;  %v388_v14 = vadd.f32 %v3916_v47, %v374_v32  ;;  %s4500_s28 = sld [smem:[#allocation2 + $0x119]] }
 0x18b   : > { %v4447_v33 = vpop.permute.xlu1 %1224  ;;  %v2659_v11 = vsel %vm594_vm2, %v2657_v49, %v2658_v42  ;;  %v1369_v49 = vrot.slane %v1365_v48, 4  ;;  %v2671_v6 = vmul.f32 %v4141_v26, %v2669_v41  ;;  %v2670_v47 = vmul.f32 %v4145_v36, %v2669_v41 }
 0x18c   : > { %5687 = vst [vmem:[#allocation76_spill] sm:$0xff] %v4447_v33  ;;  %v4459_v0 = vpop.permute.xlu0 %1222  ;;  %v1368_v40 = vrot.slane %v1364_v23, 4  ;;  %v753_v48 = vstv %s4461_s12  ;;  %v1005_v41 = vstv %s4457_s11  ;;  %s4548_s11 = sld [smem:[#allocation2 + $0x8c]] }
 0x18d   : > { %5688 = vst [vmem:[#allocation77_spill] sm:$0xff] %v4459_v0  ;;  %2013 = vrot.lane.b32.xlu1 %v2009_v1, %s3585_s10  ;;  %v5601_v1 = vrot.slane %v4455_v51, 2  ;;  %v929_v0 = vstv %s4440_s9  ;;  %s4541_s9 = sld [smem:[#allocation2 + $0x1d]]  ;;  %s4555_s12 = sld [smem:[#allocation2 + $0x10c]] }
 0x18e   : > { %2011 = vrot.lane.b32.xlu0 %v2010_v16, %s3585_s10  ;;  %v361_v16 = vadd.f32 %v3896_v30, %v347_v29  ;;  %v399_v30 = vsel %vm396_vm0, %v397_v62, %v398_v58  ;;  %v4503_v29 = vmul.f32 %v4145_v36, %v929_v0 }
 0x18f   : > { %v4476_v8 = vpop.permute.xlu1 %1881  ;;  %v4508_v15 = vsel %vm495_vm1, %v496_v52, %v5601_v1  ;;  %v402_v32 = vadd.f32 %v399_v30, %v388_v14  ;;  %v1370_v52 = vsel %vm693_vm3, %v1368_v40, %v1369_v49  ;;  %v1006_v14 = vmul.f32 %v4145_v36, %v1005_v41 }
 0x190   : > { %5689 = vst [vmem:[#allocation78_spill] sm:$0xff] %v4476_v8  ;;  %v4484_v55 = vpop.permute.xlu0 %1879  ;;  %v375_v24 = vadd.f32 %v3905_v38, %v361_v16  ;;  %v4511_v38 = vmul.f32 %v4141_v26, %v929_v0  ;;  %v1726_v16 = vstv %s4471_s18  ;;  %v2675_v0 = vrot.slane %v2671_v6, 3  ;;  %s4590_s18 = sld [smem:[#allocation2 + $0x199]] }
 0x191   : > { %5690 = vst [vmem:[#allocation79_spill] sm:$0xff] %v4484_v55  ;;  %2662 = vrot.lane.b32.xlu1 %v2658_v42, %s3584_s29  ;;  %v743_v42 = vsel %vm693_vm3, %v741_v21, %v742_v63  ;;  %v2316_v21 = vstv %s4467_s15  ;;  %v2674_v55 = vrot.slane %v2670_v47, 3  ;;  %v755_v8 = vmul.f32 %v4141_v26, %v753_v48  ;;  %s4580_s15 = sld [smem:[#allocation2 + $0x18c]] }
 0x192   : > { %2660 = vrot.lane.b32.xlu0 %v2659_v11, %s3584_s29  ;;  %v389_v23 = vadd.f32 %v3914_v46, %v375_v24  ;;  %v1650_v11 = vstv %s4465_s14  ;;  %v754_v46 = vmul.f32 %v4145_v36, %v753_v48  ;;  %v1380_v24 = vstv %s4480_s19  ;;  %s4564_s14 = sld [smem:[#allocation2 + $0x11a]]  ;;  %s4632_s19 = sld [smem:[#allocation2 + $0x9f]] }
 0x193   : > { %v4496_v20 = vpop.permute.xlu1 %2530  ;;  %v4530_v33 = vmul.f32 %v4145_v36, %v1650_v11  ;;  %v4537_v40 = vmul.f32 %v4141_v26, %v1005_v41  ;;  %v4545_v47 = vmul.f32 %v4141_v26, %v1726_v16  ;;  %v2392_v48 = vstv %s4488_s20  ;;  %s4641_s20 = sld [smem:[#allocation2 + $0x92]] }
 0x194   : > { %5691 = vst [vmem:[#allocation80_spill] sm:$0xff] %v4496_v20  ;;  %v4513_v62 = vpop.permute.xlu0 %2528  ;;  %v403_v30 = vadd.f32 %v398_v58, %v389_v23  ;;  %v4553_v41 = vmul.f32 %v4145_v36, %v2316_v21  ;;  %v1382_v58 = vmul.f32 %v4141_v26, %v1380_v24  ;;  %v1381_v23 = vmul.f32 %v4145_v36, %v1380_v24 }
 0x195   : > { %5692 = vst [vmem:[#allocation81_spill] sm:$0xff] %v4513_v62  ;;  %746 = vrot.lane.b32.xlu1 %v742_v63, %s3583_s26  ;;  %v4533_v63 = vmul.f32 %v4141_v26, %v1650_v11  ;;  %v419_v11 = vadd.f32 %v3923_v54, %v402_v32  ;;  %v758_v62 = vrot.slane %v754_v46, 4  ;;  %v1010_v54 = vrot.slane %v1006_v14, 1 }
 0x196   : > { %744 = vrot.lane.b32.xlu0 %v743_v42, %s3583_s26  ;;  %v1727_v42 = vmul.f32 %v4145_v36, %v1726_v16  ;;  %v5602_v32 = vrot.slane %v4537_v40, 1  ;;  %v2393_v20 = vmul.f32 %v4145_v36, %v2392_v48  ;;  %v420_v24 = vadd.f32 %v3921_v53, %v403_v30 }
 0x197   : > { %v4524_v1 = vpop.permute.xlu1 %613  ;;  %v4578_v46 = vmul.f32 %v4141_v26, %v2316_v21  ;;  %v1386_v14 = vrot.slane %v1382_v58, 4 }
 0x198   : > { %5693 = vst [vmem:[#allocation82_spill] sm:$0xff] %v4524_v1  ;;  %v4539_v6 = vpop.permute.xlu0 %611  ;;  %v759_v1 = vrot.slane %v755_v8, 4  ;;  %v5604_v8 = vrot.slane %v4545_v47, 1 }
 0x199   : > { %5694 = vst [vmem:[#allocation83_spill] sm:$0xff] %v4539_v6  ;;  %1373 = vrot.lane.b32.xlu1 %v1369_v49, %s3584_s29  ;;  %v2676_v6 = vsel %vm594_vm2, %v2674_v55, %v2675_v0  ;;  %v2033_v49 = vstv %s4500_s28  ;;  %v1731_v55 = vrot.slane %v1727_v42, 1  ;;  %s4653_s28 = sld [smem:[#allocation2 + $0x11b]] }
 0x19a   : > { %1371 = vrot.lane.b32.xlu0 %v1370_v52, %s3584_s29  ;;  %v4569_v52 = vmul.f32 %v4141_v26, %v2392_v48  ;;  %v1385_v48 = vrot.slane %v1381_v23, 4  ;;  %v2035_v53 = vmul.f32 %v4141_v26, %v2033_v49  ;;  %v760_v21 = vsel %vm693_vm3, %v758_v62, %v759_v1 }
 0x19b   : > { %v4560_v16 = vpop.permute.xlu1 %1241 }
 0x19c   : > { %5695 = vst [vmem:[#allocation84_spill] sm:$0xff] %v4560_v16  ;;  %v4571_v35 = vpop.permute.xlu0 %1239  ;;  %v436_v16 = vadd.f32 %v3932_v61, %v419_v11  ;;  %v437_v61 = vadd.f32 %v3928_v57, %v420_v24  ;;  %v2397_v11 = vrot.slane %v2393_v20, 1  ;;  %v5603_v58 = vrot.slane %v4569_v52, 1 }
 0x19d   : > { %2679 = vrot.lane.b32.xlu1 %v2675_v0, %s3585_s10  ;;  %v2034_v0 = vmul.f32 %v4145_v36, %v2033_v49  ;;  %v1103_v49 = vstv %s4548_s11  ;;  %v946_v20 = vadd.f32 %v3971_v27, %v4503_v29  ;;  %v1387_v24 = vsel %vm693_vm3, %v1385_v48, %v1386_v14  ;;  %s4678_s11 = sld [smem:[#allocation2 + $0x19a]] }
 0x19e   : > { %2677 = vrot.lane.b32.xlu0 %v2676_v6, %s3585_s10  ;;  %v453_v30 = vadd.f32 %v3942_v5, %v436_v16  ;;  %v4595_v6 = vsel %vm396_vm0, %v1010_v54, %v5602_v32  ;;  %v770_v5 = vstv %s4541_s9  ;;  %v454_v23 = vadd.f32 %v3940_v2, %v437_v61  ;;  %s4666_s9 = sld [smem:[#allocation2 + $0x12]] }
 0x19f   : > { %v4586_v42 = vpop.permute.xlu1 %1898  ;;  %v4606_v16 = vsel %vm396_vm0, %v1731_v55, %v5604_v8  ;;  %v1824_v54 = vstv %s4555_s12  ;;  %v2039_v32 = vrot.slane %v2035_v53, 4  ;;  %v772_v61 = vmul.f32 %v4141_v26, %v770_v5  ;;  %s4719_s12 = sld [smem:[#allocation2 + $0x1f]] }
 0x1a0   : > { %v4598_v57 = vpop.permute.xlu0 %1896  ;;  %v470_v62 = vadd.f32 %v3955_v13, %v453_v30  ;;  %v2038_v13 = vrot.slane %v2034_v0, 4  ;;  %v771_v55 = vmul.f32 %v4145_v36, %v770_v5  ;;  %v2050_v30 = vstv %s4564_s14  ;;  %s4750_s14 = sld [smem:[#allocation2 + $0xa0]] }
 0x1a1   : > { %5696 = vst [vmem:[#allocation85_spill] sm:$0xff] %v4598_v57  ;;  %763 = vrot.lane.b32.xlu1 %v759_v1, %s3584_s29  ;;  %v960_v1 = vadd.f32 %v3982_v37, %v946_v20  ;;  %v4624_v27 = vsel %vm396_vm0, %v2397_v11, %v5603_v58  ;;  %v1104_v29 = vmul.f32 %v4145_v36, %v1103_v49 }
 0x1a2   : > { %761 = vrot.lane.b32.xlu0 %v760_v21, %s3584_s29  ;;  %v4628_v48 = vmul.f32 %v4141_v26, %v1103_v49  ;;  %v471_v21 = vadd.f32 %v3948_v9, %v454_v23  ;;  %v487_v0 = vadd.f32 %v3965_v22, %v470_v62  ;;  %v947_v37 = vadd.f32 %v3986_v44, %v4511_v38 }
 0x1a3   : > { %v4615_v2 = vpop.permute.xlu1 %2547  ;;  %v4639_v11 = vmul.f32 %v4141_v26, %v1824_v54  ;;  %v974_v5 = vadd.f32 %v3992_v50, %v960_v1  ;;  %v2490_v49 = vstv %s4580_s15  ;;  %v2052_v20 = vmul.f32 %v4141_v26, %v2050_v30  ;;  %s4768_s15 = sld [smem:[#allocation2 + $0x112]] }
 0x1a4   : > { %v4630_v53 = vpop.permute.xlu0 %2545  ;;  %v2051_v9 = vmul.f32 %v4145_v36, %v2050_v30  ;;  %v2040_v44 = vsel %vm693_vm3, %v2038_v13, %v2039_v32  ;;  %v776_v38 = vrot.slane %v772_v61, 4  ;;  %v775_v23 = vrot.slane %v771_v55, 4 }
 0x1a5   : > { %1390 = vrot.lane.b32.xlu1 %v1386_v14, %s3585_s10  ;;  %v2699_v62 = vstv %s4590_s18  ;;  %v961_v14 = vadd.f32 %v3996_v59, %v947_v37  ;;  %v1108_v58 = vrot.slane %v1104_v29, 2  ;;  %v5609_v50 = vrot.slane %v4628_v48, 2  ;;  %s4777_s18 = sld [smem:[#allocation2 + $0x11c]] }
 0x1a6   : > { %1388 = vrot.lane.b32.xlu0 %v1387_v24, %s3585_s10  ;;  %v1825_v24 = vmul.f32 %v4145_v36, %v1824_v54  ;;  %v488_v30 = vadd.f32 %v3961_v17, %v471_v21  ;;  %v988_v8 = vadd.f32 %v4001_v3, %v974_v5  ;;  %v4663_v13 = vmul.f32 %v4141_v26, %v2490_v49 }
 0x1a7   : > { %v4649_v22 = vpop.permute.xlu1 %630  ;;  %v2491_v61 = vmul.f32 %v4145_v36, %v2490_v49  ;;  %v975_v59 = vadd.f32 %v4005_v7, %v961_v14  ;;  %v2056_v54 = vrot.slane %v2052_v20, 4  ;;  %v2055_v55 = vrot.slane %v2051_v9, 4 }
 0x1a8   : > { %v4658_v1 = vpop.permute.xlu0 %628  ;;  %v2701_v17 = vmul.f32 %v4141_v26, %v2699_v62  ;;  %v501_v3 = vadd.f32 %v4508_v15, %v487_v0  ;;  %v5606_v29 = vrot.slane %v4639_v11, 2  ;;  %v777_v37 = vsel %vm693_vm3, %v775_v23, %v776_v38 }
 0x1a9   : > { %2043 = vrot.lane.b32.xlu1 %v2039_v32, %s3582_s17  ;;  %v2700_v32 = vmul.f32 %v4145_v36, %v2699_v62  ;;  %v1002_v7 = vadd.f32 %v4010_v12, %v988_v8  ;;  %v989_v5 = vadd.f32 %v4014_v19, %v975_v59  ;;  %v1829_v49 = vrot.slane %v1825_v24, 2 }
 0x1aa   : > { %2041 = vrot.lane.b32.xlu0 %v2040_v44, %s3582_s17  ;;  %v1410_v9 = vstv %s4632_s19  ;;  %v4688_v15 = vsel %vm495_vm1, %v1108_v58, %v5609_v50  ;;  %v5605_v0 = vrot.slane %v4663_v13, 2  ;;  %v2495_v44 = vrot.slane %v2491_v61, 2  ;;  %s4799_s19 = sld [smem:[#allocation2 + $0x192]] }
 0x1ab   : > { %v4674_v21 = vpop.permute.xlu1 %1258  ;;  %v1201_v23 = vstv %s4641_s20  ;;  %v1003_v12 = vadd.f32 %v4027_v31, %v989_v5  ;;  %v5697_v19 = vrot.slane %v4455_v51, 2  ;;  %v2057_v62 = vsel %vm693_vm3, %v2055_v55, %v2056_v54  ;;  %s4806_s20 = sld [smem:[#allocation2 + $0x19b]] }
 0x1ac   : > { %v4682_v20 = vpop.permute.xlu0 %1256  ;;  %v2705_v14 = vrot.slane %v2701_v17, 4  ;;  %v2704_v24 = vrot.slane %v2700_v32, 4  ;;  %v1412_v61 = vmul.f32 %v4141_v26, %v1410_v9  ;;  %v2067_v59 = vstv %s4653_s28  ;;  %s4826_s28 = sld [smem:[#allocation2 + $0x20]] }
 0x1ad   : > { %780 = vrot.lane.b32.xlu1 %v776_v38, %s3585_s10  ;;  %v4696_v8 = vadd.f32 %v5697_v19, %v488_v30  ;;  %v1411_v38 = vmul.f32 %v4145_v36, %v1410_v9  ;;  %v4706_v31 = vadd.f32 %v3977_v34, %v501_v3  ;;  %v1015_v51 = vadd.f32 %v4595_v6, %v1002_v7  ;;  %v4729_v6 = vld [vmem:[%s3712_s13] sm:$0xff] }
 0x1ae   : > { %778 = vrot.lane.b32.xlu0 %v777_v37, %s3585_s10  ;;  %v4712_v30 = vsel %vm495_vm1, %v1829_v49, %v5606_v29  ;;  %v4715_v55 = vmul.f32 %v4141_v26, %v1201_v23  ;;  %v1667_v36 = vadd.f32 %v4024_v25, %v4530_v33  ;;  %v4726_v34 = vsel %vm495_vm1, %v2495_v44, %v5605_v0  ;;  %v4742_v33 = vld [vmem:[%s3712_s13 + $0x8] sm:$0xff] }
 0x1af   : > { %v4700_v58 = vpop.permute.xlu1 %1915  ;;  %v4732_v3 = vmul.f32 %v4729_v6, %v1201_v23  ;;  %v589_v26 = vstv %s4666_s9  ;;  %v1668_v37 = vadd.f32 %v4038_v45, %v4533_v63  ;;  %v5700_v32 = vrot.slane %v4537_v40, 1  ;;  %s4846_s9 = sld [smem:[#allocation2 + $0x98]] }
 0x1b0   : > { %5698 = vst [vmem:[#allocation86_spill] sm:$0xff] %v4700_v58  ;;  %v4717_v17 = vpop.permute.xlu0 %1913  ;;  %v2069_v7 = vmul.f32 %v4742_v33, %v2067_v59  ;;  %v2068_v5 = vmul.f32 %v4729_v6, %v2067_v59  ;;  %v2706_v9 = vsel %vm693_vm3, %v2704_v24, %v2705_v14  ;;  %v1416_v44 = vrot.slane %v1412_v61, 5 }
 0x1b1   : > { %5699 = vst [vmem:[#allocation87_spill] sm:$0xff] %v4717_v17  ;;  %2060 = vrot.lane.b32.xlu1 %v2056_v54, %s3581_s16  ;;  %v1016_v25 = vadd.f32 %v5700_v32, %v1003_v12  ;;  %v1415_v54 = vrot.slane %v1411_v38, 5  ;;  %v2716_v23 = vstv %s4678_s11  ;;  %v1681_v45 = vadd.f32 %v4031_v39, %v1667_v36  ;;  %v5702_v32 = vld [vmem:[#allocation12_spill] sm:$0xff]  ;;  %s4857_s11 = sld [smem:[#allocation2 + $0x18]] }
 0x1b2   : > { %2058 = vrot.lane.b32.xlu0 %v2057_v62, %s3581_s16  ;;  %v5607_v63 = vrot.slane %v4715_v55, 3  ;;  %v4755_v40 = vmul.f32 %v4742_v33, %v589_v26  ;;  %v2333_v19 = vadd.f32 %v4045_v56, %v4553_v41  ;;  %v1682_v62 = vadd.f32 %v4049_v4, %v1668_v37 }
 0x1b3   : > { %v4746_v49 = vpop.permute.xlu1 %2564  ;;  %v1206_v24 = vrot.slane %v4732_v3, 3  ;;  %v590_v61 = vmul.f32 %v4729_v6, %v589_v26  ;;  %v1032_v39 = vadd.f32 %v4055_v10, %v1015_v51  ;;  %v2073_v38 = vrot.slane %v2069_v7, 4 }
 0x1b4   : > { %v4757_v12 = vpop.permute.xlu0 %2562  ;;  %v2072_v59 = vrot.slane %v2068_v5, 4  ;;  %v2718_v36 = vmul.f32 %v4742_v33, %v2716_v23  ;;  %v2334_v56 = vadd.f32 %v4059_v18, %v4578_v46  ;;  %v1695_v4 = vadd.f32 %v4064_v28, %v1681_v45  ;;  %v5701_v46 = vld [vmem:[#allocation11_spill] sm:$0xff]  ;;  %v5703_v5 = vld [vmem:[#allocation13_spill] sm:$0xff]  ;;  %v5705_v45 = vld [vmem:[#allocation16_spill] sm:$0xff] }
 0x1b5   : > { %2709 = vrot.lane.b32.xlu1 %v2705_v14, %s3582_s17  ;;  %v1417_v14 = vsel %vm792_vm4, %v1415_v54, %v1416_v44  ;;  %v2717_v10 = vmul.f32 %v4729_v6, %v2716_v23  ;;  %v2347_v51 = vadd.f32 %v4075_v43, %v2333_v19  ;;  %v1696_v3 = vadd.f32 %v4079_v60, %v1682_v62  ;;  %v5704_v54 = vld [vmem:[#allocation14_spill] sm:$0xff]  ;;  %v5706_v19 = vld [vmem:[#allocation17_spill] sm:$0xff] }
 0x1b6   : > { %2707 = vrot.lane.b32.xlu0 %v2706_v9, %s3582_s17  ;;  %v5608_v26 = vrot.slane %v4755_v40, 3  ;;  %v801_v18 = vstv %s4719_s12  ;;  %v1033_v28 = vadd.f32 %v5701_v46, %v1016_v25  ;;  %v1049_v7 = vadd.f32 %v5702_v32, %v1032_v39  ;;  %v5709_v32 = vld [vmem:[#allocation23_spill] sm:$0xff]  ;;  %s4865_s12 = sld [smem:[#allocation2 + $0xa1]] }
 0x1b7   : > { %v4773_v41 = vpop.permute.xlu1 %647  ;;  %v2348_v9 = vadd.f32 %v5703_v5, %v2334_v56  ;;  %v1709_v23 = vadd.f32 %v5704_v54, %v1695_v4  ;;  %v2361_v43 = vadd.f32 %v5705_v45, %v2347_v51  ;;  %v1710_v60 = vadd.f32 %v5706_v19, %v1696_v3  ;;  %v5708_v51 = vld [vmem:[#allocation22_spill] sm:$0xff]  ;;  %v5713_v45 = vld [vmem:[#allocation19_spill] sm:$0xff] }
 0x1b8   : > { %v4782_v37 = vpop.permute.xlu0 %645  ;;  %v2074_v62 = vsel %vm693_vm3, %v2072_v59, %v2073_v38  ;;  %v2722_v0 = vrot.slane %v2718_v36, 4  ;;  %v2721_v25 = vrot.slane %v2717_v10, 4  ;;  %v803_v39 = vmul.f32 %v4742_v33, %v801_v18  ;;  %v5711_v36 = vld [vmem:[#allocation15_spill] sm:$0xff]  ;;  %v5712_v54 = vld [vmem:[#allocation18_spill] sm:$0xff] }
 0x1b9   : > { %1420 = vrot.lane.b32.xlu1 %v1416_v44, %s3582_s17  ;;  %v802_v56 = vmul.f32 %v4729_v6, %v801_v18  ;;  %v1427_v46 = vstv %s4750_s14  ;;  %v5707_v44 = vld [vmem:[#allocation20_spill] sm:$0xff]  ;;  %v2375_v3 = vadd.f32 %v5708_v51, %v2361_v43  ;;  %v595_v5 = vrot.slane %v590_v61, 3  ;;  %v5714_v43 = vld [vmem:[#allocation26_spill] sm:$0xff]  ;;  %s4890_s14 = sld [smem:[#allocation2 + $0x11d]] }
 0x1ba   : > { %1418 = vrot.lane.b32.xlu0 %v1417_v14, %s3582_s17  ;;  %v1723_v4 = vadd.f32 %v5707_v44, %v1709_v23  ;;  %v1724_v14 = vadd.f32 %v5709_v32, %v1710_v60  ;;  %v1050_v10 = vadd.f32 %v5711_v36, %v1033_v28  ;;  %v1066_v18 = vadd.f32 %v5712_v54, %v1049_v7 }
 0x1bb   : > { %v4794_v29 = vpop.permute.xlu1 %1275  ;;  %v2362_v19 = vadd.f32 %v5713_v45, %v2348_v9  ;;  %v4814_v23 = vsel %vm594_vm2, %v1206_v24, %v5607_v63  ;;  %v2389_v61 = vadd.f32 %v5714_v43, %v2375_v3  ;;  %v1429_v60 = vmul.f32 %v4742_v33, %v1427_v46  ;;  %v5715_v24 = vld [vmem:[#allocation21_spill] sm:$0xff] }
 0x1bc   : > { %v4804_v59 = vpop.permute.xlu0 %1273  ;;  %v1428_v44 = vmul.f32 %v4729_v6, %v1427_v46  ;;  %v1922_v28 = vstv %s4768_s15  ;;  %v2723_v7 = vsel %vm693_vm3, %v2721_v25, %v2722_v0  ;;  %v807_v9 = vrot.slane %v803_v39, 5  ;;  %v5717_v25 = vld [vmem:[#allocation24_spill] sm:$0xff]  ;;  %s4901_s15 = sld [smem:[#allocation2 + $0x19c]] }
 0x1bd   : > { %5710 = vst [vmem:[#allocation11_spill] sm:$0xff] %v4804_v59  ;;  %2077 = vrot.lane.b32.xlu1 %v2073_v38, %s3583_s26  ;;  %v806_v32 = vrot.slane %v802_v56, 5  ;;  %v2084_v36 = vstv %s4777_s18  ;;  %v1067_v38 = vadd.f32 %v5715_v24, %v1050_v10  ;;  %v1736_v3 = vadd.f32 %v4606_v16, %v1723_v4  ;;  %v5718_v56 = vld [vmem:[#allocation25_spill] sm:$0xff]  ;;  %v5720_v16 = vld [vmem:[#allocation27_spill] sm:$0xff]  ;;  %s4907_s18 = sld [smem:[#allocation2 + $0x21]] }
 0x1be   : > { %2075 = vrot.lane.b32.xlu0 %v2074_v62, %s3583_s26  ;;  %v5716_v62 = vrot.slane %v4545_v47, 1  ;;  %v4835_v46 = vsel %vm594_vm2, %v595_v5, %v5608_v26  ;;  %v1083_v39 = vadd.f32 %v5717_v25, %v1066_v18  ;;  %v2376_v43 = vadd.f32 %v5718_v56, %v2362_v19  ;;  %v5721_v25 = vld [vmem:[#allocation28_spill] sm:$0xff] }
 0x1bf   : > { %v4822_v51 = vpop.permute.xlu1 %2581  ;;  %v4843_v10 = vmul.f32 %v4742_v33, %v1922_v28  ;;  %v1923_v47 = vmul.f32 %v4729_v6, %v1922_v28  ;;  %v1084_v4 = vadd.f32 %v5720_v16, %v1067_v38  ;;  %v1432_v5 = vrot.slane %v1428_v44, 5  ;;  %v5722_v38 = vld [vmem:[#allocation29_spill] sm:$0xff] }
 0x1c0   : > { %v1737_v54 = vadd.f32 %v5716_v62, %v1724_v14  ;;  %v4837_v45 = vpop.permute.xlu0 %2579  ;;  %v1433_v14 = vrot.slane %v1429_v60, 5  ;;  %v2086_v18 = vmul.f32 %v4742_v33, %v2084_v36  ;;  %v2402_v19 = vadd.f32 %v4624_v27, %v2389_v61  ;;  %v5724_v27 = vld [vmem:[#allocation30_spill] sm:$0xff] }
 0x1c1   : > { %2726 = vrot.lane.b32.xlu1 %v2722_v0, %s3581_s16  ;;  %5719 = vst [vmem:[#allocation12_spill] sm:$0xff] %v4843_v10  ;;  %v808_v0 = vsel %vm792_vm4, %v806_v32, %v807_v9  ;;  %v2085_v62 = vmul.f32 %v4729_v6, %v2084_v36  ;;  %v2588_v28 = vstv %s4799_s19  ;;  %v1100_v56 = vadd.f32 %v5721_v25, %v1083_v39  ;;  %v5725_v32 = vld [vmem:[#allocation33_spill] sm:$0xff]  ;;  %s4941_s19 = sld [smem:[#allocation2 + $0xa2]] }
 0x1c2   : > { %2724 = vrot.lane.b32.xlu0 %v2723_v7, %s3581_s16  ;;  %v2390_v16 = vadd.f32 %v5722_v38, %v2376_v43  ;;  %v5723_v7 = vld [vmem:[#allocation31_spill] sm:$0xff]  ;;  %v2733_v63 = vstv %s4806_s20  ;;  %v1753_v61 = vadd.f32 %v5724_v27, %v1736_v3  ;;  %v1754_v26 = vadd.f32 %v5725_v32, %v1737_v54  ;;  %s4948_s20 = sld [smem:[#allocation2 + $0x19d]] }
 0x1c3   : > { %v4852_v24 = vpop.permute.xlu1 %664  ;;  %v1101_v60 = vadd.f32 %v5723_v7, %v1084_v4  ;;  %v1927_v50 = vrot.slane %v1923_v47, 3  ;;  %v1434_v39 = vsel %vm792_vm4, %v1432_v5, %v1433_v14  ;;  %v2090_v43 = vrot.slane %v2086_v18, 4  ;;  %v5727_v47 = vld [vmem:[#allocation32_spill] sm:$0xff] }
 0x1c4   : > { %v4862_v44 = vpop.permute.xlu0 %662  ;;  %v4874_v4 = vmul.f32 %v4742_v33, %v2588_v28  ;;  %v2589_v25 = vmul.f32 %v4729_v6, %v2588_v28  ;;  %v2089_v3 = vrot.slane %v2085_v62, 4  ;;  %v2735_v54 = vmul.f32 %v4742_v33, %v2733_v63  ;;  %v5731_v62 = vld [vmem:[#allocation34_spill] sm:$0xff] }
 0x1c5   : > { %811 = vrot.lane.b32.xlu1 %v807_v9, %s3582_s17  ;;  %v2734_v9 = vmul.f32 %v4729_v6, %v2733_v63  ;;  %v818_v7 = vstv %s4826_s28  ;;  %v1770_v27 = vadd.f32 %v5727_v47, %v1753_v61  ;;  %v5728_v5 = vrot.slane %v4569_v52, 1  ;;  %v5736_v47 = vld [vmem:[#allocation36_spill] sm:$0xff]  ;;  %s4960_s28 = sld [smem:[#allocation2 + $0x22]] }
 0x1c6   : > { %809 = vrot.lane.b32.xlu0 %v808_v0, %s3582_s17  ;;  %v1113_v0 = vadd.f32 %v4688_v15, %v1100_v56  ;;  %v5729_v32 = vrot.slane %v4628_v48, 2  ;;  %v2419_v17 = vadd.f32 %v5731_v62, %v2402_v19  ;;  %v5733_v61 = vrot.slane %v4843_v10, 3  ;;  %v5740_v56 = vld [vmem:[#allocation38_spill] sm:$0xff] }
 0x1c7   : > { %v4877_v38 = vpop.permute.xlu1 %1292  ;;  %v2403_v18 = vadd.f32 %v5728_v5, %v2390_v16  ;;  %v1299_v52 = vstv %s4846_s9  ;;  %v820_v48 = vmul.f32 %v4742_v33, %v818_v7  ;;  %v819_v19 = vmul.f32 %v4729_v6, %v818_v7  ;;  %s4998_s9 = sld [smem:[#allocation2 + $0xa3]] }
 0x1c8   : > { %5726 = vst [vmem:[#allocation13_spill] sm:$0xff] %v4877_v38  ;;  %v1114_v36 = vadd.f32 %v5729_v32, %v1101_v60  ;;  %v4888_v28 = vpop.permute.xlu0 %1290  ;;  %v5732_v38 = vld [vmem:[#allocation35_spill] sm:$0xff]  ;;  %v4898_v15 = vsel %vm594_vm2, %v1927_v50, %v5733_v61  ;;  %v2091_v50 = vsel %vm693_vm3, %v2089_v3, %v2090_v43  ;;  %v2739_v16 = vrot.slane %v2735_v54, 4  ;;  %v5742_v3 = vld [vmem:[#allocation40_spill] sm:$0xff] }
 0x1c9   : > { %5730 = vst [vmem:[#allocation14_spill] sm:$0xff] %v4888_v28  ;;  %v1771_v63 = vadd.f32 %v5732_v38, %v1754_v26  ;;  %1437 = vrot.lane.b32.xlu1 %v1433_v14, %s3581_s16  ;;  %5734 = vst [vmem:[#allocation16_spill] sm:$0xff] %v4898_v15  ;;  %v2593_v26 = vrot.slane %v2589_v25, 3  ;;  %v2738_v60 = vrot.slane %v2734_v9, 4  ;;  %v688_v38 = vstv %s4857_s11  ;;  %v5739_v25 = vld [vmem:[#allocation37_spill] sm:$0xff]  ;;  %s5006_s11 = sld [smem:[#allocation2 + $0x11f]] }
 0x1ca   : > { %1435 = vrot.lane.b32.xlu0 %v1434_v39, %s3581_s16  ;;  %v1130_v5 = vadd.f32 %v5736_v47, %v1113_v0  ;;  %v1444_v39 = vstv %s4865_s12  ;;  %v1300_v62 = vmul.f32 %v4729_v6, %v1299_v52  ;;  %v4919_v7 = vmul.f32 %v4742_v33, %v1299_v52  ;;  %s5064_s12 = sld [smem:[#allocation2 + $0x23]] }
 0x1cb   : > { %v4909_v14 = vpop.permute.xlu1 %1945  ;;  %v2420_v61 = vadd.f32 %v5739_v25, %v2403_v18  ;;  %v1787_v15 = vadd.f32 %v5740_v56, %v1770_v27  ;;  %v2436_v54 = vadd.f32 %v5742_v3, %v2419_v17  ;;  %v824_v9 = vrot.slane %v820_v48, 5  ;;  %v5745_v48 = vld [vmem:[#allocation41_spill] sm:$0xff]  ;;  %v5748_v25 = vld [vmem:[#allocation43_spill] sm:$0xff] }
 0x1cc   : > { %5735 = vst [vmem:[#allocation17_spill] sm:$0xff] %v4909_v14  ;;  %v4914_v32 = vpop.permute.xlu0 %1943  ;;  %5738 = vst [vmem:[#allocation22_spill] sm:$0xff] %v4919_v7  ;;  %v5741_v14 = vld [vmem:[#allocation39_spill] sm:$0xff]  ;;  %v823_v0 = vrot.slane %v819_v19, 5  ;;  %v689_v47 = vmul.f32 %v4729_v6, %v688_v38  ;;  %v4929_v52 = vmul.f32 %v4742_v33, %v688_v38  ;;  %v2740_v27 = vsel %vm693_vm3, %v2738_v60, %v2739_v16 }
 0x1cd   : > { %5737 = vst [vmem:[#allocation20_spill] sm:$0xff] %v4914_v32  ;;  %v1131_v10 = vadd.f32 %v5741_v14, %v1114_v36  ;;  %2094 = vrot.lane.b32.xlu1 %v2090_v43, %s3584_s29  ;;  %v5744_v36 = vrot.slane %v4874_v4, 3  ;;  %v1446_v43 = vmul.f32 %v4742_v33, %v1444_v39  ;;  %v1445_v18 = vmul.f32 %v4729_v6, %v1444_v39 }
 0x1ce   : > { %2092 = vrot.lane.b32.xlu0 %v2091_v50, %s3584_s29  ;;  %5743 = vst [vmem:[#allocation23_spill] sm:$0xff] %v4929_v52  ;;  %v1788_v19 = vadd.f32 %v5745_v48, %v1771_v63  ;;  %v1304_v14 = vrot.slane %v1300_v62, 4  ;;  %v2101_v60 = vstv %s4890_s14  ;;  %v2437_v3 = vadd.f32 %v5748_v25, %v2420_v61  ;;  %s5097_s14 = sld [smem:[#allocation2 + $0x120]] }
 0x1cf   : > { %v4931_v32 = vpop.permute.xlu1 %681  ;;  %v4937_v17 = vsel %vm594_vm2, %v2593_v26, %v5744_v36  ;;  %v5747_v26 = vld [vmem:[#allocation42_spill] sm:$0xff]  ;;  %v5749_v36 = vld [vmem:[#allocation44_spill] sm:$0xff]  ;;  %v2750_v39 = vstv %s4901_s15  ;;  %v825_v63 = vsel %vm792_vm4, %v823_v0, %v824_v9  ;;  %v835_v62 = vstv %s4907_s18  ;;  %s5164_s15 = sld [smem:[#allocation2 + $0x19f]]  ;;  %s5200_s18 = sld [smem:[#allocation2 + $0x121]] }
 0x1d0   : > { %v4944_v56 = vpop.permute.xlu0 %679  ;;  %v519_v38 = vadd.f32 %v5747_v26, %v4696_v8  ;;  %v1148_v28 = vadd.f32 %v5749_v36, %v1131_v10  ;;  %v694_v48 = vrot.slane %v689_v47, 4  ;;  %v1450_v8 = vrot.slane %v1446_v43, 5 }
 0x1d1   : > { %5746 = vst [vmem:[#allocation15_spill] sm:$0xff] %v4944_v56  ;;  %2743 = vrot.lane.b32.xlu1 %v2739_v16, %s3583_s26  ;;  %v1449_v26 = vrot.slane %v1445_v18, 5  ;;  %v2103_v61 = vmul.f32 %v4742_v33, %v2101_v60  ;;  %v2102_v10 = vmul.f32 %v4729_v6, %v2101_v60  ;;  %v5751_v16 = vld [vmem:[#allocation45_spill] sm:$0xff]  ;;  %v5753_v0 = vrot.slane %v4919_v7, 4  ;;  %v5755_v18 = vld [vmem:[#allocation46_spill] sm:$0xff] }
 0x1d2   : > { %2741 = vrot.lane.b32.xlu0 %v2740_v27, %s3583_s26  ;;  %v1147_v25 = vadd.f32 %v5751_v16, %v1130_v5  ;;  %v4975_v27 = vmul.f32 %v4742_v33, %v2750_v39  ;;  %v2751_v43 = vmul.f32 %v4729_v6, %v2750_v39  ;;  %v1805_v50 = vadd.f32 %v5755_v18, %v1788_v19  ;;  %v5757_v16 = vld [vmem:[#allocation48_spill] sm:$0xff] }
 0x1d3   : > { %v4962_v58 = vpop.permute.xlu1 %1962  ;;  %v4972_v47 = vsel %vm693_vm3, %v1304_v14, %v5753_v0  ;;  %v4982_v5 = vmul.f32 %v4742_v33, %v835_v62  ;;  %v836_v60 = vmul.f32 %v4729_v6, %v835_v62  ;;  %v2454_v14 = vadd.f32 %v5757_v16, %v2437_v3  ;;  %v5758_v0 = vld [vmem:[#allocation49_spill] sm:$0xff]  ;;  %v5765_v16 = vld [vmem:[#allocation52_spill] sm:$0xff] }
 0x1d4   : > { %5750 = vst [vmem:[#allocation18_spill] sm:$0xff] %v4962_v58  ;;  %v4967_v36 = vpop.permute.xlu0 %1960  ;;  %5754 = vst [vmem:[#allocation26_spill] sm:$0xff] %v4972_v47  ;;  %v5756_v58 = vld [vmem:[#allocation47_spill] sm:$0xff]  ;;  %v5759_v47 = vld [vmem:[#allocation50_spill] sm:$0xff]  ;;  %v5760_v19 = vrot.slane %v4929_v52, 4  ;;  %v2107_v39 = vrot.slane %v2103_v61, 4  ;;  %v1461_v18 = vstv %s4941_s19 }
 0x1d5   : > { %5752 = vst [vmem:[#allocation19_spill] sm:$0xff] %v4967_v36  ;;  %v1804_v56 = vadd.f32 %v5756_v58, %v1787_v15  ;;  %828 = vrot.lane.b32.xlu1 %v824_v9, %s3581_s16  ;;  %v2453_v36 = vadd.f32 %v5758_v0, %v2436_v54  ;;  %v536_v7 = vadd.f32 %v5759_v47, %v519_v38  ;;  %v2106_v62 = vrot.slane %v2102_v10, 4  ;;  %v5763_v54 = vld [vmem:[#allocation51_spill] sm:$0xff]  ;;  %s5220_s19 = sld [smem:[#allocation2 + $0x1a0]] }
 0x1d6   : > { %826 = vrot.lane.b32.xlu0 %v825_v63, %s3581_s16  ;;  %v4992_v58 = vsel %vm693_vm3, %v694_v48, %v5760_v19  ;;  %v1451_v9 = vsel %vm792_vm4, %v1449_v26, %v1450_v8  ;;  %v535_v38 = vadd.f32 %v5763_v54, %v4706_v31  ;;  %v2756_v63 = vrot.slane %v4975_v27, 4  ;;  %v5766_v26 = vld [vmem:[#allocation54_spill] sm:$0xff]  ;;  %v5768_v54 = vld [vmem:[#allocation57_spill] sm:$0xff] }
 0x1d7   : > { %5761 = vst [vmem:[#allocation21_spill] sm:$0xff] %v4992_v58  ;;  %v4994_v15 = vpop.permute.xlu1 %2611  ;;  %v2755_v47 = vrot.slane %v2751_v43, 4  ;;  %v2767_v48 = vstv %s4948_s20  ;;  %v1165_v0 = vadd.f32 %v5765_v16, %v1148_v28  ;;  %v1822_v61 = vadd.f32 %v5766_v26, %v1805_v50  ;;  %v5767_v58 = vld [vmem:[#allocation56_spill] sm:$0xff]  ;;  %v5772_v16 = vld [vmem:[#allocation62_spill] sm:$0xff]  ;;  %s5237_s20 = sld [smem:[#allocation2 + $0x122]] }
 0x1d8   : > { %5762 = vst [vmem:[#allocation24_spill] sm:$0xff] %v4994_v15  ;;  %v5002_v3 = vpop.permute.xlu0 %2609  ;;  %v841_v10 = vrot.slane %v4982_v5, 5  ;;  %v840_v19 = vrot.slane %v836_v60, 5  ;;  %v2471_v52 = vadd.f32 %v5767_v58, %v2454_v14  ;;  %v5015_v31 = vmul.f32 %v4742_v33, %v1461_v18  ;;  %v5770_v60 = vld [vmem:[#allocation53_spill] sm:$0xff]  ;;  %v5771_v58 = vld [vmem:[#allocation55_spill] sm:$0xff] }
 0x1d9   : > { %5764 = vst [vmem:[#allocation25_spill] sm:$0xff] %v5002_v3  ;;  %1454 = vrot.lane.b32.xlu1 %v1450_v8, %s3583_s26  ;;  %v1462_v27 = vmul.f32 %v4729_v6, %v1461_v18  ;;  %v852_v43 = vstv %s4960_s28  ;;  %v2470_v3 = vadd.f32 %v5768_v54, %v2453_v36  ;;  %v2108_v50 = vsel %vm693_vm3, %v2106_v62, %v2107_v39  ;;  %v5774_v18 = vld [vmem:[#allocation63_spill] sm:$0xff]  ;;  %v5782_v15 = vld [vmem:[#allocation65_spill] sm:$0xff]  ;;  %s5252_s28 = sld [smem:[#allocation2 + $0x1a1]] }
 0x1da   : > { %1452 = vrot.lane.b32.xlu0 %v1451_v9, %s3583_s26  ;;  %v5024_v8 = vmul.f32 %v4742_v33, %v2767_v48  ;;  %v2768_v5 = vmul.f32 %v4729_v6, %v2767_v48  ;;  %v1164_v14 = vadd.f32 %v5770_v60, %v1147_v25  ;;  %v1821_v9 = vadd.f32 %v5771_v58, %v1804_v56 }
 0x1db   : > { %v5020_v28 = vpop.permute.xlu1 %1322  ;;  %v2488_v26 = vadd.f32 %v5772_v16, %v2471_v52  ;;  %v2757_v36 = vsel %vm693_vm3, %v2755_v47, %v2756_v63  ;;  %v2487_v54 = vadd.f32 %v5774_v18, %v2470_v3  ;;  %v5775_v62 = vrot.slane %v4639_v11, 2  ;;  %v5776_v52 = vld [vmem:[#allocation58_spill] sm:$0xff]  ;;  %v5777_v11 = vld [vmem:[#allocation59_spill] sm:$0xff]  ;;  %v5778_v18 = vld [vmem:[#allocation60_spill] sm:$0xff] }
 0x1dc   : > { %5769 = vst [vmem:[#allocation27_spill] sm:$0xff] %v5020_v28  ;;  %v5030_v59 = vpop.permute.xlu0 %1320  ;;  %v842_v48 = vsel %vm792_vm4, %v840_v19, %v841_v10  ;;  %v5041_v56 = vmul.f32 %v4742_v33, %v852_v43  ;;  %v553_v25 = vadd.f32 %v5776_v52, %v536_v7  ;;  %v1467_v47 = vrot.slane %v5015_v31, 5 }
 0x1dd   : > { %5773 = vst [vmem:[#allocation28_spill] sm:$0xff] %v5030_v59  ;;  %v5036_v28 = vadd.f32 %v5775_v62, %v1822_v61  ;;  %2111 = vrot.lane.b32.xlu1 %v2107_v39, %s3585_s10  ;;  %v1466_v60 = vrot.slane %v1462_v27, 5  ;;  %v853_v3 = vmul.f32 %v4729_v6, %v852_v43  ;;  %v552_v61 = vadd.f32 %v5777_v11, %v535_v38  ;;  %v5779_v59 = vld [vmem:[#allocation64_spill] sm:$0xff]  ;;  %v5781_v27 = vld [vmem:[#allocation61_spill] sm:$0xff] }
 0x1de   : > { %2109 = vrot.lane.b32.xlu0 %v2108_v50, %s3585_s10  ;;  %v2773_v39 = vrot.slane %v5024_v8, 4  ;;  %v2772_v19 = vrot.slane %v2768_v5, 4  ;;  %v1478_v16 = vstv %s4998_s9  ;;  %v1182_v62 = vadd.f32 %v5778_v18, %v1165_v0  ;;  %v5783_v0 = vld [vmem:[#allocation70_spill] sm:$0xff]  ;;  %s5262_s9 = sld [smem:[#allocation2 + $0x123]] }
 0x1df   : > { %v5048_v58 = vpop.permute.xlu1 %1979  ;;  %v570_v57 = vadd.f32 %v5779_v59, %v553_v25  ;;  %v5780_v7 = vrot.slane %v4663_v13, 2  ;;  %v2131_v31 = vstv %s5006_s11  ;;  %v1181_v43 = vadd.f32 %v5781_v27, %v1164_v14  ;;  %v5784_v25 = vld [vmem:[#allocation74_spill] sm:$0xff]  ;;  %v5785_v14 = vld [vmem:[#allocation71_spill] sm:$0xff]  ;;  %s5267_s11 = sld [smem:[#allocation2 + $0x118]] }
 0x1e0   : > { %v5056_v52 = vpop.permute.xlu0 %1977  ;;  %v569_v38 = vadd.f32 %v5782_v15, %v552_v61  ;;  %v2500_v11 = vadd.f32 %v4726_v34, %v2487_v54  ;;  %v858_v5 = vrot.slane %v5041_v56, 5  ;;  %v5070_v18 = vmul.f32 %v4742_v33, %v1478_v16  ;;  %v5786_v61 = vld [vmem:[#allocation75_spill] sm:$0xff] }
 0x1e1   : > { %v2501_v50 = vadd.f32 %v5780_v7, %v2488_v26  ;;  %2760 = vrot.lane.b32.xlu1 %v2756_v63, %s3584_s29  ;;  %v587_v59 = vadd.f32 %v5783_v0, %v570_v57  ;;  %v857_v26 = vrot.slane %v853_v3, 5  ;;  %v5077_v63 = vmul.f32 %v4729_v6, %v1478_v16  ;;  %v5787_v57 = vld [vmem:[#allocation66_spill] sm:$0xff]  ;;  %v5788_v3 = vld [vmem:[#allocation80_spill] sm:$0xff] }
 0x1e2   : > { %2758 = vrot.lane.b32.xlu0 %v2757_v36, %s3584_s29  ;;  %v586_v15 = vadd.f32 %v5785_v14, %v569_v38  ;;  %v2517_v34 = vadd.f32 %v5786_v61, %v2500_v11  ;;  %v5080_v7 = vmul.f32 %v4742_v33, %v2131_v31  ;;  %v1834_v36 = vadd.f32 %v4712_v30, %v1821_v9  ;;  %v5789_v11 = vld [vmem:[#allocation67_spill] sm:$0xff]  ;;  %v5790_v14 = vld [vmem:[#allocation81_spill] sm:$0xff] }
 0x1e3   : > { %v2518_v13 = vadd.f32 %v5784_v25, %v2501_v50  ;;  %v5074_v54 = vpop.permute.xlu1 %2628  ;;  %v1199_v50 = vadd.f32 %v5787_v57, %v1182_v62  ;;  %v5088_v38 = vmul.f32 %v4729_v6, %v2131_v31  ;;  %v1198_v25 = vadd.f32 %v5789_v11, %v1181_v43 }
 0x1e4   : > { %v5085_v0 = vpop.permute.xlu0 %2626  ;;  %v2534_v61 = vadd.f32 %v5790_v14, %v2517_v34  ;;  %v1468_v16 = vsel %vm792_vm4, %v1466_v60, %v1467_v47  ;;  %v2774_v62 = vsel %vm693_vm3, %v2772_v19, %v2773_v39  ;;  %v5791_v30 = vrot.slane %v4755_v40, 3  ;;  %v5793_v34 = vld [vmem:[#allocation82_spill] sm:$0xff] }
 0x1e5   : > { %v2535_v27 = vadd.f32 %v5788_v3, %v2518_v13  ;;  %845 = vrot.lane.b32.xlu1 %v841_v10, %s3583_s26  ;;  %v859_v43 = vsel %vm792_vm4, %v857_v26, %v858_v5  ;;  %v1484_v10 = vrot.slane %v5070_v18, 5  ;;  %v600_v60 = vadd.f32 %v4835_v46, %v586_v15 }
 0x1e6   : > { %v601_v9 = vadd.f32 %v5791_v30, %v587_v59  ;;  %843 = vrot.lane.b32.xlu0 %v842_v48, %s3583_s26  ;;  %v2551_v19 = vadd.f32 %v4630_v53, %v2534_v61  ;;  %v1483_v40 = vrot.slane %v5077_v63, 5  ;;  %v2137_v59 = vrot.slane %v5080_v7, 5  ;;  %v5794_v53 = vld [vmem:[#allocation83_spill] sm:$0xff]  ;;  %v5796_v61 = vld [vmem:[#allocation76_spill] sm:$0xff] }
 0x1e7   : > { %v2552_v31 = vadd.f32 %v4615_v2, %v2535_v27  ;;  %v5109_v13 = vpop.permute.xlu1 %712  ;;  %v5792_v2 = vrot.slane %v4715_v55, 3  ;;  %v2136_v27 = vrot.slane %v5088_v38, 5  ;;  %v1211_v46 = vadd.f32 %v4814_v23, %v1198_v25  ;;  %v5795_v55 = vld [vmem:[#allocation68_spill] sm:$0xff]  ;;  %v5797_v23 = vld [vmem:[#allocation69_spill] sm:$0xff] }
 0x1e8   : > { %v618_v57 = vadd.f32 %v5793_v34, %v601_v9  ;;  %v5117_v3 = vpop.permute.xlu0 %710  ;;  %v617_v15 = vadd.f32 %v5794_v53, %v600_v60  ;;  %v2568_v11 = vadd.f32 %v4757_v12, %v2551_v19  ;;  %v869_v14 = vstv %s5064_s12  ;;  %v5798_v25 = vld [vmem:[#allocation77_spill] sm:$0xff]  ;;  %s5274_s12 = sld [smem:[#allocation2 + $0x1a2]] }
 0x1e9   : > { %v1212_v48 = vadd.f32 %v5792_v2, %v1199_v50  ;;  %v2569_v26 = vadd.f32 %v4746_v49, %v2552_v31  ;;  %1471 = vrot.lane.b32.xlu1 %v1467_v47, %s3584_s29  ;;  %v1852_v50 = vadd.f32 %v5795_v55, %v5036_v28  ;;  %v1851_v38 = vadd.f32 %v5797_v23, %v1834_v36  ;;  %v5799_v28 = vld [vmem:[#allocation72_spill] sm:$0xff]  ;;  %v5801_v36 = vld [vmem:[#allocation73_spill] sm:$0xff]  ;;  %v5804_v55 = vld [vmem:[#allocation79_spill] sm:$0xff] }
 0x1ea   : > { %v635_v49 = vadd.f32 %v4649_v22, %v618_v57  ;;  %1469 = vrot.lane.b32.xlu0 %v1468_v16, %s3584_s29  ;;  %v1228_v31 = vadd.f32 %v5798_v25, %v1211_v46  ;;  %v634_v12 = vadd.f32 %v4658_v1, %v617_v15  ;;  %v2585_v47 = vadd.f32 %v4837_v45, %v2568_v11  ;;  %v5800_v2 = vld [vmem:[#allocation84_spill] sm:$0xff]  ;;  %v5808_v23 = vld [vmem:[#allocation15_spill] sm:$0xff] }
 0x1eb   : > { %v1229_v30 = vadd.f32 %v5796_v61, %v1212_v48  ;;  %v2586_v9 = vadd.f32 %v4822_v51, %v2569_v26  ;;  %v5135_v60 = vpop.permute.xlu1 %1339  ;;  %v1869_v19 = vadd.f32 %v5799_v28, %v1852_v50  ;;  %v5143_v16 = vmul.f32 %v4742_v33, %v869_v14  ;;  %v5802_v26 = vld [vmem:[#allocation78_spill] sm:$0xff]  ;;  %v5805_v61 = vld [vmem:[#allocation24_spill] sm:$0xff]  ;;  %v5812_v28 = vld [vmem:[#allocation87_spill] sm:$0xff] }
 0x1ec   : > { %v652_v22 = vadd.f32 %v4773_v41, %v635_v49  ;;  %v5140_v51 = vpop.permute.xlu0 %1337  ;;  %v1868_v34 = vadd.f32 %v5801_v36, %v1851_v38  ;;  %v1245_v57 = vadd.f32 %v4571_v35, %v1228_v31  ;;  %v651_v1 = vadd.f32 %v4782_v37, %v634_v12  ;;  %v5806_v49 = vld [vmem:[#allocation85_spill] sm:$0xff] }
 0x1ed   : > { %v1246_v48 = vadd.f32 %v5800_v2, %v1229_v30  ;;  %2777 = vrot.lane.b32.xlu1 %v2773_v39, %s3585_s10  ;;  %v2148_v45 = vstv %s5097_s14  ;;  %v1886_v46 = vadd.f32 %v5802_v26, %v1869_v19  ;;  %v5803_v15 = vrot.slane %v4874_v4, 3  ;;  %v5809_v38 = vld [vmem:[#allocation25_spill] sm:$0xff]  ;;  %v5813_v2 = vld [vmem:[#allocation14_spill] sm:$0xff]  ;;  %s5282_s14 = sld [smem:[#allocation2 + $0x1a3]] }
 0x1ee   : > { %v669_v53 = vadd.f32 %v4852_v24, %v652_v22  ;;  %2775 = vrot.lane.b32.xlu0 %v2774_v62, %s3585_s10  ;;  %v1885_v35 = vadd.f32 %v5804_v55, %v1868_v34  ;;  %v1262_v37 = vadd.f32 %v4682_v20, %v1245_v57  ;;  %v668_v50 = vadd.f32 %v4862_v44, %v651_v1  ;;  %v5811_v31 = vld [vmem:[#allocation13_spill] sm:$0xff] }
 0x1ef   : > { %v1263_v41 = vadd.f32 %v4674_v21, %v1246_v48  ;;  %v2599_v11 = vadd.f32 %v5803_v15, %v2586_v9  ;;  %v2598_v8 = vadd.f32 %v4937_v17, %v2585_v47  ;;  %v5162_v39 = vpop.permute.xlu1 %1996  ;;  %v1903_v21 = vadd.f32 %v4586_v42, %v1886_v46  ;;  %v5807_v9 = vld [vmem:[#allocation11_spill] sm:$0xff]  ;;  %v5810_v42 = vld [vmem:[#allocation86_spill] sm:$0xff] }
 0x1f0   : > { %v686_v4 = vadd.f32 %v4931_v32, %v669_v53  ;;  %v5170_v30 = vpop.permute.xlu0 %1994  ;;  %v1902_v20 = vadd.f32 %v5806_v49, %v1885_v35  ;;  %v1279_v44 = vadd.f32 %v5807_v9, %v1262_v37  ;;  %v685_v17 = vadd.f32 %v5808_v23, %v668_v50  ;;  %v5819_v15 = vld [vmem:[#allocation22_spill] sm:$0xff]  ;;  %v5821_v50 = vld [vmem:[#allocation16_spill] sm:$0xff] }
 0x1f1   : > { %v1280_v24 = vadd.f32 %v4794_v29, %v1263_v41  ;;  %v2616_v62 = vadd.f32 %v5805_v61, %v2599_v11  ;;  %v2615_v25 = vadd.f32 %v5809_v38, %v2598_v8  ;;  %862 = vrot.lane.b32.xlu1 %v858_v5, %s3584_s29  ;;  %v1920_v29 = vadd.f32 %v5810_v42, %v1903_v21  ;;  %v5814_v5 = vld [vmem:[#allocation23_spill] sm:$0xff]  ;;  %v5817_v41 = vld [vmem:[#allocation12_spill] sm:$0xff]  ;;  %v5822_v21 = vld [vmem:[#allocation26_spill] sm:$0xff] }
 0x1f2   : > { %860 = vrot.lane.b32.xlu0 %v859_v43, %s3584_s29  ;;  %v870_v47 = vmul.f32 %v4729_v6, %v869_v14  ;;  %v1919_v19 = vadd.f32 %v5812_v28, %v1902_v20  ;;  %v1296_v48 = vadd.f32 %v5813_v2, %v1279_v44  ;;  %v1485_v56 = vsel %vm792_vm4, %v1483_v40, %v1484_v10  ;;  %v5824_v61 = vld [vmem:[#allocation27_spill] sm:$0xff]  ;;  %v5825_v9 = vld [vmem:[#allocation20_spill] sm:$0xff] }
 0x1f3   : > { %v1297_v32 = vadd.f32 %v5811_v31, %v1280_v24  ;;  %v2633_v12 = vadd.f32 %v5074_v54, %v2616_v62  ;;  %v2632_v22 = vadd.f32 %v5085_v0, %v2615_v25  ;;  %v2646_v36 = vpop.permute.xlu1 %2645  ;;  %v5815_v34 = vrot.slane %v5814_v5, 4  ;;  %v5816_v0 = vld [vmem:[#allocation21_spill] sm:$0xff]  ;;  %v5826_v23 = vld [vmem:[#allocation28_spill] sm:$0xff]  ;;  %v5827_v25 = vld [vmem:[#allocation18_spill] sm:$0xff] }
 0x1f4   : > { %v2644_v43 = vpop.permute.xlu0 %2643  ;;  %v2138_v14 = vsel %vm792_vm4, %v2136_v27, %v2137_v59  ;;  %v2150_v1 = vmul.f32 %v4742_v33, %v2148_v45  ;;  %v699_v26 = vadd.f32 %v5816_v0, %v685_v17  ;;  %v875_v40 = vrot.slane %v5143_v16, 5 }
 0x1f5   : > { %v700_v54 = vadd.f32 %v5815_v34, %v686_v4  ;;  %v5194_v57 = vadd.f32 %v2646_v36, %v2633_v12  ;;  %v5203_v63 = vadd.f32 %v2644_v43, %v2632_v22  ;;  %1488 = vrot.lane.b32.xlu1 %v1484_v10, %s3585_s10  ;;  %v2149_v46 = vmul.f32 %v4729_v6, %v2148_v45  ;;  %v5823_v45 = vld [vmem:[#allocation17_spill] sm:$0xff]  ;;  %v5828_v12 = vld [vmem:[#allocation19_spill] sm:$0xff] }
 0x1f6   : > { %v5818_v53 = vrot.slane %v5817_v41, 3  ;;  %v5820_v11 = vrot.slane %v5819_v15, 4  ;;  %1486 = vrot.lane.b32.xlu0 %v1485_v56, %s3585_s10  ;;  %v874_v37 = vrot.slane %v870_v47, 5  ;;  %v1932_v8 = vadd.f32 %v5821_v50, %v1919_v19 }
 0x1f7   : > { %v717_v35 = vadd.f32 %v5109_v13, %v700_v54  ;;  %v1309_v18 = vadd.f32 %v5822_v21, %v1296_v48  ;;  %v716_v10 = vadd.f32 %v5117_v3, %v699_v26  ;;  %v730_v16 = vpop.permute.xlu1 %729  ;;  %v2797_v24 = vstv %s5164_s15  ;;  %s5296_s15 = sld [smem:[#allocation2 + $0x198]] }
 0x1f8   : > { %v1933_v27 = vadd.f32 %v5818_v53, %v1920_v29  ;;  %v1310_v55 = vadd.f32 %v5820_v11, %v1297_v32  ;;  %v728_v20 = vpop.permute.xlu0 %727  ;;  %v2154_v13 = vrot.slane %v2150_v1, 5  ;;  %v1949_v44 = vadd.f32 %v5825_v9, %v1932_v8 }
 0x1f9   : > { %v734_v49 = vadd.f32 %v730_v16, %v717_v35  ;;  %v1326_v17 = vadd.f32 %v5826_v23, %v1309_v18  ;;  %v733_v38 = vadd.f32 %v728_v20, %v716_v10  ;;  %2141 = vrot.lane.b32.xlu1 %v2137_v59, %s3582_s17  ;;  %v2153_v3 = vrot.slane %v2149_v46, 5 }
 0x1fa   : > { %v1950_v4 = vadd.f32 %v5823_v45, %v1933_v27  ;;  %v1327_v62 = vadd.f32 %v5824_v61, %v1310_v55  ;;  %2139 = vrot.lane.b32.xlu0 %v2138_v14, %s3582_s17  ;;  %v2799_v31 = vmul.f32 %v4742_v33, %v2797_v24  ;;  %v2798_v32 = vmul.f32 %v4729_v6, %v2797_v24 }
 0x1fb   : > { %v1966_v47 = vadd.f32 %v5828_v12, %v1949_v44  ;;  %v1343_v28 = vadd.f32 %v5140_v51, %v1326_v17  ;;  %v1357_v19 = vpop.permute.xlu1 %1356  ;;  %v876_v7 = vsel %vm792_vm4, %v874_v37, %v875_v40  ;;  %v2165_v48 = vstv %s5200_s18  ;;  %s3228_s18 = sld [smem:[#allocation2 + $0x11e]] }
 0x1fc   : > { %v1967_v42 = vadd.f32 %v5827_v25, %v1950_v4  ;;  %v1344_v29 = vadd.f32 %v5135_v60, %v1327_v62  ;;  %v1355_v60 = vpop.permute.xlu0 %1354  ;;  %v2155_v51 = vsel %vm792_vm4, %v2153_v3, %v2154_v13  ;;  %v2803_v5 = vrot.slane %v2799_v31, 5 }
 0x1fd   : > { %v1983_v22 = vadd.f32 %v5056_v52, %v1966_v47  ;;  %v1360_v36 = vadd.f32 %v1355_v60, %v1343_v28  ;;  %879 = vrot.lane.b32.xlu1 %v875_v40, %s3585_s10  ;;  %v2802_v34 = vrot.slane %v2798_v32, 5  ;;  %v2167_v43 = vmul.f32 %v4742_v33, %v2165_v48 }
 0x1fe   : > { %v1984_v59 = vadd.f32 %v5048_v58, %v1967_v42  ;;  %v1361_v2 = vadd.f32 %v1357_v19, %v1344_v29  ;;  %877 = vrot.lane.b32.xlu0 %v876_v7, %s3585_s10  ;;  %v2166_v14 = vmul.f32 %v4729_v6, %v2165_v48  ;;  %v2814_v52 = vstv %s5220_s19  ;;  %s5390_s19 = sld [smem:[#allocation2 + $0x19e]] }
 0x1ff   : > { %v2000_v54 = vadd.f32 %v5170_v30, %v1983_v22  ;;  %v2014_v58 = vpop.permute.xlu1 %2013  ;;  %v2816_v30 = vmul.f32 %v4742_v33, %v2814_v52  ;;  %v2815_v26 = vmul.f32 %v4729_v6, %v2814_v52  ;;  %v2804_v46 = vsel %vm792_vm4, %v2802_v34, %v2803_v5 }
 0x200   : > { %v2001_v56 = vadd.f32 %v5162_v39, %v1984_v59  ;;  %v2012_v0 = vpop.permute.xlu0 %2011  ;;  %v2171_v41 = vrot.slane %v2167_v43, 5  ;;  %v2170_v53 = vrot.slane %v2166_v14, 5  ;;  %v2182_v27 = vstv %s5237_s20 }
 0x201   : > { %v5254_v39 = vadd.f32 %v2012_v0, %v2000_v54  ;;  %2158 = vrot.lane.b32.xlu1 %v2154_v13, %s3581_s16  ;;  %v2820_v35 = vrot.slane %v2816_v30, 5  ;;  %v2819_v37 = vrot.slane %v2815_v26, 5  ;;  %v2184_v50 = vmul.f32 %v4742_v33, %v2182_v27 }
 0x202   : > { %v5250_v1 = vadd.f32 %v2014_v58, %v2001_v56  ;;  %2156 = vrot.lane.b32.xlu0 %v2155_v51, %s3581_s16  ;;  %v2172_v21 = vsel %vm792_vm4, %v2170_v53, %v2171_v41  ;;  %v2183_v18 = vmul.f32 %v4729_v6, %v2182_v27  ;;  %v2831_v16 = vstv %s5252_s28 }
 0x203   : > { %v2663_v40 = vpop.permute.xlu1 %2662  ;;  %v2821_v24 = vsel %vm792_vm4, %v2819_v37, %v2820_v35  ;;  %v2188_v45 = vrot.slane %v2184_v50, 5  ;;  %v2833_v62 = vmul.f32 %v4742_v33, %v2831_v16  ;;  %v2832_v20 = vmul.f32 %v4729_v6, %v2831_v16 }
 0x204   : > { %v2667_v15 = vadd.f32 %v2663_v40, %v5194_v57  ;;  %v2661_v11 = vpop.permute.xlu0 %2660  ;;  %v2187_v61 = vrot.slane %v2183_v18, 5  ;;  %v2020_v23 = vstv %s5267_s11  ;;  %v2848_v28 = vstv %s5274_s12 }
 0x205   : > { %v2666_v55 = vadd.f32 %v2661_v11, %v5203_v63  ;;  %2807 = vrot.lane.b32.xlu1 %v2803_v5, %s3582_s17  ;;  %v2837_v42 = vrot.slane %v2833_v62, 5  ;;  %v2836_v29 = vrot.slane %v2832_v20, 5  ;;  %v2021_v12 = vmul.f32 %v4729_v6, %v2020_v23 }
 0x206   : > { %2805 = vrot.lane.b32.xlu0 %v2804_v46, %s3582_s17  ;;  %v2189_v25 = vsel %vm792_vm4, %v2187_v61, %v2188_v45  ;;  %v2022_v47 = vmul.f32 %v4742_v33, %v2020_v23  ;;  %v2850_v48 = vmul.f32 %v4742_v33, %v2848_v28  ;;  %v2849_v22 = vmul.f32 %v4729_v6, %v2848_v28 }
 0x207   : > { %v747_v8 = vpop.permute.xlu1 %746  ;;  %v2838_v60 = vsel %vm792_vm4, %v2836_v29, %v2837_v42  ;;  %v2025_v51 = vrot.slane %v2021_v12, 4  ;;  %v2865_v34 = vstv %s5282_s14  ;;  %v2686_v53 = vstv %s5296_s15  ;;  %s291_s14 = scalar_select %p290_p10, %s3645_s25, 1 }
 0x208   : > { %v751_v57 = vadd.f32 %v747_v8, %v734_v49  ;;  %v745_v10 = vpop.permute.xlu0 %744  ;;  %v2199_v49 = vstv %s5262_s9  ;;  %v2026_v5 = vrot.slane %v2022_v47, 4  ;;  %v2854_v14 = vrot.slane %v2850_v48, 5  ;;  %s282_s15 = sand.u32 1, %s3569_s22  }
 0x209   : > { %v750_v63 = vadd.f32 %v745_v10, %v733_v38  ;;  %2175 = vrot.lane.b32.xlu1 %v2171_v41, %s3583_s26  ;;  %v2201_v17 = vmul.f32 %v4742_v33, %v2199_v49  ;;  %v2200_v38 = vmul.f32 %v4729_v6, %v2199_v49  ;;  %v2853_v52 = vrot.slane %v2849_v22, 5  ;;  %s2998_s11 = scalar_lea.sflag [#allocation3], %s282_s15 }
 0x20a   : > { %2173 = vrot.lane.b32.xlu0 %v2172_v21, %s3583_s26  ;;  %v2867_v0 = vmul.f32 %v4742_v33, %v2865_v34  ;;  %v2866_v30 = vmul.f32 %v4729_v6, %v2865_v34  ;;  %v2027_v46 = vsel %vm693_vm3, %v2025_v51, %v2026_v5  ;;  %v2031_v27 = vadd.f32 %v2026_v5, %v5250_v1 }
 0x20b   : > { %v1374_v4 = vpop.permute.xlu1 %1373  ;;  %v2205_v7 = vrot.slane %v2201_v17, 5  ;;  %v2204_v59 = vrot.slane %v2200_v38, 5  ;;  %v2030_v11 = vadd.f32 %v2027_v46, %v5254_v39  ;;  %v2687_v21 = vmul.f32 %v4729_v6, %v2686_v53 }
 0x20c   : > { %v1378_v13 = vadd.f32 %v1374_v4, %v1361_v2  ;;  %v1372_v9 = vpop.permute.xlu0 %1371  ;;  %v2870_v37 = vrot.slane %v2866_v30, 5  ;;  %v2688_v18 = vmul.f32 %v4742_v33, %v2686_v53 }
 0x20d   : > { %v1377_v44 = vadd.f32 %v1372_v9, %v1360_v36  ;;  %2824 = vrot.lane.b32.xlu1 %v2820_v35, %s3581_s16  ;;  %v2206_v58 = vsel %vm792_vm4, %v2204_v59, %v2205_v7  ;;  %v2871_v35 = vrot.slane %v2867_v0, 5  ;;  %v5351_v0 = vld [vmem:[%s3712_s13] sm:$0xff] }
 0x20e   : > { %2822 = vrot.lane.b32.xlu0 %v2821_v24, %s3581_s16  ;;  %v2692_v24 = vrot.slane %v2688_v18, 4 }
 0x20f   : > { %v2680_v3 = vpop.permute.xlu1 %2679  ;;  %v2872_v1 = vsel %vm792_vm4, %v2870_v37, %v2871_v35 }
 0x210   : > { %v5290_v31 = vadd.f32 %v2680_v3, %v2667_v15  ;;  %v2678_v32 = vpop.permute.xlu0 %2677 }
 0x211   : > { %v2683_v19 = vadd.f32 %v2678_v32, %v2666_v55  ;;  %2192 = vrot.lane.b32.xlu1 %v2188_v45, %s3584_s29  ;;  %v2855_v55 = vsel %vm792_vm4, %v2853_v52, %v2854_v14 }
 0x212   : > { %2190 = vrot.lane.b32.xlu0 %v2189_v25, %s3584_s29  ;;  %v2697_v20 = vadd.f32 %v2692_v24, %v5290_v31 }
 0x213   : > { %v764_v2 = vpop.permute.xlu1 %763 }
 0x214   : > { %v768_v36 = vadd.f32 %v764_v2, %v751_v57  ;;  %v762_v56 = vpop.permute.xlu0 %761 }
 0x215   : > { %v767_v54 = vadd.f32 %v762_v56, %v750_v63  ;;  %2841 = vrot.lane.b32.xlu1 %v2837_v42, %s3583_s26  ;;  %v2691_v63 = vrot.slane %v2687_v21, 4 }
 0x216   : > { %2839 = vrot.lane.b32.xlu0 %v2838_v60, %s3583_s26  ;;  %s3181_s26 = sld [smem:[#allocation2 + $0x9e]] }
 0x217   : > { %v1391_v43 = vpop.permute.xlu1 %1390  ;;  %v2693_v61 = vsel %vm693_vm3, %v2691_v63, %v2692_v24 }
 0x218   : > { %v5308_v26 = vadd.f32 %v1391_v43, %v1378_v13  ;;  %v1389_v40 = vpop.permute.xlu0 %1388  ;;  %v2696_v13 = vadd.f32 %v2693_v61, %v2683_v19  ;;  %v297_v61 = vlaneseq }
 0x219   : > { %v5311_v41 = vadd.f32 %v1389_v40, %v1377_v44  ;;  %2209 = vrot.lane.b32.xlu1 %v2205_v7, %s3585_s10  ;;  %v5355_v40 = vld [vmem:[%s3712_s13 + $0x8] sm:$0xff]  ;;  %s5367_s13 = sld [smem:[#allocation5 + $0x1]] }
 0x21a   : > { %2207 = vrot.lane.b32.xlu0 %v2206_v58, %s3585_s10 }
 0x21b   : > { %v2044_v15 = vpop.permute.xlu1 %2043 }
 0x21c   : > { %v2048_v50 = vadd.f32 %v2044_v15, %v2031_v27  ;;  %v2042_v8 = vpop.permute.xlu0 %2041 }
 0x21d   : > { %v2047_v57 = vadd.f32 %v2042_v8, %v2030_v11  ;;  %2858 = vrot.lane.b32.xlu1 %v2854_v14, %s3584_s29  ;;  %v1397_v14 = vstv %s3181_s26  ;;  %s3112_s26 = sshll.u32 %s282_s15, 3 }
 0x21e   : > { %2856 = vrot.lane.b32.xlu0 %v2855_v55, %s3584_s29  ;;  %s3145_s29 = sld [smem:[#allocation2 + $0x1e]]  ;;  %v1398_v30 = vmul.f32 %v5351_v0, %v1397_v14  ;;  %v1399_v46 = vmul.f32 %v5355_v40, %v1397_v14 }
 0x21f   : > { %v781_v10 = vpop.permute.xlu1 %780 }
 0x220   : > { %v5324_v16 = vadd.f32 %v781_v10, %v768_v36  ;;  %v779_v39 = vpop.permute.xlu0 %778  ;;  %v1402_v15 = vrot.slane %v1398_v30, 5  ;;  %v1403_v11 = vrot.slane %v1399_v46, 5 }
 0x221   : > { %v5326_v45 = vadd.f32 %v779_v39, %v767_v54  ;;  %2875 = vrot.lane.b32.xlu1 %v2871_v35, %s3585_s10 }
 0x222   : > { %2873 = vrot.lane.b32.xlu0 %v2872_v1, %s3585_s10  ;;  %s5375_s10 = sld [smem:[#allocation5]] }
 0x223   : > { %v2061_v6 = vpop.permute.xlu1 %2060 }
 0x224   : > { %v2065_v33 = vadd.f32 %v2061_v6, %v2048_v50  ;;  %v2059_v4 = vpop.permute.xlu0 %2058  ;;  %v787_v35 = vstv %s3145_s29  ;;  %v1404_v50 = vsel %vm792_vm4, %v1402_v15, %v1403_v11  ;;  %s5456_s29 = sld [smem:[#allocation5 + $0x2]] }
 0x225   : > { %v2064_v62 = vadd.f32 %v2059_v4, %v2047_v57  ;;  %v788_v8 = vmul.f32 %v5351_v0, %v787_v35  ;;  %v789_v21 = vmul.f32 %v5355_v40, %v787_v35  ;;  %v1408_v57 = vadd.f32 %v1403_v11, %v5308_v26 }
 0x226   : > { %v1407_v10 = vadd.f32 %v1404_v50, %v5311_v41 }
 0x227   : > { %v2710_v49 = vpop.permute.xlu1 %2709  ;;  %v793_v63 = vrot.slane %v788_v8, 5  ;;  %v794_v24 = vrot.slane %v789_v21, 5  ;;  %v2118_v21 = vstv %s3228_s18  ;;  %s284_s18 = scalar_lea.vmem [#allocation7], %s3112_s26 }
 0x228   : > { %v2714_v9 = vadd.f32 %v2710_v49, %v2697_v20  ;;  %v2708_v44 = vpop.permute.xlu0 %2707 }
 0x229   : > { %v2713_v23 = vadd.f32 %v2708_v44, %v2696_v13  ;;  %v795_v49 = vsel %vm792_vm4, %v793_v63, %v794_v24 }
 0x22b   : > { %v1421_v17 = vpop.permute.xlu1 %1420 }
 0x22c   : > { %v1419_v38 = vpop.permute.xlu0 %1418  ;;  %v1425_v39 = vadd.f32 %v1421_v17, %v1408_v57  ;;  %v798_v17 = vadd.f32 %v795_v49, %v5326_v45 }
 0x22f   : > { %v2078_v3 = vpop.permute.xlu1 %2077 }
 0x230   : > { %v5332_v25 = vadd.f32 %v2078_v3, %v2065_v33  ;;  %v2076_v42 = vpop.permute.xlu0 %2075  ;;  %v1424_v33 = vadd.f32 %v1419_v38, %v1407_v10 }
 0x231   : > { %v5334_v29 = vadd.f32 %v2076_v42, %v2064_v62  ;;  %v1495_v42 = vstv %s5367_s13  ;;  %s3278_s13 = sld [smem:[#allocation5 + $0x3]] }
 0x233   : > { %v2727_v32 = vpop.permute.xlu1 %2726 }
 0x234   : > { %v2731_v12 = vadd.f32 %v2727_v32, %v2714_v9  ;;  %v2725_v47 = vpop.permute.xlu0 %2724  ;;  %v799_v9 = vadd.f32 %v794_v24, %v5324_v16  ;;  %v3443_v24 = vld [vmem:[%s5594_s3 + $0x10] sm:$0xff]  }
 0x235   : > { %v2730_v28 = vadd.f32 %v2725_v47, %v2713_v23  ;;  %v298_v23 = vshrl.u32 %v297_v61, 7 }
 0x237   : > { %v812_v7 = vpop.permute.xlu1 %811  ;;  %vm302_vm7 = vcmp.ge.s32.totalorder %v298_v23, 1 }
 0x238   : > { %v810_v59 = vpop.permute.xlu0 %809  ;;  %v816_v38 = vadd.f32 %v812_v7, %v799_v9 }
 0x23b   : > { %v1438_v31 = vpop.permute.xlu1 %1437 }
 0x23c   : > { %v1436_v2 = vpop.permute.xlu0 %1435  ;;  %v1442_v4 = vadd.f32 %v1438_v31, %v1425_v39 }
 0x23d   : > { %v1441_v62 = vadd.f32 %v1436_v2, %v1424_v33  ;;  %v2119_v33 = vmul.f32 %v5351_v0, %v2118_v21 }
 0x23f   : > { %v5336_v19 = vpop.permute.xlu1 %2094  ;;  %v2123_v9 = vrot.slane %v2119_v33, 5 }
 0x240   : > { %v5338_v60 = vpop.permute.xlu0 %2092 }
 0x243   : > { %v2744_v48 = vpop.permute.xlu1 %2743 }
 0x244   : > { %v5340_v22 = vadd.f32 %v2744_v48, %v2731_v12  ;;  %v2742_v36 = vpop.permute.xlu0 %2741 }
 0x245   : > { %v5342_v56 = vadd.f32 %v2742_v36, %v2730_v28  ;;  %v815_v28 = vadd.f32 %v810_v59, %v798_v17  ;;  %v299_v36 = vadd.s32 8, %v298_v23  ;;  %v2098_v17 = vadd.f32 %v5338_v60, %v5334_v29  ;;  %v3445_v29 = vld [vmem:[%s5594_s3] sm:$0xff]  }
 0x247   : > { %v829_v51 = vpop.permute.xlu1 %828  ;;  %vm305_vm5 = vcmp.le.s32.totalorder %v299_v36, 8 }
 0x248   : > { %v827_v5 = vpop.permute.xlu0 %826  ;;  %v833_v2 = vadd.f32 %v829_v51, %v816_v38  ;;  %v886_v51 = vstv %s5375_s10  ;;  %s3288_s10 = sshll.u32 %s3645_s25, 7  ;;  %s3588_s25 = smov [#allocation7]  }
 0x249   : > { %v832_v16 = vadd.f32 %v827_v5, %v815_v28  ;;  %s5549_s9 = scalar_lea.hbm %s5597_s6, %s3288_s10 }
 0x24b   : > { %v1455_v34 = vpop.permute.xlu1 %1454 }
 0x24c   : > { %v1453_v54 = vpop.permute.xlu0 %1452  ;;  %v1459_v26 = vadd.f32 %v1455_v34, %v1442_v4  ;;  %v301_v34 = vand.u32 127, %v297_v61  ;;  %v2120_v4 = vmul.f32 %v5355_v40, %v2118_v21 }
 0x24d   : > { %v1458_v41 = vadd.f32 %v1453_v54, %v1441_v62 }
 0x24e   : > { %vm308_vm6 = vcmp.ge.s32.totalorder %v301_v34, 1  ;;  %vm311_vm9 = vcmp.le.s32.totalorder %v301_v34, 32 }
 0x24f   : > { %v5344_v58 = vpop.permute.xlu1 %2111  ;;  %vm310_vm8 = vmand %vm305_vm5, %vm308_vm6 }
 0x250   : > { %v5346_v43 = vpop.permute.xlu0 %2109  ;;  %vm309_vm10 = vmand %vm302_vm7, %vm308_vm6 }
 0x251   : > { %vm5386_vm11 = vmand %vm310_vm8, %vm311_vm9 }
 0x252   : > { %vm5392_vm12 = vmand %vm309_vm10, %vm311_vm9 }
 0x253   : > { %v5348_v52 = vpop.permute.xlu1 %2760 }
 0x254   : > { %v5358_v53 = vpop.permute.xlu0 %2758  ;;  %v2765_v36 = vadd.f32 %v5348_v52, %v5340_v22 }
 0x257   : > { %v846_v27 = vpop.permute.xlu1 %845 }
 0x258   : > { %v844_v55 = vpop.permute.xlu0 %843  ;;  %v850_v45 = vadd.f32 %v846_v27, %v833_v2  ;;  %v3446_v2 = vld [vmem:[%s5594_s3 + $0x8] sm:$0xff]  }
 0x259   : > { %v849_v46 = vadd.f32 %v844_v55, %v832_v16 }
 0x25b   : > { %v1472_v37 = vpop.permute.xlu1 %1471 }
 0x25c   : > { %v1470_v18 = vpop.permute.xlu0 %1469  ;;  %v1476_v44 = vadd.f32 %v1472_v37, %v1459_v26 }
 0x25d   : > { %v1475_v3 = vadd.f32 %v1470_v18, %v1458_v41  ;;  %v2099_v41 = vadd.f32 %v5336_v19, %v5332_v25 }
 0x25f   : > { %v5365_v1 = vpop.permute.xlu1 %2777 }
 0x260   : > { %v5369_v6 = vpop.permute.xlu0 %2775 }
 0x263   : > { %v863_v20 = vpop.permute.xlu1 %862 }
 0x264   : > { %v861_v13 = vpop.permute.xlu0 %860  ;;  %v867_v7 = vadd.f32 %v863_v20, %v850_v45  ;;  %v3586_v20 = vmov 0.0  }
 0x265   : > { %v866_v59 = vadd.f32 %v861_v13, %v849_v46  ;;  %3304 = vmatprep.subr.bf16.mxu0 %v3586_v20  ;;  %3312 = vmatprep.subr.bf16.mxu1 %v3586_v20  ;;  %v3444_v13 = vld [vmem:[%s5594_s3 + $0x18] sm:$0xff]   ;;  %v2764_v46 = vadd.f32 %v5358_v53, %v5342_v56 }
 0x266   : > { %3305 = vmatpush3.bf16.msra.mxu0 %v3443_v24  ;;  %3308 = vmatprep.mubr.msk.bf16.mxu0 %vm3587_vm13, %v3586_v20 }
 0x267   : > { %v1489_v32 = vpop.permute.xlu1 %1488  ;;  %3306 = vmatprep.subr.bf16.mxu0 %v3586_v20  ;;  %3316 = vmatprep.mubr.msk.bf16.mxu1 %vm3587_vm13, %v3586_v20  ;;  %v2781_v22 = vadd.f32 %v5369_v6, %v2764_v46 }
 0x268   : > { %v1493_v12 = vadd.f32 %v1489_v32, %v1476_v44  ;;  %v1487_v47 = vpop.permute.xlu0 %1486  ;;  %v2124_v44 = vrot.slane %v2120_v4, 5  ;;  %v2116_v32 = vadd.f32 %v5344_v58, %v2099_v41  ;;  %3313 = vmatpush3.bf16.msra.mxu1 %v3445_v29 }
 0x269   : > { %v1492_v31 = vadd.f32 %v1487_v47, %v1475_v3  ;;  %v2784_v3 = vstv %s5390_s19  ;;  %3314 = vmatprep.subr.bf16.mxu1 %v3586_v20  ;;  %s3011_s19 = sshll.u32 %s284_s18, 4  ;;  %s5551_s19 = int_to_ptr.vmem [resolvable:$true] %s3011_s19 }
 0x26a   : > { %v1497_v48 = vadd.f32 %v1495_v42, %v1493_v12  ;;  %3307 = vmatpush3.bf16.msra.mxu0 %v3444_v13  ;;  %v2115_v12 = vadd.f32 %v5346_v43, %v2098_v17  ;;  %v2125_v19 = vsel %vm792_vm4, %v2123_v9, %v2124_v44  ;;  %v2785_v60 = vmul.f32 %v5351_v0, %v2784_v3  ;;  %s3507_s12 = scalar_lea.vmem %s5551_s19, 128 }
 0x26b   : > { %v1496_v54 = vadd.f32 %v1495_v42, %v1492_v31  ;;  %v5377_v14 = vpop.permute.xlu1 %2141  ;;  %3320 = vmatprep.subr.bf16.mxu0 %v3586_v20  ;;  %v2786_v58 = vmul.f32 %v5355_v40, %v2784_v3  ;;  %p3508_p12 = scmp.ne.s32.totalorder %s5551_s19, %s3507_s12 }
 0x26c   : > { %3451 = vtanh.f32 %v1497_v48  ;;  %v5379_v30 = vpop.permute.xlu0 %2139  ;;  %v2129_v48 = vadd.f32 %v2124_v44, %v2116_v32  ;;  %v2128_v0 = vadd.f32 %v2125_v19, %v2115_v12  ;;  %v2789_v16 = vrot.slane %v2785_v60, 5  ;;  %3315 = vmatpush3.bf16.msra.mxu1 %v3446_v2 }
 0x26d   : > { %3453 = vtanh.f32 %v1496_v54  ;;  %v2790_v54 = vrot.slane %v2786_v58, 5  ;;  %3328 = vmatprep.subr.bf16.mxu1 %v3586_v20  ;;  %p3509_p7 = pnand %p3508_p12, %p5833_p0 }
 0x26e   : > { %v2146_v34 = vadd.f32 %v5377_v14, %v2129_v48 }
 0x26f   : > { %v880_v15 = vpop.permute.xlu1 %879  ;;  %p3510_p8 = pneg %p3509_p7 }
 0x270   : > { %v884_v11 = vadd.f32 %v880_v15, %v867_v7  ;;  %v878_v35 = vpop.permute.xlu0 %877  ;;  %v2145_v7 = vadd.f32 %v5379_v30, %v2128_v0  ;;  %v2791_v15 = vsel %vm792_vm4, %v2789_v16, %v2790_v54 }
 0x271   : > { %v883_v5 = vadd.f32 %v878_v35, %v866_v59  ;;  %v2782_v59 = vadd.f32 %v5365_v1, %v2765_v36 }
 0x272   : > { %v888_v37 = vadd.f32 %v886_v51, %v884_v11 }
 0x273   : > { %v887_v27 = vadd.f32 %v886_v51, %v883_v5  ;;  %v5382_v50 = vpop.permute.xlu1 %2158  ;;  %v2795_v11 = vadd.f32 %v2790_v54, %v2782_v59  ;;  %v2794_v5 = vadd.f32 %v2791_v15, %v2781_v22 }
 0x274   : > { %3455 = vtanh.f32 %v888_v37  ;;  %v5384_v55 = vpop.permute.xlu0 %2156  ;;  %v2163_v51 = vadd.f32 %v5382_v50, %v2146_v34  ;;  %v2216_v37 = vstv %s5456_s29  ;;  %s3115_s29 = sshll.u32 %s291_s14, 3  ;;  %s3511_s14 = sshll.u32 %s3588_s25, 4  ;;  %s3512_s14 = int_to_ptr.vmem [resolvable:$false] %s3511_s14 }
 0x275   : > { %3457 = vtanh.f32 %v887_v27  ;;  %v2162_v52 = vadd.f32 %v5384_v55, %v2145_v7  ;;  %s3513_s26 = scalar_lea.vmem %s3512_s14, 256  ;;  %p3514_p11 = scmp.lt.s32.totalorder %s5551_s19, %s3512_s14 }
 0x276   : > { %v3452_v57 = vpop.eup %3451  ;;  %p3515_p13 = scmp.lt.s32.totalorder %s3513_s26, %s3507_s12 }
 0x277   : > { %v3454_v10 = vpop.eup %3453  ;;  %v5396_v39 = vpop.permute.xlu1 %2807  ;;  %v5400_v63 = vsel %vm5386_vm11, %v3452_v57, -1e+30 }
 0x278   : > { %v5407_v61 = vpop.permute.xlu0 %2805  ;;  %v5411_v62 = vsel %vm5392_vm12, %v3454_v10, -1e+30  ;;  %v2812_v50 = vadd.f32 %v5396_v39, %v2795_v11  ;;  %p3516_p1 = por %p3515_p13, %p3514_p11 }
 0x279   : > { %v3403_v49 = vpack.i.bf16 %v5400_v63, %v5411_v62  ;;  %v2811_v55 = vadd.f32 %v5407_v61, %v2794_v5 }
 0x27a   : > { %p3517_p2 = pnand %p3516_p1, %p3510_p8 }
 0x27b   : > { %3404 = vrot.lane.b32.xlu0 %v3403_v49, %s3582_s17  ;;  %v2176_v26 = vpop.permute.xlu1 %2175 }
 0x27c   : > { %v2174_v23 = vpop.permute.xlu0 %2173  ;;  %v2180_v56 = vadd.f32 %v2176_v26, %v2163_v51 }
 0x27d   : > { %v2179_v30 = vadd.f32 %v2174_v23, %v2162_v52  ;;  %v2882_v23 = vstv %s3278_s13 }
 0x27e   : > { %v3456_v42 = vpop.eup %3455 }
 0x27f   : > { %v3458_v38 = vpop.eup %3457  ;;  %3414 = vrot.lane.b32.xlu0 %v3403_v49, %s3581_s16  ;;  %v2825_v47 = vpop.permute.xlu1 %2824  ;;  %v5433_v25 = vsel %vm5386_vm11, %v3456_v42, -1e+30 }
 0x280   : > { %v2823_v43 = vpop.permute.xlu0 %2822  ;;  %v5445_v28 = vsel %vm5392_vm12, %v3458_v38, -1e+30  ;;  %v2829_v10 = vadd.f32 %v2825_v47, %v2812_v50 }
 0x281   : > { %v3408_v31 = vpack.i.bf16 %v5433_v25, %v5445_v28  ;;  %v2828_v33 = vadd.f32 %v2823_v43, %v2811_v55 }
 0x283   : > { %3409 = vrot.lane.b32.xlu1 %v3408_v31, %s3582_s17  ;;  %v2193_v40 = vpop.permute.xlu1 %2192 }
 0x284   : > { %v2191_v45 = vpop.permute.xlu0 %2190  ;;  %v2197_v35 = vadd.f32 %v2193_v40, %v2180_v56 }
 0x285   : > { %v2196_v1 = vadd.f32 %v2191_v45, %v2179_v30 }
 0x287   : > { %3419 = vrot.lane.b32.xlu1 %v3408_v31, %s3581_s16  ;;  %v2842_v14 = vpop.permute.xlu1 %2841 }
 0x288   : > { %v2840_v53 = vpop.permute.xlu0 %2839  ;;  %v2846_v26 = vadd.f32 %v2842_v14, %v2829_v10 }
 0x289   : > { %v2845_v41 = vadd.f32 %v2840_v53, %v2828_v33 }
 0x28b   : > { %v2210_v27 = vpop.permute.xlu1 %2209 }
 0x28c   : > { %v2214_v6 = vadd.f32 %v2210_v27, %v2197_v35  ;;  %v2208_v21 = vpop.permute.xlu0 %2207  ;;  %v3447_v27 = vld [vmem:[%s5594_s3 + $0x20] sm:$0xff]  }
 0x28d   : > { %v2213_v57 = vadd.f32 %v2208_v21, %v2196_v1 }
 0x28e   : > { %v2218_v24 = vadd.f32 %v2216_v37, %v2214_v6 }
 0x28f   : > { %v2217_v4 = vadd.f32 %v2216_v37, %v2213_v57  ;;  %v2859_v49 = vpop.permute.xlu1 %2858 }
 0x290   : > { %3459 = vtanh.f32 %v2218_v24  ;;  %v2857_v13 = vpop.permute.xlu0 %2856  ;;  %v2863_v9 = vadd.f32 %v2859_v49, %v2846_v26  ;;  %v3450_v26 = vld [vmem:[%s5594_s3 + $0x38] sm:$0xff]  }
 0x291   : > { %3461 = vtanh.f32 %v2217_v4  ;;  %v2862_v44 = vadd.f32 %v2857_v13, %v2845_v41  ;;  %v3449_v4 = vld [vmem:[%s5594_s3 + $0x30] sm:$0xff]  }
 0x293   : > { %v2876_v17 = vpop.permute.xlu1 %2875 }
 0x294   : > { %v2880_v39 = vadd.f32 %v2876_v17, %v2863_v9  ;;  %v2874_v3 = vpop.permute.xlu0 %2873 }
 0x295   : > { %v2879_v42 = vadd.f32 %v2874_v3, %v2862_v44 }
 0x296   : > { %v2884_v32 = vadd.f32 %v2882_v23, %v2880_v39 }
 0x297   : > { %v2883_v61 = vadd.f32 %v2882_v23, %v2879_v42 }
 0x298   : > { %3463 = vtanh.f32 %v2884_v32 }
 0x299   : > { %3465 = vtanh.f32 %v2883_v61 }
 0x29a   : > { %v3460_v38 = vpop.eup %3459 }
 0x29b   : > { %v3462_v12 = vpop.eup %3461  ;;  %v5476_v47 = vsel %vm5386_vm11, %v3460_v38, -1e+30 }
 0x29c   : > { %v5480_v29 = vsel %vm5392_vm12, %v3462_v12, -1e+30 }
 0x29d   : > { %v3423_v19 = vpack.i.bf16 %v5476_v47, %v5480_v29 }
 0x29f   : > { %3424 = vrot.lane.b32.xlu0 %v3423_v19, %s3582_s17  ;;  %3429 = vrot.lane.b32.xlu1 %v3423_v19, %s3581_s16 }
 0x2a2   : > { %v3464_v60 = vpop.eup %3463 }
 0x2a3   : > { %v3466_v58 = vpop.eup %3465  ;;  %v5488_v43 = vsel %vm5386_vm11, %v3464_v60, -1e+30 }
 0x2a4   : > { %v5492_v31 = vsel %vm5392_vm12, %v3466_v58, -1e+30 }
 0x2a5   : > { %v3433_v2 = vpack.i.bf16 %v5488_v43, %v5492_v31 }
 0x2a7   : > { %3434 = vrot.lane.b32.xlu0 %v3433_v2, %s3582_s17  ;;  %3439 = vrot.lane.b32.xlu1 %v3433_v2, %s3581_s16  ;;  %s293_s17 = scalar_lea.vmem %s5596_s5, %s3115_s29 }
 0x2ed   : > { %v3405_v48 = vpop.permute.xlu0 %3404 }
 0x2ee   : > { %v3407_v0 = vunpack.i.h.bf16 %v3405_v48  ;;  %v3406_v40 = vunpack.i.l.bf16 %v3405_v48 }
 0x2f0   : > { %v1511_v34 = vmax.f32 %v5400_v63, %v3407_v0  ;;  %v1510_v8 = vmax.f32 %v5411_v62, %v3406_v40 }
 0x2f1   : > { %v3415_v36 = vpop.permute.xlu0 %3414 }
 0x2f2   : > { %v3417_v16 = vunpack.i.h.bf16 %v3415_v36  ;;  %v3416_v54 = vunpack.i.l.bf16 %v3415_v36 }
 0x2f4   : > { %v1518_v18 = vmax.f32 %v1510_v8, %v3416_v54  ;;  %v1519_v45 = vmax.f32 %v1511_v34, %v3417_v16 }
 0x2f5   : > { %v3410_v46 = vpop.permute.xlu1 %3409 }
 0x2f6   : > { %v1522_v7 = vrot.slane %v1518_v18, 1  ;;  %v1523_v59 = vrot.slane %v1519_v45, 1  ;;  %v1527_v51 = vrot.slane %v1518_v18, 2  ;;  %v1528_v22 = vrot.slane %v1519_v45, 2 }
 0x2f7   : > { %v3412_v52 = vunpack.i.h.bf16 %v3410_v46  ;;  %v3411_v14 = vunpack.i.l.bf16 %v3410_v46 }
 0x2f8   : > { %v1524_v15 = vsel %vm396_vm0, %v1522_v7, %v1523_v59  ;;  %v1529_v30 = vsel %vm495_vm1, %v1527_v51, %v1528_v22 }
 0x2f9   : > { %v1526_v56 = vmax.f32 %v1518_v18, %v1524_v15  ;;  %v3420_v53 = vpop.permute.xlu1 %3419  ;;  %v902_v63 = vmax.f32 %v5433_v25, %v3412_v52  ;;  %v901_v62 = vmax.f32 %v5445_v28, %v3411_v14  ;;  %v3448_v28 = vld [vmem:[%s5594_s3 + $0x28] sm:$0xff]  }
 0x2fa   : > { %v3422_v11 = vunpack.i.h.bf16 %v3420_v53  ;;  %v3421_v35 = vunpack.i.l.bf16 %v3420_v53 }
 0x2fb   : > { %v1531_v5 = vmax.f32 %v1526_v56, %v1529_v30 }
 0x2fc   : > { %v909_v1 = vmax.f32 %v901_v62, %v3421_v35  ;;  %v910_v37 = vmax.f32 %v902_v63, %v3422_v11 }
 0x2fd   : > { %v1532_v50 = vpack.c.bf16 %v1531_v5, %v1531_v5 }
 0x2fe   : > { %v913_v6 = vrot.slane %v909_v1, 1  ;;  %v914_v21 = vrot.slane %v910_v37, 1  ;;  %v918_v55 = vrot.slane %v909_v1, 2  ;;  %v919_v57 = vrot.slane %v910_v37, 2 }
 0x2ff   : > { %3309 = vmatmul.mubr.msk.bf16.vlgmr.msra.gmra.mrb[0].mxu0 %vm1550_vm14, %v1532_v50 }
 0x300   : > { %v915_v25 = vsel %vm396_vm0, %v913_v6, %v914_v21  ;;  %3321 = vmatpush3.bf16.msra.mxu0 %v3447_v27  ;;  %3324 = vmatprep.mubr.msk.bf16.mxu0 %vm3587_vm13, %v3586_v20  ;;  %v920_v24 = vsel %vm495_vm1, %v918_v55, %v919_v57  ;;  %v3286_v21 = vld [vmem:[%s5595_s4] ss:$0 sm:$0xff] }
 0x301   : > { %v917_v10 = vmax.f32 %v909_v1, %v915_v25  ;;  %3322 = vmatprep.subr.bf16.mxu0 %v3586_v20 }
 0x303   : > { %v922_v33 = vmax.f32 %v917_v10, %v920_v24 }
 0x304   : > { %3323 = vmatpush3.bf16.msra.mxu0 %v3448_v28 }
 0x305   : > { %v923_v49 = vpack.c.bf16 %v922_v33, %v922_v33 }
 0x307   : > { %3317 = vmatmul.mubr.msk.bf16.vlgmr.msra.gmra.mrb[0].mxu1 %vm1550_vm14, %v923_v49 }
 0x308   : > { %3329 = vmatpush3.bf16.msra.mxu1 %v3449_v4  ;;  %3332 = vmatprep.mubr.msk.bf16.mxu1 %vm3587_vm13, %v3586_v20 }
 0x309   : > { %3330 = vmatprep.subr.bf16.mxu1 %v3586_v20 }
 0x30c   : > { %3331 = vmatpush3.bf16.msra.mxu1 %v3450_v26  ;;  %v2994_v26 = vld [vmem:[%s293_s17] sm:$0xff] }
 0x311   : > { %v3425_v13 = vpop.permute.xlu0 %3424  ;;  %v3430_v41 = vpop.permute.xlu1 %3429 }
 0x312   : > { %v3427_v9 = vunpack.i.h.bf16 %v3425_v13  ;;  %v3426_v44 = vunpack.i.l.bf16 %v3425_v13  ;;  %v3432_v39 = vunpack.i.h.bf16 %v3430_v41  ;;  %v3431_v3 = vunpack.i.l.bf16 %v3430_v41 }
 0x314   : > { %v2232_v23 = vmax.f32 %v5476_v47, %v3427_v9  ;;  %v2231_v17 = vmax.f32 %v5480_v29, %v3426_v44 }
 0x316   : > { %v2240_v42 = vmax.f32 %v2232_v23, %v3432_v39  ;;  %v2239_v32 = vmax.f32 %v2231_v17, %v3431_v3 }
 0x318   : > { %v2244_v61 = vrot.slane %v2240_v42, 1  ;;  %v2249_v38 = vrot.slane %v2240_v42, 2  ;;  %v2243_v12 = vrot.slane %v2239_v32, 1  ;;  %v2248_v19 = vrot.slane %v2239_v32, 2 }
 0x319   : > { %v3435_v60 = vpop.permute.xlu0 %3434  ;;  %v3440_v58 = vpop.permute.xlu1 %3439 }
 0x31a   : > { %v2245_v20 = vsel %vm396_vm0, %v2243_v12, %v2244_v61  ;;  %v3437_v2 = vunpack.i.h.bf16 %v3435_v60  ;;  %v3436_v48 = vunpack.i.l.bf16 %v3435_v60  ;;  %v2250_v40 = vsel %vm495_vm1, %v2248_v19, %v2249_v38 }
 0x31b   : > { %v2247_v0 = vmax.f32 %v2239_v32, %v2245_v20  ;;  %v3442_v36 = vunpack.i.h.bf16 %v3440_v58  ;;  %v3441_v34 = vunpack.i.l.bf16 %v3440_v58 }
 0x31c   : > { %v2898_v47 = vmax.f32 %v5488_v43, %v3437_v2  ;;  %v2897_v29 = vmax.f32 %v5492_v31, %v3436_v48 }
 0x31d   : > { %v2252_v8 = vmax.f32 %v2247_v0, %v2250_v40 }
 0x31e   : > { %v2906_v16 = vmax.f32 %v2898_v47, %v3442_v36  ;;  %v2905_v54 = vmax.f32 %v2897_v29, %v3441_v34 }
 0x31f   : > { %v2253_v18 = vpack.c.bf16 %v2252_v8, %v2252_v8 }
 0x320   : > { %v2910_v45 = vrot.slane %v2906_v16, 1  ;;  %v2915_v46 = vrot.slane %v2906_v16, 2  ;;  %v2909_v7 = vrot.slane %v2905_v54, 1  ;;  %v2914_v59 = vrot.slane %v2905_v54, 2 }
 0x321   : > { %3325 = vmatmul.mubr.msk.bf16.vlgmr.msra.gmra.mrb[4].mxu0 %vm1550_vm14, %v2253_v18 }
 0x322   : > { %v2911_v51 = vsel %vm396_vm0, %v2909_v7, %v2910_v45  ;;  %v2916_v52 = vsel %vm495_vm1, %v2914_v59, %v2915_v46 }
 0x323   : > { %v2913_v22 = vmax.f32 %v2905_v54, %v2911_v51 }
 0x325   : > { %v2918_v43 = vmax.f32 %v2913_v22, %v2916_v52 }
 0x327   : > { %v2919_v14 = vpack.c.bf16 %v2918_v43, %v2918_v43 }
 0x329   : > { %3333 = vmatmul.mubr.msk.bf16.vlgmr.msra.gmra.mrb[4].mxu1 %vm1550_vm14, %v2919_v14 }
 0x3d2   : > { %v1588_v31 = vpop.f32.mrb[0].mxu0 }
 0x3d3   : > { %v3310_v15 = vpop.f32.mrb[1].mxu0 }
 0x3d4   : > { %v1591_v56 = vpop.f32.mrb[2].mxu0 }
 0x3d5   : > { %v3311_v53 = vpop.f32.mrb[3].mxu0 }
 0x3da   : > { %v1643_v30 = vpop.f32.mrb[0].mxu1 }
 0x3db   : > { %v1644_v63 = vadd.f32 %v1643_v30, %v1588_v31  ;;  %v3318_v62 = vpop.f32.mrb[1].mxu1 }
 0x3dc   : > { %v1646_v11 = vpop.f32.mrb[2].mxu1 }
 0x3dd   : > { %v3319_v35 = vpop.f32.mrb[3].mxu1 }
 0x3f4   : > { %v2308_v5 = vpop.f32.mrb[4].mxu0 }
 0x3f5   : > { %v2314_v1 = vadd.f32 %v2308_v5, %v1644_v63  ;;  %v3326_v37 = vpop.f32.mrb[5].mxu0 }
 0x3f6   : > { %v2311_v27 = vpop.f32.mrb[6].mxu0 }
 0x3f7   : > { %v3327_v50 = vpop.f32.mrb[7].mxu0 }
 0x3fc   : > { %v2974_v6 = vpop.f32.mrb[4].mxu1 }
 0x3fd   : > { %v2980_v55 = vadd.f32 %v2974_v6, %v2314_v1  ;;  %v3334_v57 = vpop.f32.mrb[5].mxu1 }
 0x3fe   : > { %v2977_v25 = vpop.f32.mrb[6].mxu1 }
 0x3ff   : > { %v2988_v28 = vadd.f32 %v3286_v21, %v2980_v55  ;;  %v3335_v10 = vpop.f32.mrb[7].mxu1 }
 0x401   : > { %v2989_v24 = vsub.f32 0.0, %v2988_v28 }
 0x403   : > { %v2990_v33 = vmul.f32 1.442695, %v2989_v24 }
 0x405   : > { %3467 = vpow2.f32 %v2990_v33 }
 0x40f   : > { %v3468_v4 = vpop.eup %3467 }
 0x410   : > { %v2992_v49 = vadd.f32 1.0, %v3468_v4 }
 0x412   : > { %3469 = vrcp.f32 %v2992_v49 }
 0x41c   : > { %v3470_v13 = vpop.eup %3469 }
 0x41d   : > { %v2995_v41 = vmul.f32 %v3470_v13, %v2994_v26 }
 0x41f   : > { %2996 = vst [vmem:[%s284_s18] sm:$0xff] %v2995_v41 }
 0x420   : > { %3520 = shalt.err (!%p3517_p2)
}
 0x421   : > { %s3521_s15 = scalar_lea.hbm %s5549_s9, 128  ;;  %s3525_s16 = scalar_lea.hbm %s5597_s6, 256 }
 0x422   : > { %p3522_p3 = scmp.ne.s32.totalorder %s5549_s9, %s3521_s15  ;;  %p3526_p5 = scmp.lt.u32.totalorder %s5549_s9, %s5597_s6 }
 0x423   : > { %p3527_p6 = scmp.lt.u32.totalorder %s3525_s16, %s3521_s15  ;;  %p3529_p12 = scmp.lt.u32.totalorder %s3521_s15, %s5549_s9 }
 0x424   : > { %p3523_p4 = pnand %p3522_p3, %p5833_p0 }
 0x425   : > { %p3528_p10 = por %p3527_p6, %p3526_p5 }
 0x426   : > { %p3524_p9 = pneg %p3523_p4 }
 0x427   : > { %p3530_p7 = por %p3529_p12, %p3528_p10 }
 0x429   : > { %p3531_p8 = pnand %p3530_p7, %p3524_p9 }
 0x42b   : > { %3534 = shalt.err (!%p3531_p8)
}
 0x42c   : > { %3344 = dma.vmem_to_hbm [thread:$0]  (%p5833_p0), %s5551_s19, 128, %s5549_s9, %s2998_s11  }
 0x42d PF: > { %p3361_p11 = scmp.ge.s32.totalorder %s3577_s24, 2  ;;  %s3023_s18 = sand.u32 1, %s3565_s21  }
 0x42e   : > { %p5834_p13 = scmp.ne.s32.totalorder %s5614_s8, 0  ;;  %s3024_s20 = scalar_lea.sflag [#allocation3], %s3023_s18 }
 0x430   : > { %p3354_p1 = pnand %p3361_p11, %p5834_p13 }
 0x432   : > { %3560 = dma.done.wait (!%p3354_p1), %s3024_s20, 128  }
 0x433   : > { %3562 = vsyncadd (!%p3354_p1), %s3024_s20, 4294967168  ;;  %p18_p2 = scmp.ge.s32.totalorder %s3649_s27, 4   ;;  %s5835_s21 = smov %s3569_s22 }
 0x434   : > { %s5836_s22 = smov %s3573_s23  ;;  %s5837_s23 = smov %s3660_s30 }
 0x435   : > { %s5838_s24 = smov %s3649_s27  ;;  %20 = sbr.rel (!%p18_p2) target bundleno = 5 (0x5), region = 94 }
 0x43c   :  { %3029 = vsyncpa [#allocation3], 1 }
 0x43d   :  { %3031 = vsyncpa [#allocation3 + $0x1], 1 }
 0x43e   :  { %3032 = vsyncpa [#allocation4], 1 }
 0x43f   :  { %3034 = vsyncpa [#allocation4 + $0x1], 1 }
 0x440   :  { %3035 = vsyncpa [#allocation6], 1 }

</bundles_post_ra>
